<compile_context>
chip_gen: v6e
topology: v6e:2x2x1
jax: 0.10.0
libtpu: 0.0.40
codegen_flags: <defaults>
</compile_context>

<pallas_src>
import jax
import jax.numpy as jnp
from jax import lax
from jax.experimental import pallas as pl
from jax.experimental.pallas import tpu as pltpu

# ----------------------------- layout constants -----------------------------
KS = 5                      # conv kernel size
H0 = W0 = 32                # input image
C0 = 3                      # input channels
C1, C1P = 6, 8              # conv1 out channels (padded to 8 sublanes)
C2 = 16                     # conv2 out channels
OH1, OW1 = 28, 28           # conv1 valid output
PH1, PW1 = 14, 14           # pool1 output
OH2, OW2 = 10, 10           # conv2 valid output
PH2, PW2 = 5, 5             # pool2 output
F1, F2, F3 = 120, 84, 10
FP = 128                    # padded FC lane width

A1W = OH1 * W0              # 896: conv1 act, flat m'=oh*32+ow (ow>=28 is garbage)
XFW = 1152                  # flat input width, padded so every tap slice is in range
                            #   (max read = 895 + 4*32 + 4 = 1027 -> round to 9*128)
P1W = 256                   # pool1 act padded width (valid 196 = 14*14; conv2 reads <200)
A2W = OH2 * PW1             # 140: conv2 act, flat m''=oh*14+ow (ow>=10 is garbage)
P2W = PH2 * PW2             # 25


# ------------------------------ the fused kernel ----------------------------

def _lenet_fused_kernel(x_ref, w1t_ref, cb1_ref, s1_ref, w2t_ref, cb2_ref,
                        s2_ref, wf1_ref, bf1_ref, wf2_ref, bf2_ref,
                        wf3_ref, bf3_ref, out_ref):
    x2d = x_ref[0]                                              # (3, XFW) bf16

    # ---- conv1: 25 tap matmuls, f32 accumulate, bias + relu ----------------
    acc = jnp.zeros((C1P, A1W), jnp.float32)
    for kh in range(KS):
        for kw in range(KS):
            t, s = kh * KS + kw, kh * W0 + kw
            acc = acc + jnp.dot(w1t_ref[t], x2d[:, s:s + A1W],
                                preferred_element_type=jnp.float32)
    a1 = jnp.maximum(acc + cb1_ref[...], 0.0).astype(jnp.bfloat16)   # (8, 896)

    # ---- pool1 (2x2 max): four selection matmuls + elementwise max ---------
    p1 = jnp.dot(a1, s1_ref[0], preferred_element_type=jnp.float32)
    for q in range(1, 4):
        p1 = jnp.maximum(p1, jnp.dot(a1, s1_ref[q],
                                     preferred_element_type=jnp.float32))
    p1 = p1.astype(jnp.bfloat16)                                     # (8, 256)

    # ---- conv2 --------------------------------------------------------------
    acc = jnp.zeros((C2, A2W), jnp.float32)
    for kh in range(KS):
        for kw in range(KS):
            t, s = kh * KS + kw, kh * PW1 + kw
            acc = acc + jnp.dot(w2t_ref[t], p1[:, s:s + A2W],
                                preferred_element_type=jnp.float32)
    a2 = jnp.maximum(acc + cb2_ref[...], 0.0).astype(jnp.bfloat16)   # (16, 140)

    # ---- pool2 --------------------------------------------------------------
    p2 = jnp.dot(a2, s2_ref[0], preferred_element_type=jnp.float32)
    for q in range(1, 4):
        p2 = jnp.maximum(p2, jnp.dot(a2, s2_ref[q],
                                     preferred_element_type=jnp.float32))
    p2 = p2.astype(jnp.bfloat16)                                     # (16, 25)

    # ---- fc1: PyTorch (c*25 + h*5 + w) flatten is folded into wf1 slabs ----
    h = bf1_ref[...]                                                 # (1, 128) f32
    for c in range(C2):
        h = h + jnp.dot(p2[c:c + 1, :], wf1_ref[c],
                        preferred_element_type=jnp.float32)
    h = jnp.maximum(h, 0.0).astype(jnp.bfloat16)

    # ---- fc2 + relu, fc3 ----------------------------------------------------
    h = jnp.dot(h, wf2_ref[...], preferred_element_type=jnp.float32) + bf2_ref[...]
    h = jnp.maximum(h, 0.0).astype(jnp.bfloat16)
    o = jnp.dot(h, wf3_ref[...], preferred_element_type=jnp.float32) + bf3_ref[...]
    out_ref[0] = o.astype(out_ref.dtype)


# ------------------------------ host-side packing ---------------------------

def _pool_selectors(row_stride, n_src, out_h, out_w, n_cols):
    """(4, n_src, n_cols) 0/1 bf16 matrices.  S[q, m, j] = 1 iff flat source
    position m is the q-th neighbour of the 2x2 window whose output index is
    j = y*out_w + x, for a row-major activation layout with `row_stride`."""
    j = jnp.arange(n_cols)
    base = 2 * (j // out_w) * row_stride + 2 * (j % out_w)
    valid = j < out_h * out_w
    m = jnp.arange(n_src)[:, None]
    sel = []
    for dh in (0, 1):
        for dw in (0, 1):
            tgt = jnp.where(valid, base + dh * row_stride + dw, -1)
            sel.append((m == tgt[None, :]).astype(jnp.bfloat16))
    return jnp.stack(sel, axis=0)


def _prep_constants(params):
    """Pack weights into kernel-friendly layouts (bf16 matmul operands, f32
    biases, lane-padded FC dims, sublane-padded conv channels)."""
    f32, bf16 = jnp.float32, jnp.bfloat16

    w1t = jnp.transpose(params["conv1_w"], (2, 3, 0, 1)).reshape(KS * KS, C1, C0)
    w1t = jnp.pad(w1t, ((0, 0), (0, C1P - C1), (0, 0))).astype(bf16)      # (25,8,3)
    cb1 = jnp.pad(params["conv1_b"], (0, C1P - C1)).reshape(C1P, 1).astype(f32)

    w2t = jnp.transpose(params["conv2_w"], (2, 3, 0, 1)).reshape(KS * KS, C2, C1)
    w2t = jnp.pad(w2t, ((0, 0), (0, 0), (0, C1P - C1))).astype(bf16)      # (25,16,8)
    cb2 = params["conv2_b"].reshape(C2, 1).astype(f32)

    s1 = _pool_selectors(W0, A1W, PH1, PW1, P1W)                          # (4,896,256)
    s2 = _pool_selectors(PW1, A2W, PH2, PW2, P2W)                         # (4,140,25)

    wf1 = jnp.transpose(params["fc1_w"].reshape(F1, C2, P2W), (1, 2, 0))  # (16,25,120)
    wf1 = jnp.pad(wf1, ((0, 0), (0, 0), (0, FP - F1))).astype(bf16)       # (16,25,128)
    bf1 = jnp.pad(params["fc1_b"], (0, FP - F1)).reshape(1, FP).astype(f32)
    wf2 = jnp.pad(params["fc2_w"].T, ((0, FP - F1), (0, FP - F2))).astype(bf16)
    bf2 = jnp.pad(params["fc2_b"], (0, FP - F2)).reshape(1, FP).astype(f32)
    wf3 = jnp.pad(params["fc3_w"].T, ((0, FP - F2), (0, FP - F3))).astype(bf16)
    bf3 = jnp.pad(params["fc3_b"], (0, FP - F3)).reshape(1, FP).astype(f32)
    return (w1t, cb1, s1, w2t, cb2, s2, wf1, bf1, wf2, bf2, wf3, bf3)


# --------------------------------- forward ----------------------------------

def net_forward(params, x_nchw):
    """x: (N, 3, 32, 32) f32 -> logits (N, 10) f32."""
    n = x_nchw.shape[0]
    consts = _prep_constants(params)

    xf = x_nchw.reshape(n, C0, H0 * W0)
    xf = jnp.pad(xf, ((0, 0), (0, 0), (0, XFW - H0 * W0))).astype(jnp.bfloat16)

    def resident(a):   # full-array block, constant index map -> stays in VMEM
        return pl.BlockSpec(a.shape, lambda *_: (0,) * a.ndim)

    out = pl.pallas_call(
        _lenet_fused_kernel,
        out_shape=jax.ShapeDtypeStruct((n, 1, FP), jnp.float32),
        grid=(n,),
        in_specs=[pl.BlockSpec((1, C0, XFW), lambda i: (i, 0, 0))]
                 + [resident(a) for a in consts],
        out_specs=pl.BlockSpec((1, 1, FP), lambda i: (i, 0, 0)),
        compiler_params=pltpu.CompilerParams(
            dimension_semantics=("parallel",)),      # megacore split over batch
    )(xf, *consts)
    return out.reshape(n, FP)[:, :F3]


# ------------------------- pure-JAX reference & init ------------------------

def net_reference(params, x):
    dn = ("NCHW", "OIHW", "NCHW")
    y = lax.conv_general_dilated(x, params["conv1_w"], (1, 1), "VALID",
                                 dimension_numbers=dn)
    y = jnp.maximum(y + params["conv1_b"].reshape(1, -1, 1, 1), 0.0)
    y = jnp.max(y.reshape(y.shape[0], C1, PH1, 2, PW1, 2), axis=(3, 5))
    y = lax.conv_general_dilated(y, params["conv2_w"], (1, 1), "VALID",
                                 dimension_numbers=dn)
    y = jnp.maximum(y + params["conv2_b"].reshape(1, -1, 1, 1), 0.0)
    y = jnp.max(y.reshape(y.shape[0], C2, PH2, 2, PW2, 2), axis=(3, 5))
    y = y.reshape(y.shape[0], C2 * PH2 * PW2)
    y = jnp.maximum(y @ params["fc1_w"].T + params["fc1_b"], 0.0)
    y = jnp.maximum(y @ params["fc2_w"].T + params["fc2_b"], 0.0)
    return y @ params["fc3_w"].T + params["fc3_b"]


def init_params(key):
    def uni(k, shape, fan_in):
        bound = 1.0 / jnp.sqrt(jnp.float32(fan_in))
        return jax.random.uniform(k, shape, jnp.float32, -bound, bound)
    ks = jax.random.split(key, 10)
    return {
        "conv1_w": uni(ks[0], (6, 3, 5, 5), 3 * 25),
        "conv1_b": uni(ks[1], (6,), 3 * 25),
        "conv2_w": uni(ks[2], (16, 6, 5, 5), 6 * 25),
        "conv2_b": uni(ks[3], (16,), 6 * 25),
        "fc1_w": uni(ks[4], (120, 400), 400),
        "fc1_b": uni(ks[5], (120,), 400),
        "fc2_w": uni(ks[6], (84, 120), 120),
        "fc2_b": uni(ks[7], (84,), 120),
        "fc3_w": uni(ks[8], (10, 84), 84),
        "fc3_b": uni(ks[9], (10,), 84),
    }


if __name__ == "__main__":
    key = jax.random.PRNGKey(0)
    kp, kx = jax.random.split(key)
    params = init_params(kp)
    x = jax.random.normal(kx, (2, 3, 32, 32), jnp.float32)

    fwd = jax.jit(net_forward)
    out = jax.block_until_ready(fwd(params, x))

    assert out.shape == (2, 10)
    assert bool(jnp.all(jnp.isfinite(out)))
    ref = net_reference(params, x)
    # bf16 operands vs. the f32 reference: generous tolerance, still catches
    # any layout / pooling / flatten-order mistake.
    assert float(jnp.max(jnp.abs(out - ref))) < 5e-2
    print("KERNEL_OK")
</pallas_src>

<mosaic_0001>
module attributes {stable_mosaic.version = 11 : i64} {
  func.func @_lenet_fused_kernel(%arg0: i32, %arg1: memref<1x3x1152xbf16, #tpu.memory_space<vmem>>, %arg2: memref<25x8x3xbf16, #tpu.memory_space<vmem>>, %arg3: memref<8x1xf32, #tpu.memory_space<vmem>>, %arg4: memref<4x896x256xbf16, #tpu.memory_space<vmem>>, %arg5: memref<25x16x8xbf16, #tpu.memory_space<vmem>>, %arg6: memref<16x1xf32, #tpu.memory_space<vmem>>, %arg7: memref<4x140x25xbf16, #tpu.memory_space<vmem>>, %arg8: memref<16x25x128xbf16, #tpu.memory_space<vmem>>, %arg9: memref<1x128xf32, #tpu.memory_space<vmem>>, %arg10: memref<128x128xbf16, #tpu.memory_space<vmem>>, %arg11: memref<1x128xf32, #tpu.memory_space<vmem>>, %arg12: memref<128x128xbf16, #tpu.memory_space<vmem>>, %arg13: memref<1x128xf32, #tpu.memory_space<vmem>>, %arg14: memref<1x1x128xf32, #tpu.memory_space<vmem>>) attributes {dimension_semantics = [#tpu.dimension_semantics<parallel>], iteration_bounds = array<i64: 2>, scalar_prefetch = 0 : i64, scratch_operands = 0 : i64, tpu.core_type = #tpu.core_type<tc>, window_params = [{transform_indices = @transform_0, window_bounds = array<i64: 1, 3, 1152>}, {pipeline_mode = #tpu.pipeline_mode<synchronous>, transform_indices = @transform_1, window_bounds = array<i64: 25, 8, 3>}, {pipeline_mode = #tpu.pipeline_mode<synchronous>, transform_indices = @transform_2, window_bounds = array<i64: 8, 1>}, {pipeline_mode = #tpu.pipeline_mode<synchronous>, transform_indices = @transform_3, window_bounds = array<i64: 4, 896, 256>}, {pipeline_mode = #tpu.pipeline_mode<synchronous>, transform_indices = @transform_4, window_bounds = array<i64: 25, 16, 8>}, {pipeline_mode = #tpu.pipeline_mode<synchronous>, transform_indices = @transform_5, window_bounds = array<i64: 16, 1>}, {pipeline_mode = #tpu.pipeline_mode<synchronous>, transform_indices = @transform_6, window_bounds = array<i64: 4, 140, 25>}, {pipeline_mode = #tpu.pipeline_mode<synchronous>, transform_indices = @transform_7, window_bounds = array<i64: 16, 25, 128>}, {pipeline_mode = #tpu.pipeline_mode<synchronous>, transform_indices = @transform_8, window_bounds = array<i64: 1, 128>}, {pipeline_mode = #tpu.pipeline_mode<synchronous>, transform_indices = @transform_9, window_bounds = array<i64: 128, 128>}, {pipeline_mode = #tpu.pipeline_mode<synchronous>, transform_indices = @transform_10, window_bounds = array<i64: 1, 128>}, {pipeline_mode = #tpu.pipeline_mode<synchronous>, transform_indices = @transform_11, window_bounds = array<i64: 128, 128>}, {pipeline_mode = #tpu.pipeline_mode<synchronous>, transform_indices = @transform_12, window_bounds = array<i64: 1, 128>}, {transform_indices = @transform_13, window_bounds = array<i64: 1, 1, 128>}]} {
    %c0 = arith.constant 0 : index
    %c0_0 = arith.constant 0 : index
    %c0_1 = arith.constant 0 : index
    %0 = vector.load %arg1[%c0, %c0_0, %c0_1] : memref<1x3x1152xbf16, #tpu.memory_space<vmem>>, vector<1x3x1152xbf16>
    %1 = vector.shape_cast %0 : vector<1x3x1152xbf16> to vector<3x1152xbf16>
    %cst = arith.constant 0.000000e+00 : f32
    %2 = vector.broadcast %cst : f32 to vector<8x896xf32>
    %c0_2 = arith.constant 0 : index
    %c0_3 = arith.constant 0 : index
    %c0_4 = arith.constant 0 : index
    %3 = vector.load %arg2[%c0_2, %c0_3, %c0_4] : memref<25x8x3xbf16, #tpu.memory_space<vmem>>, vector<1x8x3xbf16>
    %4 = vector.shape_cast %3 : vector<1x8x3xbf16> to vector<8x3xbf16>
    %5 = vector.extract_strided_slice %1 {offsets = [0, 0], sizes = [3, 896], strides = [1, 1]} : vector<3x1152xbf16> to vector<3x896xbf16>
    %cst_5 = arith.constant dense<0.000000e+00> : vector<8x896xf32>
    %6 = tpu.matmul %4, %5, %cst_5 {dimension_numbers = #tpu.dot_dimension_numbers<[1], [0], [0], [1], [0, 0, 1, 1], [], []>} : vector<8x3xbf16>, vector<3x896xbf16>, vector<8x896xf32> -> vector<8x896xf32>
    %7 = arith.addf %2, %6 : vector<8x896xf32>
    %c1 = arith.constant 1 : index
    %c0_6 = arith.constant 0 : index
    %c0_7 = arith.constant 0 : index
    %8 = vector.load %arg2[%c1, %c0_6, %c0_7] : memref<25x8x3xbf16, #tpu.memory_space<vmem>>, vector<1x8x3xbf16>
    %9 = vector.shape_cast %8 : vector<1x8x3xbf16> to vector<8x3xbf16>
    %10 = vector.extract_strided_slice %1 {offsets = [0, 1], sizes = [3, 896], strides = [1, 1]} : vector<3x1152xbf16> to vector<3x896xbf16>
    %cst_8 = arith.constant dense<0.000000e+00> : vector<8x896xf32>
    %11 = tpu.matmul %9, %10, %cst_8 {dimension_numbers = #tpu.dot_dimension_numbers<[1], [0], [0], [1], [0, 0, 1, 1], [], []>} : vector<8x3xbf16>, vector<3x896xbf16>, vector<8x896xf32> -> vector<8x896xf32>
    %12 = arith.addf %7, %11 : vector<8x896xf32>
    %c2 = arith.constant 2 : index
    %c0_9 = arith.constant 0 : index
    %c0_10 = arith.constant 0 : index
    %13 = vector.load %arg2[%c2, %c0_9, %c0_10] : memref<25x8x3xbf16, #tpu.memory_space<vmem>>, vector<1x8x3xbf16>
    %14 = vector.shape_cast %13 : vector<1x8x3xbf16> to vector<8x3xbf16>
    %15 = vector.extract_strided_slice %1 {offsets = [0, 2], sizes = [3, 896], strides = [1, 1]} : vector<3x1152xbf16> to vector<3x896xbf16>
    %cst_11 = arith.constant dense<0.000000e+00> : vector<8x896xf32>
    %16 = tpu.matmul %14, %15, %cst_11 {dimension_numbers = #tpu.dot_dimension_numbers<[1], [0], [0], [1], [0, 0, 1, 1], [], []>} : vector<8x3xbf16>, vector<3x896xbf16>, vector<8x896xf32> -> vector<8x896xf32>
    %17 = arith.addf %12, %16 : vector<8x896xf32>
    %c3 = arith.constant 3 : index
    %c0_12 = arith.constant 0 : index
    %c0_13 = arith.constant 0 : index
    %18 = vector.load %arg2[%c3, %c0_12, %c0_13] : memref<25x8x3xbf16, #tpu.memory_space<vmem>>, vector<1x8x3xbf16>
    %19 = vector.shape_cast %18 : vector<1x8x3xbf16> to vector<8x3xbf16>
    %20 = vector.extract_strided_slice %1 {offsets = [0, 3], sizes = [3, 896], strides = [1, 1]} : vector<3x1152xbf16> to vector<3x896xbf16>
    %cst_14 = arith.constant dense<0.000000e+00> : vector<8x896xf32>
    %21 = tpu.matmul %19, %20, %cst_14 {dimension_numbers = #tpu.dot_dimension_numbers<[1], [0], [0], [1], [0, 0, 1, 1], [], []>} : vector<8x3xbf16>, vector<3x896xbf16>, vector<8x896xf32> -> vector<8x896xf32>
    %22 = arith.addf %17, %21 : vector<8x896xf32>
    %c4 = arith.constant 4 : index
    %c0_15 = arith.constant 0 : index
    %c0_16 = arith.constant 0 : index
    %23 = vector.load %arg2[%c4, %c0_15, %c0_16] : memref<25x8x3xbf16, #tpu.memory_space<vmem>>, vector<1x8x3xbf16>
    %24 = vector.shape_cast %23 : vector<1x8x3xbf16> to vector<8x3xbf16>
    %25 = vector.extract_strided_slice %1 {offsets = [0, 4], sizes = [3, 896], strides = [1, 1]} : vector<3x1152xbf16> to vector<3x896xbf16>
    %cst_17 = arith.constant dense<0.000000e+00> : vector<8x896xf32>
    %26 = tpu.matmul %24, %25, %cst_17 {dimension_numbers = #tpu.dot_dimension_numbers<[1], [0], [0], [1], [0, 0, 1, 1], [], []>} : vector<8x3xbf16>, vector<3x896xbf16>, vector<8x896xf32> -> vector<8x896xf32>
    %27 = arith.addf %22, %26 : vector<8x896xf32>
    %c5 = arith.constant 5 : index
    %c0_18 = arith.constant 0 : index
    %c0_19 = arith.constant 0 : index
    %28 = vector.load %arg2[%c5, %c0_18, %c0_19] : memref<25x8x3xbf16, #tpu.memory_space<vmem>>, vector<1x8x3xbf16>
    %29 = vector.shape_cast %28 : vector<1x8x3xbf16> to vector<8x3xbf16>
    %30 = vector.extract_strided_slice %1 {offsets = [0, 32], sizes = [3, 896], strides = [1, 1]} : vector<3x1152xbf16> to vector<3x896xbf16>
    %cst_20 = arith.constant dense<0.000000e+00> : vector<8x896xf32>
    %31 = tpu.matmul %29, %30, %cst_20 {dimension_numbers = #tpu.dot_dimension_numbers<[1], [0], [0], [1], [0, 0, 1, 1], [], []>} : vector<8x3xbf16>, vector<3x896xbf16>, vector<8x896xf32> -> vector<8x896xf32>
    %32 = arith.addf %27, %31 : vector<8x896xf32>
    %c6 = arith.constant 6 : index
    %c0_21 = arith.constant 0 : index
    %c0_22 = arith.constant 0 : index
    %33 = vector.load %arg2[%c6, %c0_21, %c0_22] : memref<25x8x3xbf16, #tpu.memory_space<vmem>>, vector<1x8x3xbf16>
    %34 = vector.shape_cast %33 : vector<1x8x3xbf16> to vector<8x3xbf16>
    %35 = vector.extract_strided_slice %1 {offsets = [0, 33], sizes = [3, 896], strides = [1, 1]} : vector<3x1152xbf16> to vector<3x896xbf16>
    %cst_23 = arith.constant dense<0.000000e+00> : vector<8x896xf32>
    %36 = tpu.matmul %34, %35, %cst_23 {dimension_numbers = #tpu.dot_dimension_numbers<[1], [0], [0], [1], [0, 0, 1, 1], [], []>} : vector<8x3xbf16>, vector<3x896xbf16>, vector<8x896xf32> -> vector<8x896xf32>
    %37 = arith.addf %32, %36 : vector<8x896xf32>
    %c7 = arith.constant 7 : index
    %c0_24 = arith.constant 0 : index
    %c0_25 = arith.constant 0 : index
    %38 = vector.load %arg2[%c7, %c0_24, %c0_25] : memref<25x8x3xbf16, #tpu.memory_space<vmem>>, vector<1x8x3xbf16>
    %39 = vector.shape_cast %38 : vector<1x8x3xbf16> to vector<8x3xbf16>
    %40 = vector.extract_strided_slice %1 {offsets = [0, 34], sizes = [3, 896], strides = [1, 1]} : vector<3x1152xbf16> to vector<3x896xbf16>
    %cst_26 = arith.constant dense<0.000000e+00> : vector<8x896xf32>
    %41 = tpu.matmul %39, %40, %cst_26 {dimension_numbers = #tpu.dot_dimension_numbers<[1], [0], [0], [1], [0, 0, 1, 1], [], []>} : vector<8x3xbf16>, vector<3x896xbf16>, vector<8x896xf32> -> vector<8x896xf32>
    %42 = arith.addf %37, %41 : vector<8x896xf32>
    %c8 = arith.constant 8 : index
    %c0_27 = arith.constant 0 : index
    %c0_28 = arith.constant 0 : index
    %43 = vector.load %arg2[%c8, %c0_27, %c0_28] : memref<25x8x3xbf16, #tpu.memory_space<vmem>>, vector<1x8x3xbf16>
    %44 = vector.shape_cast %43 : vector<1x8x3xbf16> to vector<8x3xbf16>
    %45 = vector.extract_strided_slice %1 {offsets = [0, 35], sizes = [3, 896], strides = [1, 1]} : vector<3x1152xbf16> to vector<3x896xbf16>
    %cst_29 = arith.constant dense<0.000000e+00> : vector<8x896xf32>
    %46 = tpu.matmul %44, %45, %cst_29 {dimension_numbers = #tpu.dot_dimension_numbers<[1], [0], [0], [1], [0, 0, 1, 1], [], []>} : vector<8x3xbf16>, vector<3x896xbf16>, vector<8x896xf32> -> vector<8x896xf32>
    %47 = arith.addf %42, %46 : vector<8x896xf32>
    %c9 = arith.constant 9 : index
    %c0_30 = arith.constant 0 : index
    %c0_31 = arith.constant 0 : index
    %48 = vector.load %arg2[%c9, %c0_30, %c0_31] : memref<25x8x3xbf16, #tpu.memory_space<vmem>>, vector<1x8x3xbf16>
    %49 = vector.shape_cast %48 : vector<1x8x3xbf16> to vector<8x3xbf16>
    %50 = vector.extract_strided_slice %1 {offsets = [0, 36], sizes = [3, 896], strides = [1, 1]} : vector<3x1152xbf16> to vector<3x896xbf16>
    %cst_32 = arith.constant dense<0.000000e+00> : vector<8x896xf32>
    %51 = tpu.matmul %49, %50, %cst_32 {dimension_numbers = #tpu.dot_dimension_numbers<[1], [0], [0], [1], [0, 0, 1, 1], [], []>} : vector<8x3xbf16>, vector<3x896xbf16>, vector<8x896xf32> -> vector<8x896xf32>
    %52 = arith.addf %47, %51 : vector<8x896xf32>
    %c10 = arith.constant 10 : index
    %c0_33 = arith.constant 0 : index
    %c0_34 = arith.constant 0 : index
    %53 = vector.load %arg2[%c10, %c0_33, %c0_34] : memref<25x8x3xbf16, #tpu.memory_space<vmem>>, vector<1x8x3xbf16>
    %54 = vector.shape_cast %53 : vector<1x8x3xbf16> to vector<8x3xbf16>
    %55 = vector.extract_strided_slice %1 {offsets = [0, 64], sizes = [3, 896], strides = [1, 1]} : vector<3x1152xbf16> to vector<3x896xbf16>
    %cst_35 = arith.constant dense<0.000000e+00> : vector<8x896xf32>
    %56 = tpu.matmul %54, %55, %cst_35 {dimension_numbers = #tpu.dot_dimension_numbers<[1], [0], [0], [1], [0, 0, 1, 1], [], []>} : vector<8x3xbf16>, vector<3x896xbf16>, vector<8x896xf32> -> vector<8x896xf32>
    %57 = arith.addf %52, %56 : vector<8x896xf32>
    %c11 = arith.constant 11 : index
    %c0_36 = arith.constant 0 : index
    %c0_37 = arith.constant 0 : index
    %58 = vector.load %arg2[%c11, %c0_36, %c0_37] : memref<25x8x3xbf16, #tpu.memory_space<vmem>>, vector<1x8x3xbf16>
    %59 = vector.shape_cast %58 : vector<1x8x3xbf16> to vector<8x3xbf16>
    %60 = vector.extract_strided_slice %1 {offsets = [0, 65], sizes = [3, 896], strides = [1, 1]} : vector<3x1152xbf16> to vector<3x896xbf16>
    %cst_38 = arith.constant dense<0.000000e+00> : vector<8x896xf32>
    %61 = tpu.matmul %59, %60, %cst_38 {dimension_numbers = #tpu.dot_dimension_numbers<[1], [0], [0], [1], [0, 0, 1, 1], [], []>} : vector<8x3xbf16>, vector<3x896xbf16>, vector<8x896xf32> -> vector<8x896xf32>
    %62 = arith.addf %57, %61 : vector<8x896xf32>
    %c12 = arith.constant 12 : index
    %c0_39 = arith.constant 0 : index
    %c0_40 = arith.constant 0 : index
    %63 = vector.load %arg2[%c12, %c0_39, %c0_40] : memref<25x8x3xbf16, #tpu.memory_space<vmem>>, vector<1x8x3xbf16>
    %64 = vector.shape_cast %63 : vector<1x8x3xbf16> to vector<8x3xbf16>
    %65 = vector.extract_strided_slice %1 {offsets = [0, 66], sizes = [3, 896], strides = [1, 1]} : vector<3x1152xbf16> to vector<3x896xbf16>
    %cst_41 = arith.constant dense<0.000000e+00> : vector<8x896xf32>
    %66 = tpu.matmul %64, %65, %cst_41 {dimension_numbers = #tpu.dot_dimension_numbers<[1], [0], [0], [1], [0, 0, 1, 1], [], []>} : vector<8x3xbf16>, vector<3x896xbf16>, vector<8x896xf32> -> vector<8x896xf32>
    %67 = arith.addf %62, %66 : vector<8x896xf32>
    %c13 = arith.constant 13 : index
    %c0_42 = arith.constant 0 : index
    %c0_43 = arith.constant 0 : index
    %68 = vector.load %arg2[%c13, %c0_42, %c0_43] : memref<25x8x3xbf16, #tpu.memory_space<vmem>>, vector<1x8x3xbf16>
    %69 = vector.shape_cast %68 : vector<1x8x3xbf16> to vector<8x3xbf16>
    %70 = vector.extract_strided_slice %1 {offsets = [0, 67], sizes = [3, 896], strides = [1, 1]} : vector<3x1152xbf16> to vector<3x896xbf16>
    %cst_44 = arith.constant dense<0.000000e+00> : vector<8x896xf32>
    %71 = tpu.matmul %69, %70, %cst_44 {dimension_numbers = #tpu.dot_dimension_numbers<[1], [0], [0], [1], [0, 0, 1, 1], [], []>} : vector<8x3xbf16>, vector<3x896xbf16>, vector<8x896xf32> -> vector<8x896xf32>
    %72 = arith.addf %67, %71 : vector<8x896xf32>
    %c14 = arith.constant 14 : index
    %c0_45 = arith.constant 0 : index
    %c0_46 = arith.constant 0 : index
    %73 = vector.load %arg2[%c14, %c0_45, %c0_46] : memref<25x8x3xbf16, #tpu.memory_space<vmem>>, vector<1x8x3xbf16>
    %74 = vector.shape_cast %73 : vector<1x8x3xbf16> to vector<8x3xbf16>
    %75 = vector.extract_strided_slice %1 {offsets = [0, 68], sizes = [3, 896], strides = [1, 1]} : vector<3x1152xbf16> to vector<3x896xbf16>
    %cst_47 = arith.constant dense<0.000000e+00> : vector<8x896xf32>
    %76 = tpu.matmul %74, %75, %cst_47 {dimension_numbers = #tpu.dot_dimension_numbers<[1], [0], [0], [1], [0, 0, 1, 1], [], []>} : vector<8x3xbf16>, vector<3x896xbf16>, vector<8x896xf32> -> vector<8x896xf32>
    %77 = arith.addf %72, %76 : vector<8x896xf32>
    %c15 = arith.constant 15 : index
    %c0_48 = arith.constant 0 : index
    %c0_49 = arith.constant 0 : index
    %78 = vector.load %arg2[%c15, %c0_48, %c0_49] : memref<25x8x3xbf16, #tpu.memory_space<vmem>>, vector<1x8x3xbf16>
    %79 = vector.shape_cast %78 : vector<1x8x3xbf16> to vector<8x3xbf16>
    %80 = vector.extract_strided_slice %1 {offsets = [0, 96], sizes = [3, 896], strides = [1, 1]} : vector<3x1152xbf16> to vector<3x896xbf16>
    %cst_50 = arith.constant dense<0.000000e+00> : vector<8x896xf32>
    %81 = tpu.matmul %79, %80, %cst_50 {dimension_numbers = #tpu.dot_dimension_numbers<[1], [0], [0], [1], [0, 0, 1, 1], [], []>} : vector<8x3xbf16>, vector<3x896xbf16>, vector<8x896xf32> -> vector<8x896xf32>
    %82 = arith.addf %77, %81 : vector<8x896xf32>
    %c16 = arith.constant 16 : index
    %c0_51 = arith.constant 0 : index
    %c0_52 = arith.constant 0 : index
    %83 = vector.load %arg2[%c16, %c0_51, %c0_52] : memref<25x8x3xbf16, #tpu.memory_space<vmem>>, vector<1x8x3xbf16>
    %84 = vector.shape_cast %83 : vector<1x8x3xbf16> to vector<8x3xbf16>
    %85 = vector.extract_strided_slice %1 {offsets = [0, 97], sizes = [3, 896], strides = [1, 1]} : vector<3x1152xbf16> to vector<3x896xbf16>
    %cst_53 = arith.constant dense<0.000000e+00> : vector<8x896xf32>
    %86 = tpu.matmul %84, %85, %cst_53 {dimension_numbers = #tpu.dot_dimension_numbers<[1], [0], [0], [1], [0, 0, 1, 1], [], []>} : vector<8x3xbf16>, vector<3x896xbf16>, vector<8x896xf32> -> vector<8x896xf32>
    %87 = arith.addf %82, %86 : vector<8x896xf32>
    %c17 = arith.constant 17 : index
    %c0_54 = arith.constant 0 : index
    %c0_55 = arith.constant 0 : index
    %88 = vector.load %arg2[%c17, %c0_54, %c0_55] : memref<25x8x3xbf16, #tpu.memory_space<vmem>>, vector<1x8x3xbf16>
    %89 = vector.shape_cast %88 : vector<1x8x3xbf16> to vector<8x3xbf16>
    %90 = vector.extract_strided_slice %1 {offsets = [0, 98], sizes = [3, 896], strides = [1, 1]} : vector<3x1152xbf16> to vector<3x896xbf16>
    %cst_56 = arith.constant dense<0.000000e+00> : vector<8x896xf32>
    %91 = tpu.matmul %89, %90, %cst_56 {dimension_numbers = #tpu.dot_dimension_numbers<[1], [0], [0], [1], [0, 0, 1, 1], [], []>} : vector<8x3xbf16>, vector<3x896xbf16>, vector<8x896xf32> -> vector<8x896xf32>
    %92 = arith.addf %87, %91 : vector<8x896xf32>
    %c18 = arith.constant 18 : index
    %c0_57 = arith.constant 0 : index
    %c0_58 = arith.constant 0 : index
    %93 = vector.load %arg2[%c18, %c0_57, %c0_58] : memref<25x8x3xbf16, #tpu.memory_space<vmem>>, vector<1x8x3xbf16>
    %94 = vector.shape_cast %93 : vector<1x8x3xbf16> to vector<8x3xbf16>
    %95 = vector.extract_strided_slice %1 {offsets = [0, 99], sizes = [3, 896], strides = [1, 1]} : vector<3x1152xbf16> to vector<3x896xbf16>
    %cst_59 = arith.constant dense<0.000000e+00> : vector<8x896xf32>
    %96 = tpu.matmul %94, %95, %cst_59 {dimension_numbers = #tpu.dot_dimension_numbers<[1], [0], [0], [1], [0, 0, 1, 1], [], []>} : vector<8x3xbf16>, vector<3x896xbf16>, vector<8x896xf32> -> vector<8x896xf32>
    %97 = arith.addf %92, %96 : vector<8x896xf32>
    %c19 = arith.constant 19 : index
    %c0_60 = arith.constant 0 : index
    %c0_61 = arith.constant 0 : index
    %98 = vector.load %arg2[%c19, %c0_60, %c0_61] : memref<25x8x3xbf16, #tpu.memory_space<vmem>>, vector<1x8x3xbf16>
    %99 = vector.shape_cast %98 : vector<1x8x3xbf16> to vector<8x3xbf16>
    %100 = vector.extract_strided_slice %1 {offsets = [0, 100], sizes = [3, 896], strides = [1, 1]} : vector<3x1152xbf16> to vector<3x896xbf16>
    %cst_62 = arith.constant dense<0.000000e+00> : vector<8x896xf32>
    %101 = tpu.matmul %99, %100, %cst_62 {dimension_numbers = #tpu.dot_dimension_numbers<[1], [0], [0], [1], [0, 0, 1, 1], [], []>} : vector<8x3xbf16>, vector<3x896xbf16>, vector<8x896xf32> -> vector<8x896xf32>
    %102 = arith.addf %97, %101 : vector<8x896xf32>
    %c20 = arith.constant 20 : index
    %c0_63 = arith.constant 0 : index
    %c0_64 = arith.constant 0 : index
    %103 = vector.load %arg2[%c20, %c0_63, %c0_64] : memref<25x8x3xbf16, #tpu.memory_space<vmem>>, vector<1x8x3xbf16>
    %104 = vector.shape_cast %103 : vector<1x8x3xbf16> to vector<8x3xbf16>
    %105 = vector.extract_strided_slice %1 {offsets = [0, 128], sizes = [3, 896], strides = [1, 1]} : vector<3x1152xbf16> to vector<3x896xbf16>
    %cst_65 = arith.constant dense<0.000000e+00> : vector<8x896xf32>
    %106 = tpu.matmul %104, %105, %cst_65 {dimension_numbers = #tpu.dot_dimension_numbers<[1], [0], [0], [1], [0, 0, 1, 1], [], []>} : vector<8x3xbf16>, vector<3x896xbf16>, vector<8x896xf32> -> vector<8x896xf32>
    %107 = arith.addf %102, %106 : vector<8x896xf32>
    %c21 = arith.constant 21 : index
    %c0_66 = arith.constant 0 : index
    %c0_67 = arith.constant 0 : index
    %108 = vector.load %arg2[%c21, %c0_66, %c0_67] : memref<25x8x3xbf16, #tpu.memory_space<vmem>>, vector<1x8x3xbf16>
    %109 = vector.shape_cast %108 : vector<1x8x3xbf16> to vector<8x3xbf16>
    %110 = vector.extract_strided_slice %1 {offsets = [0, 129], sizes = [3, 896], strides = [1, 1]} : vector<3x1152xbf16> to vector<3x896xbf16>
    %cst_68 = arith.constant dense<0.000000e+00> : vector<8x896xf32>
    %111 = tpu.matmul %109, %110, %cst_68 {dimension_numbers = #tpu.dot_dimension_numbers<[1], [0], [0], [1], [0, 0, 1, 1], [], []>} : vector<8x3xbf16>, vector<3x896xbf16>, vector<8x896xf32> -> vector<8x896xf32>
    %112 = arith.addf %107, %111 : vector<8x896xf32>
    %c22 = arith.constant 22 : index
    %c0_69 = arith.constant 0 : index
    %c0_70 = arith.constant 0 : index
    %113 = vector.load %arg2[%c22, %c0_69, %c0_70] : memref<25x8x3xbf16, #tpu.memory_space<vmem>>, vector<1x8x3xbf16>
    %114 = vector.shape_cast %113 : vector<1x8x3xbf16> to vector<8x3xbf16>
    %115 = vector.extract_strided_slice %1 {offsets = [0, 130], sizes = [3, 896], strides = [1, 1]} : vector<3x1152xbf16> to vector<3x896xbf16>
    %cst_71 = arith.constant dense<0.000000e+00> : vector<8x896xf32>
    %116 = tpu.matmul %114, %115, %cst_71 {dimension_numbers = #tpu.dot_dimension_numbers<[1], [0], [0], [1], [0, 0, 1, 1], [], []>} : vector<8x3xbf16>, vector<3x896xbf16>, vector<8x896xf32> -> vector<8x896xf32>
    %117 = arith.addf %112, %116 : vector<8x896xf32>
    %c23 = arith.constant 23 : index
    %c0_72 = arith.constant 0 : index
    %c0_73 = arith.constant 0 : index
    %118 = vector.load %arg2[%c23, %c0_72, %c0_73] : memref<25x8x3xbf16, #tpu.memory_space<vmem>>, vector<1x8x3xbf16>
    %119 = vector.shape_cast %118 : vector<1x8x3xbf16> to vector<8x3xbf16>
    %120 = vector.extract_strided_slice %1 {offsets = [0, 131], sizes = [3, 896], strides = [1, 1]} : vector<3x1152xbf16> to vector<3x896xbf16>
    %cst_74 = arith.constant dense<0.000000e+00> : vector<8x896xf32>
    %121 = tpu.matmul %119, %120, %cst_74 {dimension_numbers = #tpu.dot_dimension_numbers<[1], [0], [0], [1], [0, 0, 1, 1], [], []>} : vector<8x3xbf16>, vector<3x896xbf16>, vector<8x896xf32> -> vector<8x896xf32>
    %122 = arith.addf %117, %121 : vector<8x896xf32>
    %c24 = arith.constant 24 : index
    %c0_75 = arith.constant 0 : index
    %c0_76 = arith.constant 0 : index
    %123 = vector.load %arg2[%c24, %c0_75, %c0_76] : memref<25x8x3xbf16, #tpu.memory_space<vmem>>, vector<1x8x3xbf16>
    %124 = vector.shape_cast %123 : vector<1x8x3xbf16> to vector<8x3xbf16>
    %125 = vector.extract_strided_slice %1 {offsets = [0, 132], sizes = [3, 896], strides = [1, 1]} : vector<3x1152xbf16> to vector<3x896xbf16>
    %cst_77 = arith.constant dense<0.000000e+00> : vector<8x896xf32>
    %126 = tpu.matmul %124, %125, %cst_77 {dimension_numbers = #tpu.dot_dimension_numbers<[1], [0], [0], [1], [0, 0, 1, 1], [], []>} : vector<8x3xbf16>, vector<3x896xbf16>, vector<8x896xf32> -> vector<8x896xf32>
    %127 = arith.addf %122, %126 : vector<8x896xf32>
    %c0_78 = arith.constant 0 : index
    %c0_79 = arith.constant 0 : index
    %128 = vector.load %arg3[%c0_78, %c0_79] : memref<8x1xf32, #tpu.memory_space<vmem>>, vector<8x1xf32>
    %129 = vector.broadcast %128 : vector<8x1xf32> to vector<8x896xf32>
    %130 = arith.addf %127, %129 : vector<8x896xf32>
    %cst_80 = arith.constant 0.000000e+00 : f32
    %131 = vector.broadcast %cst_80 : f32 to vector<8x896xf32>
    %132 = arith.maximumf %130, %131 : vector<8x896xf32>
    %133 = arith.truncf %132 : vector<8x896xf32> to vector<8x896xbf16>
    %c0_81 = arith.constant 0 : index
    %c0_82 = arith.constant 0 : index
    %c0_83 = arith.constant 0 : index
    %134 = vector.load %arg4[%c0_81, %c0_82, %c0_83] : memref<4x896x256xbf16, #tpu.memory_space<vmem>>, vector<1x896x256xbf16>
    %135 = vector.shape_cast %134 : vector<1x896x256xbf16> to vector<896x256xbf16>
    %cst_84 = arith.constant dense<0.000000e+00> : vector<8x256xf32>
    %136 = tpu.matmul %133, %135, %cst_84 {dimension_numbers = #tpu.dot_dimension_numbers<[1], [0], [0], [1], [0, 0, 1, 1], [], []>} : vector<8x896xbf16>, vector<896x256xbf16>, vector<8x256xf32> -> vector<8x256xf32>
    %c1_85 = arith.constant 1 : index
    %c0_86 = arith.constant 0 : index
    %c0_87 = arith.constant 0 : index
    %137 = vector.load %arg4[%c1_85, %c0_86, %c0_87] : memref<4x896x256xbf16, #tpu.memory_space<vmem>>, vector<1x896x256xbf16>
    %138 = vector.shape_cast %137 : vector<1x896x256xbf16> to vector<896x256xbf16>
    %cst_88 = arith.constant dense<0.000000e+00> : vector<8x256xf32>
    %139 = tpu.matmul %133, %138, %cst_88 {dimension_numbers = #tpu.dot_dimension_numbers<[1], [0], [0], [1], [0, 0, 1, 1], [], []>} : vector<8x896xbf16>, vector<896x256xbf16>, vector<8x256xf32> -> vector<8x256xf32>
    %140 = arith.maximumf %136, %139 : vector<8x256xf32>
    %c2_89 = arith.constant 2 : index
    %c0_90 = arith.constant 0 : index
    %c0_91 = arith.constant 0 : index
    %141 = vector.load %arg4[%c2_89, %c0_90, %c0_91] : memref<4x896x256xbf16, #tpu.memory_space<vmem>>, vector<1x896x256xbf16>
    %142 = vector.shape_cast %141 : vector<1x896x256xbf16> to vector<896x256xbf16>
    %cst_92 = arith.constant dense<0.000000e+00> : vector<8x256xf32>
    %143 = tpu.matmul %133, %142, %cst_92 {dimension_numbers = #tpu.dot_dimension_numbers<[1], [0], [0], [1], [0, 0, 1, 1], [], []>} : vector<8x896xbf16>, vector<896x256xbf16>, vector<8x256xf32> -> vector<8x256xf32>
    %144 = arith.maximumf %140, %143 : vector<8x256xf32>
    %c3_93 = arith.constant 3 : index
    %c0_94 = arith.constant 0 : index
    %c0_95 = arith.constant 0 : index
    %145 = vector.load %arg4[%c3_93, %c0_94, %c0_95] : memref<4x896x256xbf16, #tpu.memory_space<vmem>>, vector<1x896x256xbf16>
    %146 = vector.shape_cast %145 : vector<1x896x256xbf16> to vector<896x256xbf16>
    %cst_96 = arith.constant dense<0.000000e+00> : vector<8x256xf32>
    %147 = tpu.matmul %133, %146, %cst_96 {dimension_numbers = #tpu.dot_dimension_numbers<[1], [0], [0], [1], [0, 0, 1, 1], [], []>} : vector<8x896xbf16>, vector<896x256xbf16>, vector<8x256xf32> -> vector<8x256xf32>
    %148 = arith.maximumf %144, %147 : vector<8x256xf32>
    %149 = arith.truncf %148 : vector<8x256xf32> to vector<8x256xbf16>
    %cst_97 = arith.constant 0.000000e+00 : f32
    %150 = vector.broadcast %cst_97 : f32 to vector<16x140xf32>
    %c0_98 = arith.constant 0 : index
    %c0_99 = arith.constant 0 : index
    %c0_100 = arith.constant 0 : index
    %151 = vector.load %arg5[%c0_98, %c0_99, %c0_100] : memref<25x16x8xbf16, #tpu.memory_space<vmem>>, vector<1x16x8xbf16>
    %152 = vector.shape_cast %151 : vector<1x16x8xbf16> to vector<16x8xbf16>
    %153 = vector.extract_strided_slice %149 {offsets = [0, 0], sizes = [8, 140], strides = [1, 1]} : vector<8x256xbf16> to vector<8x140xbf16>
    %cst_101 = arith.constant dense<0.000000e+00> : vector<16x140xf32>
    %154 = tpu.matmul %152, %153, %cst_101 {dimension_numbers = #tpu.dot_dimension_numbers<[1], [0], [0], [1], [0, 0, 1, 1], [], []>} : vector<16x8xbf16>, vector<8x140xbf16>, vector<16x140xf32> -> vector<16x140xf32>
    %155 = arith.addf %150, %154 : vector<16x140xf32>
    %c1_102 = arith.constant 1 : index
    %c0_103 = arith.constant 0 : index
    %c0_104 = arith.constant 0 : index
    %156 = vector.load %arg5[%c1_102, %c0_103, %c0_104] : memref<25x16x8xbf16, #tpu.memory_space<vmem>>, vector<1x16x8xbf16>
    %157 = vector.shape_cast %156 : vector<1x16x8xbf16> to vector<16x8xbf16>
    %158 = vector.extract_strided_slice %149 {offsets = [0, 1], sizes = [8, 140], strides = [1, 1]} : vector<8x256xbf16> to vector<8x140xbf16>
    %cst_105 = arith.constant dense<0.000000e+00> : vector<16x140xf32>
    %159 = tpu.matmul %157, %158, %cst_105 {dimension_numbers = #tpu.dot_dimension_numbers<[1], [0], [0], [1], [0, 0, 1, 1], [], []>} : vector<16x8xbf16>, vector<8x140xbf16>, vector<16x140xf32> -> vector<16x140xf32>
    %160 = arith.addf %155, %159 : vector<16x140xf32>
    %c2_106 = arith.constant 2 : index
    %c0_107 = arith.constant 0 : index
    %c0_108 = arith.constant 0 : index
    %161 = vector.load %arg5[%c2_106, %c0_107, %c0_108] : memref<25x16x8xbf16, #tpu.memory_space<vmem>>, vector<1x16x8xbf16>
    %162 = vector.shape_cast %161 : vector<1x16x8xbf16> to vector<16x8xbf16>
    %163 = vector.extract_strided_slice %149 {offsets = [0, 2], sizes = [8, 140], strides = [1, 1]} : vector<8x256xbf16> to vector<8x140xbf16>
    %cst_109 = arith.constant dense<0.000000e+00> : vector<16x140xf32>
    %164 = tpu.matmul %162, %163, %cst_109 {dimension_numbers = #tpu.dot_dimension_numbers<[1], [0], [0], [1], [0, 0, 1, 1], [], []>} : vector<16x8xbf16>, vector<8x140xbf16>, vector<16x140xf32> -> vector<16x140xf32>
    %165 = arith.addf %160, %164 : vector<16x140xf32>
    %c3_110 = arith.constant 3 : index
    %c0_111 = arith.constant 0 : index
    %c0_112 = arith.constant 0 : index
    %166 = vector.load %arg5[%c3_110, %c0_111, %c0_112] : memref<25x16x8xbf16, #tpu.memory_space<vmem>>, vector<1x16x8xbf16>
    %167 = vector.shape_cast %166 : vector<1x16x8xbf16> to vector<16x8xbf16>
    %168 = vector.extract_strided_slice %149 {offsets = [0, 3], sizes = [8, 140], strides = [1, 1]} : vector<8x256xbf16> to vector<8x140xbf16>
    %cst_113 = arith.constant dense<0.000000e+00> : vector<16x140xf32>
    %169 = tpu.matmul %167, %168, %cst_113 {dimension_numbers = #tpu.dot_dimension_numbers<[1], [0], [0], [1], [0, 0, 1, 1], [], []>} : vector<16x8xbf16>, vector<8x140xbf16>, vector<16x140xf32> -> vector<16x140xf32>
    %170 = arith.addf %165, %169 : vector<16x140xf32>
    %c4_114 = arith.constant 4 : index
    %c0_115 = arith.constant 0 : index
    %c0_116 = arith.constant 0 : index
    %171 = vector.load %arg5[%c4_114, %c0_115, %c0_116] : memref<25x16x8xbf16, #tpu.memory_space<vmem>>, vector<1x16x8xbf16>
    %172 = vector.shape_cast %171 : vector<1x16x8xbf16> to vector<16x8xbf16>
    %173 = vector.extract_strided_slice %149 {offsets = [0, 4], sizes = [8, 140], strides = [1, 1]} : vector<8x256xbf16> to vector<8x140xbf16>
    %cst_117 = arith.constant dense<0.000000e+00> : vector<16x140xf32>
    %174 = tpu.matmul %172, %173, %cst_117 {dimension_numbers = #tpu.dot_dimension_numbers<[1], [0], [0], [1], [0, 0, 1, 1], [], []>} : vector<16x8xbf16>, vector<8x140xbf16>, vector<16x140xf32> -> vector<16x140xf32>
    %175 = arith.addf %170, %174 : vector<16x140xf32>
    %c5_118 = arith.constant 5 : index
    %c0_119 = arith.constant 0 : index
    %c0_120 = arith.constant 0 : index
    %176 = vector.load %arg5[%c5_118, %c0_119, %c0_120] : memref<25x16x8xbf16, #tpu.memory_space<vmem>>, vector<1x16x8xbf16>
    %177 = vector.shape_cast %176 : vector<1x16x8xbf16> to vector<16x8xbf16>
    %178 = vector.extract_strided_slice %149 {offsets = [0, 14], sizes = [8, 140], strides = [1, 1]} : vector<8x256xbf16> to vector<8x140xbf16>
    %cst_121 = arith.constant dense<0.000000e+00> : vector<16x140xf32>
    %179 = tpu.matmul %177, %178, %cst_121 {dimension_numbers = #tpu.dot_dimension_numbers<[1], [0], [0], [1], [0, 0, 1, 1], [], []>} : vector<16x8xbf16>, vector<8x140xbf16>, vector<16x140xf32> -> vector<16x140xf32>
    %180 = arith.addf %175, %179 : vector<16x140xf32>
    %c6_122 = arith.constant 6 : index
    %c0_123 = arith.constant 0 : index
    %c0_124 = arith.constant 0 : index
    %181 = vector.load %arg5[%c6_122, %c0_123, %c0_124] : memref<25x16x8xbf16, #tpu.memory_space<vmem>>, vector<1x16x8xbf16>
    %182 = vector.shape_cast %181 : vector<1x16x8xbf16> to vector<16x8xbf16>
    %183 = vector.extract_strided_slice %149 {offsets = [0, 15], sizes = [8, 140], strides = [1, 1]} : vector<8x256xbf16> to vector<8x140xbf16>
    %cst_125 = arith.constant dense<0.000000e+00> : vector<16x140xf32>
    %184 = tpu.matmul %182, %183, %cst_125 {dimension_numbers = #tpu.dot_dimension_numbers<[1], [0], [0], [1], [0, 0, 1, 1], [], []>} : vector<16x8xbf16>, vector<8x140xbf16>, vector<16x140xf32> -> vector<16x140xf32>
    %185 = arith.addf %180, %184 : vector<16x140xf32>
    %c7_126 = arith.constant 7 : index
    %c0_127 = arith.constant 0 : index
    %c0_128 = arith.constant 0 : index
    %186 = vector.load %arg5[%c7_126, %c0_127, %c0_128] : memref<25x16x8xbf16, #tpu.memory_space<vmem>>, vector<1x16x8xbf16>
    %187 = vector.shape_cast %186 : vector<1x16x8xbf16> to vector<16x8xbf16>
    %188 = vector.extract_strided_slice %149 {offsets = [0, 16], sizes = [8, 140], strides = [1, 1]} : vector<8x256xbf16> to vector<8x140xbf16>
    %cst_129 = arith.constant dense<0.000000e+00> : vector<16x140xf32>
    %189 = tpu.matmul %187, %188, %cst_129 {dimension_numbers = #tpu.dot_dimension_numbers<[1], [0], [0], [1], [0, 0, 1, 1], [], []>} : vector<16x8xbf16>, vector<8x140xbf16>, vector<16x140xf32> -> vector<16x140xf32>
    %190 = arith.addf %185, %189 : vector<16x140xf32>
    %c8_130 = arith.constant 8 : index
    %c0_131 = arith.constant 0 : index
    %c0_132 = arith.constant 0 : index
    %191 = vector.load %arg5[%c8_130, %c0_131, %c0_132] : memref<25x16x8xbf16, #tpu.memory_space<vmem>>, vector<1x16x8xbf16>
    %192 = vector.shape_cast %191 : vector<1x16x8xbf16> to vector<16x8xbf16>
    %193 = vector.extract_strided_slice %149 {offsets = [0, 17], sizes = [8, 140], strides = [1, 1]} : vector<8x256xbf16> to vector<8x140xbf16>
    %cst_133 = arith.constant dense<0.000000e+00> : vector<16x140xf32>
    %194 = tpu.matmul %192, %193, %cst_133 {dimension_numbers = #tpu.dot_dimension_numbers<[1], [0], [0], [1], [0, 0, 1, 1], [], []>} : vector<16x8xbf16>, vector<8x140xbf16>, vector<16x140xf32> -> vector<16x140xf32>
    %195 = arith.addf %190, %194 : vector<16x140xf32>
    %c9_134 = arith.constant 9 : index
    %c0_135 = arith.constant 0 : index
    %c0_136 = arith.constant 0 : index
    %196 = vector.load %arg5[%c9_134, %c0_135, %c0_136] : memref<25x16x8xbf16, #tpu.memory_space<vmem>>, vector<1x16x8xbf16>
    %197 = vector.shape_cast %196 : vector<1x16x8xbf16> to vector<16x8xbf16>
    %198 = vector.extract_strided_slice %149 {offsets = [0, 18], sizes = [8, 140], strides = [1, 1]} : vector<8x256xbf16> to vector<8x140xbf16>
    %cst_137 = arith.constant dense<0.000000e+00> : vector<16x140xf32>
    %199 = tpu.matmul %197, %198, %cst_137 {dimension_numbers = #tpu.dot_dimension_numbers<[1], [0], [0], [1], [0, 0, 1, 1], [], []>} : vector<16x8xbf16>, vector<8x140xbf16>, vector<16x140xf32> -> vector<16x140xf32>
    %200 = arith.addf %195, %199 : vector<16x140xf32>
    %c10_138 = arith.constant 10 : index
    %c0_139 = arith.constant 0 : index
    %c0_140 = arith.constant 0 : index
    %201 = vector.load %arg5[%c10_138, %c0_139, %c0_140] : memref<25x16x8xbf16, #tpu.memory_space<vmem>>, vector<1x16x8xbf16>
    %202 = vector.shape_cast %201 : vector<1x16x8xbf16> to vector<16x8xbf16>
    %203 = vector.extract_strided_slice %149 {offsets = [0, 28], sizes = [8, 140], strides = [1, 1]} : vector<8x256xbf16> to vector<8x140xbf16>
    %cst_141 = arith.constant dense<0.000000e+00> : vector<16x140xf32>
    %204 = tpu.matmul %202, %203, %cst_141 {dimension_numbers = #tpu.dot_dimension_numbers<[1], [0], [0], [1], [0, 0, 1, 1], [], []>} : vector<16x8xbf16>, vector<8x140xbf16>, vector<16x140xf32> -> vector<16x140xf32>
    %205 = arith.addf %200, %204 : vector<16x140xf32>
    %c11_142 = arith.constant 11 : index
    %c0_143 = arith.constant 0 : index
    %c0_144 = arith.constant 0 : index
    %206 = vector.load %arg5[%c11_142, %c0_143, %c0_144] : memref<25x16x8xbf16, #tpu.memory_space<vmem>>, vector<1x16x8xbf16>
    %207 = vector.shape_cast %206 : vector<1x16x8xbf16> to vector<16x8xbf16>
    %208 = vector.extract_strided_slice %149 {offsets = [0, 29], sizes = [8, 140], strides = [1, 1]} : vector<8x256xbf16> to vector<8x140xbf16>
    %cst_145 = arith.constant dense<0.000000e+00> : vector<16x140xf32>
    %209 = tpu.matmul %207, %208, %cst_145 {dimension_numbers = #tpu.dot_dimension_numbers<[1], [0], [0], [1], [0, 0, 1, 1], [], []>} : vector<16x8xbf16>, vector<8x140xbf16>, vector<16x140xf32> -> vector<16x140xf32>
    %210 = arith.addf %205, %209 : vector<16x140xf32>
    %c12_146 = arith.constant 12 : index
    %c0_147 = arith.constant 0 : index
    %c0_148 = arith.constant 0 : index
    %211 = vector.load %arg5[%c12_146, %c0_147, %c0_148] : memref<25x16x8xbf16, #tpu.memory_space<vmem>>, vector<1x16x8xbf16>
    %212 = vector.shape_cast %211 : vector<1x16x8xbf16> to vector<16x8xbf16>
    %213 = vector.extract_strided_slice %149 {offsets = [0, 30], sizes = [8, 140], strides = [1, 1]} : vector<8x256xbf16> to vector<8x140xbf16>
    %cst_149 = arith.constant dense<0.000000e+00> : vector<16x140xf32>
    %214 = tpu.matmul %212, %213, %cst_149 {dimension_numbers = #tpu.dot_dimension_numbers<[1], [0], [0], [1], [0, 0, 1, 1], [], []>} : vector<16x8xbf16>, vector<8x140xbf16>, vector<16x140xf32> -> vector<16x140xf32>
    %215 = arith.addf %210, %214 : vector<16x140xf32>
    %c13_150 = arith.constant 13 : index
    %c0_151 = arith.constant 0 : index
    %c0_152 = arith.constant 0 : index
    %216 = vector.load %arg5[%c13_150, %c0_151, %c0_152] : memref<25x16x8xbf16, #tpu.memory_space<vmem>>, vector<1x16x8xbf16>
    %217 = vector.shape_cast %216 : vector<1x16x8xbf16> to vector<16x8xbf16>
    %218 = vector.extract_strided_slice %149 {offsets = [0, 31], sizes = [8, 140], strides = [1, 1]} : vector<8x256xbf16> to vector<8x140xbf16>
    %cst_153 = arith.constant dense<0.000000e+00> : vector<16x140xf32>
    %219 = tpu.matmul %217, %218, %cst_153 {dimension_numbers = #tpu.dot_dimension_numbers<[1], [0], [0], [1], [0, 0, 1, 1], [], []>} : vector<16x8xbf16>, vector<8x140xbf16>, vector<16x140xf32> -> vector<16x140xf32>
    %220 = arith.addf %215, %219 : vector<16x140xf32>
    %c14_154 = arith.constant 14 : index
    %c0_155 = arith.constant 0 : index
    %c0_156 = arith.constant 0 : index
    %221 = vector.load %arg5[%c14_154, %c0_155, %c0_156] : memref<25x16x8xbf16, #tpu.memory_space<vmem>>, vector<1x16x8xbf16>
    %222 = vector.shape_cast %221 : vector<1x16x8xbf16> to vector<16x8xbf16>
    %223 = vector.extract_strided_slice %149 {offsets = [0, 32], sizes = [8, 140], strides = [1, 1]} : vector<8x256xbf16> to vector<8x140xbf16>
    %cst_157 = arith.constant dense<0.000000e+00> : vector<16x140xf32>
    %224 = tpu.matmul %222, %223, %cst_157 {dimension_numbers = #tpu.dot_dimension_numbers<[1], [0], [0], [1], [0, 0, 1, 1], [], []>} : vector<16x8xbf16>, vector<8x140xbf16>, vector<16x140xf32> -> vector<16x140xf32>
    %225 = arith.addf %220, %224 : vector<16x140xf32>
    %c15_158 = arith.constant 15 : index
    %c0_159 = arith.constant 0 : index
    %c0_160 = arith.constant 0 : index
    %226 = vector.load %arg5[%c15_158, %c0_159, %c0_160] : memref<25x16x8xbf16, #tpu.memory_space<vmem>>, vector<1x16x8xbf16>
    %227 = vector.shape_cast %226 : vector<1x16x8xbf16> to vector<16x8xbf16>
    %228 = vector.extract_strided_slice %149 {offsets = [0, 42], sizes = [8, 140], strides = [1, 1]} : vector<8x256xbf16> to vector<8x140xbf16>
    %cst_161 = arith.constant dense<0.000000e+00> : vector<16x140xf32>
    %229 = tpu.matmul %227, %228, %cst_161 {dimension_numbers = #tpu.dot_dimension_numbers<[1], [0], [0], [1], [0, 0, 1, 1], [], []>} : vector<16x8xbf16>, vector<8x140xbf16>, vector<16x140xf32> -> vector<16x140xf32>
    %230 = arith.addf %225, %229 : vector<16x140xf32>
    %c16_162 = arith.constant 16 : index
    %c0_163 = arith.constant 0 : index
    %c0_164 = arith.constant 0 : index
    %231 = vector.load %arg5[%c16_162, %c0_163, %c0_164] : memref<25x16x8xbf16, #tpu.memory_space<vmem>>, vector<1x16x8xbf16>
    %232 = vector.shape_cast %231 : vector<1x16x8xbf16> to vector<16x8xbf16>
    %233 = vector.extract_strided_slice %149 {offsets = [0, 43], sizes = [8, 140], strides = [1, 1]} : vector<8x256xbf16> to vector<8x140xbf16>
    %cst_165 = arith.constant dense<0.000000e+00> : vector<16x140xf32>
    %234 = tpu.matmul %232, %233, %cst_165 {dimension_numbers = #tpu.dot_dimension_numbers<[1], [0], [0], [1], [0, 0, 1, 1], [], []>} : vector<16x8xbf16>, vector<8x140xbf16>, vector<16x140xf32> -> vector<16x140xf32>
    %235 = arith.addf %230, %234 : vector<16x140xf32>
    %c17_166 = arith.constant 17 : index
    %c0_167 = arith.constant 0 : index
    %c0_168 = arith.constant 0 : index
    %236 = vector.load %arg5[%c17_166, %c0_167, %c0_168] : memref<25x16x8xbf16, #tpu.memory_space<vmem>>, vector<1x16x8xbf16>
    %237 = vector.shape_cast %236 : vector<1x16x8xbf16> to vector<16x8xbf16>
    %238 = vector.extract_strided_slice %149 {offsets = [0, 44], sizes = [8, 140], strides = [1, 1]} : vector<8x256xbf16> to vector<8x140xbf16>
    %cst_169 = arith.constant dense<0.000000e+00> : vector<16x140xf32>
    %239 = tpu.matmul %237, %238, %cst_169 {dimension_numbers = #tpu.dot_dimension_numbers<[1], [0], [0], [1], [0, 0, 1, 1], [], []>} : vector<16x8xbf16>, vector<8x140xbf16>, vector<16x140xf32> -> vector<16x140xf32>
    %240 = arith.addf %235, %239 : vector<16x140xf32>
    %c18_170 = arith.constant 18 : index
    %c0_171 = arith.constant 0 : index
    %c0_172 = arith.constant 0 : index
    %241 = vector.load %arg5[%c18_170, %c0_171, %c0_172] : memref<25x16x8xbf16, #tpu.memory_space<vmem>>, vector<1x16x8xbf16>
    %242 = vector.shape_cast %241 : vector<1x16x8xbf16> to vector<16x8xbf16>
    %243 = vector.extract_strided_slice %149 {offsets = [0, 45], sizes = [8, 140], strides = [1, 1]} : vector<8x256xbf16> to vector<8x140xbf16>
    %cst_173 = arith.constant dense<0.000000e+00> : vector<16x140xf32>
    %244 = tpu.matmul %242, %243, %cst_173 {dimension_numbers = #tpu.dot_dimension_numbers<[1], [0], [0], [1], [0, 0, 1, 1], [], []>} : vector<16x8xbf16>, vector<8x140xbf16>, vector<16x140xf32> -> vector<16x140xf32>
    %245 = arith.addf %240, %244 : vector<16x140xf32>
    %c19_174 = arith.constant 19 : index
    %c0_175 = arith.constant 0 : index
    %c0_176 = arith.constant 0 : index
    %246 = vector.load %arg5[%c19_174, %c0_175, %c0_176] : memref<25x16x8xbf16, #tpu.memory_space<vmem>>, vector<1x16x8xbf16>
    %247 = vector.shape_cast %246 : vector<1x16x8xbf16> to vector<16x8xbf16>
    %248 = vector.extract_strided_slice %149 {offsets = [0, 46], sizes = [8, 140], strides = [1, 1]} : vector<8x256xbf16> to vector<8x140xbf16>
    %cst_177 = arith.constant dense<0.000000e+00> : vector<16x140xf32>
    %249 = tpu.matmul %247, %248, %cst_177 {dimension_numbers = #tpu.dot_dimension_numbers<[1], [0], [0], [1], [0, 0, 1, 1], [], []>} : vector<16x8xbf16>, vector<8x140xbf16>, vector<16x140xf32> -> vector<16x140xf32>
    %250 = arith.addf %245, %249 : vector<16x140xf32>
    %c20_178 = arith.constant 20 : index
    %c0_179 = arith.constant 0 : index
    %c0_180 = arith.constant 0 : index
    %251 = vector.load %arg5[%c20_178, %c0_179, %c0_180] : memref<25x16x8xbf16, #tpu.memory_space<vmem>>, vector<1x16x8xbf16>
    %252 = vector.shape_cast %251 : vector<1x16x8xbf16> to vector<16x8xbf16>
    %253 = vector.extract_strided_slice %149 {offsets = [0, 56], sizes = [8, 140], strides = [1, 1]} : vector<8x256xbf16> to vector<8x140xbf16>
    %cst_181 = arith.constant dense<0.000000e+00> : vector<16x140xf32>
    %254 = tpu.matmul %252, %253, %cst_181 {dimension_numbers = #tpu.dot_dimension_numbers<[1], [0], [0], [1], [0, 0, 1, 1], [], []>} : vector<16x8xbf16>, vector<8x140xbf16>, vector<16x140xf32> -> vector<16x140xf32>
    %255 = arith.addf %250, %254 : vector<16x140xf32>
    %c21_182 = arith.constant 21 : index
    %c0_183 = arith.constant 0 : index
    %c0_184 = arith.constant 0 : index
    %256 = vector.load %arg5[%c21_182, %c0_183, %c0_184] : memref<25x16x8xbf16, #tpu.memory_space<vmem>>, vector<1x16x8xbf16>
    %257 = vector.shape_cast %256 : vector<1x16x8xbf16> to vector<16x8xbf16>
    %258 = vector.extract_strided_slice %149 {offsets = [0, 57], sizes = [8, 140], strides = [1, 1]} : vector<8x256xbf16> to vector<8x140xbf16>
    %cst_185 = arith.constant dense<0.000000e+00> : vector<16x140xf32>
    %259 = tpu.matmul %257, %258, %cst_185 {dimension_numbers = #tpu.dot_dimension_numbers<[1], [0], [0], [1], [0, 0, 1, 1], [], []>} : vector<16x8xbf16>, vector<8x140xbf16>, vector<16x140xf32> -> vector<16x140xf32>
    %260 = arith.addf %255, %259 : vector<16x140xf32>
    %c22_186 = arith.constant 22 : index
    %c0_187 = arith.constant 0 : index
    %c0_188 = arith.constant 0 : index
    %261 = vector.load %arg5[%c22_186, %c0_187, %c0_188] : memref<25x16x8xbf16, #tpu.memory_space<vmem>>, vector<1x16x8xbf16>
    %262 = vector.shape_cast %261 : vector<1x16x8xbf16> to vector<16x8xbf16>
    %263 = vector.extract_strided_slice %149 {offsets = [0, 58], sizes = [8, 140], strides = [1, 1]} : vector<8x256xbf16> to vector<8x140xbf16>
    %cst_189 = arith.constant dense<0.000000e+00> : vector<16x140xf32>
    %264 = tpu.matmul %262, %263, %cst_189 {dimension_numbers = #tpu.dot_dimension_numbers<[1], [0], [0], [1], [0, 0, 1, 1], [], []>} : vector<16x8xbf16>, vector<8x140xbf16>, vector<16x140xf32> -> vector<16x140xf32>
    %265 = arith.addf %260, %264 : vector<16x140xf32>
    %c23_190 = arith.constant 23 : index
    %c0_191 = arith.constant 0 : index
    %c0_192 = arith.constant 0 : index
    %266 = vector.load %arg5[%c23_190, %c0_191, %c0_192] : memref<25x16x8xbf16, #tpu.memory_space<vmem>>, vector<1x16x8xbf16>
    %267 = vector.shape_cast %266 : vector<1x16x8xbf16> to vector<16x8xbf16>
    %268 = vector.extract_strided_slice %149 {offsets = [0, 59], sizes = [8, 140], strides = [1, 1]} : vector<8x256xbf16> to vector<8x140xbf16>
    %cst_193 = arith.constant dense<0.000000e+00> : vector<16x140xf32>
    %269 = tpu.matmul %267, %268, %cst_193 {dimension_numbers = #tpu.dot_dimension_numbers<[1], [0], [0], [1], [0, 0, 1, 1], [], []>} : vector<16x8xbf16>, vector<8x140xbf16>, vector<16x140xf32> -> vector<16x140xf32>
    %270 = arith.addf %265, %269 : vector<16x140xf32>
    %c24_194 = arith.constant 24 : index
    %c0_195 = arith.constant 0 : index
    %c0_196 = arith.constant 0 : index
    %271 = vector.load %arg5[%c24_194, %c0_195, %c0_196] : memref<25x16x8xbf16, #tpu.memory_space<vmem>>, vector<1x16x8xbf16>
    %272 = vector.shape_cast %271 : vector<1x16x8xbf16> to vector<16x8xbf16>
    %273 = vector.extract_strided_slice %149 {offsets = [0, 60], sizes = [8, 140], strides = [1, 1]} : vector<8x256xbf16> to vector<8x140xbf16>
    %cst_197 = arith.constant dense<0.000000e+00> : vector<16x140xf32>
    %274 = tpu.matmul %272, %273, %cst_197 {dimension_numbers = #tpu.dot_dimension_numbers<[1], [0], [0], [1], [0, 0, 1, 1], [], []>} : vector<16x8xbf16>, vector<8x140xbf16>, vector<16x140xf32> -> vector<16x140xf32>
    %275 = arith.addf %270, %274 : vector<16x140xf32>
    %c0_198 = arith.constant 0 : index
    %c0_199 = arith.constant 0 : index
    %276 = vector.load %arg6[%c0_198, %c0_199] : memref<16x1xf32, #tpu.memory_space<vmem>>, vector<16x1xf32>
    %277 = vector.broadcast %276 : vector<16x1xf32> to vector<16x140xf32>
    %278 = arith.addf %275, %277 : vector<16x140xf32>
    %cst_200 = arith.constant 0.000000e+00 : f32
    %279 = vector.broadcast %cst_200 : f32 to vector<16x140xf32>
    %280 = arith.maximumf %278, %279 : vector<16x140xf32>
    %281 = arith.truncf %280 : vector<16x140xf32> to vector<16x140xbf16>
    %c0_201 = arith.constant 0 : index
    %c0_202 = arith.constant 0 : index
    %c0_203 = arith.constant 0 : index
    %282 = vector.load %arg7[%c0_201, %c0_202, %c0_203] : memref<4x140x25xbf16, #tpu.memory_space<vmem>>, vector<1x140x25xbf16>
    %283 = vector.shape_cast %282 : vector<1x140x25xbf16> to vector<140x25xbf16>
    %cst_204 = arith.constant dense<0.000000e+00> : vector<16x25xf32>
    %284 = tpu.matmul %281, %283, %cst_204 {dimension_numbers = #tpu.dot_dimension_numbers<[1], [0], [0], [1], [0, 0, 1, 1], [], []>} : vector<16x140xbf16>, vector<140x25xbf16>, vector<16x25xf32> -> vector<16x25xf32>
    %c1_205 = arith.constant 1 : index
    %c0_206 = arith.constant 0 : index
    %c0_207 = arith.constant 0 : index
    %285 = vector.load %arg7[%c1_205, %c0_206, %c0_207] : memref<4x140x25xbf16, #tpu.memory_space<vmem>>, vector<1x140x25xbf16>
    %286 = vector.shape_cast %285 : vector<1x140x25xbf16> to vector<140x25xbf16>
    %cst_208 = arith.constant dense<0.000000e+00> : vector<16x25xf32>
    %287 = tpu.matmul %281, %286, %cst_208 {dimension_numbers = #tpu.dot_dimension_numbers<[1], [0], [0], [1], [0, 0, 1, 1], [], []>} : vector<16x140xbf16>, vector<140x25xbf16>, vector<16x25xf32> -> vector<16x25xf32>
    %288 = arith.maximumf %284, %287 : vector<16x25xf32>
    %c2_209 = arith.constant 2 : index
    %c0_210 = arith.constant 0 : index
    %c0_211 = arith.constant 0 : index
    %289 = vector.load %arg7[%c2_209, %c0_210, %c0_211] : memref<4x140x25xbf16, #tpu.memory_space<vmem>>, vector<1x140x25xbf16>
    %290 = vector.shape_cast %289 : vector<1x140x25xbf16> to vector<140x25xbf16>
    %cst_212 = arith.constant dense<0.000000e+00> : vector<16x25xf32>
    %291 = tpu.matmul %281, %290, %cst_212 {dimension_numbers = #tpu.dot_dimension_numbers<[1], [0], [0], [1], [0, 0, 1, 1], [], []>} : vector<16x140xbf16>, vector<140x25xbf16>, vector<16x25xf32> -> vector<16x25xf32>
    %292 = arith.maximumf %288, %291 : vector<16x25xf32>
    %c3_213 = arith.constant 3 : index
    %c0_214 = arith.constant 0 : index
    %c0_215 = arith.constant 0 : index
    %293 = vector.load %arg7[%c3_213, %c0_214, %c0_215] : memref<4x140x25xbf16, #tpu.memory_space<vmem>>, vector<1x140x25xbf16>
    %294 = vector.shape_cast %293 : vector<1x140x25xbf16> to vector<140x25xbf16>
    %cst_216 = arith.constant dense<0.000000e+00> : vector<16x25xf32>
    %295 = tpu.matmul %281, %294, %cst_216 {dimension_numbers = #tpu.dot_dimension_numbers<[1], [0], [0], [1], [0, 0, 1, 1], [], []>} : vector<16x140xbf16>, vector<140x25xbf16>, vector<16x25xf32> -> vector<16x25xf32>
    %296 = arith.maximumf %292, %295 : vector<16x25xf32>
    %297 = arith.truncf %296 : vector<16x25xf32> to vector<16x25xbf16>
    %c0_217 = arith.constant 0 : index
    %c0_218 = arith.constant 0 : index
    %298 = vector.load %arg9[%c0_217, %c0_218] : memref<1x128xf32, #tpu.memory_space<vmem>>, vector<1x128xf32>
    %299 = vector.extract_strided_slice %297 {offsets = [0, 0], sizes = [1, 25], strides = [1, 1]} : vector<16x25xbf16> to vector<1x25xbf16>
    %c0_219 = arith.constant 0 : index
    %c0_220 = arith.constant 0 : index
    %c0_221 = arith.constant 0 : index
    %300 = vector.load %arg8[%c0_219, %c0_220, %c0_221] : memref<16x25x128xbf16, #tpu.memory_space<vmem>>, vector<1x25x128xbf16>
    %301 = vector.shape_cast %300 : vector<1x25x128xbf16> to vector<25x128xbf16>
    %cst_222 = arith.constant dense<0.000000e+00> : vector<1x128xf32>
    %302 = tpu.matmul %299, %301, %cst_222 {dimension_numbers = #tpu.dot_dimension_numbers<[1], [0], [0], [1], [0, 0, 1, 1], [], []>} : vector<1x25xbf16>, vector<25x128xbf16>, vector<1x128xf32> -> vector<1x128xf32>
    %303 = arith.addf %298, %302 : vector<1x128xf32>
    %304 = vector.extract_strided_slice %297 {offsets = [1, 0], sizes = [1, 25], strides = [1, 1]} : vector<16x25xbf16> to vector<1x25xbf16>
    %c1_223 = arith.constant 1 : index
    %c0_224 = arith.constant 0 : index
    %c0_225 = arith.constant 0 : index
    %305 = vector.load %arg8[%c1_223, %c0_224, %c0_225] : memref<16x25x128xbf16, #tpu.memory_space<vmem>>, vector<1x25x128xbf16>
    %306 = vector.shape_cast %305 : vector<1x25x128xbf16> to vector<25x128xbf16>
    %cst_226 = arith.constant dense<0.000000e+00> : vector<1x128xf32>
    %307 = tpu.matmul %304, %306, %cst_226 {dimension_numbers = #tpu.dot_dimension_numbers<[1], [0], [0], [1], [0, 0, 1, 1], [], []>} : vector<1x25xbf16>, vector<25x128xbf16>, vector<1x128xf32> -> vector<1x128xf32>
    %308 = arith.addf %303, %307 : vector<1x128xf32>
    %309 = vector.extract_strided_slice %297 {offsets = [2, 0], sizes = [1, 25], strides = [1, 1]} : vector<16x25xbf16> to vector<1x25xbf16>
    %c2_227 = arith.constant 2 : index
    %c0_228 = arith.constant 0 : index
    %c0_229 = arith.constant 0 : index
    %310 = vector.load %arg8[%c2_227, %c0_228, %c0_229] : memref<16x25x128xbf16, #tpu.memory_space<vmem>>, vector<1x25x128xbf16>
    %311 = vector.shape_cast %310 : vector<1x25x128xbf16> to vector<25x128xbf16>
    %cst_230 = arith.constant dense<0.000000e+00> : vector<1x128xf32>
    %312 = tpu.matmul %309, %311, %cst_230 {dimension_numbers = #tpu.dot_dimension_numbers<[1], [0], [0], [1], [0, 0, 1, 1], [], []>} : vector<1x25xbf16>, vector<25x128xbf16>, vector<1x128xf32> -> vector<1x128xf32>
    %313 = arith.addf %308, %312 : vector<1x128xf32>
    %314 = vector.extract_strided_slice %297 {offsets = [3, 0], sizes = [1, 25], strides = [1, 1]} : vector<16x25xbf16> to vector<1x25xbf16>
    %c3_231 = arith.constant 3 : index
    %c0_232 = arith.constant 0 : index
    %c0_233 = arith.constant 0 : index
    %315 = vector.load %arg8[%c3_231, %c0_232, %c0_233] : memref<16x25x128xbf16, #tpu.memory_space<vmem>>, vector<1x25x128xbf16>
    %316 = vector.shape_cast %315 : vector<1x25x128xbf16> to vector<25x128xbf16>
    %cst_234 = arith.constant dense<0.000000e+00> : vector<1x128xf32>
    %317 = tpu.matmul %314, %316, %cst_234 {dimension_numbers = #tpu.dot_dimension_numbers<[1], [0], [0], [1], [0, 0, 1, 1], [], []>} : vector<1x25xbf16>, vector<25x128xbf16>, vector<1x128xf32> -> vector<1x128xf32>
    %318 = arith.addf %313, %317 : vector<1x128xf32>
    %319 = vector.extract_strided_slice %297 {offsets = [4, 0], sizes = [1, 25], strides = [1, 1]} : vector<16x25xbf16> to vector<1x25xbf16>
    %c4_235 = arith.constant 4 : index
    %c0_236 = arith.constant 0 : index
    %c0_237 = arith.constant 0 : index
    %320 = vector.load %arg8[%c4_235, %c0_236, %c0_237] : memref<16x25x128xbf16, #tpu.memory_space<vmem>>, vector<1x25x128xbf16>
    %321 = vector.shape_cast %320 : vector<1x25x128xbf16> to vector<25x128xbf16>
    %cst_238 = arith.constant dense<0.000000e+00> : vector<1x128xf32>
    %322 = tpu.matmul %319, %321, %cst_238 {dimension_numbers = #tpu.dot_dimension_numbers<[1], [0], [0], [1], [0, 0, 1, 1], [], []>} : vector<1x25xbf16>, vector<25x128xbf16>, vector<1x128xf32> -> vector<1x128xf32>
    %323 = arith.addf %318, %322 : vector<1x128xf32>
    %324 = vector.extract_strided_slice %297 {offsets = [5, 0], sizes = [1, 25], strides = [1, 1]} : vector<16x25xbf16> to vector<1x25xbf16>
    %c5_239 = arith.constant 5 : index
    %c0_240 = arith.constant 0 : index
    %c0_241 = arith.constant 0 : index
    %325 = vector.load %arg8[%c5_239, %c0_240, %c0_241] : memref<16x25x128xbf16, #tpu.memory_space<vmem>>, vector<1x25x128xbf16>
    %326 = vector.shape_cast %325 : vector<1x25x128xbf16> to vector<25x128xbf16>
    %cst_242 = arith.constant dense<0.000000e+00> : vector<1x128xf32>
    %327 = tpu.matmul %324, %326, %cst_242 {dimension_numbers = #tpu.dot_dimension_numbers<[1], [0], [0], [1], [0, 0, 1, 1], [], []>} : vector<1x25xbf16>, vector<25x128xbf16>, vector<1x128xf32> -> vector<1x128xf32>
    %328 = arith.addf %323, %327 : vector<1x128xf32>
    %329 = vector.extract_strided_slice %297 {offsets = [6, 0], sizes = [1, 25], strides = [1, 1]} : vector<16x25xbf16> to vector<1x25xbf16>
    %c6_243 = arith.constant 6 : index
    %c0_244 = arith.constant 0 : index
    %c0_245 = arith.constant 0 : index
    %330 = vector.load %arg8[%c6_243, %c0_244, %c0_245] : memref<16x25x128xbf16, #tpu.memory_space<vmem>>, vector<1x25x128xbf16>
    %331 = vector.shape_cast %330 : vector<1x25x128xbf16> to vector<25x128xbf16>
    %cst_246 = arith.constant dense<0.000000e+00> : vector<1x128xf32>
    %332 = tpu.matmul %329, %331, %cst_246 {dimension_numbers = #tpu.dot_dimension_numbers<[1], [0], [0], [1], [0, 0, 1, 1], [], []>} : vector<1x25xbf16>, vector<25x128xbf16>, vector<1x128xf32> -> vector<1x128xf32>
    %333 = arith.addf %328, %332 : vector<1x128xf32>
    %334 = vector.extract_strided_slice %297 {offsets = [7, 0], sizes = [1, 25], strides = [1, 1]} : vector<16x25xbf16> to vector<1x25xbf16>
    %c7_247 = arith.constant 7 : index
    %c0_248 = arith.constant 0 : index
    %c0_249 = arith.constant 0 : index
    %335 = vector.load %arg8[%c7_247, %c0_248, %c0_249] : memref<16x25x128xbf16, #tpu.memory_space<vmem>>, vector<1x25x128xbf16>
    %336 = vector.shape_cast %335 : vector<1x25x128xbf16> to vector<25x128xbf16>
    %cst_250 = arith.constant dense<0.000000e+00> : vector<1x128xf32>
    %337 = tpu.matmul %334, %336, %cst_250 {dimension_numbers = #tpu.dot_dimension_numbers<[1], [0], [0], [1], [0, 0, 1, 1], [], []>} : vector<1x25xbf16>, vector<25x128xbf16>, vector<1x128xf32> -> vector<1x128xf32>
    %338 = arith.addf %333, %337 : vector<1x128xf32>
    %339 = vector.extract_strided_slice %297 {offsets = [8, 0], sizes = [1, 25], strides = [1, 1]} : vector<16x25xbf16> to vector<1x25xbf16>
    %c8_251 = arith.constant 8 : index
    %c0_252 = arith.constant 0 : index
    %c0_253 = arith.constant 0 : index
    %340 = vector.load %arg8[%c8_251, %c0_252, %c0_253] : memref<16x25x128xbf16, #tpu.memory_space<vmem>>, vector<1x25x128xbf16>
    %341 = vector.shape_cast %340 : vector<1x25x128xbf16> to vector<25x128xbf16>
    %cst_254 = arith.constant dense<0.000000e+00> : vector<1x128xf32>
    %342 = tpu.matmul %339, %341, %cst_254 {dimension_numbers = #tpu.dot_dimension_numbers<[1], [0], [0], [1], [0, 0, 1, 1], [], []>} : vector<1x25xbf16>, vector<25x128xbf16>, vector<1x128xf32> -> vector<1x128xf32>
    %343 = arith.addf %338, %342 : vector<1x128xf32>
    %344 = vector.extract_strided_slice %297 {offsets = [9, 0], sizes = [1, 25], strides = [1, 1]} : vector<16x25xbf16> to vector<1x25xbf16>
    %c9_255 = arith.constant 9 : index
    %c0_256 = arith.constant 0 : index
    %c0_257 = arith.constant 0 : index
    %345 = vector.load %arg8[%c9_255, %c0_256, %c0_257] : memref<16x25x128xbf16, #tpu.memory_space<vmem>>, vector<1x25x128xbf16>
    %346 = vector.shape_cast %345 : vector<1x25x128xbf16> to vector<25x128xbf16>
    %cst_258 = arith.constant dense<0.000000e+00> : vector<1x128xf32>
    %347 = tpu.matmul %344, %346, %cst_258 {dimension_numbers = #tpu.dot_dimension_numbers<[1], [0], [0], [1], [0, 0, 1, 1], [], []>} : vector<1x25xbf16>, vector<25x128xbf16>, vector<1x128xf32> -> vector<1x128xf32>
    %348 = arith.addf %343, %347 : vector<1x128xf32>
    %349 = vector.extract_strided_slice %297 {offsets = [10, 0], sizes = [1, 25], strides = [1, 1]} : vector<16x25xbf16> to vector<1x25xbf16>
    %c10_259 = arith.constant 10 : index
    %c0_260 = arith.constant 0 : index
    %c0_261 = arith.constant 0 : index
    %350 = vector.load %arg8[%c10_259, %c0_260, %c0_261] : memref<16x25x128xbf16, #tpu.memory_space<vmem>>, vector<1x25x128xbf16>
    %351 = vector.shape_cast %350 : vector<1x25x128xbf16> to vector<25x128xbf16>
    %cst_262 = arith.constant dense<0.000000e+00> : vector<1x128xf32>
    %352 = tpu.matmul %349, %351, %cst_262 {dimension_numbers = #tpu.dot_dimension_numbers<[1], [0], [0], [1], [0, 0, 1, 1], [], []>} : vector<1x25xbf16>, vector<25x128xbf16>, vector<1x128xf32> -> vector<1x128xf32>
    %353 = arith.addf %348, %352 : vector<1x128xf32>
    %354 = vector.extract_strided_slice %297 {offsets = [11, 0], sizes = [1, 25], strides = [1, 1]} : vector<16x25xbf16> to vector<1x25xbf16>
    %c11_263 = arith.constant 11 : index
    %c0_264 = arith.constant 0 : index
    %c0_265 = arith.constant 0 : index
    %355 = vector.load %arg8[%c11_263, %c0_264, %c0_265] : memref<16x25x128xbf16, #tpu.memory_space<vmem>>, vector<1x25x128xbf16>
    %356 = vector.shape_cast %355 : vector<1x25x128xbf16> to vector<25x128xbf16>
    %cst_266 = arith.constant dense<0.000000e+00> : vector<1x128xf32>
    %357 = tpu.matmul %354, %356, %cst_266 {dimension_numbers = #tpu.dot_dimension_numbers<[1], [0], [0], [1], [0, 0, 1, 1], [], []>} : vector<1x25xbf16>, vector<25x128xbf16>, vector<1x128xf32> -> vector<1x128xf32>
    %358 = arith.addf %353, %357 : vector<1x128xf32>
    %359 = vector.extract_strided_slice %297 {offsets = [12, 0], sizes = [1, 25], strides = [1, 1]} : vector<16x25xbf16> to vector<1x25xbf16>
    %c12_267 = arith.constant 12 : index
    %c0_268 = arith.constant 0 : index
    %c0_269 = arith.constant 0 : index
    %360 = vector.load %arg8[%c12_267, %c0_268, %c0_269] : memref<16x25x128xbf16, #tpu.memory_space<vmem>>, vector<1x25x128xbf16>
    %361 = vector.shape_cast %360 : vector<1x25x128xbf16> to vector<25x128xbf16>
    %cst_270 = arith.constant dense<0.000000e+00> : vector<1x128xf32>
    %362 = tpu.matmul %359, %361, %cst_270 {dimension_numbers = #tpu.dot_dimension_numbers<[1], [0], [0], [1], [0, 0, 1, 1], [], []>} : vector<1x25xbf16>, vector<25x128xbf16>, vector<1x128xf32> -> vector<1x128xf32>
    %363 = arith.addf %358, %362 : vector<1x128xf32>
    %364 = vector.extract_strided_slice %297 {offsets = [13, 0], sizes = [1, 25], strides = [1, 1]} : vector<16x25xbf16> to vector<1x25xbf16>
    %c13_271 = arith.constant 13 : index
    %c0_272 = arith.constant 0 : index
    %c0_273 = arith.constant 0 : index
    %365 = vector.load %arg8[%c13_271, %c0_272, %c0_273] : memref<16x25x128xbf16, #tpu.memory_space<vmem>>, vector<1x25x128xbf16>
    %366 = vector.shape_cast %365 : vector<1x25x128xbf16> to vector<25x128xbf16>
    %cst_274 = arith.constant dense<0.000000e+00> : vector<1x128xf32>
    %367 = tpu.matmul %364, %366, %cst_274 {dimension_numbers = #tpu.dot_dimension_numbers<[1], [0], [0], [1], [0, 0, 1, 1], [], []>} : vector<1x25xbf16>, vector<25x128xbf16>, vector<1x128xf32> -> vector<1x128xf32>
    %368 = arith.addf %363, %367 : vector<1x128xf32>
    %369 = vector.extract_strided_slice %297 {offsets = [14, 0], sizes = [1, 25], strides = [1, 1]} : vector<16x25xbf16> to vector<1x25xbf16>
    %c14_275 = arith.constant 14 : index
    %c0_276 = arith.constant 0 : index
    %c0_277 = arith.constant 0 : index
    %370 = vector.load %arg8[%c14_275, %c0_276, %c0_277] : memref<16x25x128xbf16, #tpu.memory_space<vmem>>, vector<1x25x128xbf16>
    %371 = vector.shape_cast %370 : vector<1x25x128xbf16> to vector<25x128xbf16>
    %cst_278 = arith.constant dense<0.000000e+00> : vector<1x128xf32>
    %372 = tpu.matmul %369, %371, %cst_278 {dimension_numbers = #tpu.dot_dimension_numbers<[1], [0], [0], [1], [0, 0, 1, 1], [], []>} : vector<1x25xbf16>, vector<25x128xbf16>, vector<1x128xf32> -> vector<1x128xf32>
    %373 = arith.addf %368, %372 : vector<1x128xf32>
    %374 = vector.extract_strided_slice %297 {offsets = [15, 0], sizes = [1, 25], strides = [1, 1]} : vector<16x25xbf16> to vector<1x25xbf16>
    %c15_279 = arith.constant 15 : index
    %c0_280 = arith.constant 0 : index
    %c0_281 = arith.constant 0 : index
    %375 = vector.load %arg8[%c15_279, %c0_280, %c0_281] : memref<16x25x128xbf16, #tpu.memory_space<vmem>>, vector<1x25x128xbf16>
    %376 = vector.shape_cast %375 : vector<1x25x128xbf16> to vector<25x128xbf16>
    %cst_282 = arith.constant dense<0.000000e+00> : vector<1x128xf32>
    %377 = tpu.matmul %374, %376, %cst_282 {dimension_numbers = #tpu.dot_dimension_numbers<[1], [0], [0], [1], [0, 0, 1, 1], [], []>} : vector<1x25xbf16>, vector<25x128xbf16>, vector<1x128xf32> -> vector<1x128xf32>
    %378 = arith.addf %373, %377 : vector<1x128xf32>
    %cst_283 = arith.constant 0.000000e+00 : f32
    %379 = vector.broadcast %cst_283 : f32 to vector<1x128xf32>
    %380 = arith.maximumf %378, %379 : vector<1x128xf32>
    %381 = arith.truncf %380 : vector<1x128xf32> to vector<1x128xbf16>
    %c0_284 = arith.constant 0 : index
    %c0_285 = arith.constant 0 : index
    %382 = vector.load %arg10[%c0_284, %c0_285] : memref<128x128xbf16, #tpu.memory_space<vmem>>, vector<128x128xbf16>
    %cst_286 = arith.constant dense<0.000000e+00> : vector<1x128xf32>
    %383 = tpu.matmul %381, %382, %cst_286 {dimension_numbers = #tpu.dot_dimension_numbers<[1], [0], [0], [1], [0, 0, 1, 1], [], []>} : vector<1x128xbf16>, vector<128x128xbf16>, vector<1x128xf32> -> vector<1x128xf32>
    %c0_287 = arith.constant 0 : index
    %c0_288 = arith.constant 0 : index
    %384 = vector.load %arg11[%c0_287, %c0_288] : memref<1x128xf32, #tpu.memory_space<vmem>>, vector<1x128xf32>
    %385 = arith.addf %383, %384 : vector<1x128xf32>
    %cst_289 = arith.constant 0.000000e+00 : f32
    %386 = vector.broadcast %cst_289 : f32 to vector<1x128xf32>
    %387 = arith.maximumf %385, %386 : vector<1x128xf32>
    %388 = arith.truncf %387 : vector<1x128xf32> to vector<1x128xbf16>
    %c0_290 = arith.constant 0 : index
    %c0_291 = arith.constant 0 : index
    %389 = vector.load %arg12[%c0_290, %c0_291] : memref<128x128xbf16, #tpu.memory_space<vmem>>, vector<128x128xbf16>
    %cst_292 = arith.constant dense<0.000000e+00> : vector<1x128xf32>
    %390 = tpu.matmul %388, %389, %cst_292 {dimension_numbers = #tpu.dot_dimension_numbers<[1], [0], [0], [1], [0, 0, 1, 1], [], []>} : vector<1x128xbf16>, vector<128x128xbf16>, vector<1x128xf32> -> vector<1x128xf32>
    %c0_293 = arith.constant 0 : index
    %c0_294 = arith.constant 0 : index
    %391 = vector.load %arg13[%c0_293, %c0_294] : memref<1x128xf32, #tpu.memory_space<vmem>>, vector<1x128xf32>
    %392 = arith.addf %390, %391 : vector<1x128xf32>
    %c0_295 = arith.constant 0 : index
    %c0_296 = arith.constant 0 : index
    %c0_297 = arith.constant 0 : index
    %393 = vector.load %arg14[%c0_295, %c0_296, %c0_297] : memref<1x1x128xf32, #tpu.memory_space<vmem>>, vector<1x1x128xf32>
    %394 = vector.shape_cast %393 : vector<1x1x128xf32> to vector<1x128xf32>
    %395 = vector.shape_cast %392 : vector<1x128xf32> to vector<1x1x128xf32>
    tpu.vector_store %arg14[%c0_295, %c0_296, %c0_297], %395 {strides = array<i32>} : memref<1x1x128xf32, #tpu.memory_space<vmem>>, vector<1x1x128xf32>,
    return
  }
  func.func @transform_0(%arg0: i32) -> (i32, i32, i32) {
    %c0_i32 = arith.constant 0 : i32
    %c0_i32_0 = arith.constant 0 : i32
    %c0_i32_1 = arith.constant 0 : i32
    return %arg0, %c0_i32, %c0_i32_0 : i32, i32, i32
  }
  func.func @transform_1(%arg0: i32) -> (i32, i32, i32) {
    %c0_i32 = arith.constant 0 : i32
    %c0_i32_0 = arith.constant 0 : i32
    %c0_i32_1 = arith.constant 0 : i32
    %c0_i32_2 = arith.constant 0 : i32
    return %c0_i32, %c0_i32_0, %c0_i32_1 : i32, i32, i32
  }
  func.func @transform_2(%arg0: i32) -> (i32, i32) {
    %c0_i32 = arith.constant 0 : i32
    %c0_i32_0 = arith.constant 0 : i32
    %c0_i32_1 = arith.constant 0 : i32
    return %c0_i32, %c0_i32_0 : i32, i32
  }
  func.func @transform_3(%arg0: i32) -> (i32, i32, i32) {
    %c0_i32 = arith.constant 0 : i32
    %c0_i32_0 = arith.constant 0 : i32
    %c0_i32_1 = arith.constant 0 : i32
    %c0_i32_2 = arith.constant 0 : i32
    return %c0_i32, %c0_i32_0, %c0_i32_1 : i32, i32, i32
  }
  func.func @transform_4(%arg0: i32) -> (i32, i32, i32) {
    %c0_i32 = arith.constant 0 : i32
    %c0_i32_0 = arith.constant 0 : i32
    %c0_i32_1 = arith.constant 0 : i32
    %c0_i32_2 = arith.constant 0 : i32
    return %c0_i32, %c0_i32_0, %c0_i32_1 : i32, i32, i32
  }
  func.func @transform_5(%arg0: i32) -> (i32, i32) {
    %c0_i32 = arith.constant 0 : i32
    %c0_i32_0 = arith.constant 0 : i32
    %c0_i32_1 = arith.constant 0 : i32
    return %c0_i32, %c0_i32_0 : i32, i32
  }
  func.func @transform_6(%arg0: i32) -> (i32, i32, i32) {
    %c0_i32 = arith.constant 0 : i32
    %c0_i32_0 = arith.constant 0 : i32
    %c0_i32_1 = arith.constant 0 : i32
    %c0_i32_2 = arith.constant 0 : i32
    return %c0_i32, %c0_i32_0, %c0_i32_1 : i32, i32, i32
  }
  func.func @transform_7(%arg0: i32) -> (i32, i32, i32) {
    %c0_i32 = arith.constant 0 : i32
    %c0_i32_0 = arith.constant 0 : i32
    %c0_i32_1 = arith.constant 0 : i32
    %c0_i32_2 = arith.constant 0 : i32
    return %c0_i32, %c0_i32_0, %c0_i32_1 : i32, i32, i32
  }
  func.func @transform_8(%arg0: i32) -> (i32, i32) {
    %c0_i32 = arith.constant 0 : i32
    %c0_i32_0 = arith.constant 0 : i32
    %c0_i32_1 = arith.constant 0 : i32
    return %c0_i32, %c0_i32_0 : i32, i32
  }
  func.func @transform_9(%arg0: i32) -> (i32, i32) {
    %c0_i32 = arith.constant 0 : i32
    %c0_i32_0 = arith.constant 0 : i32
    %c0_i32_1 = arith.constant 0 : i32
    return %c0_i32, %c0_i32_0 : i32, i32
  }
  func.func @transform_10(%arg0: i32) -> (i32, i32) {
    %c0_i32 = arith.constant 0 : i32
    %c0_i32_0 = arith.constant 0 : i32
    %c0_i32_1 = arith.constant 0 : i32
    return %c0_i32, %c0_i32_0 : i32, i32
  }
  func.func @transform_11(%arg0: i32) -> (i32, i32) {
    %c0_i32 = arith.constant 0 : i32
    %c0_i32_0 = arith.constant 0 : i32
    %c0_i32_1 = arith.constant 0 : i32
    return %c0_i32, %c0_i32_0 : i32, i32
  }
  func.func @transform_12(%arg0: i32) -> (i32, i32) {
    %c0_i32 = arith.constant 0 : i32
    %c0_i32_0 = arith.constant 0 : i32
    %c0_i32_1 = arith.constant 0 : i32
    return %c0_i32, %c0_i32_0 : i32, i32
  }
  func.func @transform_13(%arg0: i32) -> (i32, i32, i32) {
    %c0_i32 = arith.constant 0 : i32
    %c0_i32_0 = arith.constant 0 : i32
    %c0_i32_1 = arith.constant 0 : i32
    return %arg0, %c0_i32, %c0_i32_0 : i32, i32, i32
  }
}

</mosaic_0001>

<bundles_post_ra>
// kernel: net_forward.1
= control target key start
LH: loop header
LB: loop body
LE: loop exit
PB: predicated region body
PF: predicated region fallthrough
CT: control target
= control target key end

     0   :  { %s18943_s0 = inlined_call_operand.vmem [shape: bf16[2,3,1152], index: 0, kind: input, shape index: {}]   ;;  %s18944_s1 = inlined_call_operand.vmem [shape: bf16[25,8,3], index: 1, kind: input, shape index: {}]   ;;  %s18945_s2 = inlined_call_operand.vmem [shape: f32[8,1], index: 2, kind: input, shape index: {}]   ;;  %s18946_s3 = inlined_call_operand.vmem [shape: bf16[4,896,256], index: 3, kind: input, shape index: {}]   ;;  %s18947_s4 = inlined_call_operand.vmem [shape: bf16[25,16,8], index: 4, kind: input, shape index: {}]   ;;  %s18948_s5 = inlined_call_operand.vmem [shape: f32[16,1], index: 5, kind: input, shape index: {}]   ;;  %s18949_s6 = inlined_call_operand.vmem [shape: bf16[4,140,25], index: 6, kind: input, shape index: {}]   ;;  %s18950_s7 = inlined_call_operand.vmem [shape: bf16[16,25,128], index: 7, kind: input, shape index: {}]   ;;  %s18951_s8 = inlined_call_operand.vmem [shape: f32[1,128], index: 8, kind: input, shape index: {}]   ;;  %s18952_s9 = inlined_call_operand.vmem [shape: bf16[128,128], index: 9, kind: input, shape index: {}]   ;;  %s18953_s10 = inlined_call_operand.vmem [shape: f32[1,128], index: 10, kind: input, shape index: {}]   ;;  %s18954_s11 = inlined_call_operand.vmem [shape: bf16[128,128], index: 11, kind: input, shape index: {}]   ;;  %s18955_s12 = inlined_call_operand.vmem [shape: f32[1,128], index: 12, kind: input, shape index: {}]   ;;  %s18956_s13 = inlined_call_operand.hbm [shape: f32[2,1,128], index: 13, kind: output, shape index: {}]  }
   0x1   :  { %18976 = sst [smem:[#allocation9_spill]] %s18943_s0 }
   0x2   :  { %18977 = sst [smem:[#allocation10_spill]] %s18944_s1 }
   0x3   :  { %18978 = sst [smem:[#allocation11_spill]] %s18945_s2 }
   0x4   :  { %18 = vsyncpa [#allocation3], 0 }
   0x5   :  { %20 = vsyncpa [#allocation3 + $0x1], 0  ;;  %s15415_s25 = smov 0   ;;  %s15417_s26 = smov 0  }
   0x6   :  { %s15419_s27 = smov 0   ;;  %s15421_s28 = smov 0  }
   0x7 LB: > { %s15436_s29 = sadd.s32 4294967295, %s15299_s28   ;;  %s12679_s30 = sadd.s32 4294967294, %s15299_s28   ;;  %s15299_s28 = sphi %s15421_s28, %s19003_s28   ;;  %s15295_s27 = sphi %s15419_s27, %s19002_s27   ;;  %s15291_s26 = sphi %s15417_s26, %s19001_s26   ;;  %s15287_s25 = sphi %s15415_s25, %s19000_s25  }
   0x8   : > { %s15440_s14 = sadd.s32 1, %s15299_s28   ;;  %s311_s15 = sadd.s32 1, %s15295_s27 }
   0x9   : > { %s308_s16 = ssub.s32 %s15299_s28, %s15440_s14  ;;  %p321_p0 = scmp.ne.s32.totalorder %s15295_s27, %s15291_s26 }
   0xa   : > { %p309_p1 = scmp.eq.s32.totalorder %s308_s16, 0  ;;  %p322_p2 = scmp.eq.s32.totalorder %s15436_s29, 1 }
   0xb   : > { %p327_p3 = scmp.ne.s32.totalorder %s15291_s26, %s15287_s25  ;;  %p328_p4 = scmp.eq.s32.totalorder %s12679_s30, 1 }
   0xc   : > { %s15451_s17 = scalar_select %p309_p1, %s15295_s27, %s311_s15  }
   0xd   : > { %p15453_p5 = por %p322_p2, %p321_p0  ;;  %p15457_p6 = por %p328_p4, %p327_p3 }
   0xe   : > { %p12682_p7 = scmp.ge.s32.totalorder %s15299_s28, 1  ;;  %p390_p8 = scmp.lt.s32.totalorder %s15299_s28, 3 }
  0x10   : > { %p391_p9 = pnand %p12682_p7, %p390_p8 }
  0x12   : > { %394 = sbr.rel (%p391_p9) target bundleno = 2665 (0xa69), region = 72 }
  0x17   : > { %p433_p10 = scmp.lt.s32.totalorder %s15436_s29, 1  ;;  %v451_v0 = vlaneseq  ;;  %v15301_v1 = vmov 1983009808   ;;  %s18981_s0 = sld [smem:[#allocation9_spill]]  ;;  %v18960_v8 = vmov 0   ;;  %vm509_vm0 = vcmask 1040384  }
  0x18   : > { %v449_v2 = vunpack.c.l.s4 %v15301_v1  ;;  %607 = vmatprep.mubr.bf16.mxu1 %v18960_v8  ;;  %566 = vmatprep.mubr.bf16.mxu0 %v18960_v8  ;;  %s18972_s30 = smov 127   ;;  %s18974_s15 = smov 126   ;;  %vm510_vm1 = vcmask 1041408   ;;  %v18959_v20 = vmov 65535   ;;  %vm497_vm2 = vcmask 1039360  }
  0x19   : > { %s434_s20 = scalar_select %p433_p10, %s15436_s29, 1  ;;  %v452_v3 = vshrl.u32 %v451_v0, 7  ;;  %14454 = vset.pattern.permute.xlu0 %v18960_v8  ;;  %14455 = vset.pattern.permute.xlu1 %v18960_v8  ;;  %v511_v21 = vsel %vm509_vm0, 4294967295, %v18959_v20  ;;  %vm505_vm3 = vcmask 23552   ;;  %v18962_v37 = vmov 0.0  }
  0x1a   : > { %v450_v4 = vunpack.c.0.s8 %v449_v2  ;;  %s18970_s16 = smov 125   ;;  %s15308_s22 = smov 95   ;;  %v15603_v23 = vsel %vm510_vm1, %v511_v21, 0  ;;  %vm15314_vm4 = vmmov 0   ;;  %vm902_vm5 = vcmask 1031168  }
  0x1b   : > { %s14371_s21 = smul.u32 18, %s434_s20  ;;  %s18968_s20 = smov 124   ;;  %vm1122_vm6 = vcmask 1022976   ;;  %vm1342_vm7 = vcmask 1014784   ;;  %vm1562_vm8 = vcmask 785408   ;;  %vm1782_vm9 = vcmask 777216  }
  0x1c   : > { %v453_v5 = vsub.s32 %v450_v4, %v452_v3  ;;  %s15309_s23 = smov 94   ;;  %s18982_s1 = sld [smem:[#allocation10_spill]]  ;;  %vm2002_vm10 = vcmask 769024   ;;  %vm2222_vm11 = vcmask 760832   ;;  %vm2442_vm12 = vcmask 752640  }
  0x1d   : > { %s15468_s24 = scalar_lea.vmem %s18981_s0, %s14371_s21  ;;  %s18957_s21 = smov 96   ;;  %vm2662_vm13 = vcmask 523264   ;;  %vm2882_vm14 = vcmask 515072   ;;  %vm3102_vm15 = vcmask 506880   ;;  %vm3322_vm0 = vcmask 498688  }
  0x1e   : > { %v440_v6 = vld [vmem:[%s15468_s24 + $0x8] sm:$0xff]  ;;  %v439_v7 = vld [vmem:[%s15468_s24] sm:$0xff]  ;;  %vm3542_vm1 = vcmask 490496   ;;  %s18989_s2 = sld [smem:[#allocation11_spill]]  ;;  %s15325_s0 = smov 114  }
  0x1f   : > { %v15474_v9 = vrot.slane %v440_v6, %v453_v5  ;;  %v447_v10 = vcombine.high %v439_v7, %v439_v7  ;;  %v15476_v11 = vrot.slane %v439_v7, %v453_v5  ;;  %v464_v13 = vcombine.high %v440_v6, %v440_v6 }
  0x21   : > { %489 = vrot.lane.b32.xlu0 %v15474_v9, %s18972_s30  ;;  %v15482_v12 = vrot.slane %v447_v10, %v453_v5  ;;  %v15492_v15 = vcombine.high %v15476_v11, %v15476_v11  ;;  %v15496_v16 = vrot.slane %v464_v13, %v453_v5  ;;  %v15510_v18 = vcombine.high %v15474_v9, %v15474_v9 }
  0x22   : > { %v12684_v33 = vld [vmem:[%s18982_s1 + $0x4] sm:$0xf]  ;;  %v701_v52 = vand.u32 %v15603_v23, %v15476_v11  ;;  %v442_v56 = vld [vmem:[%s18982_s1] sm:$0xf]  ;;  %v15722_v63 = vand.u32 %v15603_v23, %v15474_v9 }
  0x23   : > { %485 = vrot.lane.b32.xlu1 %v15482_v12, %s18972_s30  ;;  %v15488_v14 = vcombine.high %v15482_v12, %v15482_v12  ;;  %v15504_v17 = vcombine.high %v15496_v16, %v15496_v16  ;;  %v15666_v48 = vand.u32 %v15603_v23, %v15492_v15  ;;  %v15677_v50 = vand.u32 %v15603_v23, %v15482_v12 }
  0x24   : > { %v15691_v54 = vand.u32 %v15603_v23, %v15510_v18  ;;  %v15708_v59 = vand.u32 %v15603_v23, %v15496_v16 }
  0x25   : > { %487 = vrot.lane.b32.xlu0 %v15488_v14, %s18972_s30  ;;  %v15643_v40 = vand.u32 %v15603_v23, %v15488_v14 }
  0x27   : > { %483 = vrot.lane.b32.xlu1 %v15492_v15, %s18972_s30 }
  0x29   : > { %481 = vrot.lane.b32.xlu0 %v15476_v11, %s18972_s30 }
  0x2b   : > { %493 = vrot.lane.b32.xlu1 %v15496_v16, %s18972_s30 }
  0x2d   : > { %495 = vrot.lane.b32.xlu0 %v15504_v17, %s18972_s30 }
  0x2f   : > { %491 = vrot.lane.b32.xlu1 %v15510_v18, %s18972_s30 }
  0x31   : > { %892 = vrot.lane.b32.xlu0 %v15488_v14, %s18974_s15 }
  0x33   : > { %894 = vrot.lane.b32.xlu1 %v15474_v9, %s18974_s15 }
  0x35   : > { %890 = vrot.lane.b32.xlu0 %v15482_v12, %s18974_s15 }
  0x37   : > { %888 = vrot.lane.b32.xlu1 %v15492_v15, %s18974_s15 }
  0x39   : > { %886 = vrot.lane.b32.xlu0 %v15476_v11, %s18974_s15 }
  0x3b   : > { %898 = vrot.lane.b32.xlu1 %v15496_v16, %s18974_s15 }
  0x3d   : > { %900 = vrot.lane.b32.xlu0 %v15504_v17, %s18974_s15 }
  0x3f   : > { %896 = vrot.lane.b32.xlu1 %v15510_v18, %s18974_s15 }
  0x41   : > { %1112 = vrot.lane.b32.xlu0 %v15488_v14, %s18970_s16 }
  0x43   : > { %1114 = vrot.lane.b32.xlu1 %v15474_v9, %s18970_s16 }
  0x45   : > { %1110 = vrot.lane.b32.xlu0 %v15482_v12, %s18970_s16 }
  0x47   : > { %1108 = vrot.lane.b32.xlu1 %v15492_v15, %s18970_s16 }
  0x49   : > { %1106 = vrot.lane.b32.xlu0 %v15476_v11, %s18970_s16 }
  0x4b   : > { %1118 = vrot.lane.b32.xlu1 %v15496_v16, %s18970_s16 }
  0x4d   : > { %1120 = vrot.lane.b32.xlu0 %v15504_v17, %s18970_s16 }
  0x4f   : > { %1116 = vrot.lane.b32.xlu1 %v15510_v18, %s18970_s16 }
  0x51   : > { %1332 = vrot.lane.b32.xlu0 %v15488_v14, %s18968_s20 }
  0x53   : > { %1334 = vrot.lane.b32.xlu1 %v15474_v9, %s18968_s20 }
  0x55   : > { %1330 = vrot.lane.b32.xlu0 %v15482_v12, %s18968_s20 }
  0x57   : > { %1328 = vrot.lane.b32.xlu1 %v15492_v15, %s18968_s20 }
  0x59   : > { %1326 = vrot.lane.b32.xlu0 %v15476_v11, %s18968_s20 }
  0x5b   : > { %1338 = vrot.lane.b32.xlu1 %v15496_v16, %s18968_s20 }
  0x5d   : > { %1340 = vrot.lane.b32.xlu0 %v15504_v17, %s18968_s20 }
  0x5f   : > { %1336 = vrot.lane.b32.xlu1 %v15510_v18, %s18968_s20 }
  0x61   : > { %1552 = vrot.lane.b32.xlu0 %v15488_v14, %s18957_s21 }
  0x63   : > { %1554 = vrot.lane.b32.xlu1 %v15474_v9, %s18957_s21 }
  0x65   : > { %1550 = vrot.lane.b32.xlu0 %v15482_v12, %s18957_s21 }
  0x67   : > { %1548 = vrot.lane.b32.xlu1 %v15492_v15, %s18957_s21 }
  0x69   : > { %1546 = vrot.lane.b32.xlu0 %v15476_v11, %s18957_s21 }
  0x6b   : > { %1558 = vrot.lane.b32.xlu1 %v15496_v16, %s18957_s21 }
  0x6d   : > { %1560 = vrot.lane.b32.xlu0 %v15504_v17, %s18957_s21 }
  0x6f   : > { %1556 = vrot.lane.b32.xlu1 %v15510_v18, %s18957_s21  ;;  %s15310_s21 = smov 93  }
  0x71   : > { %1772 = vrot.lane.b32.xlu0 %v15488_v14, %s15308_s22 }
  0x73   : > { %1774 = vrot.lane.b32.xlu1 %v15474_v9, %s15308_s22 }
  0x75   : > { %1770 = vrot.lane.b32.xlu0 %v15482_v12, %s15308_s22 }
  0x77   : > { %1768 = vrot.lane.b32.xlu1 %v15492_v15, %s15308_s22 }
  0x79   : > { %1766 = vrot.lane.b32.xlu0 %v15476_v11, %s15308_s22 }
  0x7b   : > { %1778 = vrot.lane.b32.xlu1 %v15496_v16, %s15308_s22 }
  0x7d   : > { %1780 = vrot.lane.b32.xlu0 %v15504_v17, %s15308_s22 }
  0x7f   : > { %1776 = vrot.lane.b32.xlu1 %v15510_v18, %s15308_s22  ;;  %s15313_s22 = smov 92  }
  0x81   : > { %1992 = vrot.lane.b32.xlu0 %v15488_v14, %s15309_s23 }
  0x83   : > { %1994 = vrot.lane.b32.xlu1 %v15474_v9, %s15309_s23 }
  0x85   : > { %1990 = vrot.lane.b32.xlu0 %v15482_v12, %s15309_s23 }
  0x87   : > { %1988 = vrot.lane.b32.xlu1 %v15492_v15, %s15309_s23 }
  0x89   : > { %1986 = vrot.lane.b32.xlu0 %v15476_v11, %s15309_s23 }
  0x8b   : > { %1998 = vrot.lane.b32.xlu1 %v15496_v16, %s15309_s23 }
  0x8d   : > { %2000 = vrot.lane.b32.xlu0 %v15504_v17, %s15309_s23 }
  0x8f   : > { %1996 = vrot.lane.b32.xlu1 %v15510_v18, %s15309_s23  ;;  %s15328_s23 = smov 111  }
  0x91   : > { %2212 = vrot.lane.b32.xlu0 %v15488_v14, %s15310_s21 }
  0x93   : > { %v490_v19 = vpop.permute.xlu0 %489  ;;  %2214 = vrot.lane.b32.xlu1 %v15474_v9, %s15310_s21 }
  0x95   : > { %v486_v22 = vpop.permute.xlu1 %485  ;;  %2210 = vrot.lane.b32.xlu0 %v15482_v12, %s15310_s21 }
  0x97   : > { %2208 = vrot.lane.b32.xlu1 %v15492_v15, %s15310_s21  ;;  %v488_v24 = vpop.permute.xlu0 %487 }
  0x98   : > { %v501_v25 = vsel %vm497_vm2, %v488_v24, %v490_v19  ;;  %v500_v26 = vsel %vm497_vm2, %v486_v22, %v488_v24 }
  0x99   : > { %v484_v27 = vpop.permute.xlu1 %483  ;;  %2206 = vrot.lane.b32.xlu0 %v15476_v11, %s15310_s21  ;;  %v15612_v28 = vand.u32 %v15603_v23, %v501_v25  ;;  %v15615_v29 = vand.u32 %v15603_v23, %v500_v26  ;;  %v12693_v25 = vld [vmem:[%s18982_s1 + $0x8] sm:$0xf] }
  0x9a   : > { %v499_v30 = vsel %vm497_vm2, %v484_v27, %v486_v22 }
  0x9b   : > { %2218 = vrot.lane.b32.xlu1 %v15496_v16, %s15310_s21  ;;  %589 = vmatprep.subr.bf16.mxu1 %v15612_v28  ;;  %v482_v31 = vpop.permute.xlu0 %481  ;;  %v15622_v32 = vand.u32 %v15603_v23, %v499_v30 }
  0x9c   : > { %v498_v34 = vsel %vm497_vm2, %v482_v31, %v484_v27  ;;  %590 = vmatpush1.bf16.msra.mxu1 %v15615_v29 }
  0x9d   : > { %548 = vmatprep.subr.bf16.mxu0 %v15622_v32  ;;  %v494_v35 = vpop.permute.xlu1 %493  ;;  %2220 = vrot.lane.b32.xlu0 %v15504_v17, %s15310_s21  ;;  %v514_v36 = vand.u32 %v15603_v23, %v498_v34 }
  0x9e   : > { %14053 = vmatprep.subr.bf16.mxu1 %v18962_v37 }
  0x9f   : > { %2216 = vrot.lane.b32.xlu1 %v15510_v18, %s15310_s21  ;;  %549 = vmatpush1.bf16.msra.mxu0 %v514_v36  ;;  %v15636_v38 = vpop.permute.xlu0 %495  ;;  %s15315_s21 = smov 64  }
  0xa0   : > { %12686 = vmatmul.mubr.msk.bf16.vlgmr.msra.gmra.mxu1 %vm505_vm3, %v12684_v33  ;;  %v504_v39 = vsel %vm497_vm2, %v494_v35, %v15636_v38 }
  0xa1   : > { %v15646_v41 = vand.u32 %v15603_v23, %v504_v39  ;;  %v492_v42 = vpop.permute.xlu1 %491  ;;  %2432 = vrot.lane.b32.xlu0 %v15488_v14, %s15313_s22  ;;  %14055 = vmatprep.mubr.msk.bf16.mxu1 %vm15314_vm4, %v18962_v37 }
  0xa2   : > { %v502_v43 = vsel %vm497_vm2, %v490_v19, %v492_v42  ;;  %v503_v44 = vsel %vm497_vm2, %v492_v42, %v494_v35  ;;  %12685 = vmatmul.mubr.msk.bf16.vlgmr.msra.gmra.mxu0 %vm505_vm3, %v12684_v33 }
  0xa3   : > { %v15656_v45 = vand.u32 %v15603_v23, %v502_v43  ;;  %2434 = vrot.lane.b32.xlu1 %v15474_v9, %s15313_s22  ;;  %14054 = vmatpush3.bf16.msra.mxu1 %v15646_v41  ;;  %v893_v46 = vpop.permute.xlu0 %892  ;;  %v15662_v47 = vand.u32 %v15603_v23, %v503_v44 }
  0xa4   : > { %648 = vmatprep.mubr.bf16.mxu0 %v18960_v8  ;;  %776 = vmatprep.subr.bf16.mxu1 %v15643_v40 }
  0xa5   : > { %v15670_v49 = vpop.permute.xlu1 %894  ;;  %2430 = vrot.lane.b32.xlu0 %v15482_v12, %s15313_s22  ;;  %630 = vmatprep.subr.bf16.mxu0 %v15662_v47 }
  0xa6   : > { %631 = vmatpush1.bf16.msra.mxu0 %v15656_v45  ;;  %v906_v57 = vsel %vm902_vm5, %v893_v46, %v15670_v49 }
  0xa7   : > { %2428 = vrot.lane.b32.xlu1 %v15492_v15, %s15313_s22  ;;  %v891_v51 = vpop.permute.xlu0 %890  ;;  %735 = vmatprep.subr.bf16.mxu0 %v15666_v48  ;;  %v15717_v62 = vand.u32 %v906_v57, %v15603_v23 }
  0xa8   : > { %14056 = vmatmul.mubr.msk.bf16.vlgmr.msra.gmra.mxu1 %vm505_vm3, %v12684_v33  ;;  %v905_v2 = vsel %vm902_vm5, %v891_v51, %v893_v46 }
  0xa9   : > { %v889_v53 = vpop.permute.xlu1 %888  ;;  %2426 = vrot.lane.b32.xlu0 %v15476_v11, %s15313_s22  ;;  %777 = vmatpush1.bf16.msra.mxu1 %v15677_v50  ;;  %v15741_v5 = vand.u32 %v905_v2, %v15603_v23 }
  0xaa   : > { %12687 = vmatmul.mubr.msk.bf16.vlgmr.msra.gmra.mxu0 %vm505_vm3, %v12684_v33  ;;  %794 = vmatprep.mubr.bf16.mxu1 %v18960_v8  ;;  %v904_v60 = vsel %vm902_vm5, %v889_v53, %v891_v51 }
  0xab   : > { %2438 = vrot.lane.b32.xlu1 %v15496_v16, %s15313_s22  ;;  %v887_v55 = vpop.permute.xlu0 %886  ;;  %736 = vmatpush1.bf16.msra.mxu0 %v701_v52  ;;  %v15728_v1 = vand.u32 %v904_v60, %v15603_v23 }
  0xac   : > { %753 = vmatprep.mubr.bf16.mxu0 %v18960_v8  ;;  %14059 = vmatprep.subr.bf16.mxu1 %v18962_v37  ;;  %v903_v4 = vsel %vm902_vm5, %v887_v55, %v889_v53 }
  0xad   : > { %v899_v58 = vpop.permute.xlu1 %898  ;;  %2440 = vrot.lane.b32.xlu0 %v15504_v17, %s15313_s22  ;;  %817 = vmatprep.subr.bf16.mxu0 %v15691_v54  ;;  %v914_v10 = vand.u32 %v903_v4, %v15603_v23 }
  0xaf   : > { %2436 = vrot.lane.b32.xlu1 %v15510_v18, %s15313_s22  ;;  %v15714_v61 = vpop.permute.xlu0 %900  ;;  %s15316_s22 = smov 63  }
  0xb0   : > { %12690 = vmatmul.mubr.msk.bf16.vlgmr.msra.gmra.mxu1 %vm505_vm3, %v442_v56  ;;  %v909_v22 = vsel %vm902_vm5, %v899_v58, %v15714_v61 }
  0xb1   : > { %v897_v0 = vpop.permute.xlu1 %896  ;;  %2652 = vrot.lane.b32.xlu0 %v15488_v14, %s15315_s21  ;;  %14060 = vmatpush3.bf16.msra.mxu1 %v15708_v59  ;;  %v15771_v26 = vand.u32 %v909_v22, %v15603_v23 }
  0xb2   : > { %12689 = vmatmul.mubr.msk.bf16.vlgmr.msra.gmra.mxu0 %vm505_vm3, %v442_v56  ;;  %14061 = vmatprep.mubr.msk.bf16.mxu1 %vm15314_vm4, %v18962_v37  ;;  %v908_v6 = vsel %vm902_vm5, %v897_v0, %v899_v58  ;;  %v907_v31 = vsel %vm902_vm5, %v15670_v49, %v897_v0  ;;  %v12698_v0 = vld [vmem:[%s18982_s1 + $0xc] sm:$0xf] }
  0xb3   : > { %2654 = vrot.lane.b32.xlu1 %v15474_v9, %s15315_s21  ;;  %v1113_v3 = vpop.permute.xlu0 %1112  ;;  %989 = vmatprep.subr.bf16.mxu1 %v15717_v62  ;;  %v15754_v19 = vand.u32 %v908_v6, %v15603_v23  ;;  %v15790_v36 = vand.u32 %v907_v31, %v15603_v23 }
  0xb4   : > { %818 = vmatpush1.bf16.msra.mxu0 %v15722_v63  ;;  %835 = vmatprep.mubr.bf16.mxu0 %v18960_v8 }
  0xb5   : > { %v15744_v7 = vpop.permute.xlu1 %1114  ;;  %2650 = vrot.lane.b32.xlu0 %v15482_v12, %s15315_s21  ;;  %948 = vmatprep.subr.bf16.mxu0 %v15728_v1 }
  0xb6   : > { %v1126_v27 = vsel %vm1122_vm6, %v1113_v3, %v15744_v7 }
  0xb7   : > { %2648 = vrot.lane.b32.xlu1 %v15492_v15, %s15315_s21  ;;  %v1111_v13 = vpop.permute.xlu0 %1110  ;;  %v15787_v35 = vand.u32 %v1126_v27, %v15603_v23 }
  0xb8   : > { %14062 = vmatmul.mubr.msk.bf16.vlgmr.msra.gmra.mxu1 %vm505_vm3, %v442_v56  ;;  %v1125_v43 = vsel %vm1122_vm6, %v1111_v13, %v1113_v3 }
  0xb9   : > { %990 = vmatpush1.bf16.msra.mxu1 %v15741_v5  ;;  %v1109_v21 = vpop.permute.xlu1 %1108  ;;  %2646 = vrot.lane.b32.xlu0 %v15476_v11, %s15315_s21  ;;  %v15809_v49 = vand.u32 %v1125_v43, %v15603_v23 }
  0xba   : > { %12691 = vmatmul.mubr.msk.bf16.vlgmr.msra.gmra.mxu0 %vm505_vm3, %v442_v56  ;;  %1007 = vmatprep.mubr.bf16.mxu1 %v18960_v8  ;;  %v1124_v33 = vsel %vm1122_vm6, %v1109_v21, %v1111_v13 }
  0xbb   : > { %2658 = vrot.lane.b32.xlu1 %v15496_v16, %s15315_s21  ;;  %v1107_v24 = vpop.permute.xlu0 %1106  ;;  %949 = vmatpush1.bf16.msra.mxu0 %v914_v10  ;;  %v15796_v42 = vand.u32 %v1124_v33, %v15603_v23 }
  0xbc   : > { %966 = vmatprep.mubr.bf16.mxu0 %v18960_v8  ;;  %1030 = vmatprep.subr.bf16.mxu0 %v15754_v19  ;;  %v1123_v46 = vsel %vm1122_vm6, %v1107_v24, %v1109_v21 }
  0xbd   : > { %v1119_v30 = vpop.permute.xlu1 %1118  ;;  %2660 = vrot.lane.b32.xlu0 %v15504_v17, %s15315_s21  ;;  %14065 = vmatprep.subr.bf16.mxu1 %v18962_v37  ;;  %v1134_v53 = vand.u32 %v1123_v46, %v15603_v23 }
  0xbf   : > { %2656 = vrot.lane.b32.xlu1 %v15510_v18, %s15315_s21  ;;  %v15783_v34 = vpop.permute.xlu0 %1120  ;;  %s15317_s21 = smov 62  }
  0xc0   : > { %12695 = vmatmul.mubr.msk.bf16.vlgmr.msra.gmra.mxu1 %vm505_vm3, %v12693_v25  ;;  %v1129_v58 = vsel %vm1122_vm6, %v1119_v30, %v15783_v34 }
  0xc1   : > { %v1117_v39 = vpop.permute.xlu1 %1116  ;;  %2872 = vrot.lane.b32.xlu0 %v15488_v14, %s15316_s22  ;;  %14066 = vmatpush3.bf16.msra.mxu1 %v15771_v26  ;;  %v15839_v2 = vand.u32 %v1129_v58, %v15603_v23 }
  0xc2   : > { %12694 = vmatmul.mubr.msk.bf16.vlgmr.msra.gmra.mxu0 %vm505_vm3, %v12693_v25  ;;  %14067 = vmatprep.mubr.msk.bf16.mxu1 %vm15314_vm4, %v18962_v37  ;;  %v1128_v51 = vsel %vm1122_vm6, %v1117_v39, %v1119_v30  ;;  %v1127_v6 = vsel %vm1122_vm6, %v15744_v7, %v1117_v39 }
  0xc3   : > { %1031 = vmatpush1.bf16.msra.mxu0 %v15790_v36  ;;  %2874 = vrot.lane.b32.xlu1 %v15474_v9, %s15316_s22  ;;  %v1333_v44 = vpop.permute.xlu0 %1332  ;;  %v15822_v56 = vand.u32 %v1128_v51, %v15603_v23  ;;  %v15858_v22 = vand.u32 %v1127_v6, %v15603_v23 }
  0xc4   : > { %1209 = vmatprep.subr.bf16.mxu1 %v15787_v35  ;;  %1048 = vmatprep.mubr.bf16.mxu0 %v18960_v8 }
  0xc5   : > { %v15812_v52 = vpop.permute.xlu1 %1334  ;;  %2870 = vrot.lane.b32.xlu0 %v15482_v12, %s15316_s22  ;;  %1168 = vmatprep.subr.bf16.mxu0 %v15796_v42 }
  0xc6   : > { %v1346_v3 = vsel %vm1342_vm7, %v1333_v44, %v15812_v52 }
  0xc7   : > { %2868 = vrot.lane.b32.xlu1 %v15492_v15, %s15316_s22  ;;  %v1331_v55 = vpop.permute.xlu0 %1330  ;;  %v15855_v21 = vand.u32 %v1346_v3, %v15603_v23 }
  0xc8   : > { %14068 = vmatmul.mubr.msk.bf16.vlgmr.msra.gmra.mxu1 %vm505_vm3, %v12693_v25 }
  0xc9   : > { %1210 = vmatpush1.bf16.msra.mxu1 %v15809_v49  ;;  %v1329_v57 = vpop.permute.xlu1 %1328  ;;  %2866 = vrot.lane.b32.xlu0 %v15476_v11, %s15316_s22 }
  0xca   : > { %12696 = vmatmul.mubr.msk.bf16.vlgmr.msra.gmra.mxu0 %vm505_vm3, %v12693_v25  ;;  %1227 = vmatprep.mubr.bf16.mxu1 %v18960_v8  ;;  %v1344_v10 = vsel %vm1342_vm7, %v1329_v57, %v1331_v55  ;;  %v1345_v25 = vsel %vm1342_vm7, %v1331_v55, %v1333_v44 }
  0xcb   : > { %2878 = vrot.lane.b32.xlu1 %v15496_v16, %s15316_s22  ;;  %v1327_v60 = vpop.permute.xlu0 %1326  ;;  %1169 = vmatpush1.bf16.msra.mxu0 %v1134_v53  ;;  %v15864_v7 = vand.u32 %v1344_v10, %v15603_v23  ;;  %v15877_v31 = vand.u32 %v1345_v25, %v15603_v23 }
  0xcc   : > { %1186 = vmatprep.mubr.bf16.mxu0 %v18960_v8  ;;  %1250 = vmatprep.subr.bf16.mxu0 %v15822_v56  ;;  %v1343_v30 = vsel %vm1342_vm7, %v1327_v60, %v1329_v57  ;;  %v12703_v57 = vld [vmem:[%s18982_s1 + $0x10] sm:$0xf] }
  0xcd   : > { %v1339_v4 = vpop.permute.xlu1 %1338  ;;  %2880 = vrot.lane.b32.xlu0 %v15504_v17, %s15316_s22  ;;  %14071 = vmatprep.subr.bf16.mxu1 %v18962_v37  ;;  %18984 = vst [vmem:[#allocation6_spill] sm:$0xff] %v15864_v7  ;;  %v1354_v43 = vand.u32 %v1343_v30, %v15603_v23 }
  0xcf   : > { %2876 = vrot.lane.b32.xlu1 %v15510_v18, %s15316_s22  ;;  %v15851_v13 = vpop.permute.xlu0 %1340  ;;  %s15318_s22 = smov 61  }
  0xd0   : > { %18983 = vst [vmem:[#allocation5_spill] sm:$0xff] %v15851_v13  ;;  %12700 = vmatmul.mubr.msk.bf16.vlgmr.msra.gmra.mxu1 %vm505_vm3, %v12698_v0  ;;  %v1349_v53 = vsel %vm1342_vm7, %v1339_v4, %v15851_v13  ;;  %v18987_v13 = vmov 0.0  }
  0xd1   : > { %v1337_v24 = vpop.permute.xlu1 %1336  ;;  %3092 = vrot.lane.b32.xlu0 %v15488_v14, %s15317_s21  ;;  %14072 = vmatpush3.bf16.msra.mxu1 %v15839_v2  ;;  %v15907_v58 = vand.u32 %v1349_v53, %v15603_v23 }
  0xd2   : > { %12699 = vmatmul.mubr.msk.bf16.vlgmr.msra.gmra.mxu0 %vm505_vm3, %v12698_v0  ;;  %14073 = vmatprep.mubr.msk.bf16.mxu1 %vm15314_vm4, %v18962_v37  ;;  %v1348_v33 = vsel %vm1342_vm7, %v1337_v24, %v1339_v4  ;;  %v1347_v3 = vsel %vm1342_vm7, %v15812_v52, %v1337_v24 }
  0xd3   : > { %1251 = vmatpush1.bf16.msra.mxu0 %v15858_v22  ;;  %3094 = vrot.lane.b32.xlu1 %v15474_v9, %s15317_s21  ;;  %v1553_v27 = vpop.permute.xlu0 %1552  ;;  %v15890_v46 = vand.u32 %v1348_v33, %v15603_v23  ;;  %18986 = vst [vmem:[#allocation8_spill] sm:$0xff] %v15907_v58  ;;  %v15922_v25 = vand.u32 %v1347_v3, %v15603_v23 }
  0xd4   : > { %1429 = vmatprep.subr.bf16.mxu1 %v15855_v21  ;;  %1268 = vmatprep.mubr.bf16.mxu0 %v18960_v8 }
  0xd5   : > { %v15880_v39 = vpop.permute.xlu1 %1554  ;;  %3090 = vrot.lane.b32.xlu0 %v15482_v12, %s15317_s21  ;;  %1388 = vmatprep.subr.bf16.mxu0 %v15864_v7  ;;  %18985 = vst [vmem:[#allocation7_spill] sm:$0xff] %v15890_v46 }
  0xd6   : > { %v1566_v60 = vsel %vm1562_vm8, %v1553_v27, %v15880_v39 }
  0xd7   : > { %3088 = vrot.lane.b32.xlu1 %v15492_v15, %s15317_s21  ;;  %v1551_v44 = vpop.permute.xlu0 %1550  ;;  %v1583_v10 = vand.u32 %v1566_v60, %v15603_v23 }
  0xd8   : > { %14074 = vmatmul.mubr.msk.bf16.vlgmr.msra.gmra.mxu1 %vm505_vm3, %v12698_v0  ;;  %v1565_v24 = vsel %vm1562_vm8, %v1551_v44, %v1553_v27 }
  0xd9   : > { %1430 = vmatpush1.bf16.msra.mxu1 %v15877_v31  ;;  %v1549_v51 = vpop.permute.xlu1 %1548  ;;  %3086 = vrot.lane.b32.xlu0 %v15476_v11, %s15317_s21  ;;  %v1580_v53 = vand.u32 %v1565_v24, %v15603_v23 }
  0xda   : > { %12701 = vmatmul.mubr.msk.bf16.vlgmr.msra.gmra.mxu0 %vm505_vm3, %v12698_v0  ;;  %1447 = vmatprep.mubr.bf16.mxu1 %v18960_v8  ;;  %v1564_v4 = vsel %vm1562_vm8, %v1549_v51, %v1551_v44 }
  0xdb   : > { %3098 = vrot.lane.b32.xlu1 %v15496_v16, %s15317_s21  ;;  %v1547_v55 = vpop.permute.xlu0 %1546  ;;  %1389 = vmatpush1.bf16.msra.mxu0 %v1354_v43  ;;  %v1577_v52 = vand.u32 %v1564_v4, %v15603_v23 }
  0xdc   : > { %1406 = vmatprep.mubr.bf16.mxu0 %v18960_v8  ;;  %1470 = vmatprep.subr.bf16.mxu0 %v15890_v46  ;;  %v1563_v43 = vsel %vm1562_vm8, %v1547_v55, %v1549_v51 }
  0xdd   : > { %v1559_v0 = vpop.permute.xlu1 %1558  ;;  %3100 = vrot.lane.b32.xlu0 %v15504_v17, %s15317_s21  ;;  %14077 = vmatprep.subr.bf16.mxu1 %v18962_v37  ;;  %v1574_v60 = vand.u32 %v1563_v43, %v15603_v23 }
  0xdf   : > { %3096 = vrot.lane.b32.xlu1 %v15510_v18, %s15317_s21  ;;  %v1561_v6 = vpop.permute.xlu0 %1560  ;;  %s15319_s21 = smov 60  }
  0xe0   : > { %12705 = vmatmul.mubr.msk.bf16.vlgmr.msra.gmra.mxu1 %vm505_vm3, %v12703_v57  ;;  %v1569_v4 = vsel %vm1562_vm8, %v1559_v0, %v1561_v6 }
  0xe1   : > { %v1557_v30 = vpop.permute.xlu1 %1556  ;;  %3312 = vrot.lane.b32.xlu0 %v15488_v14, %s15318_s22  ;;  %14078 = vmatpush3.bf16.msra.mxu1 %v15907_v58  ;;  %v1592_v24 = vand.u32 %v1569_v4, %v15603_v23 }
  0xe2   : > { %12704 = vmatmul.mubr.msk.bf16.vlgmr.msra.gmra.mxu0 %vm505_vm3, %v12703_v57  ;;  %14079 = vmatprep.mubr.msk.bf16.mxu1 %vm15314_vm4, %v18962_v37  ;;  %v1568_v27 = vsel %vm1562_vm8, %v1557_v30, %v1559_v0  ;;  %v1567_v6 = vsel %vm1562_vm8, %v15880_v39, %v1557_v30 }
  0xe3   : > { %1471 = vmatpush1.bf16.msra.mxu0 %v15922_v25  ;;  %3314 = vrot.lane.b32.xlu1 %v15474_v9, %s15318_s22  ;;  %v1773_v33 = vpop.permute.xlu0 %1772  ;;  %v1589_v55 = vand.u32 %v1568_v27, %v15603_v23 }
  0xe4   : > { %1649 = vmatprep.subr.bf16.mxu1 %v1583_v10  ;;  %1488 = vmatprep.mubr.bf16.mxu0 %v18960_v8 }
  0xe5   : > { %v15939_v44 = vpop.permute.xlu1 %1774  ;;  %3310 = vrot.lane.b32.xlu0 %v15482_v12, %s15318_s22  ;;  %1608 = vmatprep.subr.bf16.mxu0 %v1577_v52  ;;  %v12708_v52 = vld [vmem:[%s18982_s1 + $0x14] sm:$0xf] }
  0xe6   : > { %v1786_v0 = vsel %vm1782_vm9, %v1773_v33, %v15939_v44 }
  0xe7   : > { %3308 = vrot.lane.b32.xlu1 %v15492_v15, %s15318_s22  ;;  %v1771_v51 = vpop.permute.xlu0 %1770  ;;  %v1803_v27 = vand.u32 %v1786_v0, %v15603_v23 }
  0xe8   : > { %14080 = vmatmul.mubr.msk.bf16.vlgmr.msra.gmra.mxu1 %vm505_vm3, %v12703_v57  ;;  %v1785_v30 = vsel %vm1782_vm9, %v1771_v51, %v1773_v33 }
  0xe9   : > { %1650 = vmatpush1.bf16.msra.mxu1 %v1580_v53  ;;  %v1769_v3 = vpop.permute.xlu1 %1768  ;;  %3306 = vrot.lane.b32.xlu0 %v15476_v11, %s15318_s22 }
  0xea   : > { %12706 = vmatmul.mubr.msk.bf16.vlgmr.msra.gmra.mxu0 %vm505_vm3, %v12703_v57  ;;  %1667 = vmatprep.mubr.bf16.mxu1 %v18960_v8  ;;  %v1784_v43 = vsel %vm1782_vm9, %v1769_v3, %v1771_v51 }
  0xeb   : > { %3318 = vrot.lane.b32.xlu1 %v15496_v16, %s15318_s22  ;;  %v1767_v10 = vpop.permute.xlu0 %1766  ;;  %1609 = vmatpush1.bf16.msra.mxu0 %v1574_v60  ;;  %v1586_v60 = vand.u32 %v1567_v6, %v15603_v23  ;;  %v1797_v39 = vand.u32 %v1784_v43, %v15603_v23 }
  0xec   : > { %1626 = vmatprep.mubr.bf16.mxu0 %v18960_v8  ;;  %1690 = vmatprep.subr.bf16.mxu0 %v1589_v55  ;;  %v1783_v0 = vsel %vm1782_vm9, %v1767_v10, %v1769_v3 }
  0xed   : > { %v1779_v57 = vpop.permute.xlu1 %1778  ;;  %3320 = vrot.lane.b32.xlu0 %v15504_v17, %s15318_s22  ;;  %14083 = vmatprep.subr.bf16.mxu1 %v18962_v37  ;;  %v1794_v51 = vand.u32 %v1783_v0, %v15603_v23 }
  0xef   : > { %3316 = vrot.lane.b32.xlu1 %v15510_v18, %s15318_s22  ;;  %v1781_v53 = vpop.permute.xlu0 %1780  ;;  %s15320_s22 = smov 32  }
  0xf0   : > { %12710 = vmatmul.mubr.msk.bf16.vlgmr.msra.gmra.mxu1 %vm505_vm3, %v12708_v52 }
  0xf1   : > { %v1777_v55 = vpop.permute.xlu1 %1776  ;;  %3532 = vrot.lane.b32.xlu0 %v15488_v14, %s15319_s21  ;;  %14084 = vmatpush3.bf16.msra.mxu1 %v1592_v24  ;;  %v1800_v24 = vand.u32 %v1785_v30, %v15603_v23 }
  0xf2   : > { %12709 = vmatmul.mubr.msk.bf16.vlgmr.msra.gmra.mxu0 %vm505_vm3, %v12708_v52  ;;  %14085 = vmatprep.mubr.msk.bf16.mxu1 %vm15314_vm4, %v18962_v37  ;;  %v1788_v6 = vsel %vm1782_vm9, %v1777_v55, %v1779_v57 }
  0xf3   : > { %1691 = vmatpush1.bf16.msra.mxu0 %v1586_v60  ;;  %3534 = vrot.lane.b32.xlu1 %v15474_v9, %s15319_s21  ;;  %v1993_v4 = vpop.permute.xlu0 %1992  ;;  %v1809_v10 = vand.u32 %v1788_v6, %v15603_v23 }
  0xf4   : > { %1869 = vmatprep.subr.bf16.mxu1 %v1803_v27  ;;  %1708 = vmatprep.mubr.bf16.mxu0 %v18960_v8  ;;  %v1789_v27 = vsel %vm1782_vm9, %v1779_v57, %v1781_v53  ;;  %v1787_v53 = vsel %vm1782_vm9, %v15939_v44, %v1777_v55  ;;  %vm3762_vm9 = vcmask 261120  }
  0xf5   : > { %v15986_v33 = vpop.permute.xlu1 %1994  ;;  %3530 = vrot.lane.b32.xlu0 %v15482_v12, %s15319_s21  ;;  %1828 = vmatprep.subr.bf16.mxu0 %v1797_v39  ;;  %v12713_v39 = vld [vmem:[%s18982_s1 + $0x18] sm:$0xf]  ;;  %v1812_v30 = vand.u32 %v1789_v27, %v15603_v23 }
  0xf6   : > { %v2006_v57 = vsel %vm2002_vm10, %v1993_v4, %v15986_v33 }
  0xf7   : > { %3528 = vrot.lane.b32.xlu1 %v15492_v15, %s15319_s21  ;;  %v1991_v3 = vpop.permute.xlu0 %1990  ;;  %v2023_v6 = vand.u32 %v2006_v57, %v15603_v23 }
  0xf8   : > { %14086 = vmatmul.mubr.msk.bf16.vlgmr.msra.gmra.mxu1 %vm505_vm3, %v12708_v52  ;;  %v2005_v55 = vsel %vm2002_vm10, %v1991_v3, %v1993_v4 }
  0xf9   : > { %1870 = vmatpush1.bf16.msra.mxu1 %v1800_v24  ;;  %v1989_v43 = vpop.permute.xlu1 %1988  ;;  %3526 = vrot.lane.b32.xlu0 %v15476_v11, %s15319_s21 }
  0xfa   : > { %12711 = vmatmul.mubr.msk.bf16.vlgmr.msra.gmra.mxu0 %vm505_vm3, %v12708_v52  ;;  %1887 = vmatprep.mubr.bf16.mxu1 %v18960_v8  ;;  %v2004_v0 = vsel %vm2002_vm10, %v1989_v43, %v1991_v3 }
  0xfb   : > { %3538 = vrot.lane.b32.xlu1 %v15496_v16, %s15319_s21  ;;  %v1987_v60 = vpop.permute.xlu0 %1986  ;;  %1829 = vmatpush1.bf16.msra.mxu0 %v1794_v51  ;;  %v1806_v51 = vand.u32 %v1787_v53, %v15603_v23  ;;  %v2017_v44 = vand.u32 %v2004_v0, %v15603_v23 }
  0xfc   : > { %1846 = vmatprep.mubr.bf16.mxu0 %v18960_v8  ;;  %1910 = vmatprep.subr.bf16.mxu0 %v1809_v10  ;;  %v2003_v57 = vsel %vm2002_vm10, %v1987_v60, %v1989_v43 }
  0xfd   : > { %v1999_v52 = vpop.permute.xlu1 %1998  ;;  %3540 = vrot.lane.b32.xlu0 %v15504_v17, %s15319_s21  ;;  %14089 = vmatprep.subr.bf16.mxu1 %v18962_v37  ;;  %v2014_v3 = vand.u32 %v2003_v57, %v15603_v23 }
  0xff   : > { %3536 = vrot.lane.b32.xlu1 %v15510_v18, %s15319_s21  ;;  %v2001_v24 = vpop.permute.xlu0 %2000  ;;  %s15321_s21 = smov 31  }
 0x100   : > { %12715 = vmatmul.mubr.msk.bf16.vlgmr.msra.gmra.mxu1 %vm505_vm3, %v12713_v39 }
 0x101   : > { %v1997_v10 = vpop.permute.xlu1 %1996  ;;  %3752 = vrot.lane.b32.xlu0 %v15488_v14, %s15320_s22  ;;  %14090 = vmatpush3.bf16.msra.mxu1 %v1812_v30  ;;  %v2020_v30 = vand.u32 %v2005_v55, %v15603_v23 }
 0x102   : > { %12714 = vmatmul.mubr.msk.bf16.vlgmr.msra.gmra.mxu0 %vm505_vm3, %v12713_v39  ;;  %14091 = vmatprep.mubr.msk.bf16.mxu1 %vm15314_vm4, %v18962_v37  ;;  %v2008_v53 = vsel %vm2002_vm10, %v1997_v10, %v1999_v52 }
 0x103   : > { %1911 = vmatpush1.bf16.msra.mxu0 %v1806_v51  ;;  %3754 = vrot.lane.b32.xlu1 %v15474_v9, %s15320_s22  ;;  %v2213_v27 = vpop.permute.xlu0 %2212  ;;  %v2029_v43 = vand.u32 %v2008_v53, %v15603_v23 }
 0x104   : > { %2089 = vmatprep.subr.bf16.mxu1 %v2023_v6  ;;  %1928 = vmatprep.mubr.bf16.mxu0 %v18960_v8  ;;  %v2009_v6 = vsel %vm2002_vm10, %v1999_v52, %v2001_v24  ;;  %v2007_v52 = vsel %vm2002_vm10, %v15986_v33, %v1997_v10  ;;  %vm3982_vm10 = vcmask 252928  }
 0x105   : > { %v16033_v4 = vpop.permute.xlu1 %2214  ;;  %3750 = vrot.lane.b32.xlu0 %v15482_v12, %s15320_s22  ;;  %2048 = vmatprep.subr.bf16.mxu0 %v2017_v44  ;;  %v2032_v44 = vand.u32 %v2009_v6, %v15603_v23 }
 0x106   : > { %v2226_v55 = vsel %vm2222_vm11, %v2213_v27, %v16033_v4 }
 0x107   : > { %3748 = vrot.lane.b32.xlu1 %v15492_v15, %s15320_s22  ;;  %v2211_v0 = vpop.permute.xlu0 %2210  ;;  %v2243_v53 = vand.u32 %v2226_v55, %v15603_v23 }
 0x108   : > { %14092 = vmatmul.mubr.msk.bf16.vlgmr.msra.gmra.mxu1 %vm505_vm3, %v12713_v39  ;;  %v2225_v10 = vsel %vm2222_vm11, %v2211_v0, %v2213_v27 }
 0x109   : > { %2090 = vmatpush1.bf16.msra.mxu1 %v2020_v30  ;;  %v2209_v60 = vpop.permute.xlu1 %2208  ;;  %3746 = vrot.lane.b32.xlu0 %v15476_v11, %s15320_s22 }
 0x10a   : > { %12716 = vmatmul.mubr.msk.bf16.vlgmr.msra.gmra.mxu0 %vm505_vm3, %v12713_v39  ;;  %2107 = vmatprep.mubr.bf16.mxu1 %v18960_v8  ;;  %v12718_v39 = vld [vmem:[%s18982_s1 + $0x1c] sm:$0xf]  ;;  %v2224_v24 = vsel %vm2222_vm11, %v2209_v60, %v2211_v0 }
 0x10b   : > { %3758 = vrot.lane.b32.xlu1 %v15496_v16, %s15320_s22  ;;  %v2207_v51 = vpop.permute.xlu0 %2206  ;;  %2049 = vmatpush1.bf16.msra.mxu0 %v2014_v3  ;;  %v2026_v3 = vand.u32 %v2007_v52, %v15603_v23  ;;  %v2237_v33 = vand.u32 %v2224_v24, %v15603_v23 }
 0x10c   : > { %2066 = vmatprep.mubr.bf16.mxu0 %v18960_v8  ;;  %2130 = vmatprep.subr.bf16.mxu0 %v2029_v43  ;;  %v2223_v55 = vsel %vm2222_vm11, %v2207_v51, %v2209_v60 }
 0x10d   : > { %v2219_v57 = vpop.permute.xlu1 %2218  ;;  %3760 = vrot.lane.b32.xlu0 %v15504_v17, %s15320_s22  ;;  %14095 = vmatprep.subr.bf16.mxu1 %v18962_v37  ;;  %v2234_v0 = vand.u32 %v2223_v55, %v15603_v23 }
 0x10f   : > { %3756 = vrot.lane.b32.xlu1 %v15510_v18, %s15320_s22  ;;  %v2221_v30 = vpop.permute.xlu0 %2220  ;;  %s15322_s22 = smov 30  }
 0x110   : > { %12720 = vmatmul.mubr.msk.bf16.vlgmr.msra.gmra.mxu1 %vm505_vm3, %v12718_v39 }
 0x111   : > { %v2217_v43 = vpop.permute.xlu1 %2216  ;;  %3972 = vrot.lane.b32.xlu0 %v15488_v14, %s15321_s21  ;;  %14096 = vmatpush3.bf16.msra.mxu1 %v2032_v44  ;;  %v2240_v44 = vand.u32 %v2225_v10, %v15603_v23 }
 0x112   : > { %12719 = vmatmul.mubr.msk.bf16.vlgmr.msra.gmra.mxu0 %vm505_vm3, %v12718_v39  ;;  %14097 = vmatprep.mubr.msk.bf16.mxu1 %vm15314_vm4, %v18962_v37  ;;  %v2228_v52 = vsel %vm2222_vm11, %v2217_v43, %v2219_v57 }
 0x113   : > { %2131 = vmatpush1.bf16.msra.mxu0 %v2026_v3  ;;  %3974 = vrot.lane.b32.xlu1 %v15474_v9, %s15321_s21  ;;  %v2433_v6 = vpop.permute.xlu0 %2432  ;;  %v2249_v60 = vand.u32 %v2228_v52, %v15603_v23 }
 0x114   : > { %2309 = vmatprep.subr.bf16.mxu1 %v2243_v53  ;;  %2148 = vmatprep.mubr.bf16.mxu0 %v18960_v8  ;;  %v2229_v53 = vsel %vm2222_vm11, %v2219_v57, %v2221_v30  ;;  %v12723_v57 = vld [vmem:[%s18982_s1 + $0x20] sm:$0xf] }
 0x115   : > { %v16080_v27 = vpop.permute.xlu1 %2434  ;;  %3970 = vrot.lane.b32.xlu0 %v15482_v12, %s15321_s21  ;;  %2268 = vmatprep.subr.bf16.mxu0 %v2237_v33  ;;  %v2252_v33 = vand.u32 %v2229_v53, %v15603_v23 }
 0x116   : > { %v2446_v10 = vsel %vm2442_vm12, %v2433_v6, %v16080_v27 }
 0x117   : > { %3968 = vrot.lane.b32.xlu1 %v15492_v15, %s15321_s21  ;;  %v2431_v24 = vpop.permute.xlu0 %2430  ;;  %v2463_v52 = vand.u32 %v2446_v10, %v15603_v23 }
 0x118   : > { %14098 = vmatmul.mubr.msk.bf16.vlgmr.msra.gmra.mxu1 %vm505_vm3, %v12718_v39 }
 0x119   : > { %2310 = vmatpush1.bf16.msra.mxu1 %v2240_v44  ;;  %v2429_v51 = vpop.permute.xlu1 %2428  ;;  %3966 = vrot.lane.b32.xlu0 %v15476_v11, %s15321_s21 }
 0x11a   : > { %12721 = vmatmul.mubr.msk.bf16.vlgmr.msra.gmra.mxu0 %vm505_vm3, %v12718_v39  ;;  %2327 = vmatprep.mubr.bf16.mxu1 %v18960_v8  ;;  %v2227_v39 = vsel %vm2222_vm11, %v16033_v4, %v2217_v43  ;;  %v2444_v30 = vsel %vm2442_vm12, %v2429_v51, %v2431_v24  ;;  %v2445_v43 = vsel %vm2442_vm12, %v2431_v24, %v2433_v6  ;;  %vm4202_vm11 = vcmask 244736  }
 0x11b   : > { %3978 = vrot.lane.b32.xlu1 %v15496_v16, %s15321_s21  ;;  %v2427_v3 = vpop.permute.xlu0 %2426  ;;  %2269 = vmatpush1.bf16.msra.mxu0 %v2234_v0  ;;  %v2246_v0 = vand.u32 %v2227_v39, %v15603_v23  ;;  %v2457_v4 = vand.u32 %v2444_v30, %v15603_v23 }
 0x11c   : > { %2286 = vmatprep.mubr.bf16.mxu0 %v18960_v8  ;;  %2350 = vmatprep.subr.bf16.mxu0 %v2249_v60  ;;  %v2443_v10 = vsel %vm2442_vm12, %v2427_v3, %v2429_v51 }
 0x11d   : > { %v2439_v55 = vpop.permute.xlu1 %2438  ;;  %3980 = vrot.lane.b32.xlu0 %v15504_v17, %s15321_s21  ;;  %14101 = vmatprep.subr.bf16.mxu1 %v18962_v37  ;;  %v2454_v24 = vand.u32 %v2443_v10, %v15603_v23 }
 0x11f   : > { %3976 = vrot.lane.b32.xlu1 %v15510_v18, %s15321_s21  ;;  %v2441_v44 = vpop.permute.xlu0 %2440  ;;  %s15323_s21 = smov 29  }
 0x120   : > { %12725 = vmatmul.mubr.msk.bf16.vlgmr.msra.gmra.mxu1 %vm505_vm3, %v12723_v57 }
 0x121   : > { %v2437_v60 = vpop.permute.xlu1 %2436  ;;  %4192 = vrot.lane.b32.xlu0 %v15488_v14, %s15322_s22  ;;  %14102 = vmatpush3.bf16.msra.mxu1 %v2252_v33  ;;  %v2460_v33 = vand.u32 %v2445_v43, %v15603_v23 }
 0x122   : > { %12724 = vmatmul.mubr.msk.bf16.vlgmr.msra.gmra.mxu0 %vm505_vm3, %v12723_v57  ;;  %14103 = vmatprep.mubr.msk.bf16.mxu1 %vm15314_vm4, %v18962_v37  ;;  %v2448_v39 = vsel %vm2442_vm12, %v2437_v60, %v2439_v55 }
 0x123   : > { %2351 = vmatpush1.bf16.msra.mxu0 %v2246_v0  ;;  %4194 = vrot.lane.b32.xlu1 %v15474_v9, %s15322_s22  ;;  %v2653_v53 = vpop.permute.xlu0 %2652  ;;  %v2469_v51 = vand.u32 %v2448_v39, %v15603_v23 }
 0x124   : > { %2529 = vmatprep.subr.bf16.mxu1 %v2463_v52  ;;  %2368 = vmatprep.mubr.bf16.mxu0 %v18960_v8  ;;  %v2449_v52 = vsel %vm2442_vm12, %v2439_v55, %v2441_v44  ;;  %v12728_v55 = vld [vmem:[%s18982_s1 + $0x24] sm:$0xf] }
 0x125   : > { %v16127_v6 = vpop.permute.xlu1 %2654  ;;  %4190 = vrot.lane.b32.xlu0 %v15482_v12, %s15322_s22  ;;  %2488 = vmatprep.subr.bf16.mxu0 %v2457_v4  ;;  %v2472_v4 = vand.u32 %v2449_v52, %v15603_v23 }
 0x126   : > { %v2666_v43 = vsel %vm2662_vm13, %v2653_v53, %v16127_v6 }
 0x127   : > { %4188 = vrot.lane.b32.xlu1 %v15492_v15, %s15322_s22  ;;  %v2651_v30 = vpop.permute.xlu0 %2650  ;;  %v2683_v39 = vand.u32 %v2666_v43, %v15603_v23 }
 0x128   : > { %14104 = vmatmul.mubr.msk.bf16.vlgmr.msra.gmra.mxu1 %vm505_vm3, %v12723_v57 }
 0x129   : > { %2530 = vmatpush1.bf16.msra.mxu1 %v2460_v33  ;;  %v2649_v3 = vpop.permute.xlu1 %2648  ;;  %4186 = vrot.lane.b32.xlu0 %v15476_v11, %s15322_s22 }
 0x12a   : > { %12726 = vmatmul.mubr.msk.bf16.vlgmr.msra.gmra.mxu0 %vm505_vm3, %v12723_v57  ;;  %2547 = vmatprep.mubr.bf16.mxu1 %v18960_v8  ;;  %v2447_v57 = vsel %vm2442_vm12, %v16080_v27, %v2437_v60  ;;  %v2664_v44 = vsel %vm2662_vm13, %v2649_v3, %v2651_v30  ;;  %v2665_v60 = vsel %vm2662_vm13, %v2651_v30, %v2653_v53  ;;  %vm4422_vm12 = vcmask 236544  }
 0x12b   : > { %4198 = vrot.lane.b32.xlu1 %v15496_v16, %s15322_s22  ;;  %v2647_v0 = vpop.permute.xlu0 %2646  ;;  %2489 = vmatpush1.bf16.msra.mxu0 %v2454_v24  ;;  %v2466_v24 = vand.u32 %v2447_v57, %v15603_v23  ;;  %v2677_v27 = vand.u32 %v2664_v44, %v15603_v23 }
 0x12c   : > { %2506 = vmatprep.mubr.bf16.mxu0 %v18960_v8  ;;  %2570 = vmatprep.subr.bf16.mxu0 %v2469_v51  ;;  %v2663_v43 = vsel %vm2662_vm13, %v2647_v0, %v2649_v3 }
 0x12d   : > { %v2659_v10 = vpop.permute.xlu1 %2658  ;;  %4200 = vrot.lane.b32.xlu0 %v15504_v17, %s15322_s22  ;;  %14107 = vmatprep.subr.bf16.mxu1 %v18962_v37  ;;  %v2674_v30 = vand.u32 %v2663_v43, %v15603_v23 }
 0x12f   : > { %4196 = vrot.lane.b32.xlu1 %v15510_v18, %s15322_s22  ;;  %v2661_v33 = vpop.permute.xlu0 %2660  ;;  %s15324_s22 = smov 28  }
 0x130   : > { %12730 = vmatmul.mubr.msk.bf16.vlgmr.msra.gmra.mxu1 %vm505_vm3, %v12728_v55 }
 0x131   : > { %v2657_v51 = vpop.permute.xlu1 %2656  ;;  %4412 = vrot.lane.b32.xlu0 %v15488_v14, %s15323_s21  ;;  %14108 = vmatpush3.bf16.msra.mxu1 %v2472_v4  ;;  %v2680_v4 = vand.u32 %v2665_v60, %v15603_v23 }
 0x132   : > { %12729 = vmatmul.mubr.msk.bf16.vlgmr.msra.gmra.mxu0 %vm505_vm3, %v12728_v55  ;;  %14109 = vmatprep.mubr.msk.bf16.mxu1 %vm15314_vm4, %v18962_v37  ;;  %v2668_v57 = vsel %vm2662_vm13, %v2657_v51, %v2659_v10 }
 0x133   : > { %2571 = vmatpush1.bf16.msra.mxu0 %v2466_v24  ;;  %4414 = vrot.lane.b32.xlu1 %v15474_v9, %s15323_s21  ;;  %v2873_v52 = vpop.permute.xlu0 %2872  ;;  %v2689_v3 = vand.u32 %v2668_v57, %v15603_v23 }
 0x134   : > { %2749 = vmatprep.subr.bf16.mxu1 %v2683_v39  ;;  %2588 = vmatprep.mubr.bf16.mxu0 %v18960_v8  ;;  %v2669_v39 = vsel %vm2662_vm13, %v2659_v10, %v2661_v33  ;;  %v12733_v10 = vld [vmem:[%s18982_s1 + $0x28] sm:$0xf] }
 0x135   : > { %v16174_v53 = vpop.permute.xlu1 %2874  ;;  %4410 = vrot.lane.b32.xlu0 %v15482_v12, %s15323_s21  ;;  %2708 = vmatprep.subr.bf16.mxu0 %v2677_v27  ;;  %v2692_v27 = vand.u32 %v2669_v39, %v15603_v23 }
 0x136   : > { %v2886_v60 = vsel %vm2882_vm14, %v2873_v52, %v16174_v53 }
 0x137   : > { %4408 = vrot.lane.b32.xlu1 %v15492_v15, %s15323_s21  ;;  %v2871_v44 = vpop.permute.xlu0 %2870  ;;  %v2903_v57 = vand.u32 %v2886_v60, %v15603_v23 }
 0x138   : > { %14110 = vmatmul.mubr.msk.bf16.vlgmr.msra.gmra.mxu1 %vm505_vm3, %v12728_v55 }
 0x139   : > { %2750 = vmatpush1.bf16.msra.mxu1 %v2680_v4  ;;  %v2869_v0 = vpop.permute.xlu1 %2868  ;;  %4406 = vrot.lane.b32.xlu0 %v15476_v11, %s15323_s21 }
 0x13a   : > { %12731 = vmatmul.mubr.msk.bf16.vlgmr.msra.gmra.mxu0 %vm505_vm3, %v12728_v55  ;;  %2767 = vmatprep.mubr.bf16.mxu1 %v18960_v8  ;;  %v2667_v55 = vsel %vm2662_vm13, %v16127_v6, %v2657_v51  ;;  %v2884_v33 = vsel %vm2882_vm14, %v2869_v0, %v2871_v44  ;;  %v2885_v51 = vsel %vm2882_vm14, %v2871_v44, %v2873_v52  ;;  %vm4642_vm13 = vcmask 228352  }
 0x13b   : > { %4418 = vrot.lane.b32.xlu1 %v15496_v16, %s15323_s21  ;;  %v2867_v24 = vpop.permute.xlu0 %2866  ;;  %2709 = vmatpush1.bf16.msra.mxu0 %v2674_v30  ;;  %v2686_v30 = vand.u32 %v2667_v55, %v15603_v23  ;;  %v2897_v6 = vand.u32 %v2884_v33, %v15603_v23 }
 0x13c   : > { %2726 = vmatprep.mubr.bf16.mxu0 %v18960_v8  ;;  %2790 = vmatprep.subr.bf16.mxu0 %v2689_v3  ;;  %v2883_v60 = vsel %vm2882_vm14, %v2867_v24, %v2869_v0 }
 0x13d   : > { %v2879_v43 = vpop.permute.xlu1 %2878  ;;  %4420 = vrot.lane.b32.xlu0 %v15504_v17, %s15323_s21  ;;  %14113 = vmatprep.subr.bf16.mxu1 %v18962_v37  ;;  %v2894_v44 = vand.u32 %v2883_v60, %v15603_v23 }
 0x13f   : > { %4416 = vrot.lane.b32.xlu1 %v15510_v18, %s15323_s21  ;;  %v2881_v4 = vpop.permute.xlu0 %2880  ;;  %s15327_s21 = smov 112  }
 0x140   : > { %12735 = vmatmul.mubr.msk.bf16.vlgmr.msra.gmra.mxu1 %vm505_vm3, %v12733_v10  ;;  %v2889_v55 = vsel %vm2882_vm14, %v2879_v43, %v2881_v4  ;;  %v12789_v4 = vld.sshfl [vmem:[%s15468_s24 + $0x10] sm:$0x3 pattern:$0x76325410]  ;;  %s18996_s24 = smov 125  }
 0x141   : > { %v2877_v3 = vpop.permute.xlu1 %2876  ;;  %4632 = vrot.lane.b32.xlu0 %v15488_v14, %s15324_s22  ;;  %14114 = vmatpush3.bf16.msra.mxu1 %v2692_v27  ;;  %v2900_v14 = vand.u32 %v2885_v51, %v15603_v23 }
 0x142   : > { %12734 = vmatmul.mubr.msk.bf16.vlgmr.msra.gmra.mxu0 %vm505_vm3, %v12733_v10  ;;  %14115 = vmatprep.mubr.msk.bf16.mxu1 %vm15314_vm4, %v18962_v37  ;;  %v2888_v27 = vsel %vm2882_vm14, %v2877_v3, %v2879_v43 }
 0x143   : > { %2791 = vmatpush1.bf16.msra.mxu0 %v2686_v30  ;;  %4634 = vrot.lane.b32.xlu1 %v15474_v9, %s15324_s22  ;;  %v3093_v39 = vpop.permute.xlu0 %3092  ;;  %v2909_v0 = vand.u32 %v2888_v27, %v15603_v23 }
 0x144   : > { %2969 = vmatprep.subr.bf16.mxu1 %v2903_v57  ;;  %2808 = vmatprep.mubr.bf16.mxu0 %v18960_v8 }
 0x145   : > { %v16221_v52 = vpop.permute.xlu1 %3094  ;;  %4630 = vrot.lane.b32.xlu0 %v15482_v12, %s15324_s22  ;;  %2928 = vmatprep.subr.bf16.mxu0 %v2897_v6 }
 0x147   : > { %4628 = vrot.lane.b32.xlu1 %v15492_v15, %s15324_s22  ;;  %v3091_v9 = vpop.permute.xlu0 %3090  ;;  %v2912_v15 = vand.u32 %v2889_v55, %v15603_v23 }
 0x148   : > { %14116 = vmatmul.mubr.msk.bf16.vlgmr.msra.gmra.mxu1 %vm505_vm3, %v12733_v10 }
 0x149   : > { %2970 = vmatpush1.bf16.msra.mxu1 %v2900_v14  ;;  %v3089_v24 = vpop.permute.xlu1 %3088  ;;  %4626 = vrot.lane.b32.xlu0 %v15476_v11, %s15324_s22  ;;  %v3106_v11 = vsel %vm3102_vm15, %v3093_v39, %v16221_v52 }
 0x14a   : > { %12736 = vmatmul.mubr.msk.bf16.vlgmr.msra.gmra.mxu0 %vm505_vm3, %v12733_v10  ;;  %2987 = vmatprep.mubr.bf16.mxu1 %v18960_v8  ;;  %v12738_v10 = vld [vmem:[%s18982_s1 + $0x2c] sm:$0xf]  ;;  %v3104_v33 = vsel %vm3102_vm15, %v3089_v24, %v3091_v9  ;;  %v3123_v30 = vand.u32 %v3106_v11, %v15603_v23 }
 0x14b   : > { %4638 = vrot.lane.b32.xlu1 %v15496_v16, %s15324_s22  ;;  %v3087_v12 = vpop.permute.xlu0 %3086  ;;  %2929 = vmatpush1.bf16.msra.mxu0 %v2894_v44  ;;  %v2887_v16 = vsel %vm2882_vm14, %v16174_v53, %v2877_v3  ;;  %v3117_v60 = vand.u32 %v3104_v33, %v15603_v23  ;;  %v3105_v53 = vsel %vm3102_vm15, %v3091_v9, %v3093_v39  ;;  %vm9153_vm14 = vcmask 64512  }
 0x14c   : > { %2946 = vmatprep.mubr.bf16.mxu0 %v18960_v8  ;;  %3010 = vmatprep.subr.bf16.mxu0 %v2909_v0  ;;  %v2906_v6 = vand.u32 %v2887_v16, %v15603_v23  ;;  %v3103_v3 = vsel %vm3102_vm15, %v3087_v12, %v3089_v24  ;;  %v3120_v14 = vand.u32 %v3105_v53, %v15603_v23 }
 0x14d   : > { %v3099_v43 = vpop.permute.xlu1 %3098  ;;  %4640 = vrot.lane.b32.xlu0 %v15504_v17, %s15324_s22  ;;  %14119 = vmatprep.subr.bf16.mxu1 %v18962_v37  ;;  %v3114_v39 = vand.u32 %v3103_v3, %v15603_v23 }
 0x14f   : > { %4636 = vrot.lane.b32.xlu1 %v15510_v18, %s15324_s22  ;;  %v3101_v57 = vpop.permute.xlu0 %3100  ;;  %s18997_s22 = smov 124  }
 0x150   : > { %12740 = vmatmul.mubr.msk.bf16.vlgmr.msra.gmra.mxu1 %vm505_vm3, %v12738_v10  ;;  %v3109_v55 = vsel %vm3102_vm15, %v3099_v43, %v3101_v57 }
 0x151   : > { %v3097_v51 = vpop.permute.xlu1 %3096  ;;  %5032 = vrot.lane.b32.xlu0 %v12789_v4, %s18972_s30  ;;  %14120 = vmatpush3.bf16.msra.mxu1 %v2912_v15  ;;  %v3132_v11 = vand.u32 %v3109_v55, %v15603_v23  ;;  %s15331_s30 = smov 99  }
 0x152   : > { %12739 = vmatmul.mubr.msk.bf16.vlgmr.msra.gmra.mxu0 %vm505_vm3, %v12738_v10  ;;  %14121 = vmatprep.mubr.msk.bf16.mxu1 %vm15314_vm4, %v18962_v37  ;;  %v3108_v27 = vsel %vm3102_vm15, %v3097_v51, %v3099_v43  ;;  %v12743_v43 = vld [vmem:[%s18982_s1 + $0x30] sm:$0xf] }
 0x153   : > { %3011 = vmatpush1.bf16.msra.mxu0 %v2906_v6  ;;  %5213 = vrot.lane.b32.xlu1 %v12789_v4, %s18974_s15  ;;  %v3313_v18 = vpop.permute.xlu0 %3312  ;;  %v3129_v0 = vand.u32 %v3108_v27, %v15603_v23  ;;  %s15332_s15 = smov 98  }
 0x154   : > { %3189 = vmatprep.subr.bf16.mxu1 %v3123_v30  ;;  %3028 = vmatprep.mubr.bf16.mxu0 %v18960_v8 }
 0x155   : > { %v16267_v44 = vpop.permute.xlu1 %3314  ;;  %5394 = vrot.lane.b32.xlu0 %v12789_v4, %s18970_s16  ;;  %3148 = vmatprep.subr.bf16.mxu0 %v3117_v60  ;;  %s18994_s16 = smov 126  }
 0x156   : > { %v3326_v12 = vsel %vm3322_vm0, %v3313_v18, %v16267_v44 }
 0x157   : > { %5575 = vrot.lane.b32.xlu1 %v12789_v4, %s18968_s20  ;;  %v3311_v9 = vpop.permute.xlu0 %3310  ;;  %v3343_v4 = vand.u32 %v3326_v12, %v15603_v23  ;;  %s18995_s20 = smov 127  }
 0x158   : > { %14122 = vmatmul.mubr.msk.bf16.vlgmr.msra.gmra.mxu1 %vm505_vm3, %v12738_v10  ;;  %v3325_v3 = vsel %vm3322_vm0, %v3311_v9, %v3313_v18 }
 0x159   : > { %3190 = vmatpush1.bf16.msra.mxu1 %v3120_v14  ;;  %v3309_v24 = vpop.permute.xlu1 %3308  ;;  %3207 = vmatprep.mubr.bf16.mxu1 %v18960_v8  ;;  %v3340_v55 = vand.u32 %v3325_v3, %v15603_v23 }
 0x15a   : > { %12741 = vmatmul.mubr.msk.bf16.vlgmr.msra.gmra.mxu0 %vm505_vm3, %v12738_v10  ;;  %14125 = vmatprep.subr.bf16.mxu1 %v18962_v37  ;;  %v3324_v16 = vsel %vm3322_vm0, %v3309_v24, %v3311_v9  ;;  %v3107_v10 = vsel %vm3102_vm15, %v16221_v52, %v3097_v51  ;;  %vm9763_vm15 = vcmask 900096  }
 0x15b   : > { %v3307_v15 = vpop.permute.xlu0 %3306  ;;  %3149 = vmatpush1.bf16.msra.mxu0 %v3114_v39  ;;  %3166 = vmatprep.mubr.bf16.mxu0 %v18960_v8  ;;  %v3337_v6 = vand.u32 %v3324_v16, %v15603_v23  ;;  %v3126_v60 = vand.u32 %v3107_v10, %v15603_v23 }
 0x15c   : > { %3230 = vmatprep.subr.bf16.mxu0 %v3129_v0  ;;  %v3323_v51 = vsel %vm3322_vm0, %v3307_v15, %v3309_v24 }
 0x15d   : > { %v3319_v33 = vpop.permute.xlu1 %3318  ;;  %v3334_v16 = vand.u32 %v3323_v51, %v15603_v23 }
 0x15f   : > { %v3321_v57 = vpop.permute.xlu0 %3320 }
 0x160   : > { %v609_v30 = vpop.f32.mrf.mxu1  ;;  %12745 = vmatmul.mubr.msk.bf16.vlgmr.msra.gmra.mxu1 %vm505_vm3, %v12743_v43 }
 0x161   : > { %v3317_v53 = vpop.permute.xlu1 %3316  ;;  %14126 = vmatpush3.bf16.msra.mxu1 %v3132_v11  ;;  %14127 = vmatprep.mubr.msk.bf16.mxu1 %vm15314_vm4, %v18962_v37 }
 0x162   : > { %v611_v14 = vpop.f32.mrf.mxu1  ;;  %v568_v27 = vpop.f32.mrf.mxu0  ;;  %12744 = vmatmul.mubr.msk.bf16.vlgmr.msra.gmra.mxu0 %vm505_vm3, %v12743_v43  ;;  %3409 = vmatprep.subr.bf16.mxu1 %v3343_v4  ;;  %v3328_v12 = vsel %vm3322_vm0, %v3317_v53, %v3319_v33 }
 0x163   : > { %3231 = vmatpush1.bf16.msra.mxu0 %v3126_v60  ;;  %v3533_v52 = vpop.permute.xlu0 %3532  ;;  %3248 = vmatprep.mubr.bf16.mxu0 %v18960_v8  ;;  %v3349_v15 = vand.u32 %v3328_v12, %v15603_v23  ;;  %v3329_v60 = vsel %vm3322_vm0, %v3319_v33, %v3321_v57 }
 0x164   : > { %v613_v39 = vpop.f32.mrf.mxu1  ;;  %v16298_v0 = vpop.f32.mrf.mxu0  ;;  %3368 = vmatprep.subr.bf16.mxu0 %v3337_v6  ;;  %v3352_v33 = vand.u32 %v3329_v60, %v15603_v23 }
 0x165   : > { %v16302_v18 = vpop.permute.xlu1 %3534 }
 0x166   : > { %v614_v9 = vpop.f32.mrf.mxu1  ;;  %v572_v11 = vpop.f32.mrf.mxu0  ;;  %v3546_v51 = vsel %vm3542_vm1, %v3533_v52, %v16302_v18 }
 0x167   : > { %v3531_v10 = vpop.permute.xlu0 %3530  ;;  %v3563_v20 = vand.u32 %v3546_v51, %v15603_v23 }
 0x168   : > { %v16305_v4 = vpop.f32.mrf.mxu1  ;;  %14128 = vmatmul.mubr.msk.bf16.vlgmr.msra.gmra.mxu1 %vm505_vm3, %v12743_v43  ;;  %v573_v24 = vpop.f32.mrf.mxu0 }
 0x169   : > { %3410 = vmatpush1.bf16.msra.mxu1 %v3340_v55  ;;  %v3529_v6 = vpop.permute.xlu1 %3528  ;;  %3427 = vmatprep.mubr.bf16.mxu1 %v18960_v8  ;;  %v3327_v24 = vsel %vm3322_vm0, %v16267_v44, %v3317_v53  ;;  %v3545_v44 = vsel %vm3542_vm1, %v3531_v10, %v3533_v52  ;;  %vm9833_vm0 = vcmask 818176  }
 0x16a   : > { %v14057_v3 = vpop.f32.mrf.mxu1  ;;  %v16311_v39 = vpop.f32.mrf.mxu0  ;;  %12746 = vmatmul.mubr.msk.bf16.vlgmr.msra.gmra.mxu0 %vm505_vm3, %v12743_v43  ;;  %14131 = vmatprep.subr.bf16.mxu1 %v18962_v37  ;;  %v3544_v57 = vsel %vm3542_vm1, %v3529_v6, %v3531_v10  ;;  %v12748_v43 = vld [vmem:[%s18982_s1 + $0x34] sm:$0xf]  ;;  %v3346_v37 = vand.u32 %v3327_v24, %v15603_v23  ;;  %v18988_v24 = vmov 0   ;;  %v3560_v52 = vand.u32 %v3545_v44, %v15603_v23 }
 0x16b   : > { %v3527_v9 = vpop.permute.xlu0 %3526  ;;  %3369 = vmatpush1.bf16.msra.mxu0 %v3334_v16  ;;  %3386 = vmatprep.mubr.bf16.mxu0 %v18960_v8  ;;  %v3557_v60 = vand.u32 %v3544_v57, %v15603_v23 }
 0x16c   : > { %v694_v55 = vpop.f32.mrf.mxu1  ;;  %v16318_v12 = vpop.f32.mrf.mxu0  ;;  %3450 = vmatprep.subr.bf16.mxu0 %v3349_v15 }
 0x16d   : > { %v3539_v11 = vpop.permute.xlu1 %3538 }
 0x16e   : > { %v14058_v3 = vpop.f32.mrf.mxu1  ;;  %v654_v16 = vpop.f32.mrf.mxu0 }
 0x16f   : > { %v3541_v55 = vpop.permute.xlu0 %3540 }
 0x170   : > { %v796_v8 = vpop.f32.mrf.mxu1  ;;  %12750 = vmatmul.mubr.msk.bf16.vlgmr.msra.gmra.mxu1 %vm505_vm3, %v12748_v43  ;;  %v655_v15 = vpop.f32.mrf.mxu0 }
 0x171   : > { %v16331_v46 = vadd.f32 %v796_v8, %v609_v30  ;;  %v3537_v58 = vpop.permute.xlu1 %3536  ;;  %14132 = vmatpush3.bf16.msra.mxu1 %v3352_v33  ;;  %14133 = vmatprep.mubr.msk.bf16.mxu1 %vm15314_vm4, %v18987_v13  ;;  %v3543_v8 = vsel %vm3542_vm1, %v3527_v9, %v3529_v6 }
 0x172   : > { %v798_v53 = vpop.f32.mrf.mxu1  ;;  %v755_v51 = vpop.f32.mrf.mxu0  ;;  %12749 = vmatmul.mubr.msk.bf16.vlgmr.msra.gmra.mxu0 %vm505_vm3, %v12748_v43  ;;  %3629 = vmatprep.subr.bf16.mxu1 %v3563_v20  ;;  %v3548_v10 = vsel %vm3542_vm1, %v3537_v58, %v3539_v11 }
 0x173   : > { %v16337_v3 = vadd.f32 %v798_v53, %v611_v14  ;;  %v16339_v16 = vadd.f32 %v755_v51, %v568_v27  ;;  %3451 = vmatpush1.bf16.msra.mxu0 %v3346_v37  ;;  %v3753_v57 = vpop.permute.xlu0 %3752  ;;  %3468 = vmatprep.mubr.bf16.mxu0 %v18988_v24  ;;  %v3554_v37 = vand.u32 %v3543_v8, %v15603_v23 }
 0x174   : > { %v800_v30 = vpop.f32.mrf.mxu1  ;;  %v757_v33 = vpop.f32.mrf.mxu0  ;;  %3588 = vmatprep.subr.bf16.mxu0 %v3557_v60  ;;  %v3569_v6 = vand.u32 %v3548_v10, %v15603_v23  ;;  %v3549_v51 = vsel %vm3542_vm1, %v3539_v11, %v3541_v55 }
 0x175   : > { %v16346_v15 = vadd.f32 %v757_v33, %v16298_v0  ;;  %v16348_v20 = vpop.permute.xlu1 %3754  ;;  %v3572_v11 = vand.u32 %v3549_v51, %v15603_v23 }
 0x176   : > { %v801_v14 = vpop.f32.mrf.mxu1  ;;  %v759_v27 = vpop.f32.mrf.mxu0  ;;  %v3766_v8 = vsel %vm3762_vm9, %v3753_v57, %v16348_v20 }
 0x177   : > { %v3751_v53 = vpop.permute.xlu0 %3750 }
 0x178   : > { %v878_v9 = vpop.f32.mrf.mxu1  ;;  %14134 = vmatmul.mubr.msk.bf16.vlgmr.msra.gmra.mxu1 %vm505_vm3, %v12748_v43  ;;  %v760_v60 = vpop.f32.mrf.mxu0 }
 0x179   : > { %v16354_v44 = vadd.f32 %v878_v9, %v16305_v4  ;;  %3630 = vmatpush1.bf16.msra.mxu1 %v3560_v52  ;;  %v3749_v0 = vpop.permute.xlu1 %3748  ;;  %3647 = vmatprep.mubr.bf16.mxu1 %v18988_v24  ;;  %v3783_v9 = vand.u32 %v3766_v8, %v15603_v23 }
 0x17a   : > { %v14063_v30 = vpop.f32.mrf.mxu1  ;;  %v837_v33 = vpop.f32.mrf.mxu0  ;;  %12751 = vmatmul.mubr.msk.bf16.vlgmr.msra.gmra.mxu0 %vm505_vm3, %v12748_v43  ;;  %14137 = vmatprep.subr.bf16.mxu1 %v18987_v13  ;;  %v3764_v55 = vsel %vm3762_vm9, %v3749_v0, %v3751_v53 }
 0x17b   : > { %v16363_v10 = vadd.f32 %v837_v33, %v16311_v39  ;;  %v3747_v4 = vpop.permute.xlu0 %3746  ;;  %3589 = vmatpush1.bf16.msra.mxu0 %v3554_v37  ;;  %3606 = vmatprep.mubr.bf16.mxu0 %v18988_v24  ;;  %v12753_v39 = vld [vmem:[%s18982_s1 + $0x38] sm:$0xf]  ;;  %v3547_v37 = vsel %vm3542_vm1, %v16302_v18, %v3537_v58  ;;  %v3777_v51 = vand.u32 %v3764_v55, %v15603_v23  ;;  %vm9903_vm1 = vcmask 809984  }
 0x17c   : > { %v881_v52 = vpop.f32.mrf.mxu1  ;;  %v839_v14 = vpop.f32.mrf.mxu0  ;;  %3670 = vmatprep.subr.bf16.mxu0 %v3569_v6  ;;  %v3765_v58 = vsel %vm3762_vm9, %v3751_v53, %v3753_v57 }
 0x17d   : > { %v16369_v43 = vadd.f32 %v839_v14, %v16318_v12  ;;  %v3759_v27 = vpop.permute.xlu1 %3758  ;;  %v3566_v52 = vand.u32 %v3547_v37, %v15603_v23  ;;  %v3780_v57 = vand.u32 %v3765_v58, %v15603_v23 }
 0x17e   : > { %v14064_v60 = vpop.f32.mrf.mxu1  ;;  %v841_v30 = vpop.f32.mrf.mxu0 }
 0x17f   : > { %v3761_v6 = vpop.permute.xlu0 %3760 }
 0x180   : > { %v1009_v33 = vpop.f32.mrf.mxu1  ;;  %12755 = vmatmul.mubr.msk.bf16.vlgmr.msra.gmra.mxu1 %vm505_vm3, %v12753_v39  ;;  %v842_v12 = vpop.f32.mrf.mxu0 }
 0x181   : > { %v16381_v14 = vadd.f32 %v1009_v33, %v16331_v46  ;;  %v3757_v7 = vpop.permute.xlu1 %3756  ;;  %14138 = vmatpush3.bf16.msra.mxu1 %v3572_v11  ;;  %14139 = vmatprep.mubr.msk.bf16.mxu1 %vm15314_vm4, %v18987_v13  ;;  %v3763_v11 = vsel %vm3762_vm9, %v3747_v4, %v3749_v0 }
 0x182   : > { %v1011_v18 = vpop.f32.mrf.mxu1  ;;  %v968_v8 = vpop.f32.mrf.mxu0  ;;  %12754 = vmatmul.mubr.msk.bf16.vlgmr.msra.gmra.mxu0 %vm505_vm3, %v12753_v39  ;;  %3849 = vmatprep.subr.bf16.mxu1 %v3783_v9  ;;  %v3768_v53 = vsel %vm3762_vm9, %v3757_v7, %v3759_v27  ;;  %v3774_v12 = vand.u32 %v3763_v11, %v15603_v23 }
 0x183   : > { %v16388_v55 = vadd.f32 %v1011_v18, %v16337_v3  ;;  %v16391_v37 = vadd.f32 %v968_v8, %v16339_v16  ;;  %3671 = vmatpush1.bf16.msra.mxu0 %v3566_v52  ;;  %v3973_v46 = vpop.permute.xlu0 %3972  ;;  %3688 = vmatprep.mubr.bf16.mxu0 %v18988_v24  ;;  %v3789_v0 = vand.u32 %v3768_v53, %v15603_v23 }
 0x184   : > { %v1013_v60 = vpop.f32.mrf.mxu1  ;;  %v970_v30 = vpop.f32.mrf.mxu0  ;;  %3808 = vmatprep.subr.bf16.mxu0 %v3777_v51  ;;  %v3769_v18 = vsel %vm3762_vm9, %v3759_v27, %v3761_v6 }
 0x185   : > { %v16398_v9 = vadd.f32 %v970_v30, %v16346_v15  ;;  %v16400_v3 = vpop.permute.xlu1 %3974  ;;  %v3792_v27 = vand.u32 %v3769_v18, %v15603_v23 }
 0x186   : > { %v1014_v16 = vpop.f32.mrf.mxu1  ;;  %v972_v33 = vpop.f32.mrf.mxu0  ;;  %v3986_v11 = vsel %vm3982_vm10, %v3973_v46, %v16400_v3 }
 0x187   : > { %v3971_v52 = vpop.permute.xlu0 %3970  ;;  %v3767_v33 = vsel %vm3762_vm9, %v16348_v20, %v3757_v7  ;;  %vm9973_vm9 = vcmask 801792  }
 0x188   : > { %v1091_v4 = vpop.f32.mrf.mxu1  ;;  %14140 = vmatmul.mubr.msk.bf16.vlgmr.msra.gmra.mxu1 %vm505_vm3, %v12753_v39  ;;  %v973_v51 = vpop.f32.mrf.mxu0  ;;  %v3985_v7 = vsel %vm3982_vm10, %v3971_v52, %v3973_v46 }
 0x189   : > { %v16406_v58 = vadd.f32 %v1091_v4, %v16354_v44  ;;  %3850 = vmatpush1.bf16.msra.mxu1 %v3780_v57  ;;  %v3969_v15 = vpop.permute.xlu1 %3968  ;;  %3867 = vmatprep.mubr.bf16.mxu1 %v18988_v24  ;;  %v4000_v46 = vand.u32 %v3985_v7, %v15603_v23 }
 0x18a   : > { %v14069_v8 = vpop.f32.mrf.mxu1  ;;  %v1050_v60 = vpop.f32.mrf.mxu0  ;;  %12756 = vmatmul.mubr.msk.bf16.vlgmr.msra.gmra.mxu0 %vm505_vm3, %v12753_v39  ;;  %14143 = vmatprep.subr.bf16.mxu1 %v18987_v13  ;;  %v3984_v6 = vsel %vm3982_vm10, %v3969_v15, %v3971_v52 }
 0x18b   : > { %v16415_v30 = vadd.f32 %v1050_v60, %v16363_v10  ;;  %v3967_v44 = vpop.permute.xlu0 %3966  ;;  %3809 = vmatpush1.bf16.msra.mxu0 %v3774_v12  ;;  %3826 = vmatprep.mubr.bf16.mxu0 %v18988_v24  ;;  %v12758_v10 = vld [vmem:[%s18982_s1 + $0x3c] sm:$0xf]  ;;  %v4003_v12 = vand.u32 %v3986_v11, %v15603_v23  ;;  %v3997_v18 = vand.u32 %v3984_v6, %v15603_v23 }
 0x18c   : > { %v1094_v57 = vpop.f32.mrf.mxu1  ;;  %v1052_v53 = vpop.f32.mrf.mxu0  ;;  %3890 = vmatprep.subr.bf16.mxu0 %v3789_v0  ;;  %v3786_v60 = vand.u32 %v3767_v33, %v15603_v23 }
 0x18d   : > { %v16421_v39 = vadd.f32 %v1052_v53, %v16369_v43  ;;  %v3979_v16 = vpop.permute.xlu1 %3978 }
 0x18e   : > { %v14070_v4 = vpop.f32.mrf.mxu1  ;;  %v1054_v51 = vpop.f32.mrf.mxu0 }
 0x18f   : > { %v3981_v0 = vpop.permute.xlu0 %3980 }
 0x190   : > { %v1229_v8 = vpop.f32.mrf.mxu1  ;;  %12760 = vmatmul.mubr.msk.bf16.vlgmr.msra.gmra.mxu1 %vm505_vm3, %v12758_v10  ;;  %v1055_v43 = vpop.f32.mrf.mxu0 }
 0x191   : > { %v16433_v57 = vadd.f32 %v1229_v8, %v16381_v14  ;;  %v3977_v53 = vpop.permute.xlu1 %3976  ;;  %14144 = vmatpush3.bf16.msra.mxu1 %v3792_v27  ;;  %14145 = vmatprep.mubr.msk.bf16.mxu1 %vm15314_vm4, %v18987_v13  ;;  %v3983_v27 = vsel %vm3982_vm10, %v3967_v44, %v3969_v15 }
 0x192   : > { %v1231_v20 = vpop.f32.mrf.mxu1  ;;  %v1188_v11 = vpop.f32.mrf.mxu0  ;;  %12759 = vmatmul.mubr.msk.bf16.vlgmr.msra.gmra.mxu0 %vm505_vm3, %v12758_v10  ;;  %4069 = vmatprep.subr.bf16.mxu1 %v4003_v12  ;;  %v3988_v52 = vsel %vm3982_vm10, %v3977_v53, %v3979_v16  ;;  %v3994_v43 = vand.u32 %v3983_v27, %v15603_v23 }
 0x193   : > { %v16440_v6 = vadd.f32 %v1231_v20, %v16388_v55  ;;  %v16443_v33 = vadd.f32 %v1188_v11, %v16391_v37  ;;  %3891 = vmatpush1.bf16.msra.mxu0 %v3786_v60  ;;  %v4193_v14 = vpop.permute.xlu0 %4192  ;;  %3908 = vmatprep.mubr.bf16.mxu0 %v18988_v24  ;;  %v4009_v15 = vand.u32 %v3988_v52, %v15603_v23 }
 0x194   : > { %v1233_v4 = vpop.f32.mrf.mxu1  ;;  %v1190_v51 = vpop.f32.mrf.mxu0  ;;  %4028 = vmatprep.subr.bf16.mxu0 %v3997_v18  ;;  %v3989_v20 = vsel %vm3982_vm10, %v3979_v16, %v3981_v0 }
 0x195   : > { %v16450_v12 = vadd.f32 %v1190_v51, %v16398_v9  ;;  %v16452_v55 = vpop.permute.xlu1 %4194  ;;  %v4012_v16 = vand.u32 %v3989_v20, %v15603_v23 }
 0x196   : > { %v1234_v37 = vpop.f32.mrf.mxu1  ;;  %v1192_v8 = vpop.f32.mrf.mxu0  ;;  %v4206_v27 = vsel %vm4202_vm11, %v4193_v14, %v16452_v55 }
 0x197   : > { %v4191_v60 = vpop.permute.xlu0 %4190  ;;  %v3987_v8 = vsel %vm3982_vm10, %v16400_v3, %v3977_v53  ;;  %vm10043_vm10 = vcmask 793600  }
 0x198   : > { %v1311_v44 = vpop.f32.mrf.mxu1  ;;  %14146 = vmatmul.mubr.msk.bf16.vlgmr.msra.gmra.mxu1 %vm505_vm3, %v12758_v10  ;;  %v1193_v18 = vpop.f32.mrf.mxu0  ;;  %v4205_v3 = vsel %vm4202_vm11, %v4191_v60, %v4193_v14 }
 0x199   : > { %v16458_v7 = vadd.f32 %v1311_v44, %v16406_v58  ;;  %4070 = vmatpush1.bf16.msra.mxu1 %v4000_v46  ;;  %v4189_v9 = vpop.permute.xlu1 %4188  ;;  %4087 = vmatprep.mubr.bf16.mxu1 %v18988_v24  ;;  %v4220_v14 = vand.u32 %v4205_v3, %v15603_v23 }
 0x19a   : > { %v14075_v11 = vpop.f32.mrf.mxu1  ;;  %v1270_v4 = vpop.f32.mrf.mxu0  ;;  %12761 = vmatmul.mubr.msk.bf16.vlgmr.msra.gmra.mxu0 %vm505_vm3, %v12758_v10  ;;  %14149 = vmatprep.subr.bf16.mxu1 %v18987_v13  ;;  %v4204_v0 = vsel %vm4202_vm11, %v4189_v9, %v4191_v60 }
 0x19b   : > { %v16467_v51 = vadd.f32 %v1270_v4, %v16415_v30  ;;  %v4187_v58 = vpop.permute.xlu0 %4186  ;;  %4029 = vmatpush1.bf16.msra.mxu0 %v3994_v43  ;;  %4046 = vmatprep.mubr.bf16.mxu0 %v18988_v24  ;;  %v12763_v30 = vld [vmem:[%s18982_s1 + $0x40] sm:$0xf]  ;;  %v4223_v43 = vand.u32 %v4206_v27, %v15603_v23  ;;  %v4217_v20 = vand.u32 %v4204_v0, %v15603_v23 }
 0x19c   : > { %v1314_v46 = vpop.f32.mrf.mxu1  ;;  %v1272_v52 = vpop.f32.mrf.mxu0  ;;  %4110 = vmatprep.subr.bf16.mxu0 %v4009_v15  ;;  %v4006_v4 = vand.u32 %v3987_v8, %v15603_v23 }
 0x19d   : > { %v16473_v10 = vadd.f32 %v1272_v52, %v16421_v39  ;;  %v4199_v37 = vpop.permute.xlu1 %4198 }
 0x19e   : > { %v14076_v44 = vpop.f32.mrf.mxu1  ;;  %v1274_v18 = vpop.f32.mrf.mxu0 }
 0x19f   : > { %v4201_v15 = vpop.permute.xlu0 %4200 }
 0x1a0   : > { %v1449_v11 = vpop.f32.mrf.mxu1  ;;  %12765 = vmatmul.mubr.msk.bf16.vlgmr.msra.gmra.mxu1 %vm505_vm3, %v12763_v30  ;;  %v1275_v39 = vpop.f32.mrf.mxu0 }
 0x1a1   : > { %v16485_v46 = vadd.f32 %v1449_v11, %v16433_v57  ;;  %v4197_v52 = vpop.permute.xlu1 %4196  ;;  %14150 = vmatpush3.bf16.msra.mxu1 %v4012_v16  ;;  %14151 = vmatprep.mubr.msk.bf16.mxu1 %vm15314_vm4, %v18987_v13  ;;  %v4203_v16 = vsel %vm4202_vm11, %v4187_v58, %v4189_v9 }
 0x1a2   : > { %v1451_v53 = vpop.f32.mrf.mxu1  ;;  %v1408_v27 = vpop.f32.mrf.mxu0  ;;  %12764 = vmatmul.mubr.msk.bf16.vlgmr.msra.gmra.mxu0 %vm505_vm3, %v12763_v30  ;;  %4289 = vmatprep.subr.bf16.mxu1 %v4223_v43  ;;  %v4208_v60 = vsel %vm4202_vm11, %v4197_v52, %v4199_v37  ;;  %v4214_v39 = vand.u32 %v4203_v16, %v15603_v23 }
 0x1a3   : > { %v16492_v0 = vadd.f32 %v1451_v53, %v16440_v6  ;;  %v16495_v8 = vadd.f32 %v1408_v27, %v16443_v33  ;;  %4111 = vmatpush1.bf16.msra.mxu0 %v4006_v4  ;;  %v4413_v57 = vpop.permute.xlu0 %4412  ;;  %4128 = vmatprep.mubr.bf16.mxu0 %v18988_v24  ;;  %v4229_v9 = vand.u32 %v4208_v60, %v15603_v23 }
 0x1a4   : > { %v1453_v44 = vpop.f32.mrf.mxu1  ;;  %v1410_v18 = vpop.f32.mrf.mxu0  ;;  %4248 = vmatprep.subr.bf16.mxu0 %v4217_v20 }
 0x1a5   : > { %v16502_v43 = vadd.f32 %v1410_v18, %v16450_v12  ;;  %v16504_v6 = vpop.permute.xlu1 %4414  ;;  %v4209_v12 = vsel %vm4202_vm11, %v4199_v37, %v4201_v15 }
 0x1a6   : > { %v1454_v33 = vpop.f32.mrf.mxu1  ;;  %v1412_v11 = vpop.f32.mrf.mxu0  ;;  %v4426_v16 = vsel %vm4422_vm12, %v4413_v57, %v16504_v6  ;;  %v4232_v37 = vand.u32 %v4209_v12, %v15603_v23 }
 0x1a7   : > { %v4411_v4 = vpop.permute.xlu0 %4410  ;;  %v4207_v11 = vsel %vm4202_vm11, %v16452_v55, %v4197_v52  ;;  %vm10182_vm11 = vcmask 703488  }
 0x1a8   : > { %v1531_v58 = vpop.f32.mrf.mxu1  ;;  %14152 = vmatmul.mubr.msk.bf16.vlgmr.msra.gmra.mxu1 %vm505_vm3, %v12763_v30  ;;  %v1413_v20 = vpop.f32.mrf.mxu0  ;;  %v4425_v55 = vsel %vm4422_vm12, %v4411_v4, %v4413_v57 }
 0x1a9   : > { %v1543_v3 = vadd.f32 %v1531_v58, %v16458_v7  ;;  %4290 = vmatpush1.bf16.msra.mxu1 %v4220_v14  ;;  %v4409_v53 = vpop.permute.xlu1 %4408  ;;  %4307 = vmatprep.mubr.bf16.mxu1 %v18988_v24 }
 0x1aa   : > { %v14081_v27 = vpop.f32.mrf.mxu1  ;;  %v1490_v44 = vpop.f32.mrf.mxu0  ;;  %12766 = vmatmul.mubr.msk.bf16.vlgmr.msra.gmra.mxu0 %vm505_vm3, %v12763_v30  ;;  %14155 = vmatprep.subr.bf16.mxu1 %v18987_v13  ;;  %v4424_v15 = vsel %vm4422_vm12, %v4409_v53, %v4411_v4 }
 0x1ab   : > { %v16517_v18 = vadd.f32 %v1490_v44, %v16467_v51  ;;  %v4407_v60 = vpop.permute.xlu0 %4406  ;;  %4249 = vmatpush1.bf16.msra.mxu0 %v4214_v39  ;;  %4266 = vmatprep.mubr.bf16.mxu0 %v18988_v24  ;;  %v12768_v51 = vld [vmem:[%s18982_s1 + $0x44] sm:$0xf]  ;;  %v4443_v39 = vand.u32 %v4426_v16, %v15603_v23  ;;  %v4437_v12 = vand.u32 %v4424_v15, %v15603_v23 }
 0x1ac   : > { %v1534_v7 = vpop.f32.mrf.mxu1  ;;  %v1492_v14 = vpop.f32.mrf.mxu0  ;;  %4330 = vmatprep.subr.bf16.mxu0 %v4229_v9  ;;  %v4226_v44 = vand.u32 %v4207_v11, %v15603_v23  ;;  %v4423_v11 = vsel %vm4422_vm12, %v4407_v60, %v4409_v53 }
 0x1ad   : > { %v16523_v30 = vadd.f32 %v1492_v14, %v16473_v10  ;;  %v4419_v33 = vpop.permute.xlu1 %4418 }
 0x1ae   : > { %v14082_v58 = vpop.f32.mrf.mxu1  ;;  %v1494_v20 = vpop.f32.mrf.mxu0 }
 0x1af   : > { %v4421_v9 = vpop.permute.xlu0 %4420 }
 0x1b0   : > { %v1669_v27 = vpop.f32.mrf.mxu1  ;;  %12770 = vmatmul.mubr.msk.bf16.vlgmr.msra.gmra.mxu1 %vm505_vm3, %v12768_v51  ;;  %v1495_v10 = vpop.f32.mrf.mxu0 }
 0x1b1   : > { %v1759_v7 = vadd.f32 %v1669_v27, %v16485_v46  ;;  %v4417_v14 = vpop.permute.xlu1 %4416  ;;  %14156 = vmatpush3.bf16.msra.mxu1 %v4232_v37  ;;  %14157 = vmatprep.mubr.msk.bf16.mxu1 %vm15314_vm4, %v18987_v13  ;;  %v4440_v37 = vand.u32 %v4425_v55, %v15603_v23 }
 0x1b2   : > { %v1671_v52 = vpop.f32.mrf.mxu1  ;;  %v1628_v16 = vpop.f32.mrf.mxu0  ;;  %12769 = vmatmul.mubr.msk.bf16.vlgmr.msra.gmra.mxu0 %vm505_vm3, %v12768_v51  ;;  %4509 = vmatprep.subr.bf16.mxu1 %v4443_v39  ;;  %v4428_v57 = vsel %vm4422_vm12, %v4417_v14, %v4419_v33 }
 0x1b3   : > { %v1760_v15 = vadd.f32 %v1671_v52, %v16492_v0  ;;  %v1757_v58 = vadd.f32 %v1628_v16, %v16495_v8  ;;  %4331 = vmatpush1.bf16.msra.mxu0 %v4226_v44  ;;  %4348 = vmatprep.mubr.bf16.mxu0 %v18988_v24  ;;  %v4633_v4 = vpop.permute.xlu0 %4632  ;;  %v4434_v8 = vand.u32 %v4423_v11, %v15603_v23 }
 0x1b4   : > { %v1673_v46 = vpop.f32.mrf.mxu1  ;;  %v1630_v20 = vpop.f32.mrf.mxu0  ;;  %4468 = vmatprep.subr.bf16.mxu0 %v4437_v12  ;;  %v4449_v53 = vand.u32 %v4428_v57, %v15603_v23 }
 0x1b5   : > { %v1758_v27 = vadd.f32 %v1630_v20, %v16502_v43  ;;  %v16546_v39 = vpop.permute.xlu1 %4634  ;;  %v4429_v43 = vsel %vm4422_vm12, %v4419_v33, %v4421_v9 }
 0x1b6   : > { %v1674_v0 = vpop.f32.mrf.mxu1  ;;  %v1632_v10 = vpop.f32.mrf.mxu0  ;;  %v4646_v11 = vsel %vm4642_vm13, %v4633_v4, %v16546_v39  ;;  %v4452_v33 = vand.u32 %v4429_v43, %v15603_v23 }
 0x1b7   : > { %v4631_v46 = vpop.permute.xlu0 %4630  ;;  %v12773_v0 = vld [vmem:[%s18982_s1 + $0x48] sm:$0xf]  ;;  %v4663_v10 = vand.u32 %v4646_v11, %v15603_v23 }
 0x1b8   : > { %v1751_v60 = vpop.f32.mrf.mxu1  ;;  %14158 = vmatmul.mubr.msk.bf16.vlgmr.msra.gmra.mxu1 %vm505_vm3, %v12768_v51  ;;  %v1633_v12 = vpop.f32.mrf.mxu0 }
 0x1b9   : > { %v1763_v44 = vadd.f32 %v1751_v60, %v1543_v3  ;;  %4510 = vmatpush1.bf16.msra.mxu1 %v4440_v37  ;;  %v4629_v55 = vpop.permute.xlu1 %4628  ;;  %4527 = vmatprep.mubr.bf16.mxu1 %v18988_v24 }
 0x1ba   : > { %v14087_v52 = vpop.f32.mrf.mxu1  ;;  %v1710_v16 = vpop.f32.mrf.mxu0  ;;  %12771 = vmatmul.mubr.msk.bf16.vlgmr.msra.gmra.mxu0 %vm505_vm3, %v12768_v51  ;;  %14161 = vmatprep.subr.bf16.mxu1 %v18987_v13  ;;  %v4644_v9 = vsel %vm4642_vm13, %v4629_v55, %v4631_v46 }
 0x1bb   : > { %v1761_v20 = vadd.f32 %v1710_v16, %v16517_v18  ;;  %4469 = vmatpush1.bf16.msra.mxu0 %v4434_v8  ;;  %4486 = vmatprep.mubr.bf16.mxu0 %v18988_v24  ;;  %v4427_v18 = vsel %vm4422_vm12, %v16504_v6, %v4417_v14  ;;  %v4645_v16 = vsel %vm4642_vm13, %v4631_v46, %v4633_v4  ;;  %v4627_v11 = vpop.permute.xlu0 %4626  ;;  %vm10322_vm12 = vcmask 687104  }
 0x1bc   : > { %v1754_v3 = vpop.f32.mrf.mxu1  ;;  %v1712_v37 = vpop.f32.mrf.mxu0  ;;  %4550 = vmatprep.subr.bf16.mxu0 %v4449_v53  ;;  %v4657_v53 = vand.u32 %v4644_v9, %v15603_v23 }
 0x1bd   : > { %v1762_v51 = vadd.f32 %v1712_v37, %v16523_v30  ;;  %v4639_v57 = vpop.permute.xlu1 %4638  ;;  %v4446_v30 = vand.u32 %v4427_v18, %v15603_v23 }
 0x1be   : > { %v14088_v8 = vpop.f32.mrf.mxu1  ;;  %v1714_v60 = vpop.f32.mrf.mxu0 }
 0x1bf   : > { %v4643_v8 = vsel %vm4642_vm13, %v4627_v11, %v4629_v55 }
 0x1c0   : > { %v1889_v12 = vpop.f32.mrf.mxu1  ;;  %12775 = vmatmul.mubr.msk.bf16.vlgmr.msra.gmra.mxu1 %vm505_vm3, %v12773_v0  ;;  %v1715_v43 = vpop.f32.mrf.mxu0 }
 0x1c1   : > { %v1979_v52 = vadd.f32 %v1889_v12, %v1759_v7  ;;  %14162 = vmatpush3.bf16.msra.mxu1 %v4452_v33  ;;  %14163 = vmatprep.mubr.msk.bf16.mxu1 %vm15314_vm4, %v18987_v13  ;;  %v4637_v3 = vpop.permute.xlu1 %4636  ;;  %v4660_v33 = vand.u32 %v4645_v16, %v15603_v23  ;;  %v4641_v43 = vpop.permute.xlu0 %4640 }
 0x1c2   : > { %v1891_v6 = vpop.f32.mrf.mxu1  ;;  %v1848_v14 = vpop.f32.mrf.mxu0  ;;  %12774 = vmatmul.mubr.msk.bf16.vlgmr.msra.gmra.mxu0 %vm505_vm3, %v12773_v0  ;;  %4729 = vmatprep.subr.bf16.mxu1 %v4663_v10  ;;  %v4648_v4 = vsel %vm4642_vm13, %v4637_v3, %v4639_v57  ;;  %v4654_v10 = vand.u32 %v4643_v8, %v15603_v23 }
 0x1c3   : > { %v1980_v37 = vadd.f32 %v1891_v6, %v1760_v15  ;;  %v1977_v9 = vadd.f32 %v1848_v14, %v1757_v58  ;;  %4551 = vmatpush1.bf16.msra.mxu0 %v4446_v30  ;;  %4568 = vmatprep.mubr.bf16.mxu0 %v18988_v24  ;;  %v4669_v15 = vand.u32 %v4648_v4, %v15603_v23 }
 0x1c4   : > { %v1893_v18 = vpop.f32.mrf.mxu1  ;;  %v1850_v7 = vpop.f32.mrf.mxu0  ;;  %4688 = vmatprep.subr.bf16.mxu0 %v4657_v53  ;;  %v4649_v53 = vsel %vm4642_vm13, %v4639_v57, %v4641_v43  ;;  %v12778_v57 = vld [vmem:[%s18982_s1 + $0x4c] sm:$0xf] }
 0x1c5   : > { %v1978_v46 = vadd.f32 %v1850_v7, %v1758_v27  ;;  %v4647_v18 = vsel %vm4642_vm13, %v16546_v39, %v4637_v3  ;;  %vm10392_vm13 = vcmask 678912  }
 0x1c6   : > { %v1894_v60 = vpop.f32.mrf.mxu1  ;;  %v1852_v12 = vpop.f32.mrf.mxu0  ;;  %v4666_v4 = vand.u32 %v4647_v18, %v15603_v23 }
 0x1c8   : > { %v1971_v58 = vpop.f32.mrf.mxu1  ;;  %14164 = vmatmul.mubr.msk.bf16.vlgmr.msra.gmra.mxu1 %vm505_vm3, %v12773_v0  ;;  %v1853_v55 = vpop.f32.mrf.mxu0 }
 0x1c9   : > { %v1983_v30 = vadd.f32 %v1971_v58, %v1763_v44  ;;  %4730 = vmatpush1.bf16.msra.mxu1 %v4660_v33  ;;  %4747 = vmatprep.mubr.bf16.mxu1 %v18988_v24  ;;  %v4672_v44 = vand.u32 %v4649_v53, %v15603_v23 }
 0x1ca   : > { %v14093_v16 = vpop.f32.mrf.mxu1  ;;  %v1930_v6 = vpop.f32.mrf.mxu0  ;;  %12776 = vmatmul.mubr.msk.bf16.vlgmr.msra.gmra.mxu0 %vm505_vm3, %v12773_v0  ;;  %14167 = vmatprep.subr.bf16.mxu1 %v18987_v13 }
 0x1cb   : > { %v1981_v27 = vadd.f32 %v1930_v6, %v1761_v20  ;;  %4689 = vmatpush1.bf16.msra.mxu0 %v4654_v10  ;;  %4706 = vmatprep.mubr.bf16.mxu0 %v18988_v24  ;;  %v4850_v6 = vand.u32 %v15603_v23, %v15504_v17 }
 0x1cc   : > { %v1974_v14 = vpop.f32.mrf.mxu1  ;;  %v1932_v11 = vpop.f32.mrf.mxu0  ;;  %4770 = vmatprep.subr.bf16.mxu0 %v4669_v15 }
 0x1cd   : > { %v1982_v8 = vadd.f32 %v1932_v11, %v1762_v51 }
 0x1ce   : > { %v14094_v0 = vpop.f32.mrf.mxu1  ;;  %v1934_v7 = vpop.f32.mrf.mxu0 }
 0x1d0   : > { %v2109_v33 = vpop.f32.mrf.mxu1  ;;  %12780 = vmatmul.mubr.msk.bf16.vlgmr.msra.gmra.mxu1 %vm505_vm3, %v12778_v57  ;;  %v1935_v20 = vpop.f32.mrf.mxu0 }
 0x1d1   : > { %v2199_v60 = vadd.f32 %v2109_v33, %v1979_v52  ;;  %14168 = vmatpush3.bf16.msra.mxu1 %v4672_v44  ;;  %14169 = vmatprep.mubr.msk.bf16.mxu1 %vm15314_vm4, %v18987_v13 }
 0x1d2   : > { %v2111_v51 = vpop.f32.mrf.mxu1  ;;  %v2068_v12 = vpop.f32.mrf.mxu0  ;;  %12779 = vmatmul.mubr.msk.bf16.vlgmr.msra.gmra.mxu0 %vm505_vm3, %v12778_v57  ;;  %4907 = vmatprep.subr.bf16.mxu1 %v15722_v63 }
 0x1d3   : > { %v2200_v39 = vadd.f32 %v2111_v51, %v1980_v37  ;;  %v2197_v3 = vadd.f32 %v2068_v12, %v1977_v9  ;;  %4771 = vmatpush1.bf16.msra.mxu0 %v4666_v4  ;;  %4788 = vmatprep.mubr.bf16.mxu0 %v18988_v24  ;;  %v5033_v51 = vpop.permute.xlu0 %5032 }
 0x1d4   : > { %v2113_v10 = vpop.f32.mrf.mxu1  ;;  %v2070_v15 = vpop.f32.mrf.mxu0  ;;  %4866 = vmatprep.subr.bf16.mxu0 %v15677_v50 }
 0x1d5   : > { %v2198_v52 = vadd.f32 %v2070_v15, %v1978_v46 }
 0x1d6   : > { %v2114_v58 = vpop.f32.mrf.mxu1  ;;  %v2072_v55 = vpop.f32.mrf.mxu0 }
 0x1d8   : > { %v2191_v43 = vpop.f32.mrf.mxu1  ;;  %14170 = vmatmul.mubr.msk.bf16.vlgmr.msra.gmra.mxu1 %vm505_vm3, %v12778_v57  ;;  %v2073_v53 = vpop.f32.mrf.mxu0 }
 0x1d9   : > { %v2203_v16 = vadd.f32 %v2191_v43, %v1983_v30  ;;  %4908 = vmatpush1.bf16.msra.mxu1 %v15643_v40  ;;  %4925 = vmatprep.mubr.bf16.mxu1 %v18988_v24  ;;  %v12783_v40 = vld [vmem:[%s18982_s1 + $0x50] sm:$0xf] }
 0x1da   : > { %v14099_v63 = vpop.f32.mrf.mxu1  ;;  %v2150_v37 = vpop.f32.mrf.mxu0  ;;  %12781 = vmatmul.mubr.msk.bf16.vlgmr.msra.gmra.mxu0 %vm505_vm3, %v12778_v57  ;;  %14173 = vmatprep.subr.bf16.mxu1 %v18987_v13 }
 0x1db   : > { %v2201_v9 = vadd.f32 %v2150_v37, %v1981_v27  ;;  %4867 = vmatpush1.bf16.msra.mxu0 %v15666_v48  ;;  %4884 = vmatprep.mubr.bf16.mxu0 %v18988_v24 }
 0x1dc   : > { %v2194_v50 = vpop.f32.mrf.mxu1  ;;  %v2152_v46 = vpop.f32.mrf.mxu0  ;;  %4948 = vmatprep.subr.bf16.mxu0 %v15708_v59 }
 0x1dd   : > { %v2202_v30 = vadd.f32 %v2152_v46, %v1982_v8 }
 0x1de   : > { %v14100_v14 = vpop.f32.mrf.mxu1  ;;  %v2154_v11 = vpop.f32.mrf.mxu0 }
 0x1df   : > { %v5214_v14 = vpop.permute.xlu1 %5213 }
 0x1e0   : > { %v2329_v44 = vpop.f32.mrf.mxu1  ;;  %12785 = vmatmul.mubr.msk.bf16.vlgmr.msra.gmra.mxu1 %vm505_vm3, %v12783_v40  ;;  %v2155_v48 = vpop.f32.mrf.mxu0 }
 0x1e1   : > { %v2419_v27 = vadd.f32 %v2329_v44, %v2199_v60  ;;  %14174 = vmatpush3.bf16.msra.mxu1 %v4850_v6  ;;  %14175 = vmatprep.mubr.msk.bf16.mxu1 %vm15314_vm4, %v18987_v13  ;;  %v5215_v48 = vsel %vm902_vm5, %v15714_v61, %v5214_v14  ;;  %v18991_v14 = vld [vmem:[#allocation5_spill] sm:$0xff] }
 0x1e2   : > { %5096 = vmatprep.subr.bf16.mxu1 %v15656_v45  ;;  %v2331_v59 = vpop.f32.mrf.mxu1  ;;  %v2288_v8 = vpop.f32.mrf.mxu0  ;;  %12784 = vmatmul.mubr.msk.bf16.vlgmr.msra.gmra.mxu0 %vm505_vm3, %v12783_v40  ;;  %v5754_v45 = vld [vmem:[%s18989_s2] sm:$0xff] }
 0x1e3   : > { %v2420_v57 = vadd.f32 %v2331_v59, %v2200_v39  ;;  %v2417_v18 = vadd.f32 %v2288_v8, %v2197_v3  ;;  %4949 = vmatpush1.bf16.msra.mxu0 %v15691_v54  ;;  %4966 = vmatprep.mubr.bf16.mxu0 %v18988_v24  ;;  %v5034_v3 = vsel %vm497_vm2, %v15636_v38, %v5033_v51  ;;  %v12794_v8 = vld [vmem:[%s18982_s1 + $0x58] sm:$0xf] }
 0x1e4   : > { %v2333_v17 = vpop.f32.mrf.mxu1  ;;  %5055 = vmatprep.subr.bf16.mxu0 %v15615_v29  ;;  %v2290_v0 = vpop.f32.mrf.mxu0  ;;  %5757 = vperm.xlu0 %14454, %v5754_v45   ;;  %v5039_v43 = vand.u32 %v5034_v3, %v15603_v23 }
 0x1e5   : > { %v2418_v7 = vadd.f32 %v2290_v0, %v2198_v52  ;;  %v12788_v52 = vld [vmem:[%s18982_s1 + $0x54] sm:$0xf]  ;;  %v5220_v17 = vand.u32 %v5215_v48, %v15603_v23  ;;  %v12804_v48 = vld [vmem:[%s18982_s1 + $0x60] sm:$0xf] }
 0x1e6   : > { %v2334_v33 = vpop.f32.mrf.mxu1  ;;  %v2292_v20 = vpop.f32.mrf.mxu0 }
 0x1e8   : > { %v2411_v4 = vpop.f32.mrf.mxu1  ;;  %14176 = vmatmul.mubr.msk.bf16.vlgmr.msra.gmra.mxu1 %vm505_vm3, %v12783_v40  ;;  %v2293_v60 = vpop.f32.mrf.mxu0 }
 0x1e9   : > { %v2423_v54 = vadd.f32 %v2411_v4, %v2203_v16  ;;  %5097 = vmatpush1.bf16.msra.mxu1 %v15612_v28  ;;  %5114 = vmatprep.mubr.bf16.mxu1 %v18988_v24 }
 0x1ea   : > { %v14105_v29 = vpop.f32.mrf.mxu1  ;;  %v2370_v12 = vpop.f32.mrf.mxu0  ;;  %12786 = vmatmul.mubr.msk.bf16.vlgmr.msra.gmra.mxu0 %vm505_vm3, %v12783_v40  ;;  %14179 = vmatprep.subr.bf16.mxu1 %v18987_v13 }
 0x1eb   : > { %v2421_v39 = vadd.f32 %v2370_v12, %v2201_v9  ;;  %5056 = vmatpush1.bf16.msra.mxu0 %v15622_v32  ;;  %5073 = vmatprep.mubr.bf16.mxu0 %v18988_v24  ;;  %v5395_v12 = vpop.permute.xlu0 %5394 }
 0x1ec   : > { %v2414_v10 = vpop.f32.mrf.mxu1  ;;  %5137 = vmatprep.subr.bf16.mxu0 %v15646_v41  ;;  %v2372_v28 = vpop.f32.mrf.mxu0 }
 0x1ed   : > { %v2422_v15 = vadd.f32 %v2372_v28, %v2202_v30  ;;  %v5396_v10 = vsel %vm1122_vm6, %v15783_v34, %v5395_v12 }
 0x1ee   : > { %v14106_v58 = vpop.f32.mrf.mxu1  ;;  %v2374_v55 = vpop.f32.mrf.mxu0 }
 0x1f0   : > { %v2549_v53 = vpop.f32.mrf.mxu1  ;;  %12791 = vmatmul.mubr.msk.bf16.vlgmr.msra.gmra.mxu1 %vm505_vm3, %v12788_v52  ;;  %v2375_v32 = vpop.f32.mrf.mxu0 }
 0x1f1   : > { %v2639_v16 = vadd.f32 %v2549_v53, %v2419_v27  ;;  %14180 = vmatpush3.bf16.msra.mxu1 %v5039_v43  ;;  %14181 = vmatprep.mubr.msk.bf16.mxu1 %vm15314_vm4, %v18987_v13  ;;  %v5401_v43 = vand.u32 %v5396_v10, %v15603_v23  ;;  %v14463_v10 = vld [vmem:[%s18946_s3 + $0x74] ss:$8 sps:$4 sm:$0xff]  }
 0x1f2   : > { %5277 = vmatprep.subr.bf16.mxu1 %v15790_v36  ;;  %v2551_v38 = vpop.f32.mrf.mxu1  ;;  %v2508_v41 = vpop.f32.mrf.mxu0  ;;  %12790 = vmatmul.mubr.msk.bf16.vlgmr.msra.gmra.mxu0 %vm505_vm3, %v12788_v52 }
 0x1f3   : > { %v2640_v63 = vadd.f32 %v2551_v38, %v2420_v57  ;;  %v2637_v37 = vadd.f32 %v2508_v41, %v2417_v18  ;;  %5138 = vmatpush1.bf16.msra.mxu0 %v15662_v47  ;;  %5155 = vmatprep.mubr.bf16.mxu0 %v18988_v24 }
 0x1f4   : > { %v2553_v9 = vpop.f32.mrf.mxu1  ;;  %5236 = vmatprep.subr.bf16.mxu0 %v15741_v5  ;;  %v2510_v50 = vpop.f32.mrf.mxu0 }
 0x1f5   : > { %v2638_v46 = vadd.f32 %v2510_v50, %v2418_v7 }
 0x1f6   : > { %v2554_v30 = vpop.f32.mrf.mxu1  ;;  %v2512_v40 = vpop.f32.mrf.mxu0 }
 0x1f7   : > { %v5576_v30 = vpop.permute.xlu1 %5575 }
 0x1f8   : > { %v2631_v6 = vpop.f32.mrf.mxu1  ;;  %14182 = vmatmul.mubr.msk.bf16.vlgmr.msra.gmra.mxu1 %vm505_vm3, %v12788_v52  ;;  %v2513_v36 = vpop.f32.mrf.mxu0 }
 0x1f9   : > { %v2643_v11 = vadd.f32 %v2631_v6, %v2423_v54  ;;  %5278 = vmatpush1.bf16.msra.mxu1 %v15717_v62  ;;  %5295 = vmatprep.mubr.bf16.mxu1 %v18988_v24  ;;  %v18990_v36 = vld [vmem:[#allocation6_spill] sm:$0xff] }
 0x1fa   : > { %v14111_v47 = vpop.f32.mrf.mxu1  ;;  %v2590_v44 = vpop.f32.mrf.mxu0  ;;  %12792 = vmatmul.mubr.msk.bf16.vlgmr.msra.gmra.mxu0 %vm505_vm3, %v12788_v52  ;;  %14185 = vmatprep.subr.bf16.mxu1 %v18987_v13  ;;  %v12799_v52 = vld [vmem:[%s18982_s1 + $0x5c] sm:$0xf]  ;;  %s15326_s1 = smov 113  }
 0x1fb   : > { %v2641_v5 = vadd.f32 %v2590_v44, %v2421_v39  ;;  %5237 = vmatpush1.bf16.msra.mxu0 %v15728_v1  ;;  %5254 = vmatprep.mubr.bf16.mxu0 %v18988_v24  ;;  %v18992_v44 = vld [vmem:[#allocation8_spill] sm:$0xff] }
 0x1fc   : > { %v2634_v27 = vpop.f32.mrf.mxu1  ;;  %5318 = vmatprep.subr.bf16.mxu0 %v15771_v26  ;;  %v2592_v62 = vpop.f32.mrf.mxu0 }
 0x1fd   : > { %v2642_v59 = vadd.f32 %v2592_v62, %v2422_v15 }
 0x1fe   : > { %v14112_v57 = vpop.f32.mrf.mxu1  ;;  %v2594_v18 = vpop.f32.mrf.mxu0 }
 0x200   : > { %v2769_v0 = vpop.f32.mrf.mxu1  ;;  %12796 = vmatmul.mubr.msk.bf16.vlgmr.msra.gmra.mxu1 %vm505_vm3, %v12794_v8  ;;  %v2595_v1 = vpop.f32.mrf.mxu0 }
 0x201   : > { %v2859_v7 = vadd.f32 %v2769_v0, %v2639_v16  ;;  %14186 = vmatpush3.bf16.msra.mxu1 %v5220_v17  ;;  %14187 = vmatprep.mubr.msk.bf16.mxu1 %vm15314_vm4, %v18987_v13 }
 0x202   : > { %5458 = vmatprep.subr.bf16.mxu1 %v15858_v22  ;;  %v2771_v61 = vpop.f32.mrf.mxu1  ;;  %v2728_v26 = vpop.f32.mrf.mxu0  ;;  %12795 = vmatmul.mubr.msk.bf16.vlgmr.msra.gmra.mxu0 %vm505_vm3, %v12794_v8 }
 0x203   : > { %v2860_v33 = vadd.f32 %v2771_v61, %v2640_v63  ;;  %v2857_v20 = vadd.f32 %v2728_v26, %v2637_v37  ;;  %5319 = vmatpush1.bf16.msra.mxu0 %v15754_v19  ;;  %5336 = vmatprep.mubr.bf16.mxu0 %v18988_v24  ;;  %v18993_v61 = vld [vmem:[#allocation7_spill] sm:$0xff] }
 0x204   : > { %v2773_v45 = vpop.f32.mrf.mxu1  ;;  %5417 = vmatprep.subr.bf16.mxu0 %v15809_v49  ;;  %v2730_v4 = vpop.f32.mrf.mxu0 }
 0x205   : > { %v2858_v60 = vadd.f32 %v2730_v4, %v2638_v46 }
 0x206   : > { %v2774_v51 = vpop.f32.mrf.mxu1  ;;  %v2732_v54 = vpop.f32.mrf.mxu0 }
 0x208   : > { %v2851_v29 = vpop.f32.mrf.mxu1  ;;  %14188 = vmatmul.mubr.msk.bf16.vlgmr.msra.gmra.mxu1 %vm505_vm3, %v12794_v8  ;;  %v2733_v22 = vpop.f32.mrf.mxu0 }
 0x209   : > { %v2863_v39 = vadd.f32 %v2851_v29, %v2643_v11  ;;  %5459 = vmatpush1.bf16.msra.mxu1 %v15787_v35  ;;  %5476 = vmatprep.mubr.bf16.mxu1 %v18988_v24  ;;  %v5577_v11 = vsel %vm1342_vm7, %v18991_v14, %v5576_v30  ;;  %v14460_v22 = vld [vmem:[%s18946_s3 + $0x174] ss:$8 sps:$4 sm:$0xff]  }
 0x20a   : > { %v14117_v19 = vpop.f32.mrf.mxu1  ;;  %v2810_v3 = vpop.f32.mrf.mxu0  ;;  %12797 = vmatmul.mubr.msk.bf16.vlgmr.msra.gmra.mxu0 %vm505_vm3, %v12794_v8  ;;  %14191 = vmatprep.subr.bf16.mxu1 %v18987_v13 }
 0x20b   : > { %v2861_v49 = vadd.f32 %v2810_v3, %v2641_v5  ;;  %5418 = vmatpush1.bf16.msra.mxu0 %v15796_v42  ;;  %5435 = vmatprep.mubr.bf16.mxu0 %v18988_v24 }
 0x20c   : > { %v2854_v28 = vpop.f32.mrf.mxu1  ;;  %5499 = vmatprep.subr.bf16.mxu0 %v15839_v2  ;;  %v2812_v35 = vpop.f32.mrf.mxu0 }
 0x20d   : > { %v2862_v15 = vadd.f32 %v2812_v35, %v2642_v59  ;;  %v5582_v59 = vand.u32 %v5577_v11, %v15603_v23  ;;  %v14481_v11 = vld [vmem:[%s18946_s3 + $0x44] ss:$8 sps:$4 sm:$0xff]  }
 0x20e   : > { %v14118_v58 = vpop.f32.mrf.mxu1  ;;  %v2814_v55 = vpop.f32.mrf.mxu0 }
 0x20f   : > { %v14466_v58 = vld [vmem:[%s18946_s3 + $0x164] ss:$8 sps:$4 sm:$0xff]  }
 0x210   : > { %v2989_v53 = vpop.f32.mrf.mxu1  ;;  %12801 = vmatmul.mubr.msk.bf16.vlgmr.msra.gmra.mxu1 %vm505_vm3, %v12799_v52  ;;  %v2815_v42 = vpop.f32.mrf.mxu0 }
 0x211   : > { %v3079_v32 = vadd.f32 %v2989_v53, %v2859_v7  ;;  %14192 = vmatpush3.bf16.msra.mxu1 %v5401_v43  ;;  %14193 = vmatprep.mubr.msk.bf16.mxu1 %vm15314_vm4, %v18987_v13  ;;  %v14469_v42 = vld [vmem:[%s18946_s3 + $0x64] ss:$8 sps:$4 sm:$0xff]  }
 0x212   : > { %5639 = vmatprep.subr.bf16.mxu1 %v15922_v25  ;;  %v2991_v34 = vpop.f32.mrf.mxu1  ;;  %v2948_v2 = vpop.f32.mrf.mxu0  ;;  %12800 = vmatmul.mubr.msk.bf16.vlgmr.msra.gmra.mxu0 %vm505_vm3, %v12799_v52 }
 0x213   : > { %v3080_v16 = vadd.f32 %v2991_v34, %v2860_v33  ;;  %v3077_v38 = vadd.f32 %v2948_v2, %v2857_v20  ;;  %5500 = vmatpush1.bf16.msra.mxu0 %v15822_v56  ;;  %5517 = vmatprep.mubr.bf16.mxu0 %v18988_v24  ;;  %v14467_v2 = vld [vmem:[%s18946_s3 + $0x60] ss:$8 sps:$4 sm:$0xff]  }
 0x214   : > { %v2993_v41 = vpop.f32.mrf.mxu1  ;;  %5598 = vmatprep.subr.bf16.mxu0 %v15877_v31  ;;  %v2950_v63 = vpop.f32.mrf.mxu0 }
 0x215   : > { %v3078_v37 = vadd.f32 %v2950_v63, %v2858_v60  ;;  %v14470_v63 = vld [vmem:[%s18946_s3 + $0x150] ss:$8 sps:$4 sm:$0xff]  }
 0x216   : > { %v2994_v9 = vpop.f32.mrf.mxu1  ;;  %v2952_v50 = vpop.f32.mrf.mxu0 }
 0x218   : > { %v3071_v46 = vpop.f32.mrf.mxu1  ;;  %14194 = vmatmul.mubr.msk.bf16.vlgmr.msra.gmra.mxu1 %vm505_vm3, %v12799_v52  ;;  %v2953_v25 = vpop.f32.mrf.mxu0 }
 0x219   : > { %v3083_v40 = vadd.f32 %v3071_v46, %v2863_v39  ;;  %5640 = vmatpush1.bf16.msra.mxu1 %v15855_v21  ;;  %5657 = vmatprep.mubr.bf16.mxu1 %v18988_v24  ;;  %v14458_v39 = vld [vmem:[%s18946_s3 + $0x170] ss:$8 sps:$4 sm:$0xff]   ;;  %v14475_v46 = vld [vmem:[%s18946_s3 + $0x54] ss:$8 sps:$4 sm:$0xff]  }
 0x21a   : > { %v14123_v56 = vpop.f32.mrf.mxu1  ;;  %v3030_v6 = vpop.f32.mrf.mxu0  ;;  %12802 = vmatmul.mubr.msk.bf16.vlgmr.msra.gmra.mxu0 %vm505_vm3, %v12799_v52  ;;  %14197 = vmatprep.subr.bf16.mxu1 %v18987_v13  ;;  %v14464_v52 = vld [vmem:[%s18946_s3 + $0x160] ss:$8 sps:$4 sm:$0xff]  }
 0x21b   : > { %v3081_v31 = vadd.f32 %v3030_v6, %v2861_v49  ;;  %5599 = vmatpush1.bf16.msra.mxu0 %v18990_v36  ;;  %5616 = vmatprep.mubr.bf16.mxu0 %v18988_v24  ;;  %v14476_v56 = vld [vmem:[%s18946_s3 + $0x140] ss:$8 sps:$4 sm:$0xff]   ;;  %v14478_v6 = vld [vmem:[%s18946_s3 + $0x144] ss:$8 sps:$4 sm:$0xff]  }
 0x21c   : > { %v3074_v47 = vpop.f32.mrf.mxu1  ;;  %5680 = vmatprep.subr.bf16.mxu0 %v18992_v44  ;;  %v3032_v21 = vpop.f32.mrf.mxu0 }
 0x21d   : > { %v3082_v5 = vadd.f32 %v3032_v21, %v2862_v15  ;;  %v14461_v15 = vld [vmem:[%s18946_s3 + $0x70] ss:$8 sps:$4 sm:$0xff]   ;;  %v14479_v21 = vld [vmem:[%s18946_s3 + $0x40] ss:$8 sps:$4 sm:$0xff]  }
 0x21e   : > { %v14124_v27 = vpop.f32.mrf.mxu1  ;;  %v3034_v62 = vpop.f32.mrf.mxu0 }
 0x21f   : > { %v14482_v27 = vld [vmem:[%s18946_s3 + $0x130] ss:$8 sps:$4 sm:$0xff]  }
 0x220   : > { %v3209_v8 = vpop.f32.mrf.mxu1  ;;  %12806 = vmatmul.mubr.msk.bf16.vlgmr.msra.gmra.mxu1 %vm505_vm3, %v12804_v48  ;;  %v3035_v57 = vpop.f32.mrf.mxu0 }
 0x221   : > { %v3299_v18 = vadd.f32 %v3209_v8, %v3079_v32  ;;  %14198 = vmatpush3.bf16.msra.mxu1 %v5582_v59  ;;  %14199 = vmatprep.mubr.msk.bf16.mxu1 %vm15314_vm4, %v18987_v13  ;;  %v14487_v57 = vld [vmem:[%s18946_s3 + $0x34] ss:$8 sps:$4 sm:$0xff]  }
 0x222   : > { %v3211_v17 = vpop.f32.mrf.mxu1  ;;  %v3168_v0 = vpop.f32.mrf.mxu0  ;;  %12805 = vmatmul.mubr.msk.bf16.vlgmr.msra.gmra.mxu0 %vm505_vm3, %v12804_v48  ;;  %6494 = vmatprep.subr.bf16.mxu1 %v14460_v22 }
 0x223   : > { %v3300_v1 = vadd.f32 %v3211_v17, %v3080_v16  ;;  %v3297_v7 = vadd.f32 %v3168_v0, %v3077_v38  ;;  %5681 = vmatpush1.bf16.msra.mxu0 %v18993_v61  ;;  %5698 = vmatprep.mubr.bf16.mxu0 %v18988_v24  ;;  %v14472_v16 = vld [vmem:[%s18946_s3 + $0x154] ss:$8 sps:$4 sm:$0xff]   ;;  %v14485_v0 = vld [vmem:[%s18946_s3 + $0x30] ss:$8 sps:$4 sm:$0xff]  }
 0x224   : > { %v3213_v23 = vpop.f32.mrf.mxu1  ;;  %v3170_v26 = vpop.f32.mrf.mxu0  ;;  %6453 = vmatprep.subr.bf16.mxu0 %v14463_v10  ;;  %v14497_v10 = vld [vmem:[%s18946_s3 + $0x10] ss:$8 sps:$4 sm:$0xff]  }
 0x225   : > { %v3298_v33 = vadd.f32 %v3170_v26, %v3078_v37 }
 0x226   : > { %v3214_v20 = vpop.f32.mrf.mxu1  ;;  %v3172_v45 = vpop.f32.mrf.mxu0 }
 0x228   : > { %v3291_v4 = vpop.f32.mrf.mxu1  ;;  %14200 = vmatmul.mubr.msk.bf16.vlgmr.msra.gmra.mxu1 %vm505_vm3, %v12804_v48  ;;  %v3173_v60 = vpop.f32.mrf.mxu0 }
 0x229   : > { %v3303_v51 = vadd.f32 %v3291_v4, %v3083_v40  ;;  %6495 = vmatpush1.bf16.msra.mxu1 %v14458_v39  ;;  %v14473_v40 = vld [vmem:[%s18946_s3 + $0x50] ss:$8 sps:$4 sm:$0xff]   ;;  %v14491_v4 = vld [vmem:[%s18946_s3 + $0x20] ss:$8 sps:$4 sm:$0xff]   ;;  %v14496_v60 = vld [vmem:[%s18946_s3 + $0x114] ss:$8 sps:$4 sm:$0xff]  }
 0x22a   : > { %v14129_v54 = vpop.f32.mrf.mxu1  ;;  %v3250_v29 = vpop.f32.mrf.mxu0  ;;  %12807 = vmatmul.mubr.msk.bf16.vlgmr.msra.gmra.mxu0 %vm505_vm3, %v12804_v48  ;;  %6496 = vmatprep.subr.bf16.mxu1 %v14466_v58  ;;  %vm9157_vm3 = vcmask 1043456  }
 0x22b   : > { %v3301_v12 = vadd.f32 %v3250_v29, %v3081_v31  ;;  %6454 = vmatpush1.bf16.msra.mxu0 %v14461_v15  ;;  %v14494_v29 = vld [vmem:[%s18946_s3 + $0x110] ss:$8 sps:$4 sm:$0xff]  }
 0x22c   : > { %v3294_v19 = vpop.f32.mrf.mxu1  ;;  %v3252_v3 = vpop.f32.mrf.mxu0  ;;  %6455 = vmatprep.subr.bf16.mxu0 %v14469_v42  ;;  %v14503_v42 = vld [vmem:[%s18946_s3] ss:$8 sps:$4 sm:$0xff]  }
 0x22d   : > { %v3302_v49 = vadd.f32 %v3252_v3, %v3082_v5  ;;  %6497 = vmatpush1.bf16.msra.mxu1 %v14464_v52  ;;  %v14484_v5 = vld [vmem:[%s18946_s3 + $0x134] ss:$8 sps:$4 sm:$0xff]  }
 0x22e   : > { %v14130_v28 = vpop.f32.mrf.mxu1  ;;  %v3254_v35 = vpop.f32.mrf.mxu0  ;;  %6498 = vmatprep.subr.bf16.mxu1 %v14472_v16  ;;  %v14499_v19 = vld [vmem:[%s18946_s3 + $0x14] ss:$8 sps:$4 sm:$0xff]  }
 0x22f   : > { %6456 = vmatpush1.bf16.msra.mxu0 %v14467_v2  ;;  %v14500_v28 = vld [vmem:[%s18946_s3 + $0x100] ss:$8 sps:$4 sm:$0xff]   ;;  %v14502_v35 = vld [vmem:[%s18946_s3 + $0x104] ss:$8 sps:$4 sm:$0xff]   ;;  %v14506_v2 = vld [vmem:[%s18946_s3 + $0x1f0] ss:$8 sps:$4 sm:$0xff]  }
 0x230   : > { %v3429_v55 = vpop.f32.mrf.mxu1  ;;  %v3255_v43 = vpop.f32.mrf.mxu0  ;;  %6457 = vmatprep.subr.bf16.mxu0 %v14475_v46  ;;  %v14512_v46 = vld [vmem:[%s18946_s3 + $0x1e0] ss:$8 sps:$4 sm:$0xff]  }
 0x231   : > { %v3519_v53 = vadd.f32 %v3429_v55, %v3299_v18  ;;  %6499 = vmatpush1.bf16.msra.mxu1 %v14470_v63  ;;  %v14505_v55 = vld [vmem:[%s18946_s3 + $0x4] ss:$8 sps:$4 sm:$0xff]   ;;  %v14511_v63 = vld [vmem:[%s18946_s3 + $0xf4] ss:$8 sps:$4 sm:$0xff]  }
 0x232   : > { %v3431_v32 = vpop.f32.mrf.mxu1  ;;  %v3388_v34 = vpop.f32.mrf.mxu0  ;;  %6500 = vmatprep.subr.bf16.mxu1 %v14478_v6  ;;  %v14517_v6 = vld [vmem:[%s18946_s3 + $0xe4] ss:$8 sps:$4 sm:$0xff]  }
 0x233   : > { %v3520_v38 = vadd.f32 %v3431_v32, %v3300_v1  ;;  %v3517_v41 = vadd.f32 %v3388_v34, %v3297_v7  ;;  %6458 = vmatpush1.bf16.msra.mxu0 %v14473_v40  ;;  %v14488_v1 = vld [vmem:[%s18946_s3 + $0x120] ss:$8 sps:$4 sm:$0xff]   ;;  %v14490_v7 = vld [vmem:[%s18946_s3 + $0x124] ss:$8 sps:$4 sm:$0xff]   ;;  %v14508_v32 = vld [vmem:[%s18946_s3 + $0x1f4] ss:$8 sps:$4 sm:$0xff]  }
 0x234   : > { %v3433_v37 = vpop.f32.mrf.mxu1  ;;  %v3390_v9 = vpop.f32.mrf.mxu0  ;;  %6459 = vmatprep.subr.bf16.mxu0 %v14481_v11  ;;  %v14520_v11 = vld [vmem:[%s18946_s3 + $0x1d4] ss:$8 sps:$4 sm:$0xff]  }
 0x235   : > { %v3518_v50 = vadd.f32 %v3390_v9, %v3298_v33  ;;  %6501 = vmatpush1.bf16.msra.mxu1 %v14476_v56  ;;  %v14493_v33 = vld [vmem:[%s18946_s3 + $0x24] ss:$8 sps:$4 sm:$0xff]  }
 0x236   : > { %v3434_v25 = vpop.f32.mrf.mxu1  ;;  %v3392_v30 = vpop.f32.mrf.mxu0  ;;  %6502 = vmatprep.subr.bf16.mxu1 %v14484_v5 }
 0x237   : > { %6460 = vmatpush1.bf16.msra.mxu0 %v14479_v21  ;;  %v14514_v25 = vld [vmem:[%s18946_s3 + $0x1e4] ss:$8 sps:$4 sm:$0xff]   ;;  %v14518_v21 = vld [vmem:[%s18946_s3 + $0x1d0] ss:$8 sps:$4 sm:$0xff]  }
 0x238   : > { %v3511_v31 = vpop.f32.mrf.mxu1  ;;  %v3393_v36 = vpop.f32.mrf.mxu0  ;;  %6461 = vmatprep.subr.bf16.mxu0 %v14487_v57  ;;  %v14521_v57 = vld [vmem:[%s18946_s3 + $0xd0] ss:$8 sps:$4 sm:$0xff]  }
 0x239   : > { %v3523_v14 = vadd.f32 %v3511_v31, %v3303_v51  ;;  %6503 = vmatpush1.bf16.msra.mxu1 %v14482_v27 }
 0x23a   : > { %v14135_v47 = vpop.f32.mrf.mxu1  ;;  %v3470_v44 = vpop.f32.mrf.mxu0  ;;  %6504 = vmatprep.subr.bf16.mxu1 %v14490_v7 }
 0x23b   : > { %v3521_v48 = vadd.f32 %v3470_v44, %v3301_v12  ;;  %6462 = vmatpush1.bf16.msra.mxu0 %v14485_v0 }
 0x23c   : > { %v3514_v62 = vpop.f32.mrf.mxu1  ;;  %v3472_v59 = vpop.f32.mrf.mxu0  ;;  %6463 = vmatprep.subr.bf16.mxu0 %v14493_v33  ;;  %v14527_v33 = vld [vmem:[%s18946_s3 + $0xc0] ss:$8 sps:$4 sm:$0xff]  }
 0x23d   : > { %v3522_v8 = vadd.f32 %v3472_v59, %v3302_v49  ;;  %6505 = vmatpush1.bf16.msra.mxu1 %v14488_v1  ;;  %v14523_v62 = vld [vmem:[%s18946_s3 + $0xd4] ss:$8 sps:$4 sm:$0xff]  }
 0x23e   : > { %v14136_v18 = vpop.f32.mrf.mxu1  ;;  %v3474_v17 = vpop.f32.mrf.mxu0  ;;  %6506 = vmatprep.subr.bf16.mxu1 %v14496_v60 }
 0x23f   : > { %6464 = vmatpush1.bf16.msra.mxu0 %v14491_v4  ;;  %v14524_v18 = vld [vmem:[%s18946_s3 + $0x1c0] ss:$8 sps:$4 sm:$0xff]   ;;  %v14526_v17 = vld [vmem:[%s18946_s3 + $0x1c4] ss:$8 sps:$4 sm:$0xff]   ;;  %v14530_v4 = vld [vmem:[%s18946_s3 + $0x1b0] ss:$8 sps:$4 sm:$0xff]  }
 0x240   : > { %v3649_v61 = vpop.f32.mrf.mxu1  ;;  %v3475_v23 = vpop.f32.mrf.mxu0  ;;  %6465 = vmatprep.subr.bf16.mxu0 %v14499_v19  ;;  %v14536_v19 = vld [vmem:[%s18946_s3 + $0x1a0] ss:$8 sps:$4 sm:$0xff]  }
 0x241   : > { %v3739_v26 = vadd.f32 %v3649_v61, %v3519_v53  ;;  %6507 = vmatpush1.bf16.msra.mxu1 %v14494_v29  ;;  %v14529_v61 = vld [vmem:[%s18946_s3 + $0xc4] ss:$8 sps:$4 sm:$0xff]   ;;  %v14535_v29 = vld [vmem:[%s18946_s3 + $0xb4] ss:$8 sps:$4 sm:$0xff]  }
 0x242   : > { %v3651_v20 = vpop.f32.mrf.mxu1  ;;  %v3608_v45 = vpop.f32.mrf.mxu0  ;;  %6508 = vmatprep.subr.bf16.mxu1 %v14502_v35  ;;  %v14539_v35 = vld [vmem:[%s18946_s3 + $0xa0] ss:$8 sps:$4 sm:$0xff]  }
 0x243   : > { %v3740_v51 = vadd.f32 %v3651_v20, %v3520_v38  ;;  %v3737_v54 = vadd.f32 %v3608_v45, %v3517_v41  ;;  %6466 = vmatpush1.bf16.msra.mxu0 %v14497_v10  ;;  %v14532_v20 = vld [vmem:[%s18946_s3 + $0x1b4] ss:$8 sps:$4 sm:$0xff]  }
 0x244   : > { %v3653_v22 = vpop.f32.mrf.mxu1  ;;  %v3610_v12 = vpop.f32.mrf.mxu0  ;;  %6467 = vmatprep.subr.bf16.mxu0 %v14505_v55  ;;  %v14544_v55 = vld [vmem:[%s18946_s3 + $0x194] ss:$8 sps:$4 sm:$0xff]  }
 0x245   : > { %v3738_v39 = vadd.f32 %v3610_v12, %v3518_v50  ;;  %6509 = vmatpush1.bf16.msra.mxu1 %v14500_v28  ;;  %v14509_v50 = vld [vmem:[%s18946_s3 + $0xf0] ss:$8 sps:$4 sm:$0xff]  }
 0x246   : > { %v3654_v3 = vpop.f32.mrf.mxu1  ;;  %v3612_v49 = vpop.f32.mrf.mxu0  ;;  %6510 = vmatprep.subr.bf16.mxu1 %v14508_v32 }
 0x247   : > { %6468 = vmatpush1.bf16.msra.mxu0 %v14503_v42  ;;  %v14538_v3 = vld [vmem:[%s18946_s3 + $0x1a4] ss:$8 sps:$4 sm:$0xff]   ;;  %v14542_v42 = vld [vmem:[%s18946_s3 + $0x190] ss:$8 sps:$4 sm:$0xff]  }
 0x248   : > { %v3731_v15 = vpop.f32.mrf.mxu1  ;;  %v3613_v52 = vpop.f32.mrf.mxu0  ;;  %6469 = vmatprep.subr.bf16.mxu0 %v14511_v63  ;;  %v14545_v63 = vld [vmem:[%s18946_s3 + $0x90] ss:$8 sps:$4 sm:$0xff]  }
 0x249   : > { %v3743_v58 = vadd.f32 %v3731_v15, %v3523_v14  ;;  %6511 = vmatpush2.bf16.msra.mxu1 %v14506_v2  ;;  %v14515_v14 = vld [vmem:[%s18946_s3 + $0xe0] ss:$8 sps:$4 sm:$0xff]   ;;  %v14541_v15 = vld [vmem:[%s18946_s3 + $0xa4] ss:$8 sps:$4 sm:$0xff]  }
 0x24a   : > { %v14141_v43 = vpop.f32.mrf.mxu1  ;;  %v3690_v53 = vpop.f32.mrf.mxu0  ;;  %6512 = vmatprep.subr.bf16.mxu1 %v14514_v25 }
 0x24b   : > { %v3741_v34 = vadd.f32 %v3690_v53, %v3521_v48  ;;  %6470 = vmatpush2.bf16.msra.mxu0 %v14509_v50 }
 0x24c   : > { %v3734_v16 = vpop.f32.mrf.mxu1  ;;  %v3692_v38 = vpop.f32.mrf.mxu0  ;;  %6471 = vmatprep.subr.bf16.mxu0 %v14517_v6  ;;  %v14551_v6 = vld [vmem:[%s18946_s3 + $0x80] ss:$8 sps:$4 sm:$0xff]  }
 0x24d   : > { %v3742_v41 = vadd.f32 %v3692_v38, %v3522_v8  ;;  %6513 = vmatpush2.bf16.msra.mxu1 %v14512_v46  ;;  %v14547_v16 = vld [vmem:[%s18946_s3 + $0x94] ss:$8 sps:$4 sm:$0xff]  }
 0x24e   : > { %v14142_v37 = vpop.f32.mrf.mxu1  ;;  %v3694_v9 = vpop.f32.mrf.mxu0  ;;  %6514 = vmatprep.subr.bf16.mxu1 %v14520_v11 }
 0x24f   : > { %6472 = vmatpush2.bf16.msra.mxu0 %v14515_v14  ;;  %v14550_v37 = vld [vmem:[%s18946_s3 + $0x184] ss:$8 sps:$4 sm:$0xff]   ;;  %v14548_v9 = vld [vmem:[%s18946_s3 + $0x180] ss:$8 sps:$4 sm:$0xff]  }
 0x250   : > { %v3869_v30 = vpop.f32.mrf.mxu1  ;;  %v3695_v40 = vpop.f32.mrf.mxu0  ;;  %6473 = vmatprep.subr.bf16.mxu0 %v14523_v62 }
 0x251   : > { %v3959_v56 = vadd.f32 %v3869_v30, %v3739_v26  ;;  %6515 = vmatpush2.bf16.msra.mxu1 %v14518_v21  ;;  %v14553_v30 = vld [vmem:[%s18946_s3 + $0x84] ss:$8 sps:$4 sm:$0xff]  }
 0x252   : > { %v3871_v31 = vpop.f32.mrf.mxu1  ;;  %v3828_v36 = vpop.f32.mrf.mxu0  ;;  %6516 = vmatprep.subr.bf16.mxu1 %v14526_v17 }
 0x253   : > { %v3960_v47 = vadd.f32 %v3871_v31, %v3740_v51  ;;  %v3957_v44 = vadd.f32 %v3828_v36, %v3737_v54  ;;  %6474 = vmatpush2.bf16.msra.mxu0 %v14521_v57  ;;  %v14556_v31 = vld [vmem:[%s18946_s3 + $0x374] ss:$8 sps:$4 sm:$0xff]  }
 0x254   : > { %v3873_v5 = vpop.f32.mrf.mxu1  ;;  %v3830_v48 = vpop.f32.mrf.mxu0  ;;  %6475 = vmatprep.subr.bf16.mxu0 %v14529_v61 }
 0x255   : > { %v3958_v27 = vadd.f32 %v3830_v48, %v3738_v39  ;;  %6517 = vmatpush2.bf16.msra.mxu1 %v14524_v18  ;;  %v14533_v39 = vld [vmem:[%s18946_s3 + $0xb0] ss:$8 sps:$4 sm:$0xff]  }
 0x256   : > { %v3874_v59 = vpop.f32.mrf.mxu1  ;;  %v3832_v8 = vpop.f32.mrf.mxu0  ;;  %6518 = vmatprep.subr.bf16.mxu1 %v14532_v20 }
 0x257   : > { %6476 = vmatpush2.bf16.msra.mxu0 %v14527_v33 }
 0x258   : > { %v3951_v0 = vpop.f32.mrf.mxu1  ;;  %v3833_v1 = vpop.f32.mrf.mxu0  ;;  %6477 = vmatprep.subr.bf16.mxu0 %v14535_v29 }
 0x259   : > { %v3963_v7 = vadd.f32 %v3951_v0, %v3743_v58  ;;  %6519 = vmatpush2.bf16.msra.mxu1 %v14530_v4 }
 0x25a   : > { %v14147_v23 = vpop.f32.mrf.mxu1  ;;  %v3910_v26 = vpop.f32.mrf.mxu0  ;;  %6520 = vmatprep.subr.bf16.mxu1 %v14538_v3 }
 0x25b   : > { %v3961_v45 = vadd.f32 %v3910_v26, %v3741_v34  ;;  %6478 = vmatpush2.bf16.msra.mxu0 %v14533_v39 }
 0x25c   : > { %v3954_v60 = vpop.f32.mrf.mxu1  ;;  %v3912_v51 = vpop.f32.mrf.mxu0  ;;  %6479 = vmatprep.subr.bf16.mxu0 %v14541_v15 }
 0x25d   : > { %v3962_v54 = vadd.f32 %v3912_v51, %v3742_v41  ;;  %6521 = vmatpush2.bf16.msra.mxu1 %v14536_v19 }
 0x25e   : > { %v14148_v22 = vpop.f32.mrf.mxu1  ;;  %v3914_v12 = vpop.f32.mrf.mxu0  ;;  %6522 = vmatprep.subr.bf16.mxu1 %v14544_v55 }
 0x25f   : > { %6480 = vmatpush2.bf16.msra.mxu0 %v14539_v35 }
 0x260   : > { %v4089_v49 = vpop.f32.mrf.mxu1  ;;  %v3915_v10 = vpop.f32.mrf.mxu0  ;;  %6481 = vmatprep.subr.bf16.mxu0 %v14547_v16 }
 0x261   : > { %v4179_v28 = vadd.f32 %v4089_v49, %v3959_v56  ;;  %6523 = vmatpush2.bf16.msra.mxu1 %v14542_v42 }
 0x262   : > { %v4091_v52 = vpop.f32.mrf.mxu1  ;;  %v4048_v58 = vpop.f32.mrf.mxu0  ;;  %6524 = vmatprep.subr.bf16.mxu1 %v14550_v37 }
 0x263   : > { %v4180_v43 = vadd.f32 %v4091_v52, %v3960_v47  ;;  %v4177_v53 = vadd.f32 %v4048_v58, %v3957_v44  ;;  %6482 = vmatpush2.bf16.msra.mxu0 %v14545_v63  ;;  %v14559_v44 = vld [vmem:[%s18946_s3 + $0x274] ss:$8 sps:$4 sm:$0xff]  }
 0x264   : > { %v4093_v32 = vpop.f32.mrf.mxu1  ;;  %v4050_v34 = vpop.f32.mrf.mxu0  ;;  %6483 = vmatprep.subr.bf16.mxu0 %v14553_v30 }
 0x265   : > { %v4178_v2 = vadd.f32 %v4050_v34, %v3958_v27  ;;  %6525 = vmatpush2.bf16.msra.mxu1 %v14548_v9 }
 0x266   : > { %v4094_v38 = vpop.f32.mrf.mxu1  ;;  %v4052_v41 = vpop.f32.mrf.mxu0  ;;  %6576 = vmatprep.subr.bf16.mxu1 %v14556_v31 }
 0x267   : > { %6484 = vmatpush2.bf16.msra.mxu0 %v14551_v6 }
 0x268   : > { %v4171_v50 = vpop.f32.mrf.mxu1  ;;  %v4053_v46 = vpop.f32.mrf.mxu0  ;;  %6535 = vmatprep.subr.bf16.mxu0 %v14559_v44 }
 0x269   : > { %v4183_v25 = vadd.f32 %v4171_v50, %v3963_v7 }
 0x26a   : > { %v14153_v40 = vpop.f32.mrf.mxu1  ;;  %v4130_v56 = vpop.f32.mrf.mxu0 }
 0x26b   : > { %v4181_v36 = vadd.f32 %v4130_v56, %v3961_v45 }
 0x26c   : > { %v4174_v14 = vpop.f32.mrf.mxu1  ;;  %v4132_v11 = vpop.f32.mrf.mxu0 }
 0x26d   : > { %v4182_v47 = vadd.f32 %v4132_v11, %v3962_v54 }
 0x26e   : > { %v14154_v21 = vpop.f32.mrf.mxu1  ;;  %v4134_v5 = vpop.f32.mrf.mxu0 }
 0x270   : > { %v4309_v48 = vpop.f32.mrf.mxu1  ;;  %v4135_v27 = vpop.f32.mrf.mxu0 }
 0x271   : > { %v4399_v62 = vadd.f32 %v4309_v48, %v4179_v28 }
 0x272   : > { %v4311_v59 = vpop.f32.mrf.mxu1  ;;  %v4268_v8 = vpop.f32.mrf.mxu0 }
 0x273   : > { %v4400_v57 = vadd.f32 %v4311_v59, %v4180_v43  ;;  %v4397_v18 = vadd.f32 %v4268_v8, %v4177_v53 }
 0x274   : > { %v4313_v17 = vpop.f32.mrf.mxu1  ;;  %v4270_v0 = vpop.f32.mrf.mxu0 }
 0x275   : > { %v4398_v1 = vadd.f32 %v4270_v0, %v4178_v2 }
 0x276   : > { %v4314_v7 = vpop.f32.mrf.mxu1  ;;  %v4272_v61 = vpop.f32.mrf.mxu0 }
 0x278   : > { %v4391_v23 = vpop.f32.mrf.mxu1  ;;  %v4273_v26 = vpop.f32.mrf.mxu0 }
 0x279   : > { %v4403_v33 = vadd.f32 %v4391_v23, %v4183_v25 }
 0x27a   : > { %v14159_v20 = vpop.f32.mrf.mxu1  ;;  %v4350_v45 = vpop.f32.mrf.mxu0 }
 0x27b   : > { %v4401_v4 = vadd.f32 %v4350_v45, %v4181_v36 }
 0x27c   : > { %v4394_v60 = vpop.f32.mrf.mxu1  ;;  %v4352_v51 = vpop.f32.mrf.mxu0 }
 0x27d   : > { %v4402_v54 = vadd.f32 %v4352_v51, %v4182_v47 }
 0x27e   : > { %v14160_v29 = vpop.f32.mrf.mxu1  ;;  %v4354_v22 = vpop.f32.mrf.mxu0 }
 0x280   : > { %v4529_v12 = vpop.f32.mrf.mxu1  ;;  %v4355_v39 = vpop.f32.mrf.mxu0 }
 0x281   : > { %v4619_v19 = vadd.f32 %v4529_v12, %v4399_v62 }
 0x282   : > { %v4531_v3 = vpop.f32.mrf.mxu1  ;;  %v4488_v49 = vpop.f32.mrf.mxu0 }
 0x283   : > { %v4620_v10 = vadd.f32 %v4531_v3, %v4400_v57  ;;  %v4617_v28 = vadd.f32 %v4488_v49, %v4397_v18 }
 0x284   : > { %v4533_v35 = vpop.f32.mrf.mxu1  ;;  %v4490_v15 = vpop.f32.mrf.mxu0 }
 0x285   : > { %v4618_v52 = vadd.f32 %v4490_v15, %v4398_v1 }
 0x286   : > { %v4534_v58 = vpop.f32.mrf.mxu1  ;;  %v4492_v55 = vpop.f32.mrf.mxu0 }
 0x288   : > { %v4611_v43 = vpop.f32.mrf.mxu1  ;;  %v4493_v53 = vpop.f32.mrf.mxu0 }
 0x289   : > { %v4623_v42 = vadd.f32 %v4611_v43, %v4403_v33 }
 0x28a   : > { %v14165_v32 = vpop.f32.mrf.mxu1  ;;  %v4570_v34 = vpop.f32.mrf.mxu0 }
 0x28b   : > { %v4621_v2 = vadd.f32 %v4570_v34, %v4401_v4 }
 0x28c   : > { %v4614_v16 = vpop.f32.mrf.mxu1  ;;  %v4572_v38 = vpop.f32.mrf.mxu0 }
 0x28d   : > { %v4622_v41 = vadd.f32 %v4572_v38, %v4402_v54 }
 0x28e   : > { %v14166_v63 = vpop.f32.mrf.mxu1  ;;  %v4574_v37 = vpop.f32.mrf.mxu0 }
 0x290   : > { %v4749_v9 = vpop.f32.mrf.mxu1  ;;  %v4575_v50 = vpop.f32.mrf.mxu0 }
 0x291   : > { %v16911_v46 = vadd.f32 %v4749_v9, %v4619_v19 }
 0x292   : > { %v4751_v25 = vpop.f32.mrf.mxu1  ;;  %v4708_v30 = vpop.f32.mrf.mxu0 }
 0x293   : > { %v16913_v40 = vadd.f32 %v4751_v25, %v4620_v10  ;;  %v16915_v56 = vadd.f32 %v4708_v30, %v4617_v28 }
 0x294   : > { %v4753_v6 = vpop.f32.mrf.mxu1  ;;  %v4710_v31 = vpop.f32.mrf.mxu0 }
 0x295   : > { %v16917_v36 = vadd.f32 %v4710_v31, %v4618_v52 }
 0x296   : > { %v4754_v14 = vpop.f32.mrf.mxu1  ;;  %v4712_v11 = vpop.f32.mrf.mxu0 }
 0x298   : > { %v4831_v47 = vpop.f32.mrf.mxu1  ;;  %v4713_v44 = vpop.f32.mrf.mxu0 }
 0x299   : > { %v4843_v21 = vadd.f32 %v4831_v47, %v4623_v42 }
 0x29a   : > { %v14171_v5 = vpop.f32.mrf.mxu1  ;;  %v4790_v48 = vpop.f32.mrf.mxu0 }
 0x29b   : > { %v4841_v27 = vadd.f32 %v4790_v48, %v4621_v2 }
 0x29c   : > { %v4834_v62 = vpop.f32.mrf.mxu1  ;;  %v4792_v59 = vpop.f32.mrf.mxu0 }
 0x29d   : > { %v16919_v8 = vadd.f32 %v4792_v59, %v4622_v41 }
 0x29e   : > { %v14172_v57 = vpop.f32.mrf.mxu1  ;;  %v4794_v18 = vpop.f32.mrf.mxu0 }
 0x2a0   : > { %v16921_v17 = vpop.f32.mrf.mxu1  ;;  %v4795_v0 = vpop.f32.mrf.mxu0 }
 0x2a2   : > { %v16923_v1 = vpop.f32.mrf.mxu1  ;;  %v16925_v7 = vpop.f32.mrf.mxu0 }
 0x2a4   : > { %v4931_v61 = vpop.f32.mrf.mxu1  ;;  %v16927_v23 = vpop.f32.mrf.mxu0 }
 0x2a6   : > { %v4932_v26 = vpop.f32.mrf.mxu1  ;;  %v4890_v33 = vpop.f32.mrf.mxu0 }
 0x2a8   : > { %v5009_v20 = vpop.f32.mrf.mxu1  ;;  %v4891_v45 = vpop.f32.mrf.mxu0 }
 0x2a9   : > { %v5021_v4 = vadd.f32 %v5009_v20, %v4843_v21 }
 0x2aa   : > { %v14177_v60 = vpop.f32.mrf.mxu1  ;;  %v4968_v51 = vpop.f32.mrf.mxu0 }
 0x2ab   : > { %v5019_v54 = vadd.f32 %v4968_v51, %v4841_v27 }
 0x2ac   : > { %v5012_v29 = vpop.f32.mrf.mxu1  ;;  %v16929_v22 = vpop.f32.mrf.mxu0 }
 0x2ad   : > { %v5015_v29 = vadd.f32 %v16925_v7, %v16915_v56 }
 0x2ae   : > { %v14178_v12 = vpop.f32.mrf.mxu1  ;;  %v4972_v39 = vpop.f32.mrf.mxu0 }
 0x2b0   : > { %v5116_v19 = vpop.f32.mrf.mxu1  ;;  %v4973_v3 = vpop.f32.mrf.mxu0 }
 0x2b2   : > { %v5118_v49 = vpop.f32.mrf.mxu1  ;;  %v5075_v10 = vpop.f32.mrf.mxu0 }
 0x2b4   : > { %v5120_v28 = vpop.f32.mrf.mxu1  ;;  %v5077_v35 = vpop.f32.mrf.mxu0 }
 0x2b6   : > { %v5121_v15 = vpop.f32.mrf.mxu1  ;;  %v5079_v52 = vpop.f32.mrf.mxu0 }
 0x2b7   : > { %v5016_v15 = vadd.f32 %v16927_v23, %v16917_v36 }
 0x2b8   : > { %v5198_v58 = vpop.f32.mrf.mxu1  ;;  %v5080_v55 = vpop.f32.mrf.mxu0 }
 0x2b9   : > { %v16931_v43 = vadd.f32 %v5198_v58, %v5021_v4  ;;  %v5017_v4 = vadd.f32 %v16921_v17, %v16911_v46  ;;  %v5204_v58 = vadd.f32 %v5075_v10, %v5015_v29  ;;  %v14560_v29 = vld [vmem:[%s18946_s3 + $0x360] ss:$8 sps:$4 sm:$0xff]  }
 0x2ba   : > { %v14183_v53 = vpop.f32.mrf.mxu1  ;;  %v5157_v42 = vpop.f32.mrf.mxu0 }
 0x2bb   : > { %v5208_v32 = vadd.f32 %v5157_v42, %v5019_v54  ;;  %v5018_v54 = vadd.f32 %v16923_v1, %v16913_v40  ;;  %v5206_v12 = vadd.f32 %v5116_v19, %v5017_v4  ;;  %v5205_v53 = vadd.f32 %v5077_v35, %v5016_v15  ;;  %v16949_v1 = vpop.permute.xlu0 %5757 }
 0x2bc   : > { %v5201_v34 = vpop.f32.mrf.mxu1  ;;  %v16933_v2 = vpop.f32.mrf.mxu0 }
 0x2bd   : > { %v5207_v52 = vadd.f32 %v5118_v49, %v5018_v54 }
 0x2be   : > { %v14184_v16 = vpop.f32.mrf.mxu1  ;;  %v5161_v38 = vpop.f32.mrf.mxu0 }
 0x2c0   : > { %v5297_v41 = vpop.f32.mrf.mxu1  ;;  %v5162_v63 = vpop.f32.mrf.mxu0 }
 0x2c1   : > { %v5387_v55 = vadd.f32 %v5297_v41, %v5206_v12  ;;  %v14568_v12 = vld [vmem:[%s18946_s3 + $0x354] ss:$8 sps:$4 sm:$0xff]  }
 0x2c2   : > { %v5299_v37 = vpop.f32.mrf.mxu1  ;;  %v5256_v9 = vpop.f32.mrf.mxu0 }
 0x2c3   : > { %v5388_v42 = vadd.f32 %v5299_v37, %v5207_v52  ;;  %v5020_v37 = vadd.f32 %v16929_v22, %v16919_v8  ;;  %v14554_v22 = vld [vmem:[%s18946_s3 + $0x370] ss:$8 sps:$4 sm:$0xff]   ;;  %v14563_v52 = vld [vmem:[%s18946_s3 + $0x260] ss:$8 sps:$4 sm:$0xff]  }
 0x2c4   : > { %v5301_v50 = vpop.f32.mrf.mxu1  ;;  %v5258_v25 = vpop.f32.mrf.mxu0 }
 0x2c5   : > { %v5386_v19 = vadd.f32 %v5258_v25, %v5205_v53  ;;  %v14574_v53 = vld [vmem:[%s18946_s3 + $0x344] ss:$8 sps:$4 sm:$0xff]  }
 0x2c6   : > { %v5302_v30 = vpop.f32.mrf.mxu1  ;;  %v5260_v6 = vpop.f32.mrf.mxu0 }
 0x2c8   : > { %v16935_v31 = vpop.f32.mrf.mxu1  ;;  %v5261_v14 = vpop.f32.mrf.mxu0 }
 0x2ca   : > { %v14189_v11 = vpop.f32.mrf.mxu1  ;;  %v5338_v47 = vpop.f32.mrf.mxu0 }
 0x2cb   : > { %v5389_v44 = vadd.f32 %v5338_v47, %v5208_v32  ;;  %v5385_v32 = vadd.f32 %v5256_v9, %v5204_v58  ;;  %v5209_v47 = vadd.f32 %v16933_v2, %v5020_v37  ;;  %v14562_v2 = vld [vmem:[%s18946_s3 + $0x364] ss:$8 sps:$4 sm:$0xff]   ;;  %v14571_v58 = vld [vmem:[%s18946_s3 + $0x254] ss:$8 sps:$4 sm:$0xff]  }
 0x2cc   : > { %v5382_v21 = vpop.f32.mrf.mxu1  ;;  %v5340_v5 = vpop.f32.mrf.mxu0  ;;  %v14598_v37 = vld [vmem:[%s18946_s3 + $0x304] ss:$8 sps:$4 sm:$0xff]  }
 0x2ce   : > { %v14190_v48 = vpop.f32.mrf.mxu1  ;;  %v5342_v27 = vpop.f32.mrf.mxu0 }
 0x2d0   : > { %v5478_v62 = vpop.f32.mrf.mxu1  ;;  %v5343_v59 = vpop.f32.mrf.mxu0 }
 0x2d1   : > { %v5568_v40 = vadd.f32 %v5478_v62, %v5387_v55  ;;  %v5390_v59 = vadd.f32 %v5340_v5, %v5209_v47  ;;  %v14557_v5 = vld [vmem:[%s18946_s3 + $0x270] ss:$8 sps:$4 sm:$0xff]   ;;  %v14607_v47 = vld [vmem:[%s18946_s3 + $0x2f4] ss:$8 sps:$4 sm:$0xff]  }
 0x2d2   : > { %v5480_v57 = vpop.f32.mrf.mxu1  ;;  %v5437_v18 = vpop.f32.mrf.mxu0 }
 0x2d3   : > { %v5569_v34 = vadd.f32 %v5480_v57, %v5388_v42  ;;  %v5566_v16 = vadd.f32 %v5437_v18, %v5385_v32  ;;  %v14569_v32 = vld [vmem:[%s18946_s3 + $0x250] ss:$8 sps:$4 sm:$0xff]  }
 0x2d4   : > { %v5482_v0 = vpop.f32.mrf.mxu1  ;;  %v5439_v61 = vpop.f32.mrf.mxu0 }
 0x2d5   : > { %v5567_v36 = vadd.f32 %v5439_v61, %v5386_v19  ;;  %v14575_v19 = vld [vmem:[%s18946_s3 + $0x240] ss:$8 sps:$4 sm:$0xff]  }
 0x2d6   : > { %v5483_v26 = vpop.f32.mrf.mxu1  ;;  %v5441_v33 = vpop.f32.mrf.mxu0 }
 0x2d8   : > { %v16937_v20 = vpop.f32.mrf.mxu1  ;;  %v5442_v45 = vpop.f32.mrf.mxu0 }
 0x2da   : > { %v14195_v60 = vpop.f32.mrf.mxu1  ;;  %v5519_v51 = vpop.f32.mrf.mxu0 }
 0x2db   : > { %v16945_v39 = vadd.f32 %v5519_v51, %v5389_v44  ;;  %v14565_v60 = vld [vmem:[%s18946_s3 + $0x264] ss:$8 sps:$4 sm:$0xff]  }
 0x2dc   : > { %v5563_v3 = vpop.f32.mrf.mxu1  ;;  %v5521_v28 = vpop.f32.mrf.mxu0 }
 0x2dd   : > { %v5571_v26 = vadd.f32 %v5521_v28, %v5390_v59  ;;  %v14608_v59 = vld [vmem:[%s18946_s3 + $0x3e0] ss:$8 sps:$4 sm:$0xff]  }
 0x2de   : > { %v14196_v46 = vpop.f32.mrf.mxu1  ;;  %v5523_v17 = vpop.f32.mrf.mxu0 }
 0x2df   : > { %v14566_v17 = vld [vmem:[%s18946_s3 + $0x350] ss:$8 sps:$4 sm:$0xff]  }
 0x2e0   : > { %v5659_v56 = vpop.f32.mrf.mxu1  ;;  %v5524_v7 = vpop.f32.mrf.mxu0 }
 0x2e1   : > { %v5749_v38 = vadd.f32 %v5659_v56, %v5568_v40  ;;  %v14577_v40 = vld [vmem:[%s18946_s3 + $0x244] ss:$8 sps:$4 sm:$0xff]   ;;  %v14572_v56 = vld [vmem:[%s18946_s3 + $0x340] ss:$8 sps:$4 sm:$0xff]   ;;  %v14580_v7 = vld [vmem:[%s18946_s3 + $0x334] ss:$8 sps:$4 sm:$0xff]  }
 0x2e2   : > { %v5661_v63 = vpop.f32.mrf.mxu1  ;;  %v5618_v50 = vpop.f32.mrf.mxu0 }
 0x2e3   : > { %v5750_v23 = vadd.f32 %v5661_v63, %v5569_v34  ;;  %v5747_v49 = vadd.f32 %v5618_v50, %v5566_v16  ;;  %v5762_v10 = vadd.f32 %v16949_v1, %v5749_v38  ;;  %v14583_v34 = vld [vmem:[%s18946_s3 + $0x234] ss:$8 sps:$4 sm:$0xff]   ;;  %v14578_v16 = vld [vmem:[%s18946_s3 + $0x330] ss:$8 sps:$4 sm:$0xff]   ;;  %v5391_v38 = vadd.f32 %v16935_v31, %v16931_v43  ;;  %v14586_v63 = vld [vmem:[%s18946_s3 + $0x324] ss:$8 sps:$4 sm:$0xff]  }
 0x2e4   : > { %v5663_v41 = vpop.f32.mrf.mxu1  ;;  %v5620_v35 = vpop.f32.mrf.mxu0  ;;  %v14581_v50 = vld [vmem:[%s18946_s3 + $0x230] ss:$8 sps:$4 sm:$0xff]   ;;  %v14584_v43 = vld [vmem:[%s18946_s3 + $0x320] ss:$8 sps:$4 sm:$0xff]  }
 0x2e5   : > { %v5763_v9 = vadd.f32 %v16949_v1, %v5750_v23  ;;  %v5760_v30 = vadd.f32 %v16949_v1, %v5747_v49  ;;  %v5748_v25 = vadd.f32 %v5620_v35, %v5567_v36  ;;  %v5769_v11 = vmax.f32 %v5762_v10, 0.0  ;;  %v14589_v23 = vld [vmem:[%s18946_s3 + $0x224] ss:$8 sps:$4 sm:$0xff]   ;;  %v14592_v49 = vld [vmem:[%s18946_s3 + $0x314] ss:$8 sps:$4 sm:$0xff]  }
 0x2e6   : > { %v5664_v6 = vpop.f32.mrf.mxu1  ;;  %v5622_v14 = vpop.f32.mrf.mxu0  ;;  %v5572_v36 = vadd.f32 %v16937_v20, %v5391_v38  ;;  %v14587_v20 = vld [vmem:[%s18946_s3 + $0x220] ss:$8 sps:$4 sm:$0xff]   ;;  %v14595_v10 = vld [vmem:[%s18946_s3 + $0x214] ss:$8 sps:$4 sm:$0xff]   ;;  %v14590_v41 = vld [vmem:[%s18946_s3 + $0x310] ss:$8 sps:$4 sm:$0xff]  }
 0x2e7   : > { %v5770_v44 = vmax.f32 %v5763_v9, 0.0  ;;  %v5761_v21 = vadd.f32 %v16949_v1, %v5748_v25  ;;  %v5767_v48 = vmax.f32 %v5760_v30, 0.0  ;;  %v16967_v0 = vpack.c.bf16 %v5769_v11, %v5769_v11  ;;  %v14593_v9 = vld [vmem:[%s18946_s3 + $0x210] ss:$8 sps:$4 sm:$0xff]   ;;  %v14601_v30 = vld [vmem:[%s18946_s3 + $0x204] ss:$8 sps:$4 sm:$0xff]  }
 0x2e8   : > { %v16958_v27 = vpop.f32.mrf.mxu1  ;;  %v5623_v62 = vpop.f32.mrf.mxu0  ;;  %v14596_v25 = vld [vmem:[%s18946_s3 + $0x300] ss:$8 sps:$4 sm:$0xff]   ;;  %v14604_v14 = vld [vmem:[%s18946_s3 + $0x3f4] ss:$8 sps:$4 sm:$0xff]   ;;  %v14658_v38 = vld [vmem:[%s18946_s3 + $0x464] ss:$8 sps:$4 sm:$0xff]  }
 0x2e9   : > { %v16960_v57 = vpack.c.bf16 %v5770_v44, %v5770_v44  ;;  %v5768_v8 = vmax.f32 %v5761_v21, 0.0  ;;  %v16978_v45 = vpack.c.bf16 %v5767_v48, %v5767_v48  ;;  %v5753_v31 = vadd.f32 %v16958_v27, %v5572_v36  ;;  %v14599_v11 = vld [vmem:[%s18946_s3 + $0x200] ss:$8 sps:$4 sm:$0xff]   ;;  %v14602_v44 = vld [vmem:[%s18946_s3 + $0x3f0] ss:$8 sps:$4 sm:$0xff]  }
 0x2ea   : > { %v16965_v18 = vpop.f32.mrf.mxu0  ;;  %v14201_v61 = vpop.f32.mrf.mxu1  ;;  %v14610_v48 = vld [vmem:[%s18946_s3 + $0x3e4] ss:$8 sps:$4 sm:$0xff]   ;;  %v14605_v27 = vld [vmem:[%s18946_s3 + $0x2f0] ss:$8 sps:$4 sm:$0xff]  }
 0x2eb   : > { %v16972_v33 = vpack.c.bf16 %v5768_v8, %v5768_v8  ;;  %6526 = vmatprep.mubr.bf16.mxu1 %v16960_v57  ;;  %v5766_v35 = vadd.f32 %v16949_v1, %v5753_v31  ;;  %v14613_v62 = vld [vmem:[%s18946_s3 + $0x2e4] ss:$8 sps:$4 sm:$0xff]   ;;  %v14616_v8 = vld [vmem:[%s18946_s3 + $0x3d4] ss:$8 sps:$4 sm:$0xff]   ;;  %v14614_v61 = vld [vmem:[%s18946_s3 + $0x3d0] ss:$8 sps:$4 sm:$0xff]  }
 0x2ec   : > { %6527 = vmatmul.mubr.bf16.vlgmr.msra.gmra.mxu1 %v16967_v0  ;;  %v5702_v4 = vpop.f32.mrf.mxu0  ;;  %v5744_v51 = vpop.f32.mrf.mxu1  ;;  %v14661_v36 = vld [vmem:[%s18946_s3 + $0x4e4] ss:$8 sps:$4 sm:$0xff]   ;;  %v14659_v31 = vld [vmem:[%s18946_s3 + $0x4e0] ss:$8 sps:$4 sm:$0xff]  }
 0x2ed   : > { %6577 = vmatpush1.bf16.msra.mxu1 %v14554_v22  ;;  %v5752_v54 = vadd.f32 %v5702_v4, %v5571_v26  ;;  %6485 = vmatprep.mubr.bf16.mxu0 %v16972_v33  ;;  %v5773_v6 = vmax.f32 %v5766_v35, 0.0  ;;  %v14611_v22 = vld [vmem:[%s18946_s3 + $0x2e0] ss:$8 sps:$4 sm:$0xff]   ;;  %v14622_v26 = vld [vmem:[%s18946_s3 + $0x3c4] ss:$8 sps:$4 sm:$0xff]  }
 0x2ee   : > { %6486 = vmatmul.mubr.bf16.vlgmr.msra.gmra.mxu0 %v16978_v45  ;;  %6578 = vmatprep.subr.bf16.mxu1 %v14562_v2  ;;  %v14202_v3 = vpop.f32.mrf.mxu1  ;;  %v5704_v28 = vpop.f32.mrf.mxu0  ;;  %v14619_v2 = vld [vmem:[%s18946_s3 + $0x2d4] ss:$8 sps:$4 sm:$0xff]   ;;  %v14625_v4 = vld [vmem:[%s18946_s3 + $0x2c4] ss:$8 sps:$4 sm:$0xff]  }
 0x2ef   : > { %v5765_v15 = vadd.f32 %v16949_v1, %v5752_v54  ;;  %6536 = vmatpush1.bf16.msra.mxu0 %v14557_v5  ;;  %6608 = vmatprep.mubr.bf16.mxu1 %v18988_v24  ;;  %v17083_v21 = vpack.c.bf16 %v5773_v6, %v5773_v6  ;;  %v14617_v5 = vld [vmem:[%s18946_s3 + $0x2d0] ss:$8 sps:$4 sm:$0xff]   ;;  %v14628_v51 = vld [vmem:[%s18946_s3 + $0x3b4] ss:$8 sps:$4 sm:$0xff]   ;;  %v14623_v54 = vld [vmem:[%s18946_s3 + $0x2c0] ss:$8 sps:$4 sm:$0xff]  }
 0x2f0   : > { %6537 = vmatprep.subr.bf16.mxu0 %v14565_v60  ;;  %v5705_v55 = vpop.f32.mrf.mxu0  ;;  %v14620_v60 = vld [vmem:[%s18946_s3 + $0x3c0] ss:$8 sps:$4 sm:$0xff]   ;;  %v14634_v3 = vld [vmem:[%s18946_s3 + $0x3a4] ss:$8 sps:$4 sm:$0xff]   ;;  %v14629_v28 = vld [vmem:[%s18946_s3 + $0x2b0] ss:$8 sps:$4 sm:$0xff]  }
 0x2f1   : > { %v5772_v46 = vmax.f32 %v5765_v15, 0.0  ;;  %6579 = vmatpush1.bf16.msra.mxu1 %v14560_v29  ;;  %v14631_v29 = vld [vmem:[%s18946_s3 + $0x2b4] ss:$8 sps:$4 sm:$0xff]   ;;  %v14637_v15 = vld [vmem:[%s18946_s3 + $0x2a4] ss:$8 sps:$4 sm:$0xff]  }
 0x2f2   : > { %6580 = vmatprep.subr.bf16.mxu1 %v14568_v12  ;;  %v14626_v12 = vld [vmem:[%s18946_s3 + $0x3b0] ss:$8 sps:$4 sm:$0xff]   ;;  %v14635_v55 = vld [vmem:[%s18946_s3 + $0x2a0] ss:$8 sps:$4 sm:$0xff]   ;;  %v14673_v35 = vld [vmem:[%s18946_s3 + $0x4c4] ss:$8 sps:$4 sm:$0xff]  }
 0x2f3   : > { %v17006_v42 = vpack.c.bf16 %v5772_v46, %v5772_v46  ;;  %6538 = vmatpush1.bf16.msra.mxu0 %v14563_v52  ;;  %v14632_v52 = vld [vmem:[%s18946_s3 + $0x3a0] ss:$8 sps:$4 sm:$0xff]   ;;  %v5751_v46 = vadd.f32 %v16965_v18, %v16945_v39  ;;  %v14641_v39 = vld [vmem:[%s18946_s3 + $0x290] ss:$8 sps:$4 sm:$0xff]  }
 0x2f4   : > { %6539 = vmatprep.subr.bf16.mxu0 %v14571_v58  ;;  %v14640_v58 = vld [vmem:[%s18946_s3 + $0x394] ss:$8 sps:$4 sm:$0xff]   ;;  %v14674_v6 = vld [vmem:[%s18946_s3 + $0x430] ss:$8 sps:$4 sm:$0xff]  }
 0x2f5   : > { %6581 = vmatpush1.bf16.msra.mxu1 %v14566_v17  ;;  %6567 = vmatprep.mubr.bf16.mxu0 %v17006_v42  ;;  %v14643_v17 = vld [vmem:[%s18946_s3 + $0x294] ss:$8 sps:$4 sm:$0xff]   ;;  %v5764_v18 = vadd.f32 %v16949_v1, %v5751_v46  ;;  %v14647_v1 = vld [vmem:[%s18946_s3 + $0x280] ss:$8 sps:$4 sm:$0xff]   ;;  %v14721_v46 = vld [vmem:[%s18946_s3 + $0x544] ss:$8 sps:$4 sm:$0xff]  }
 0x2f6   : > { %6582 = vmatprep.subr.bf16.mxu1 %v14574_v53  ;;  %v14638_v53 = vld [vmem:[%s18946_s3 + $0x390] ss:$8 sps:$4 sm:$0xff]  }
 0x2f7   : > { %6540 = vmatpush1.bf16.msra.mxu0 %v14569_v32  ;;  %v14646_v32 = vld [vmem:[%s18946_s3 + $0x384] ss:$8 sps:$4 sm:$0xff]  }
 0x2f8   : > { %6541 = vmatprep.subr.bf16.mxu0 %v14577_v40  ;;  %v14649_v40 = vld [vmem:[%s18946_s3 + $0x284] ss:$8 sps:$4 sm:$0xff]  }
 0x2f9   : > { %6583 = vmatpush1.bf16.msra.mxu1 %v14572_v56  ;;  %v14644_v56 = vld [vmem:[%s18946_s3 + $0x380] ss:$8 sps:$4 sm:$0xff]  }
 0x2fa   : > { %6584 = vmatprep.subr.bf16.mxu1 %v14580_v7  ;;  %v14652_v7 = vld [vmem:[%s18946_s3 + $0x474] ss:$8 sps:$4 sm:$0xff]  }
 0x2fb   : > { %6542 = vmatpush1.bf16.msra.mxu0 %v14575_v19  ;;  %v5771_v19 = vmax.f32 %v5764_v18, 0.0  ;;  %v14722_v18 = vld [vmem:[%s18946_s3 + $0x5b0] ss:$8 sps:$4 sm:$0xff]  }
 0x2fc   : > { %6543 = vmatprep.subr.bf16.mxu0 %v14583_v34  ;;  %v14655_v34 = vld [vmem:[%s18946_s3 + $0x4f4] ss:$8 sps:$4 sm:$0xff]  }
 0x2fd   : > { %6585 = vmatpush1.bf16.msra.mxu1 %v14578_v16  ;;  %v14650_v16 = vld [vmem:[%s18946_s3 + $0x470] ss:$8 sps:$4 sm:$0xff]  }
 0x2fe   : > { %6586 = vmatprep.subr.bf16.mxu1 %v14586_v63  ;;  %v14653_v63 = vld [vmem:[%s18946_s3 + $0x4f0] ss:$8 sps:$4 sm:$0xff]  }
 0x2ff   : > { %6544 = vmatpush1.bf16.msra.mxu0 %v14581_v50  ;;  %v17192_v50 = vpack.c.bf16 %v5771_v19, %v5771_v19  ;;  %v14736_v19 = vld [vmem:[%s18946_s3 + $0x594] ss:$8 sps:$4 sm:$0xff]  }
 0x300   : > { %6545 = vmatprep.subr.bf16.mxu0 %v14589_v23  ;;  %v14656_v23 = vld [vmem:[%s18946_s3 + $0x460] ss:$8 sps:$4 sm:$0xff]  }
 0x301   : > { %6587 = vmatpush1.bf16.msra.mxu1 %v14584_v43  ;;  %v14664_v43 = vld [vmem:[%s18946_s3 + $0x454] ss:$8 sps:$4 sm:$0xff]  }
 0x302   : > { %6588 = vmatprep.subr.bf16.mxu1 %v14592_v49  ;;  %v14667_v49 = vld [vmem:[%s18946_s3 + $0x4d4] ss:$8 sps:$4 sm:$0xff]  }
 0x303   : > { %6546 = vmatpush1.bf16.msra.mxu0 %v14587_v20  ;;  %v14662_v20 = vld [vmem:[%s18946_s3 + $0x450] ss:$8 sps:$4 sm:$0xff]  }
 0x304   : > { %6547 = vmatprep.subr.bf16.mxu0 %v14595_v10  ;;  %v14670_v10 = vld [vmem:[%s18946_s3 + $0x444] ss:$8 sps:$4 sm:$0xff]  }
 0x305   : > { %6589 = vmatpush1.bf16.msra.mxu1 %v14590_v41  ;;  %v14665_v41 = vld [vmem:[%s18946_s3 + $0x4d0] ss:$8 sps:$4 sm:$0xff]  }
 0x306   : > { %6590 = vmatprep.subr.bf16.mxu1 %v14598_v37  ;;  %v14668_v37 = vld [vmem:[%s18946_s3 + $0x440] ss:$8 sps:$4 sm:$0xff]  }
 0x307   : > { %6548 = vmatpush1.bf16.msra.mxu0 %v14593_v9  ;;  %v14676_v9 = vld [vmem:[%s18946_s3 + $0x434] ss:$8 sps:$4 sm:$0xff]  }
 0x308   : > { %6549 = vmatprep.subr.bf16.mxu0 %v14601_v30  ;;  %v14671_v30 = vld [vmem:[%s18946_s3 + $0x4c0] ss:$8 sps:$4 sm:$0xff]  }
 0x309   : > { %6591 = vmatpush1.bf16.msra.mxu1 %v14596_v25  ;;  %v14679_v25 = vld [vmem:[%s18946_s3 + $0x4b4] ss:$8 sps:$4 sm:$0xff]  }
 0x30a   : > { %7290 = vmatprep.subr.bf16.mxu1 %v14604_v14  ;;  %v14682_v14 = vld [vmem:[%s18946_s3 + $0x424] ss:$8 sps:$4 sm:$0xff]  }
 0x30b   : > { %6550 = vmatpush1.bf16.msra.mxu0 %v14599_v11  ;;  %v14677_v11 = vld [vmem:[%s18946_s3 + $0x4b0] ss:$8 sps:$4 sm:$0xff]  }
 0x30c   : > { %6609 = vmatmul.mubr.bf16.vlgmr.msra.gmra.mxu1 %v17083_v21  ;;  %6551 = vmatprep.subr.bf16.mxu0 %v14607_v47  ;;  %v14685_v47 = vld [vmem:[%s18946_s3 + $0x4a4] ss:$8 sps:$4 sm:$0xff]  }
 0x30d   : > { %7291 = vmatpush1.bf16.msra.mxu1 %v14602_v44  ;;  %7322 = vmatprep.mubr.bf16.mxu1 %v16972_v33  ;;  %v14680_v44 = vld [vmem:[%s18946_s3 + $0x420] ss:$8 sps:$4 sm:$0xff]  }
 0x30e   : > { %7292 = vmatprep.subr.bf16.mxu1 %v14610_v48  ;;  %v14688_v48 = vld [vmem:[%s18946_s3 + $0x414] ss:$8 sps:$4 sm:$0xff]  }
 0x30f   : > { %6552 = vmatpush2.bf16.msra.mxu0 %v14605_v27  ;;  %v14683_v27 = vld [vmem:[%s18946_s3 + $0x4a0] ss:$8 sps:$4 sm:$0xff]  }
 0x310   : > { %6553 = vmatprep.subr.bf16.mxu0 %v14613_v62  ;;  %v14691_v62 = vld [vmem:[%s18946_s3 + $0x494] ss:$8 sps:$4 sm:$0xff]  }
 0x311   : > { %7293 = vmatpush1.bf16.msra.mxu1 %v14608_v59  ;;  %v14686_v59 = vld [vmem:[%s18946_s3 + $0x410] ss:$8 sps:$4 sm:$0xff]  }
 0x312   : > { %7294 = vmatprep.subr.bf16.mxu1 %v14616_v8  ;;  %v14694_v8 = vld [vmem:[%s18946_s3 + $0x404] ss:$8 sps:$4 sm:$0xff]  }
 0x313   : > { %6554 = vmatpush2.bf16.msra.mxu0 %v14611_v22  ;;  %v14689_v22 = vld [vmem:[%s18946_s3 + $0x490] ss:$8 sps:$4 sm:$0xff]  }
 0x314   : > { %6555 = vmatprep.subr.bf16.mxu0 %v14619_v2  ;;  %v14697_v2 = vld [vmem:[%s18946_s3 + $0x484] ss:$8 sps:$4 sm:$0xff]  }
 0x315   : > { %7295 = vmatpush1.bf16.msra.mxu1 %v14614_v61  ;;  %v14692_v61 = vld [vmem:[%s18946_s3 + $0x400] ss:$8 sps:$4 sm:$0xff]  }
 0x316   : > { %7296 = vmatprep.subr.bf16.mxu1 %v14622_v26  ;;  %v14700_v26 = vld [vmem:[%s18946_s3 + $0x5f4] ss:$8 sps:$4 sm:$0xff]  }
 0x317   : > { %6556 = vmatpush2.bf16.msra.mxu0 %v14617_v5  ;;  %v14695_v5 = vld [vmem:[%s18946_s3 + $0x480] ss:$8 sps:$4 sm:$0xff]  }
 0x318   : > { %6557 = vmatprep.subr.bf16.mxu0 %v14625_v4  ;;  %v14703_v4 = vld [vmem:[%s18946_s3 + $0x574] ss:$8 sps:$4 sm:$0xff]  }
 0x319   : > { %7297 = vmatpush1.bf16.msra.mxu1 %v14620_v60  ;;  %v14698_v60 = vld [vmem:[%s18946_s3 + $0x5f0] ss:$8 sps:$4 sm:$0xff]  }
 0x31a   : > { %7298 = vmatprep.subr.bf16.mxu1 %v14628_v51  ;;  %v14706_v51 = vld [vmem:[%s18946_s3 + $0x5e4] ss:$8 sps:$4 sm:$0xff]  }
 0x31b   : > { %6558 = vmatpush2.bf16.msra.mxu0 %v14623_v54  ;;  %v14701_v54 = vld [vmem:[%s18946_s3 + $0x570] ss:$8 sps:$4 sm:$0xff]  }
 0x31c   : > { %6559 = vmatprep.subr.bf16.mxu0 %v14631_v29  ;;  %v14709_v29 = vld [vmem:[%s18946_s3 + $0x564] ss:$8 sps:$4 sm:$0xff]  }
 0x31d   : > { %7299 = vmatpush1.bf16.msra.mxu1 %v14626_v12  ;;  %v14704_v12 = vld [vmem:[%s18946_s3 + $0x5e0] ss:$8 sps:$4 sm:$0xff]  }
 0x31e   : > { %7300 = vmatprep.subr.bf16.mxu1 %v14634_v3  ;;  %v14712_v3 = vld [vmem:[%s18946_s3 + $0x5d4] ss:$8 sps:$4 sm:$0xff]  }
 0x31f   : > { %6560 = vmatpush2.bf16.msra.mxu0 %v14629_v28  ;;  %v14707_v28 = vld [vmem:[%s18946_s3 + $0x560] ss:$8 sps:$4 sm:$0xff]  }
 0x320   : > { %6561 = vmatprep.subr.bf16.mxu0 %v14637_v15  ;;  %v14715_v15 = vld [vmem:[%s18946_s3 + $0x554] ss:$8 sps:$4 sm:$0xff]  }
 0x321   : > { %7301 = vmatpush1.bf16.msra.mxu1 %v14632_v52  ;;  %v14710_v52 = vld [vmem:[%s18946_s3 + $0x5d0] ss:$8 sps:$4 sm:$0xff]  }
 0x322   : > { %7302 = vmatprep.subr.bf16.mxu1 %v14640_v58  ;;  %v14718_v58 = vld [vmem:[%s18946_s3 + $0x5c4] ss:$8 sps:$4 sm:$0xff]  }
 0x323   : > { %6562 = vmatpush2.bf16.msra.mxu0 %v14635_v55  ;;  %v14713_v55 = vld [vmem:[%s18946_s3 + $0x550] ss:$8 sps:$4 sm:$0xff]  }
 0x324   : > { %6563 = vmatprep.subr.bf16.mxu0 %v14643_v17  ;;  %v14716_v17 = vld [vmem:[%s18946_s3 + $0x5c0] ss:$8 sps:$4 sm:$0xff]  }
 0x325   : > { %7303 = vmatpush1.bf16.msra.mxu1 %v14638_v53  ;;  %v14724_v53 = vld [vmem:[%s18946_s3 + $0x5b4] ss:$8 sps:$4 sm:$0xff]  }
 0x326   : > { %7304 = vmatprep.subr.bf16.mxu1 %v14646_v32  ;;  %v14719_v32 = vld [vmem:[%s18946_s3 + $0x540] ss:$8 sps:$4 sm:$0xff]  }
 0x327   : > { %6564 = vmatpush2.bf16.msra.mxu0 %v14641_v39  ;;  %v14727_v39 = vld [vmem:[%s18946_s3 + $0x534] ss:$8 sps:$4 sm:$0xff]  }
 0x328   : > { %6565 = vmatprep.subr.bf16.mxu0 %v14649_v40  ;;  %v14730_v40 = vld [vmem:[%s18946_s3 + $0x5a4] ss:$8 sps:$4 sm:$0xff]  }
 0x329   : > { %7305 = vmatpush1.bf16.msra.mxu1 %v14644_v56  ;;  %v14725_v56 = vld [vmem:[%s18946_s3 + $0x530] ss:$8 sps:$4 sm:$0xff]  }
 0x32a   : > { %7306 = vmatprep.subr.bf16.mxu1 %v14652_v7  ;;  %v14733_v7 = vld [vmem:[%s18946_s3 + $0x524] ss:$8 sps:$4 sm:$0xff]  }
 0x32b   : > { %6566 = vmatpush2.bf16.msra.mxu0 %v14647_v1  ;;  %v14728_v1 = vld [vmem:[%s18946_s3 + $0x5a0] ss:$8 sps:$4 sm:$0xff]  }
 0x32c   : > { %7331 = vmatprep.subr.bf16.mxu0 %v14655_v34  ;;  %v14731_v34 = vld [vmem:[%s18946_s3 + $0x520] ss:$8 sps:$4 sm:$0xff]  }
 0x32d   : > { %7307 = vmatpush2.bf16.msra.mxu1 %v14650_v16  ;;  %v14739_v16 = vld [vmem:[%s18946_s3 + $0x514] ss:$8 sps:$4 sm:$0xff]  }
 0x32e   : > { %6568 = vmatmul.mubr.bf16.vlgmr.msra.gmra.mxu0 %v17192_v50  ;;  %7308 = vmatprep.subr.bf16.mxu1 %v14658_v38  ;;  %v14734_v38 = vld [vmem:[%s18946_s3 + $0x590] ss:$8 sps:$4 sm:$0xff]  }
 0x32f   : > { %7332 = vmatpush1.bf16.msra.mxu0 %v14653_v63  ;;  %7363 = vmatprep.mubr.bf16.mxu0 %v16960_v57  ;;  %v14742_v63 = vld [vmem:[%s18946_s3 + $0x584] ss:$8 sps:$4 sm:$0xff]  }
 0x330   : > { %7333 = vmatprep.subr.bf16.mxu0 %v14661_v36  ;;  %v14737_v36 = vld [vmem:[%s18946_s3 + $0x510] ss:$8 sps:$4 sm:$0xff]  }
 0x331   : > { %7309 = vmatpush2.bf16.msra.mxu1 %v14656_v23  ;;  %v14745_v23 = vld [vmem:[%s18946_s3 + $0x504] ss:$8 sps:$4 sm:$0xff]  }
 0x332   : > { %7310 = vmatprep.subr.bf16.mxu1 %v14664_v43  ;;  %v14740_v43 = vld [vmem:[%s18946_s3 + $0x580] ss:$8 sps:$4 sm:$0xff]  }
 0x333   : > { %7334 = vmatpush1.bf16.msra.mxu0 %v14659_v31  ;;  %v14748_v31 = vld [vmem:[%s18946_s3 + $0x674] ss:$8 sps:$4 sm:$0xff]  }
 0x334   : > { %7335 = vmatprep.subr.bf16.mxu0 %v14667_v49  ;;  %v14743_v49 = vld [vmem:[%s18946_s3 + $0x500] ss:$8 sps:$4 sm:$0xff]  }
 0x335   : > { %7311 = vmatpush2.bf16.msra.mxu1 %v14662_v20  ;;  %v14751_v20 = vld [vmem:[%s18946_s3 + $0x6f4] ss:$8 sps:$4 sm:$0xff]  }
 0x336   : > { %7312 = vmatprep.subr.bf16.mxu1 %v14670_v10  ;;  %v14746_v10 = vld [vmem:[%s18946_s3 + $0x670] ss:$8 sps:$4 sm:$0xff]  }
 0x337   : > { %7336 = vmatpush1.bf16.msra.mxu0 %v14665_v41  ;;  %v14754_v41 = vld [vmem:[%s18946_s3 + $0x664] ss:$8 sps:$4 sm:$0xff]  }
 0x338   : > { %7337 = vmatprep.subr.bf16.mxu0 %v14673_v35  ;;  %v14749_v35 = vld [vmem:[%s18946_s3 + $0x6f0] ss:$8 sps:$4 sm:$0xff]  }
 0x339   : > { %7313 = vmatpush2.bf16.msra.mxu1 %v14668_v37  ;;  %v14757_v37 = vld [vmem:[%s18946_s3 + $0x6e4] ss:$8 sps:$4 sm:$0xff]  }
 0x33a   : > { %7314 = vmatprep.subr.bf16.mxu1 %v14676_v9  ;;  %v14752_v9 = vld [vmem:[%s18946_s3 + $0x660] ss:$8 sps:$4 sm:$0xff]  }
 0x33b   : > { %7338 = vmatpush1.bf16.msra.mxu0 %v14671_v30  ;;  %v14760_v30 = vld [vmem:[%s18946_s3 + $0x654] ss:$8 sps:$4 sm:$0xff]  }
 0x33c   : > { %7339 = vmatprep.subr.bf16.mxu0 %v14679_v25  ;;  %v14755_v25 = vld [vmem:[%s18946_s3 + $0x6e0] ss:$8 sps:$4 sm:$0xff]  }
 0x33d   : > { %7315 = vmatpush2.bf16.msra.mxu1 %v14674_v6  ;;  %v14763_v6 = vld [vmem:[%s18946_s3 + $0x6d4] ss:$8 sps:$4 sm:$0xff]  }
 0x33e   : > { %7316 = vmatprep.subr.bf16.mxu1 %v14682_v14  ;;  %v14758_v14 = vld [vmem:[%s18946_s3 + $0x650] ss:$8 sps:$4 sm:$0xff]  }
 0x33f   : > { %7340 = vmatpush1.bf16.msra.mxu0 %v14677_v11  ;;  %v14766_v11 = vld [vmem:[%s18946_s3 + $0x644] ss:$8 sps:$4 sm:$0xff]  }
 0x340   : > { %7341 = vmatprep.subr.bf16.mxu0 %v14685_v47  ;;  %v14761_v47 = vld [vmem:[%s18946_s3 + $0x6d0] ss:$8 sps:$4 sm:$0xff]  }
 0x341   : > { %7317 = vmatpush2.bf16.msra.mxu1 %v14680_v44  ;;  %v14769_v44 = vld [vmem:[%s18946_s3 + $0x6c4] ss:$8 sps:$4 sm:$0xff]  }
 0x342   : > { %7318 = vmatprep.subr.bf16.mxu1 %v14688_v48  ;;  %v14764_v48 = vld [vmem:[%s18946_s3 + $0x640] ss:$8 sps:$4 sm:$0xff]  }
 0x343   : > { %7342 = vmatpush1.bf16.msra.mxu0 %v14683_v27  ;;  %v14772_v27 = vld [vmem:[%s18946_s3 + $0x634] ss:$8 sps:$4 sm:$0xff]  }
 0x344   : > { %7343 = vmatprep.subr.bf16.mxu0 %v14691_v62  ;;  %v14767_v62 = vld [vmem:[%s18946_s3 + $0x6c0] ss:$8 sps:$4 sm:$0xff]  }
 0x345   : > { %7319 = vmatpush2.bf16.msra.mxu1 %v14686_v59  ;;  %v14775_v59 = vld [vmem:[%s18946_s3 + $0x6b4] ss:$8 sps:$4 sm:$0xff]  }
 0x346   : > { %7320 = vmatprep.subr.bf16.mxu1 %v14694_v8  ;;  %v14770_v8 = vld [vmem:[%s18946_s3 + $0x630] ss:$8 sps:$4 sm:$0xff]  }
 0x347   : > { %7344 = vmatpush1.bf16.msra.mxu0 %v14689_v22  ;;  %v14778_v22 = vld [vmem:[%s18946_s3 + $0x624] ss:$8 sps:$4 sm:$0xff]  }
 0x348   : > { %7345 = vmatprep.subr.bf16.mxu0 %v14697_v2  ;;  %v14773_v2 = vld [vmem:[%s18946_s3 + $0x6b0] ss:$8 sps:$4 sm:$0xff]  }
 0x349   : > { %7321 = vmatpush2.bf16.msra.mxu1 %v14692_v61  ;;  %v14781_v61 = vld [vmem:[%s18946_s3 + $0x6a4] ss:$8 sps:$4 sm:$0xff]  }
 0x34a   : > { %7372 = vmatprep.subr.bf16.mxu1 %v14700_v26  ;;  %v14776_v26 = vld [vmem:[%s18946_s3 + $0x620] ss:$8 sps:$4 sm:$0xff]  }
 0x34b   : > { %7346 = vmatpush1.bf16.msra.mxu0 %v14695_v5  ;;  %v14784_v5 = vld [vmem:[%s18946_s3 + $0x614] ss:$8 sps:$4 sm:$0xff]  }
 0x34c   : > { %7323 = vmatmul.mubr.bf16.vlgmr.msra.gmra.mxu1 %v16978_v45  ;;  %7347 = vmatprep.subr.bf16.mxu0 %v14703_v4  ;;  %v14779_v4 = vld [vmem:[%s18946_s3 + $0x6a0] ss:$8 sps:$4 sm:$0xff]  }
 0x34d   : > { %7373 = vmatpush1.bf16.msra.mxu1 %v14698_v60  ;;  %7404 = vmatprep.mubr.bf16.mxu1 %v17006_v42  ;;  %v14787_v60 = vld [vmem:[%s18946_s3 + $0x694] ss:$8 sps:$4 sm:$0xff]  }
 0x34e   : > { %7374 = vmatprep.subr.bf16.mxu1 %v14706_v51  ;;  %v14782_v51 = vld [vmem:[%s18946_s3 + $0x610] ss:$8 sps:$4 sm:$0xff]  }
 0x34f   : > { %7348 = vmatpush2.bf16.msra.mxu0 %v14701_v54  ;;  %v14790_v54 = vld [vmem:[%s18946_s3 + $0x604] ss:$8 sps:$4 sm:$0xff]  }
 0x350   : > { %7349 = vmatprep.subr.bf16.mxu0 %v14709_v29  ;;  %v14785_v29 = vld [vmem:[%s18946_s3 + $0x690] ss:$8 sps:$4 sm:$0xff]  }
 0x351   : > { %7375 = vmatpush1.bf16.msra.mxu1 %v14704_v12  ;;  %v14793_v12 = vld [vmem:[%s18946_s3 + $0x684] ss:$8 sps:$4 sm:$0xff]  }
 0x352   : > { %7376 = vmatprep.subr.bf16.mxu1 %v14712_v3  ;;  %v14788_v3 = vld [vmem:[%s18946_s3 + $0x600] ss:$8 sps:$4 sm:$0xff]  }
 0x353   : > { %7350 = vmatpush2.bf16.msra.mxu0 %v14707_v28  ;;  %v14796_v28 = vld [vmem:[%s18946_s3 + $0x874] ss:$8 sps:$4 sm:$0xff]  }
 0x354   : > { %7351 = vmatprep.subr.bf16.mxu0 %v14715_v15  ;;  %v14791_v15 = vld [vmem:[%s18946_s3 + $0x680] ss:$8 sps:$4 sm:$0xff]  }
 0x355   : > { %7377 = vmatpush1.bf16.msra.mxu1 %v14710_v52  ;;  %v14799_v52 = vld [vmem:[%s18946_s3 + $0x774] ss:$8 sps:$4 sm:$0xff]  }
 0x356   : > { %7378 = vmatprep.subr.bf16.mxu1 %v14718_v58  ;;  %v14794_v58 = vld [vmem:[%s18946_s3 + $0x870] ss:$8 sps:$4 sm:$0xff]  }
 0x357   : > { %7352 = vmatpush2.bf16.msra.mxu0 %v14713_v55  ;;  %v14802_v55 = vld [vmem:[%s18946_s3 + $0x864] ss:$8 sps:$4 sm:$0xff]  }
 0x358   : > { %7353 = vmatprep.subr.bf16.mxu0 %v14721_v46  ;;  %v14797_v46 = vld [vmem:[%s18946_s3 + $0x770] ss:$8 sps:$4 sm:$0xff]  }
 0x359   : > { %7379 = vmatpush1.bf16.msra.mxu1 %v14716_v17  ;;  %v14805_v17 = vld [vmem:[%s18946_s3 + $0x764] ss:$8 sps:$4 sm:$0xff]  }
 0x35a   : > { %7380 = vmatprep.subr.bf16.mxu1 %v14724_v53  ;;  %v14800_v53 = vld [vmem:[%s18946_s3 + $0x860] ss:$8 sps:$4 sm:$0xff]  }
 0x35b   : > { %7354 = vmatpush2.bf16.msra.mxu0 %v14719_v32  ;;  %v14808_v32 = vld [vmem:[%s18946_s3 + $0x854] ss:$8 sps:$4 sm:$0xff]  }
 0x35c   : > { %7355 = vmatprep.subr.bf16.mxu0 %v14727_v39  ;;  %v14803_v39 = vld [vmem:[%s18946_s3 + $0x760] ss:$8 sps:$4 sm:$0xff]  }
 0x35d   : > { %7381 = vmatpush1.bf16.msra.mxu1 %v14722_v18  ;;  %v14811_v18 = vld [vmem:[%s18946_s3 + $0x754] ss:$8 sps:$4 sm:$0xff]  }
 0x35e   : > { %7382 = vmatprep.subr.bf16.mxu1 %v14730_v40  ;;  %v14806_v40 = vld [vmem:[%s18946_s3 + $0x850] ss:$8 sps:$4 sm:$0xff]  }
 0x35f   : > { %7356 = vmatpush2.bf16.msra.mxu0 %v14725_v56  ;;  %v14814_v56 = vld [vmem:[%s18946_s3 + $0x844] ss:$8 sps:$4 sm:$0xff]  }
 0x360   : > { %7357 = vmatprep.subr.bf16.mxu0 %v14733_v7  ;;  %v14809_v7 = vld [vmem:[%s18946_s3 + $0x750] ss:$8 sps:$4 sm:$0xff]  }
 0x361   : > { %7383 = vmatpush1.bf16.msra.mxu1 %v14728_v1  ;;  %v14817_v1 = vld [vmem:[%s18946_s3 + $0x744] ss:$8 sps:$4 sm:$0xff]  }
 0x362   : > { %7384 = vmatprep.subr.bf16.mxu1 %v14736_v19  ;;  %v14812_v19 = vld [vmem:[%s18946_s3 + $0x840] ss:$8 sps:$4 sm:$0xff]  }
 0x363   : > { %7358 = vmatpush2.bf16.msra.mxu0 %v14731_v34  ;;  %v14820_v34 = vld [vmem:[%s18946_s3 + $0x834] ss:$8 sps:$4 sm:$0xff]  }
 0x364   : > { %7359 = vmatprep.subr.bf16.mxu0 %v14739_v16  ;;  %v14815_v16 = vld [vmem:[%s18946_s3 + $0x740] ss:$8 sps:$4 sm:$0xff]  }
 0x365   : > { %7385 = vmatpush1.bf16.msra.mxu1 %v14734_v38  ;;  %v14823_v38 = vld [vmem:[%s18946_s3 + $0x734] ss:$8 sps:$4 sm:$0xff]  }
 0x366   : > { %7386 = vmatprep.subr.bf16.mxu1 %v14742_v63  ;;  %v14818_v63 = vld [vmem:[%s18946_s3 + $0x830] ss:$8 sps:$4 sm:$0xff]  }
 0x367   : > { %7360 = vmatpush2.bf16.msra.mxu0 %v14737_v36  ;;  %v14826_v36 = vld [vmem:[%s18946_s3 + $0x824] ss:$8 sps:$4 sm:$0xff]  }
 0x368   : > { %7361 = vmatprep.subr.bf16.mxu0 %v14745_v23  ;;  %v14821_v23 = vld [vmem:[%s18946_s3 + $0x730] ss:$8 sps:$4 sm:$0xff]  }
 0x369   : > { %7387 = vmatpush1.bf16.msra.mxu1 %v14740_v43  ;;  %v14829_v43 = vld [vmem:[%s18946_s3 + $0x724] ss:$8 sps:$4 sm:$0xff]  }
 0x36a   : > { %7388 = vmatprep.subr.bf16.mxu1 %v14748_v31  ;;  %v14824_v31 = vld [vmem:[%s18946_s3 + $0x820] ss:$8 sps:$4 sm:$0xff]  }
 0x36b   : > { %7362 = vmatpush2.bf16.msra.mxu0 %v14743_v49  ;;  %v14832_v49 = vld [vmem:[%s18946_s3 + $0x814] ss:$8 sps:$4 sm:$0xff]  }
 0x36c   : > { %7413 = vmatprep.subr.bf16.mxu0 %v14751_v20  ;;  %v14827_v20 = vld [vmem:[%s18946_s3 + $0x720] ss:$8 sps:$4 sm:$0xff]  }
 0x36d   : > { %7389 = vmatpush2.bf16.msra.mxu1 %v14746_v10  ;;  %v14835_v10 = vld [vmem:[%s18946_s3 + $0x714] ss:$8 sps:$4 sm:$0xff]  }
 0x36e   : > { %7364 = vmatmul.mubr.bf16.vlgmr.msra.gmra.mxu0 %v16967_v0  ;;  %7390 = vmatprep.subr.bf16.mxu1 %v14754_v41  ;;  %v14830_v41 = vld [vmem:[%s18946_s3 + $0x810] ss:$8 sps:$4 sm:$0xff]  }
 0x36f   : > { %7414 = vmatpush1.bf16.msra.mxu0 %v14749_v35  ;;  %7445 = vmatprep.mubr.bf16.mxu0 %v18988_v24  ;;  %v14838_v35 = vld [vmem:[%s18946_s3 + $0x804] ss:$8 sps:$4 sm:$0xff]  }
 0x370   : > { %7415 = vmatprep.subr.bf16.mxu0 %v14757_v37  ;;  %v14833_v37 = vld [vmem:[%s18946_s3 + $0x710] ss:$8 sps:$4 sm:$0xff]  }
 0x371   : > { %7391 = vmatpush2.bf16.msra.mxu1 %v14752_v9  ;;  %v14841_v9 = vld [vmem:[%s18946_s3 + $0x704] ss:$8 sps:$4 sm:$0xff]  }
 0x372   : > { %7392 = vmatprep.subr.bf16.mxu1 %v14760_v30  ;;  %v14836_v30 = vld [vmem:[%s18946_s3 + $0x800] ss:$8 sps:$4 sm:$0xff]  }
 0x373   : > { %7416 = vmatpush1.bf16.msra.mxu0 %v14755_v25  ;;  %v14844_v25 = vld [vmem:[%s18946_s3 + $0x8f4] ss:$8 sps:$4 sm:$0xff]  }
 0x374   : > { %7417 = vmatprep.subr.bf16.mxu0 %v14763_v6  ;;  %v14839_v6 = vld [vmem:[%s18946_s3 + $0x700] ss:$8 sps:$4 sm:$0xff]  }
 0x375   : > { %7393 = vmatpush2.bf16.msra.mxu1 %v14758_v14  ;;  %v14847_v14 = vld [vmem:[%s18946_s3 + $0x7f4] ss:$8 sps:$4 sm:$0xff]  }
 0x376   : > { %7394 = vmatprep.subr.bf16.mxu1 %v14766_v11  ;;  %v14842_v11 = vld [vmem:[%s18946_s3 + $0x8f0] ss:$8 sps:$4 sm:$0xff]  }
 0x377   : > { %7418 = vmatpush1.bf16.msra.mxu0 %v14761_v47  ;;  %v14850_v47 = vld [vmem:[%s18946_s3 + $0x8e4] ss:$8 sps:$4 sm:$0xff]  }
 0x378   : > { %7419 = vmatprep.subr.bf16.mxu0 %v14769_v44  ;;  %v14845_v44 = vld [vmem:[%s18946_s3 + $0x7f0] ss:$8 sps:$4 sm:$0xff]  }
 0x379   : > { %7395 = vmatpush2.bf16.msra.mxu1 %v14764_v48 }
 0x37a   : > { %7396 = vmatprep.subr.bf16.mxu1 %v14772_v27  ;;  %v14853_v27 = vld [vmem:[%s18946_s3 + $0x7e4] ss:$8 sps:$4 sm:$0xff]  }
 0x37b   : > { %7420 = vmatpush1.bf16.msra.mxu0 %v14767_v62  ;;  %v14848_v62 = vld [vmem:[%s18946_s3 + $0x8e0] ss:$8 sps:$4 sm:$0xff]  }
 0x37c   : > { %7421 = vmatprep.subr.bf16.mxu0 %v14775_v59 }
 0x37d   : > { %7397 = vmatpush2.bf16.msra.mxu1 %v14770_v8 }
 0x37e   : > { %7398 = vmatprep.subr.bf16.mxu1 %v14778_v22  ;;  %v14856_v22 = vld [vmem:[%s18946_s3 + $0x8d4] ss:$8 sps:$4 sm:$0xff]  }
 0x37f   : > { %7422 = vmatpush1.bf16.msra.mxu0 %v14773_v2 }
 0x380   : > { %7423 = vmatprep.subr.bf16.mxu0 %v14781_v61  ;;  %v14851_v61 = vld [vmem:[%s18946_s3 + $0x7e0] ss:$8 sps:$4 sm:$0xff]  }
 0x381   : > { %7399 = vmatpush2.bf16.msra.mxu1 %v14776_v26 }
 0x382   : > { %7400 = vmatprep.subr.bf16.mxu1 %v14784_v5 }
 0x383   : > { %7424 = vmatpush1.bf16.msra.mxu0 %v14779_v4  ;;  %v14859_v4 = vld [vmem:[%s18946_s3 + $0x7d4] ss:$8 sps:$4 sm:$0xff]  }
 0x384   : > { %7425 = vmatprep.subr.bf16.mxu0 %v14787_v60 }
 0x385   : > { %7401 = vmatpush2.bf16.msra.mxu1 %v14782_v51  ;;  %v14854_v51 = vld [vmem:[%s18946_s3 + $0x8d0] ss:$8 sps:$4 sm:$0xff]  }
 0x386   : > { %7402 = vmatprep.subr.bf16.mxu1 %v14790_v54 }
 0x387   : > { %7426 = vmatpush1.bf16.msra.mxu0 %v14785_v29 }
 0x388   : > { %7427 = vmatprep.subr.bf16.mxu0 %v14793_v12  ;;  %v14862_v12 = vld [vmem:[%s18946_s3 + $0x8c4] ss:$8 sps:$4 sm:$0xff]  }
 0x389   : > { %7403 = vmatpush2.bf16.msra.mxu1 %v14788_v3  ;;  %v14857_v3 = vld [vmem:[%s18946_s3 + $0x7d0] ss:$8 sps:$4 sm:$0xff]  }
 0x38a   : > { %8170 = vmatprep.subr.bf16.mxu1 %v14796_v28 }
 0x38b   : > { %7428 = vmatpush1.bf16.msra.mxu0 %v14791_v15  ;;  %v14865_v15 = vld [vmem:[%s18946_s3 + $0x7c4] ss:$8 sps:$4 sm:$0xff]  }
 0x38c   : > { %7405 = vmatmul.mubr.bf16.vlgmr.msra.gmra.mxu1 %v17192_v50  ;;  %8129 = vmatprep.subr.bf16.mxu0 %v14799_v52  ;;  %v14860_v52 = vld [vmem:[%s18946_s3 + $0x8c0] ss:$8 sps:$4 sm:$0xff]  }
 0x38d   : > { %8171 = vmatpush1.bf16.msra.mxu1 %v14794_v58  ;;  %8202 = vmatprep.mubr.bf16.mxu1 %v16960_v57  ;;  %v14868_v58 = vld [vmem:[%s18946_s3 + $0x8b4] ss:$8 sps:$4 sm:$0xff]  }
 0x38e   : > { %7446 = vmatmul.mubr.bf16.vlgmr.msra.gmra.mxu0 %v17083_v21  ;;  %8172 = vmatprep.subr.bf16.mxu1 %v14802_v55  ;;  %v14863_v55 = vld [vmem:[%s18946_s3 + $0x7c0] ss:$8 sps:$4 sm:$0xff]  }
 0x38f   : > { %8130 = vmatpush1.bf16.msra.mxu0 %v14797_v46  ;;  %8161 = vmatprep.mubr.bf16.mxu0 %v16972_v33  ;;  %v14871_v46 = vld [vmem:[%s18946_s3 + $0x7b4] ss:$8 sps:$4 sm:$0xff]  }
 0x390   : > { %8131 = vmatprep.subr.bf16.mxu0 %v14805_v17  ;;  %v14866_v17 = vld [vmem:[%s18946_s3 + $0x8b0] ss:$8 sps:$4 sm:$0xff]  }
 0x391   : > { %8173 = vmatpush1.bf16.msra.mxu1 %v14800_v53  ;;  %v14874_v53 = vld [vmem:[%s18946_s3 + $0x8a4] ss:$8 sps:$4 sm:$0xff]  }
 0x392   : > { %8174 = vmatprep.subr.bf16.mxu1 %v14808_v32  ;;  %v14869_v32 = vld [vmem:[%s18946_s3 + $0x7b0] ss:$8 sps:$4 sm:$0xff]  }
 0x393   : > { %8132 = vmatpush1.bf16.msra.mxu0 %v14803_v39  ;;  %v14877_v39 = vld [vmem:[%s18946_s3 + $0x7a4] ss:$8 sps:$4 sm:$0xff]  }
 0x394   : > { %8133 = vmatprep.subr.bf16.mxu0 %v14811_v18  ;;  %v14872_v18 = vld [vmem:[%s18946_s3 + $0x8a0] ss:$8 sps:$4 sm:$0xff]  }
 0x395   : > { %8175 = vmatpush1.bf16.msra.mxu1 %v14806_v40  ;;  %v14880_v40 = vld [vmem:[%s18946_s3 + $0x894] ss:$8 sps:$4 sm:$0xff]  }
 0x396   : > { %8176 = vmatprep.subr.bf16.mxu1 %v14814_v56  ;;  %v14875_v56 = vld [vmem:[%s18946_s3 + $0x7a0] ss:$8 sps:$4 sm:$0xff]  }
 0x397   : > { %8134 = vmatpush1.bf16.msra.mxu0 %v14809_v7  ;;  %v14883_v7 = vld [vmem:[%s18946_s3 + $0x794] ss:$8 sps:$4 sm:$0xff]  }
 0x398   : > { %8135 = vmatprep.subr.bf16.mxu0 %v14817_v1  ;;  %v14878_v1 = vld [vmem:[%s18946_s3 + $0x890] ss:$8 sps:$4 sm:$0xff]  }
 0x399   : > { %8177 = vmatpush1.bf16.msra.mxu1 %v14812_v19  ;;  %v14886_v19 = vld [vmem:[%s18946_s3 + $0x884] ss:$8 sps:$4 sm:$0xff]  }
 0x39a   : > { %8178 = vmatprep.subr.bf16.mxu1 %v14820_v34  ;;  %v14881_v34 = vld [vmem:[%s18946_s3 + $0x790] ss:$8 sps:$4 sm:$0xff]  }
 0x39b   : > { %8136 = vmatpush1.bf16.msra.mxu0 %v14815_v16  ;;  %v14889_v16 = vld [vmem:[%s18946_s3 + $0x784] ss:$8 sps:$4 sm:$0xff]  }
 0x39c   : > { %8137 = vmatprep.subr.bf16.mxu0 %v14823_v38  ;;  %v14884_v38 = vld [vmem:[%s18946_s3 + $0x880] ss:$8 sps:$4 sm:$0xff]  }
 0x39d   : > { %8179 = vmatpush1.bf16.msra.mxu1 %v14818_v63  ;;  %v14892_v63 = vld [vmem:[%s18946_s3 + $0xa74] ss:$8 sps:$4 sm:$0xff]  }
 0x39e   : > { %8180 = vmatprep.subr.bf16.mxu1 %v14826_v36  ;;  %v14887_v36 = vld [vmem:[%s18946_s3 + $0x780] ss:$8 sps:$4 sm:$0xff]  }
 0x39f   : > { %8138 = vmatpush1.bf16.msra.mxu0 %v14821_v23  ;;  %v14895_v23 = vld [vmem:[%s18946_s3 + $0x974] ss:$8 sps:$4 sm:$0xff]  }
 0x3a0   : > { %8139 = vmatprep.subr.bf16.mxu0 %v14829_v43  ;;  %v14890_v43 = vld [vmem:[%s18946_s3 + $0xa70] ss:$8 sps:$4 sm:$0xff]  }
 0x3a1   : > { %8181 = vmatpush1.bf16.msra.mxu1 %v14824_v31  ;;  %v14898_v31 = vld [vmem:[%s18946_s3 + $0xa64] ss:$8 sps:$4 sm:$0xff]  }
 0x3a2   : > { %8182 = vmatprep.subr.bf16.mxu1 %v14832_v49  ;;  %v14893_v49 = vld [vmem:[%s18946_s3 + $0x970] ss:$8 sps:$4 sm:$0xff]  }
 0x3a3   : > { %8140 = vmatpush1.bf16.msra.mxu0 %v14827_v20 }
 0x3a4   : > { %8141 = vmatprep.subr.bf16.mxu0 %v14835_v10  ;;  %v14901_v10 = vld [vmem:[%s18946_s3 + $0x964] ss:$8 sps:$4 sm:$0xff]  }
 0x3a5   : > { %8183 = vmatpush1.bf16.msra.mxu1 %v14830_v41  ;;  %v14896_v41 = vld [vmem:[%s18946_s3 + $0xa60] ss:$8 sps:$4 sm:$0xff]  }
 0x3a6   : > { %8184 = vmatprep.subr.bf16.mxu1 %v14838_v35 }
 0x3a7   : > { %8142 = vmatpush1.bf16.msra.mxu0 %v14833_v37  ;;  %v14904_v37 = vld [vmem:[%s18946_s3 + $0xa54] ss:$8 sps:$4 sm:$0xff]  }
 0x3a8   : > { %8143 = vmatprep.subr.bf16.mxu0 %v14841_v9  ;;  %v14899_v9 = vld [vmem:[%s18946_s3 + $0x960] ss:$8 sps:$4 sm:$0xff]  }
 0x3a9   : > { %8185 = vmatpush1.bf16.msra.mxu1 %v14836_v30 }
 0x3aa   : > { %8186 = vmatprep.subr.bf16.mxu1 %v14844_v25  ;;  %v14907_v25 = vld [vmem:[%s18946_s3 + $0x954] ss:$8 sps:$4 sm:$0xff]  }
 0x3ab   : > { %8144 = vmatpush1.bf16.msra.mxu0 %v14839_v6  ;;  %v14902_v6 = vld [vmem:[%s18946_s3 + $0xa50] ss:$8 sps:$4 sm:$0xff]  }
 0x3ac   : > { %v6528_v48 = vpop.f32.mrf.mxu1  ;;  %8145 = vmatprep.subr.bf16.mxu0 %v14847_v14 }
 0x3ad   : > { %8187 = vmatpush2.bf16.msra.mxu1 %v14842_v11  ;;  %v14910_v11 = vld [vmem:[%s18946_s3 + $0xa44] ss:$8 sps:$4 sm:$0xff]  }
 0x3ae   : > { %v6530_v59 = vpop.f32.mrf.mxu1  ;;  %v6487_v8 = vpop.f32.mrf.mxu0  ;;  %8188 = vmatprep.subr.bf16.mxu1 %v14850_v47  ;;  %v14905_v47 = vld [vmem:[%s18946_s3 + $0x950] ss:$8 sps:$4 sm:$0xff]  }
 0x3af   : > { %v17597_v2 = vadd.f32 %v6528_v48, %v6487_v8  ;;  %8146 = vmatpush2.bf16.msra.mxu0 %v14845_v44  ;;  %v14913_v44 = vld [vmem:[%s18946_s3 + $0x944] ss:$8 sps:$4 sm:$0xff]   ;;  %v14908_v48 = vld [vmem:[%s18946_s3 + $0xa40] ss:$8 sps:$4 sm:$0xff]   ;;  %v14914_v8 = vld [vmem:[%s18946_s3 + $0xa30] ss:$8 sps:$4 sm:$0xff]  }
 0x3b0   : > { %v6532_v26 = vpop.f32.mrf.mxu1  ;;  %v6489_v5 = vpop.f32.mrf.mxu0  ;;  %8147 = vmatprep.subr.bf16.mxu0 %v14853_v27  ;;  %v14916_v27 = vld [vmem:[%s18946_s3 + $0xa34] ss:$8 sps:$4 sm:$0xff]  }
 0x3b1   : > { %8189 = vmatpush2.bf16.msra.mxu1 %v14848_v62  ;;  %v17605_v60 = vadd.f32 %v6530_v59, %v6489_v5  ;;  %v14911_v62 = vld [vmem:[%s18946_s3 + $0x940] ss:$8 sps:$4 sm:$0xff]   ;;  %v14919_v59 = vld [vmem:[%s18946_s3 + $0x934] ss:$8 sps:$4 sm:$0xff]   ;;  %v14925_v26 = vld [vmem:[%s18946_s3 + $0x924] ss:$8 sps:$4 sm:$0xff]  }
 0x3b2   : > { %v6533_v54 = vpop.f32.mrf.mxu1  ;;  %v6491_v29 = vpop.f32.mrf.mxu0  ;;  %8190 = vmatprep.subr.bf16.mxu1 %v14856_v22  ;;  %v14922_v22 = vld [vmem:[%s18946_s3 + $0xa24] ss:$8 sps:$4 sm:$0xff]   ;;  %v14920_v5 = vld [vmem:[%s18946_s3 + $0xa20] ss:$8 sps:$4 sm:$0xff]  }
 0x3b3   : > { %8148 = vmatpush2.bf16.msra.mxu0 %v14851_v61  ;;  %v14917_v61 = vld [vmem:[%s18946_s3 + $0x930] ss:$8 sps:$4 sm:$0xff]   ;;  %v14931_v54 = vld [vmem:[%s18946_s3 + $0x914] ss:$8 sps:$4 sm:$0xff]  }
 0x3b4   : > { %v6492_v28 = vpop.f32.mrf.mxu0  ;;  %8149 = vmatprep.subr.bf16.mxu0 %v14859_v4  ;;  %v14928_v4 = vld [vmem:[%s18946_s3 + $0xa14] ss:$8 sps:$4 sm:$0xff]   ;;  %v14926_v29 = vld [vmem:[%s18946_s3 + $0xa10] ss:$8 sps:$4 sm:$0xff]  }
 0x3b5   : > { %8191 = vmatpush2.bf16.msra.mxu1 %v14854_v51  ;;  %v14923_v51 = vld [vmem:[%s18946_s3 + $0x920] ss:$8 sps:$4 sm:$0xff]   ;;  %v14937_v28 = vld [vmem:[%s18946_s3 + $0x904] ss:$8 sps:$4 sm:$0xff]  }
 0x3b6   : > { %8192 = vmatprep.subr.bf16.mxu1 %v14862_v12  ;;  %v14934_v12 = vld [vmem:[%s18946_s3 + $0xa04] ss:$8 sps:$4 sm:$0xff]  }
 0x3b7   : > { %8150 = vmatpush2.bf16.msra.mxu0 %v14857_v3  ;;  %v14929_v3 = vld [vmem:[%s18946_s3 + $0x910] ss:$8 sps:$4 sm:$0xff]  }
 0x3b8   : > { %8151 = vmatprep.subr.bf16.mxu0 %v14865_v15  ;;  %v14932_v15 = vld [vmem:[%s18946_s3 + $0xa00] ss:$8 sps:$4 sm:$0xff]  }
 0x3b9   : > { %8193 = vmatpush2.bf16.msra.mxu1 %v14860_v52  ;;  %v14940_v52 = vld [vmem:[%s18946_s3 + $0xaf4] ss:$8 sps:$4 sm:$0xff]  }
 0x3ba   : > { %8194 = vmatprep.subr.bf16.mxu1 %v14868_v58  ;;  %v14935_v58 = vld [vmem:[%s18946_s3 + $0x900] ss:$8 sps:$4 sm:$0xff]  }
 0x3bb   : > { %8152 = vmatpush2.bf16.msra.mxu0 %v14863_v55  ;;  %v14943_v55 = vld [vmem:[%s18946_s3 + $0x9f4] ss:$8 sps:$4 sm:$0xff]  }
 0x3bc   : > { %8153 = vmatprep.subr.bf16.mxu0 %v14871_v46  ;;  %v14938_v46 = vld [vmem:[%s18946_s3 + $0xaf0] ss:$8 sps:$4 sm:$0xff]  }
 0x3bd   : > { %8195 = vmatpush2.bf16.msra.mxu1 %v14866_v17  ;;  %v14946_v17 = vld [vmem:[%s18946_s3 + $0xae4] ss:$8 sps:$4 sm:$0xff]  }
 0x3be   : > { %8196 = vmatprep.subr.bf16.mxu1 %v14874_v53  ;;  %v14941_v53 = vld [vmem:[%s18946_s3 + $0x9f0] ss:$8 sps:$4 sm:$0xff]  }
 0x3bf   : > { %8154 = vmatpush2.bf16.msra.mxu0 %v14869_v32  ;;  %v14949_v32 = vld [vmem:[%s18946_s3 + $0x9e4] ss:$8 sps:$4 sm:$0xff]  }
 0x3c0   : > { %8155 = vmatprep.subr.bf16.mxu0 %v14877_v39  ;;  %v14944_v39 = vld [vmem:[%s18946_s3 + $0xae0] ss:$8 sps:$4 sm:$0xff]  }
 0x3c1   : > { %8197 = vmatpush2.bf16.msra.mxu1 %v14872_v18 }
 0x3c2   : > { %8198 = vmatprep.subr.bf16.mxu1 %v14880_v40  ;;  %v14952_v40 = vld [vmem:[%s18946_s3 + $0xad4] ss:$8 sps:$4 sm:$0xff]  }
 0x3c3   : > { %8156 = vmatpush2.bf16.msra.mxu0 %v14875_v56 }
 0x3c4   : > { %8157 = vmatprep.subr.bf16.mxu0 %v14883_v7  ;;  %v14947_v7 = vld [vmem:[%s18946_s3 + $0x9e0] ss:$8 sps:$4 sm:$0xff]  }
 0x3c5   : > { %8199 = vmatpush2.bf16.msra.mxu1 %v14878_v1 }
 0x3c6   : > { %8200 = vmatprep.subr.bf16.mxu1 %v14886_v19 }
 0x3c7   : > { %8158 = vmatpush2.bf16.msra.mxu0 %v14881_v34 }
 0x3c8   : > { %8159 = vmatprep.subr.bf16.mxu0 %v14889_v16 }
 0x3c9   : > { %8201 = vmatpush2.bf16.msra.mxu1 %v14884_v38  ;;  %v14958_v38 = vld [vmem:[%s18946_s3 + $0xac4] ss:$8 sps:$4 sm:$0xff]  }
 0x3ca   : > { %8252 = vmatprep.subr.bf16.mxu1 %v14892_v63 }
 0x3cb   : > { %8160 = vmatpush2.bf16.msra.mxu0 %v14887_v36  ;;  %v14953_v36 = vld [vmem:[%s18946_s3 + $0x9d0] ss:$8 sps:$4 sm:$0xff]  }
 0x3cc   : > { %v17688_v20 = vpop.f32.mrf.mxu1  ;;  %8203 = vmatmul.mubr.bf16.vlgmr.msra.gmra.mxu1 %v16967_v0  ;;  %8211 = vmatprep.subr.bf16.mxu0 %v14895_v23  ;;  %v14961_v23 = vld [vmem:[%s18946_s3 + $0x9c4] ss:$8 sps:$4 sm:$0xff]  }
 0x3cd   : > { %8253 = vmatpush1.bf16.msra.mxu1 %v14890_v43  ;;  %8284 = vmatprep.mubr.bf16.mxu1 %v18988_v24  ;;  %v14956_v43 = vld [vmem:[%s18946_s3 + $0xac0] ss:$8 sps:$4 sm:$0xff]  }
 0x3ce   : > { %v17698_v35 = vpop.f32.mrf.mxu1  ;;  %8162 = vmatmul.mubr.bf16.vlgmr.msra.gmra.mxu0 %v16978_v45  ;;  %8254 = vmatprep.subr.bf16.mxu1 %v14898_v31  ;;  %v14964_v31 = vld [vmem:[%s18946_s3 + $0xab4] ss:$8 sps:$4 sm:$0xff]  }
 0x3cf   : > { %8212 = vmatpush1.bf16.msra.mxu0 %v14893_v49  ;;  %8243 = vmatprep.mubr.bf16.mxu0 %v17006_v42  ;;  %v14959_v49 = vld [vmem:[%s18946_s3 + $0x9c0] ss:$8 sps:$4 sm:$0xff]  }
 0x3d0   : > { %v6614_v30 = vpop.f32.mrf.mxu1  ;;  %8213 = vmatprep.subr.bf16.mxu0 %v14901_v10  ;;  %v14962_v10 = vld [vmem:[%s18946_s3 + $0xab0] ss:$8 sps:$4 sm:$0xff]  }
 0x3d1   : > { %8255 = vmatpush1.bf16.msra.mxu1 %v14896_v41  ;;  %v14970_v41 = vld [vmem:[%s18946_s3 + $0xaa4] ss:$8 sps:$4 sm:$0xff]   ;;  %v14976_v30 = vld [vmem:[%s18946_s3 + $0xa94] ss:$8 sps:$4 sm:$0xff]  }
 0x3d2   : > { %v6615_v14 = vpop.f32.mrf.mxu1  ;;  %8256 = vmatprep.subr.bf16.mxu1 %v14904_v37  ;;  %v14973_v37 = vld [vmem:[%s18946_s3 + $0x9a4] ss:$8 sps:$4 sm:$0xff]  }
 0x3d3   : > { %8214 = vmatpush1.bf16.msra.mxu0 %v14899_v9  ;;  %v14968_v9 = vld [vmem:[%s18946_s3 + $0xaa0] ss:$8 sps:$4 sm:$0xff]   ;;  %v14974_v14 = vld [vmem:[%s18946_s3 + $0xa90] ss:$8 sps:$4 sm:$0xff]  }
 0x3d4   : > { %8215 = vmatprep.subr.bf16.mxu0 %v14907_v25  ;;  %v14971_v25 = vld [vmem:[%s18946_s3 + $0x9a0] ss:$8 sps:$4 sm:$0xff]  }
 0x3d5   : > { %8257 = vmatpush1.bf16.msra.mxu1 %v14902_v6  ;;  %v14979_v6 = vld [vmem:[%s18946_s3 + $0x994] ss:$8 sps:$4 sm:$0xff]  }
 0x3d6   : > { %8258 = vmatprep.subr.bf16.mxu1 %v14910_v11  ;;  %v14982_v11 = vld [vmem:[%s18946_s3 + $0xa84] ss:$8 sps:$4 sm:$0xff]  }
 0x3d7   : > { %8216 = vmatpush1.bf16.msra.mxu0 %v14905_v47  ;;  %v14977_v47 = vld [vmem:[%s18946_s3 + $0x990] ss:$8 sps:$4 sm:$0xff]  }
 0x3d8   : > { %8217 = vmatprep.subr.bf16.mxu0 %v14913_v44  ;;  %v14985_v44 = vld [vmem:[%s18946_s3 + $0x984] ss:$8 sps:$4 sm:$0xff]  }
 0x3d9   : > { %8259 = vmatpush1.bf16.msra.mxu1 %v14908_v48  ;;  %v14980_v48 = vld [vmem:[%s18946_s3 + $0xa80] ss:$8 sps:$4 sm:$0xff]  }
 0x3da   : > { %8260 = vmatprep.subr.bf16.mxu1 %v14916_v27  ;;  %v14988_v27 = vld [vmem:[%s18946_s3 + $0xb74] ss:$8 sps:$4 sm:$0xff]  }
 0x3db   : > { %8218 = vmatpush1.bf16.msra.mxu0 %v14911_v62  ;;  %v14983_v62 = vld [vmem:[%s18946_s3 + $0x980] ss:$8 sps:$4 sm:$0xff]  }
 0x3dc   : > { %8219 = vmatprep.subr.bf16.mxu0 %v14919_v59  ;;  %v14991_v59 = vld [vmem:[%s18946_s3 + $0xbf4] ss:$8 sps:$4 sm:$0xff]  }
 0x3dd   : > { %8261 = vmatpush1.bf16.msra.mxu1 %v14914_v8  ;;  %v14986_v8 = vld [vmem:[%s18946_s3 + $0xb70] ss:$8 sps:$4 sm:$0xff]  }
 0x3de   : > { %8262 = vmatprep.subr.bf16.mxu1 %v14922_v22  ;;  %v14994_v22 = vld [vmem:[%s18946_s3 + $0xb64] ss:$8 sps:$4 sm:$0xff]  }
 0x3df   : > { %8220 = vmatpush1.bf16.msra.mxu0 %v14917_v61  ;;  %v14989_v61 = vld [vmem:[%s18946_s3 + $0xbf0] ss:$8 sps:$4 sm:$0xff]  }
 0x3e0   : > { %8221 = vmatprep.subr.bf16.mxu0 %v14925_v26 }
 0x3e1   : > { %8263 = vmatpush1.bf16.msra.mxu1 %v14920_v5  ;;  %v14997_v5 = vld [vmem:[%s18946_s3 + $0xbe4] ss:$8 sps:$4 sm:$0xff]  }
 0x3e2   : > { %8264 = vmatprep.subr.bf16.mxu1 %v14928_v4  ;;  %v14992_v4 = vld [vmem:[%s18946_s3 + $0xb60] ss:$8 sps:$4 sm:$0xff]  }
 0x3e3   : > { %8222 = vmatpush1.bf16.msra.mxu0 %v14923_v51 }
 0x3e4   : > { %8223 = vmatprep.subr.bf16.mxu0 %v14931_v54  ;;  %v15000_v54 = vld [vmem:[%s18946_s3 + $0xb54] ss:$8 sps:$4 sm:$0xff]  }
 0x3e5   : > { %8265 = vmatpush1.bf16.msra.mxu1 %v14926_v29  ;;  %v14995_v29 = vld [vmem:[%s18946_s3 + $0xbe0] ss:$8 sps:$4 sm:$0xff]  }
 0x3e6   : > { %8266 = vmatprep.subr.bf16.mxu1 %v14934_v12 }
 0x3e7   : > { %8224 = vmatpush1.bf16.msra.mxu0 %v14929_v3  ;;  %v15003_v3 = vld [vmem:[%s18946_s3 + $0xbd4] ss:$8 sps:$4 sm:$0xff]  }
 0x3e8   : > { %8225 = vmatprep.subr.bf16.mxu0 %v14937_v28  ;;  %v14998_v28 = vld [vmem:[%s18946_s3 + $0xb50] ss:$8 sps:$4 sm:$0xff]  }
 0x3e9   : > { %8267 = vmatpush1.bf16.msra.mxu1 %v14932_v15 }
 0x3ea   : > { %8968 = vmatprep.subr.bf16.mxu1 %v14940_v52  ;;  %v15001_v52 = vld [vmem:[%s18946_s3 + $0xbd0] ss:$8 sps:$4 sm:$0xff]  }
 0x3eb   : > { %8226 = vmatpush1.bf16.msra.mxu0 %v14935_v58  ;;  %v15009_v58 = vld [vmem:[%s18946_s3 + $0xbc4] ss:$8 sps:$4 sm:$0xff]  }
 0x3ec   : > { %8285 = vmatmul.mubr.bf16.vlgmr.msra.gmra.mxu1 %v17083_v21  ;;  %8227 = vmatprep.subr.bf16.mxu0 %v14943_v55  ;;  %v15004_v55 = vld [vmem:[%s18946_s3 + $0xb40] ss:$8 sps:$4 sm:$0xff]  }
 0x3ed   : > { %8969 = vmatpush1.bf16.msra.mxu1 %v14938_v46  ;;  %9000 = vmatprep.mubr.bf16.mxu1 %v16972_v33  ;;  %v14955_v33 = vld [vmem:[%s18946_s3 + $0x9d4] ss:$8 sps:$4 sm:$0xff]  }
 0x3ee   : > { %v6569_v18 = vpop.f32.mrf.mxu0  ;;  %8970 = vmatprep.subr.bf16.mxu1 %v14946_v17  ;;  %v15012_v46 = vld [vmem:[%s18946_s3 + $0xb34] ss:$8 sps:$4 sm:$0xff]   ;;  %v15007_v17 = vld [vmem:[%s18946_s3 + $0xbc0] ss:$8 sps:$4 sm:$0xff]  }
 0x3ef   : > { %v6570_v56 = vadd.f32 %v6569_v18, %v17597_v2  ;;  %8228 = vmatpush2.bf16.msra.mxu0 %v14941_v53  ;;  %v14950_v2 = vld [vmem:[%s18946_s3 + $0xad0] ss:$8 sps:$4 sm:$0xff]   ;;  %v15015_v53 = vld [vmem:[%s18946_s3 + $0xbb4] ss:$8 sps:$4 sm:$0xff]  }
 0x3f0   : > { %v6571_v1 = vpop.f32.mrf.mxu0  ;;  %8229 = vmatprep.subr.bf16.mxu0 %v14949_v32  ;;  %v15010_v32 = vld [vmem:[%s18946_s3 + $0xb30] ss:$8 sps:$4 sm:$0xff]  }
 0x3f1   : > { %v17811_v19 = vadd.f32 %v17688_v20, %v6570_v56  ;;  %v6572_v34 = vadd.f32 %v6571_v1, %v17605_v60  ;;  %8971 = vmatpush1.bf16.msra.mxu1 %v14944_v39  ;;  %v14967_v20 = vld [vmem:[%s18946_s3 + $0x9b4] ss:$8 sps:$4 sm:$0xff]   ;;  %v15018_v39 = vld [vmem:[%s18946_s3 + $0xb24] ss:$8 sps:$4 sm:$0xff]   ;;  %v15013_v18 = vld [vmem:[%s18946_s3 + $0xbb0] ss:$8 sps:$4 sm:$0xff]  }
 0x3f2   : > { %v6573_v16 = vpop.f32.mrf.mxu0  ;;  %8972 = vmatprep.subr.bf16.mxu1 %v14952_v40  ;;  %v15021_v40 = vld [vmem:[%s18946_s3 + $0xba4] ss:$8 sps:$4 sm:$0xff]   ;;  %v15016_v56 = vld [vmem:[%s18946_s3 + $0xb20] ss:$8 sps:$4 sm:$0xff]  }
 0x3f3   : > { %v17821_v63 = vadd.f32 %v17698_v35, %v6572_v34  ;;  %8230 = vmatpush2.bf16.msra.mxu0 %v14947_v7  ;;  %v14965_v35 = vld [vmem:[%s18946_s3 + $0x9b0] ss:$8 sps:$4 sm:$0xff]   ;;  %v15024_v7 = vld [vmem:[%s18946_s3 + $0xb14] ss:$8 sps:$4 sm:$0xff]   ;;  %v15019_v1 = vld [vmem:[%s18946_s3 + $0xba0] ss:$8 sps:$4 sm:$0xff]  }
 0x3f4   : > { %v6574_v60 = vpop.f32.mrf.mxu0  ;;  %8231 = vmatprep.subr.bf16.mxu0 %v14955_v33  ;;  %v15027_v33 = vld [vmem:[%s18946_s3 + $0xb94] ss:$8 sps:$4 sm:$0xff]   ;;  %v15022_v34 = vld [vmem:[%s18946_s3 + $0xb10] ss:$8 sps:$4 sm:$0xff]  }
 0x3f5   : > { %8973 = vmatpush1.bf16.msra.mxu1 %v14950_v2  ;;  %v15030_v2 = vld [vmem:[%s18946_s3 + $0xb04] ss:$8 sps:$4 sm:$0xff]   ;;  %v15025_v16 = vld [vmem:[%s18946_s3 + $0xb90] ss:$8 sps:$4 sm:$0xff]   ;;  %v15036_v60 = vld [vmem:[%s18946_s3 + $0xcf4] ss:$8 sps:$4 sm:$0xff]  }
 0x3f6   : > { %8974 = vmatprep.subr.bf16.mxu1 %v14958_v38  ;;  %v15033_v38 = vld [vmem:[%s18946_s3 + $0xb84] ss:$8 sps:$4 sm:$0xff]  }
 0x3f7   : > { %8232 = vmatpush2.bf16.msra.mxu0 %v14953_v36  ;;  %v15028_v36 = vld [vmem:[%s18946_s3 + $0xb00] ss:$8 sps:$4 sm:$0xff]  }
 0x3f8   : > { %8233 = vmatprep.subr.bf16.mxu0 %v14961_v23  ;;  %v15031_v23 = vld [vmem:[%s18946_s3 + $0xb80] ss:$8 sps:$4 sm:$0xff]  }
 0x3f9   : > { %8975 = vmatpush1.bf16.msra.mxu1 %v14956_v43  ;;  %v15039_v43 = vld [vmem:[%s18946_s3 + $0xc74] ss:$8 sps:$4 sm:$0xff]  }
 0x3fa   : > { %8976 = vmatprep.subr.bf16.mxu1 %v14964_v31  ;;  %v15034_v31 = vld [vmem:[%s18946_s3 + $0xcf0] ss:$8 sps:$4 sm:$0xff]  }
 0x3fb   : > { %8234 = vmatpush2.bf16.msra.mxu0 %v14959_v49  ;;  %v15042_v49 = vld [vmem:[%s18946_s3 + $0xce4] ss:$8 sps:$4 sm:$0xff]  }
 0x3fc   : > { %8235 = vmatprep.subr.bf16.mxu0 %v14967_v20  ;;  %v15037_v20 = vld [vmem:[%s18946_s3 + $0xc70] ss:$8 sps:$4 sm:$0xff]  }
 0x3fd   : > { %8977 = vmatpush1.bf16.msra.mxu1 %v14962_v10  ;;  %v15045_v10 = vld [vmem:[%s18946_s3 + $0xc64] ss:$8 sps:$4 sm:$0xff]  }
 0x3fe   : > { %8978 = vmatprep.subr.bf16.mxu1 %v14970_v41  ;;  %v15040_v41 = vld [vmem:[%s18946_s3 + $0xce0] ss:$8 sps:$4 sm:$0xff]  }
 0x3ff   : > { %8236 = vmatpush2.bf16.msra.mxu0 %v14965_v35 }
 0x400   : > { %8237 = vmatprep.subr.bf16.mxu0 %v14973_v37  ;;  %v15048_v37 = vld [vmem:[%s18946_s3 + $0xcd4] ss:$8 sps:$4 sm:$0xff]  }
 0x401   : > { %8979 = vmatpush1.bf16.msra.mxu1 %v14968_v9  ;;  %v15043_v9 = vld [vmem:[%s18946_s3 + $0xc60] ss:$8 sps:$4 sm:$0xff]  }
 0x402   : > { %8980 = vmatprep.subr.bf16.mxu1 %v14976_v30 }
 0x403   : > { %8238 = vmatpush2.bf16.msra.mxu0 %v14971_v25 }
 0x404   : > { %8239 = vmatprep.subr.bf16.mxu0 %v14979_v6  ;;  %v15046_v6 = vld [vmem:[%s18946_s3 + $0xcd0] ss:$8 sps:$4 sm:$0xff]  }
 0x405   : > { %8981 = vmatpush1.bf16.msra.mxu1 %v14974_v14 }
 0x406   : > { %8982 = vmatprep.subr.bf16.mxu1 %v14982_v11  ;;  %v15054_v11 = vld [vmem:[%s18946_s3 + $0xcc4] ss:$8 sps:$4 sm:$0xff]  }
 0x407   : > { %8240 = vmatpush2.bf16.msra.mxu0 %v14977_v47  ;;  %v15049_v47 = vld [vmem:[%s18946_s3 + $0xc50] ss:$8 sps:$4 sm:$0xff]  }
 0x408   : > { %8241 = vmatprep.subr.bf16.mxu0 %v14985_v44 }
 0x409   : > { %8983 = vmatpush1.bf16.msra.mxu1 %v14980_v48  ;;  %v15057_v48 = vld [vmem:[%s18946_s3 + $0xc44] ss:$8 sps:$4 sm:$0xff]  }
 0x40a   : > { %8984 = vmatprep.subr.bf16.mxu1 %v14988_v27  ;;  %v15052_v27 = vld [vmem:[%s18946_s3 + $0xcc0] ss:$8 sps:$4 sm:$0xff]  }
 0x40b   : > { %8242 = vmatpush2.bf16.msra.mxu0 %v14983_v62  ;;  %v15060_v62 = vld [vmem:[%s18946_s3 + $0xcb4] ss:$8 sps:$4 sm:$0xff]  }
 0x40c   : > { %v17898_v26 = vpop.f32.mrf.mxu1  ;;  %9009 = vmatprep.subr.bf16.mxu0 %v14991_v59  ;;  %v15055_v59 = vld [vmem:[%s18946_s3 + $0xc40] ss:$8 sps:$4 sm:$0xff]  }
 0x40d   : > { %8985 = vmatpush2.bf16.msra.mxu1 %v14986_v8  ;;  %v15063_v8 = vld [vmem:[%s18946_s3 + $0xc34] ss:$8 sps:$4 sm:$0xff]  }
 0x40e   : > { %v17906_v51 = vpop.f32.mrf.mxu1  ;;  %8244 = vmatmul.mubr.bf16.vlgmr.msra.gmra.mxu0 %v17192_v50  ;;  %8986 = vmatprep.subr.bf16.mxu1 %v14994_v22  ;;  %v15058_v22 = vld [vmem:[%s18946_s3 + $0xcb0] ss:$8 sps:$4 sm:$0xff]  }
 0x40f   : > { %9010 = vmatpush1.bf16.msra.mxu0 %v14989_v61  ;;  %9041 = vmatprep.mubr.bf16.mxu0 %v16960_v57  ;;  %v15006_v57 = vld [vmem:[%s18946_s3 + $0xb44] ss:$8 sps:$4 sm:$0xff]  }
 0x410   : > { %v7328_v12 = vpop.f32.mrf.mxu1  ;;  %9011 = vmatprep.subr.bf16.mxu0 %v14997_v5  ;;  %v15066_v61 = vld [vmem:[%s18946_s3 + $0xca4] ss:$8 sps:$4 sm:$0xff]  }
 0x411   : > { %8987 = vmatpush2.bf16.msra.mxu1 %v14992_v4  ;;  %v15069_v5 = vld [vmem:[%s18946_s3 + $0xc24] ss:$8 sps:$4 sm:$0xff]   ;;  %v15064_v4 = vld [vmem:[%s18946_s3 + $0xca0] ss:$8 sps:$4 sm:$0xff]   ;;  %v15070_v12 = vld [vmem:[%s18946_s3 + $0xc90] ss:$8 sps:$4 sm:$0xff]  }
 0x412   : > { %v7329_v15 = vpop.f32.mrf.mxu1  ;;  %8988 = vmatprep.subr.bf16.mxu1 %v15000_v54  ;;  %v15067_v54 = vld [vmem:[%s18946_s3 + $0xc20] ss:$8 sps:$4 sm:$0xff]  }
 0x413   : > { %9012 = vmatpush1.bf16.msra.mxu0 %v14995_v29  ;;  %v15075_v29 = vld [vmem:[%s18946_s3 + $0xc14] ss:$8 sps:$4 sm:$0xff]   ;;  %v15081_v15 = vld [vmem:[%s18946_s3 + $0xc04] ss:$8 sps:$4 sm:$0xff]  }
 0x414   : > { %9013 = vmatprep.subr.bf16.mxu0 %v15003_v3  ;;  %v15078_v3 = vld [vmem:[%s18946_s3 + $0xc84] ss:$8 sps:$4 sm:$0xff]  }
 0x415   : > { %8989 = vmatpush2.bf16.msra.mxu1 %v14998_v28  ;;  %v15073_v28 = vld [vmem:[%s18946_s3 + $0xc10] ss:$8 sps:$4 sm:$0xff]  }
 0x416   : > { %8990 = vmatprep.subr.bf16.mxu1 %v15006_v57  ;;  %v15076_v57 = vld [vmem:[%s18946_s3 + $0xc80] ss:$8 sps:$4 sm:$0xff]  }
 0x417   : > { %9014 = vmatpush1.bf16.msra.mxu0 %v15001_v52  ;;  %v15084_v52 = vld [vmem:[%s18946_s3 + $0xd74] ss:$8 sps:$4 sm:$0xff]  }
 0x418   : > { %9015 = vmatprep.subr.bf16.mxu0 %v15009_v58  ;;  %v15079_v58 = vld [vmem:[%s18946_s3 + $0xc00] ss:$8 sps:$4 sm:$0xff]  }
 0x419   : > { %8991 = vmatpush2.bf16.msra.mxu1 %v15004_v55  ;;  %v15087_v55 = vld [vmem:[%s18946_s3 + $0xdf4] ss:$8 sps:$4 sm:$0xff]  }
 0x41a   : > { %8992 = vmatprep.subr.bf16.mxu1 %v15012_v46  ;;  %v15082_v46 = vld [vmem:[%s18946_s3 + $0xd70] ss:$8 sps:$4 sm:$0xff]  }
 0x41b   : > { %9016 = vmatpush1.bf16.msra.mxu0 %v15007_v17  ;;  %v15090_v17 = vld [vmem:[%s18946_s3 + $0xd64] ss:$8 sps:$4 sm:$0xff]  }
 0x41c   : > { %9017 = vmatprep.subr.bf16.mxu0 %v15015_v53  ;;  %v15085_v53 = vld [vmem:[%s18946_s3 + $0xdf0] ss:$8 sps:$4 sm:$0xff]  }
 0x41d   : > { %8993 = vmatpush2.bf16.msra.mxu1 %v15010_v32 }
 0x41e   : > { %8994 = vmatprep.subr.bf16.mxu1 %v15018_v39  ;;  %v15093_v39 = vld [vmem:[%s18946_s3 + $0xde4] ss:$8 sps:$4 sm:$0xff]  }
 0x41f   : > { %9018 = vmatpush1.bf16.msra.mxu0 %v15013_v18 }
 0x420   : > { %9019 = vmatprep.subr.bf16.mxu0 %v15021_v40  ;;  %v15088_v40 = vld [vmem:[%s18946_s3 + $0xd60] ss:$8 sps:$4 sm:$0xff]  }
 0x421   : > { %8995 = vmatpush2.bf16.msra.mxu1 %v15016_v56 }
 0x422   : > { %8996 = vmatprep.subr.bf16.mxu1 %v15024_v7 }
 0x423   : > { %9020 = vmatpush1.bf16.msra.mxu0 %v15019_v1  ;;  %v15096_v1 = vld [vmem:[%s18946_s3 + $0xd54] ss:$8 sps:$4 sm:$0xff]  }
 0x424   : > { %9021 = vmatprep.subr.bf16.mxu0 %v15027_v33 }
 0x425   : > { %8997 = vmatpush2.bf16.msra.mxu1 %v15022_v34 }
 0x426   : > { %8998 = vmatprep.subr.bf16.mxu1 %v15030_v2  ;;  %v15091_v2 = vld [vmem:[%s18946_s3 + $0xde0] ss:$8 sps:$4 sm:$0xff]  }
 0x427   : > { %9022 = vmatpush1.bf16.msra.mxu0 %v15025_v16 }
 0x428   : > { %9023 = vmatprep.subr.bf16.mxu0 %v15033_v38 }
 0x429   : > { %8999 = vmatpush2.bf16.msra.mxu1 %v15028_v36 }
 0x42a   : > { %9050 = vmatprep.subr.bf16.mxu1 %v15036_v60 }
 0x42b   : > { %9024 = vmatpush1.bf16.msra.mxu0 %v15031_v23  ;;  %v15094_v23 = vld [vmem:[%s18946_s3 + $0xd50] ss:$8 sps:$4 sm:$0xff]  }
 0x42c   : > { %9001 = vmatmul.mubr.bf16.vlgmr.msra.gmra.mxu1 %v16978_v45  ;;  %9025 = vmatprep.subr.bf16.mxu0 %v15039_v43 }
 0x42d   : > { %9051 = vmatpush1.bf16.msra.mxu1 %v15034_v31  ;;  %9082 = vmatprep.mubr.bf16.mxu1 %v17006_v42  ;;  %v15051_v42 = vld [vmem:[%s18946_s3 + $0xc54] ss:$8 sps:$4 sm:$0xff]  }
 0x42e   : > { %v7365_v35 = vpop.f32.mrf.mxu0  ;;  %9052 = vmatprep.subr.bf16.mxu1 %v15042_v49  ;;  %v15102_v49 = vld [vmem:[%s18946_s3 + $0xd44] ss:$8 sps:$4 sm:$0xff]  }
 0x42f   : > { %v18012_v45 = vadd.f32 %v7365_v35, %v17898_v26  ;;  %9026 = vmatpush2.bf16.msra.mxu0 %v15037_v20  ;;  %v15061_v26 = vld [vmem:[%s18946_s3 + $0xc30] ss:$8 sps:$4 sm:$0xff]   ;;  %v15105_v35 = vld [vmem:[%s18946_s3 + $0xdc4] ss:$8 sps:$4 sm:$0xff]  }
 0x430   : > { %v7367_v30 = vpop.f32.mrf.mxu0  ;;  %9027 = vmatprep.subr.bf16.mxu0 %v15045_v10  ;;  %v15097_v10 = vld [vmem:[%s18946_s3 + $0xdd0] ss:$8 sps:$4 sm:$0xff]  }
 0x431   : > { %v18021_v25 = vadd.f32 %v7367_v30, %v17906_v51  ;;  %9053 = vmatpush1.bf16.msra.mxu1 %v15040_v41  ;;  %v15072_v51 = vld [vmem:[%s18946_s3 + $0xc94] ss:$8 sps:$4 sm:$0xff]  }
 0x432   : > { %v7369_v14 = vpop.f32.mrf.mxu0  ;;  %9054 = vmatprep.subr.bf16.mxu1 %v15048_v37  ;;  %v15100_v37 = vld [vmem:[%s18946_s3 + $0xd40] ss:$8 sps:$4 sm:$0xff]   ;;  %v15111_v30 = vld [vmem:[%s18946_s3 + $0xdb4] ss:$8 sps:$4 sm:$0xff]  }
 0x433   : > { %9028 = vmatpush2.bf16.msra.mxu0 %v15043_v9  ;;  %v15103_v9 = vld [vmem:[%s18946_s3 + $0xdc0] ss:$8 sps:$4 sm:$0xff]   ;;  %v15117_v14 = vld [vmem:[%s18946_s3 + $0xda4] ss:$8 sps:$4 sm:$0xff]  }
 0x434   : > { %v7370_v44 = vpop.f32.mrf.mxu0  ;;  %9029 = vmatprep.subr.bf16.mxu0 %v15051_v42  ;;  %v15106_v42 = vld [vmem:[%s18946_s3 + $0xd30] ss:$8 sps:$4 sm:$0xff]  }
 0x435   : > { %9055 = vmatpush1.bf16.msra.mxu1 %v15046_v6  ;;  %v15109_v6 = vld [vmem:[%s18946_s3 + $0xdb0] ss:$8 sps:$4 sm:$0xff]   ;;  %v15115_v44 = vld [vmem:[%s18946_s3 + $0xda0] ss:$8 sps:$4 sm:$0xff]  }
 0x436   : > { %9056 = vmatprep.subr.bf16.mxu1 %v15054_v11  ;;  %v15112_v11 = vld [vmem:[%s18946_s3 + $0xd20] ss:$8 sps:$4 sm:$0xff]  }
 0x437   : > { %9030 = vmatpush2.bf16.msra.mxu0 %v15049_v47  ;;  %v15120_v47 = vld [vmem:[%s18946_s3 + $0xd14] ss:$8 sps:$4 sm:$0xff]  }
 0x438   : > { %9031 = vmatprep.subr.bf16.mxu0 %v15057_v48  ;;  %v15123_v48 = vld [vmem:[%s18946_s3 + $0xd94] ss:$8 sps:$4 sm:$0xff]  }
 0x439   : > { %9057 = vmatpush1.bf16.msra.mxu1 %v15052_v27  ;;  %v15118_v27 = vld [vmem:[%s18946_s3 + $0xd10] ss:$8 sps:$4 sm:$0xff]  }
 0x43a   : > { %9058 = vmatprep.subr.bf16.mxu1 %v15060_v62  ;;  %v15126_v62 = vld [vmem:[%s18946_s3 + $0xd04] ss:$8 sps:$4 sm:$0xff]  }
 0x43b   : > { %9032 = vmatpush2.bf16.msra.mxu0 %v15055_v59  ;;  %v15121_v59 = vld [vmem:[%s18946_s3 + $0xd90] ss:$8 sps:$4 sm:$0xff]  }
 0x43c   : > { %9033 = vmatprep.subr.bf16.mxu0 %v15063_v8  ;;  %v15129_v8 = vld [vmem:[%s18946_s3 + $0xd84] ss:$8 sps:$4 sm:$0xff]  }
 0x43d   : > { %9059 = vmatpush1.bf16.msra.mxu1 %v15058_v22  ;;  %v15124_v22 = vld [vmem:[%s18946_s3 + $0xd00] ss:$8 sps:$4 sm:$0xff]  }
 0x43e   : > { %9060 = vmatprep.subr.bf16.mxu1 %v15066_v61  ;;  %v15127_v61 = vld [vmem:[%s18946_s3 + $0xd80] ss:$8 sps:$4 sm:$0xff]  }
 0x43f   : > { %9034 = vmatpush2.bf16.msra.mxu0 %v15061_v26 }
 0x440   : > { %9035 = vmatprep.subr.bf16.mxu0 %v15069_v5 }
 0x441   : > { %9061 = vmatpush1.bf16.msra.mxu1 %v15064_v4 }
 0x442   : > { %9062 = vmatprep.subr.bf16.mxu1 %v15072_v51 }
 0x443   : > { %9036 = vmatpush2.bf16.msra.mxu0 %v15067_v54 }
 0x444   : > { %9037 = vmatprep.subr.bf16.mxu0 %v15075_v29 }
 0x445   : > { %9063 = vmatpush1.bf16.msra.mxu1 %v15070_v12 }
 0x446   : > { %9064 = vmatprep.subr.bf16.mxu1 %v15078_v3 }
 0x447   : > { %9038 = vmatpush2.bf16.msra.mxu0 %v15073_v28 }
 0x448   : > { %9039 = vmatprep.subr.bf16.mxu0 %v15081_v15 }
 0x449   : > { %9065 = vmatpush1.bf16.msra.mxu1 %v15076_v57 }
 0x44a   : > { %9066 = vmatprep.subr.bf16.mxu1 %v15084_v52 }
 0x44b   : > { %9040 = vmatpush2.bf16.msra.mxu0 %v15079_v58 }
 0x44c   : > { %v7406_v32 = vpop.f32.mrf.mxu1  ;;  %9091 = vmatprep.subr.bf16.mxu0 %v15087_v55 }
 0x44d   : > { %v7407_v18 = vadd.f32 %v7406_v32, %v18012_v45  ;;  %9067 = vmatpush2.bf16.msra.mxu1 %v15082_v46  ;;  %v15108_v45 = vld [vmem:[%s18946_s3 + $0xd34] ss:$8 sps:$4 sm:$0xff]  }
 0x44e   : > { %v7408_v56 = vpop.f32.mrf.mxu1  ;;  %v7447_v7 = vpop.f32.mrf.mxu0  ;;  %9042 = vmatmul.mubr.bf16.vlgmr.msra.gmra.mxu0 %v16967_v0  ;;  %9068 = vmatprep.subr.bf16.mxu1 %v15090_v17  ;;  %v15099_v0 = vld [vmem:[%s18946_s3 + $0xdd4] ss:$8 sps:$4 sm:$0xff]  }
 0x44f   : > { %v7409_v33 = vadd.f32 %v7408_v56, %v18021_v25  ;;  %v18116_v34 = vadd.f32 %v7447_v7, %v7407_v18  ;;  %9092 = vmatpush1.bf16.msra.mxu0 %v15085_v53  ;;  %9123 = vmatprep.mubr.bf16.mxu0 %v18988_v24  ;;  %v15114_v25 = vld [vmem:[%s18946_s3 + $0xd24] ss:$8 sps:$4 sm:$0xff]  }
 0x450   : > { %v7410_v16 = vpop.f32.mrf.mxu1  ;;  %v7449_v38 = vpop.f32.mrf.mxu0  ;;  %9093 = vmatprep.subr.bf16.mxu0 %v15093_v39 }
 0x451   : > { %v7454_v36 = vmax.f32 %v17811_v19, %v18116_v34  ;;  %v18127_v60 = vadd.f32 %v7449_v38, %v7409_v33  ;;  %9069 = vmatpush2.bf16.msra.mxu1 %v15088_v40 }
 0x452   : > { %v7411_v43 = vpop.f32.mrf.mxu1  ;;  %v7451_v31 = vpop.f32.mrf.mxu0  ;;  %9070 = vmatprep.subr.bf16.mxu1 %v15096_v1 }
 0x453   : > { %v7455_v20 = vmax.f32 %v17821_v63, %v18127_v60  ;;  %9094 = vmatpush1.bf16.msra.mxu0 %v15091_v2 }
 0x454   : > { %v7452_v41 = vpop.f32.mrf.mxu0  ;;  %9095 = vmatprep.subr.bf16.mxu0 %v15099_v0 }
 0x455   : > { %9071 = vmatpush2.bf16.msra.mxu1 %v15094_v23 }
 0x456   : > { %9072 = vmatprep.subr.bf16.mxu1 %v15102_v49 }
 0x457   : > { %9096 = vmatpush1.bf16.msra.mxu0 %v15097_v10 }
 0x458   : > { %9097 = vmatprep.subr.bf16.mxu0 %v15105_v35 }
 0x459   : > { %9073 = vmatpush2.bf16.msra.mxu1 %v15100_v37 }
 0x45a   : > { %9074 = vmatprep.subr.bf16.mxu1 %v15108_v45 }
 0x45b   : > { %9098 = vmatpush1.bf16.msra.mxu0 %v15103_v9 }
 0x45c   : > { %9099 = vmatprep.subr.bf16.mxu0 %v15111_v30 }
 0x45d   : > { %9075 = vmatpush2.bf16.msra.mxu1 %v15106_v42 }
 0x45e   : > { %9076 = vmatprep.subr.bf16.mxu1 %v15114_v25 }
 0x45f   : > { %9100 = vmatpush1.bf16.msra.mxu0 %v15109_v6 }
 0x460   : > { %9101 = vmatprep.subr.bf16.mxu0 %v15117_v14  ;;  %v15131_v14 = vld [vmem:[%s18947_s4] sm:$0xff]  }
 0x461   : > { %9077 = vmatpush2.bf16.msra.mxu1 %v15112_v11  ;;  %v10870_v11 = vld [vmem:[%s18948_s5] sm:$0xff] }
 0x462   : > { %9078 = vmatprep.subr.bf16.mxu1 %v15120_v47  ;;  %v10871_v47 = vld [vmem:[%s18948_s5 + $0x8] sm:$0xff] }
 0x463   : > { %9102 = vmatpush1.bf16.msra.mxu0 %v15115_v44 }
 0x464   : > { %9103 = vmatprep.subr.bf16.mxu0 %v15123_v48 }
 0x465   : > { %9079 = vmatpush2.bf16.msra.mxu1 %v15118_v27 }
 0x466   : > { %9080 = vmatprep.subr.bf16.mxu1 %v15126_v62 }
 0x467   : > { %9104 = vmatpush1.bf16.msra.mxu0 %v15121_v59 }
 0x468   : > { %9105 = vmatprep.subr.bf16.mxu0 %v15129_v8 }
 0x469   : > { %9081 = vmatpush2.bf16.msra.mxu1 %v15124_v22  ;;  %v15130_v22 = vld [vmem:[%s18947_s4 + $0x8] sm:$0xff]  }
 0x46b   : > { %9106 = vmatpush1.bf16.msra.mxu0 %v15127_v61 }
 0x46c   : > { %9083 = vmatmul.mubr.bf16.vlgmr.msra.gmra.mxu1 %v17192_v50 }
 0x46d   : > { %9253 = vmatprep.mubr.bf16.mxu1 %v18988_v24 }
 0x46e   : > { %9124 = vmatmul.mubr.bf16.vlgmr.msra.gmra.mxu0 %v17083_v21 }
 0x46f   : > { %9196 = vmatprep.mubr.bf16.mxu0 %v18988_v24 }
 0x48c   : > { %v8204_v26 = vpop.f32.mrf.mxu1 }
 0x48e   : > { %v8206_v5 = vpop.f32.mrf.mxu1  ;;  %v8163_v4 = vpop.f32.mrf.mxu0 }
 0x48f   : > { %v8205_v51 = vadd.f32 %v8204_v26, %v8163_v4 }
 0x490   : > { %v8208_v54 = vpop.f32.mrf.mxu1  ;;  %v8165_v29 = vpop.f32.mrf.mxu0 }
 0x491   : > { %v8207_v12 = vadd.f32 %v8206_v5, %v8165_v29 }
 0x492   : > { %v8209_v3 = vpop.f32.mrf.mxu1  ;;  %v8167_v28 = vpop.f32.mrf.mxu0 }
 0x493   : > { %v15132_v3 = vld [vmem:[%s18947_s4 + $0x10] sm:$0xff]   ;;  %v15133_v28 = vld [vmem:[%s18947_s4 + $0x18] sm:$0xff]  }
 0x494   : > { %v8168_v15 = vpop.f32.mrf.mxu0 }
 0x4ac   : > { %v8286_v57 = vpop.f32.mrf.mxu1 }
 0x4ae   : > { %v8288_v52 = vpop.f32.mrf.mxu1 }
 0x4b0   : > { %v8290_v58 = vpop.f32.mrf.mxu1 }
 0x4b2   : > { %v8291_v50 = vpop.f32.mrf.mxu1 }
 0x4ce   : > { %v8245_v55 = vpop.f32.mrf.mxu0 }
 0x4cf   : > { %v8246_v46 = vadd.f32 %v8245_v55, %v8205_v51 }
 0x4d0   : > { %v8247_v17 = vpop.f32.mrf.mxu0 }
 0x4d1   : > { %v8287_v21 = vadd.f32 %v8286_v57, %v8246_v46  ;;  %v8248_v53 = vadd.f32 %v8247_v17, %v8207_v12 }
 0x4d2   : > { %v8249_v32 = vpop.f32.mrf.mxu0 }
 0x4d3   : > { %v8289_v39 = vadd.f32 %v8288_v52, %v8248_v53  ;;  %v8293_v18 = vmax.f32 %v7454_v36, %v8287_v21  ;;  %v15134_v21 = vld [vmem:[%s18947_s4 + $0x20] sm:$0xff]   ;;  %v15135_v53 = vld [vmem:[%s18947_s4 + $0x28] sm:$0xff]  }
 0x4d4   : > { %v8250_v40 = vpop.f32.mrf.mxu0 }
 0x4d5   : > { %v8294_v56 = vmax.f32 %v7455_v20, %v8289_v39 }
 0x4ec   : > { %v9002_v7 = vpop.f32.mrf.mxu1 }
 0x4ee   : > { %v9004_v1 = vpop.f32.mrf.mxu1 }
 0x4f0   : > { %v9006_v33 = vpop.f32.mrf.mxu1 }
 0x4f2   : > { %v9007_v2 = vpop.f32.mrf.mxu1 }
 0x4f3   : > { %v15136_v2 = vld [vmem:[%s18947_s4 + $0x30] sm:$0xff]  }
 0x50e   : > { %v9043_v16 = vpop.f32.mrf.mxu0 }
 0x50f   : > { %v9044_v43 = vadd.f32 %v9043_v16, %v9002_v7  ;;  %v15137_v16 = vld [vmem:[%s18947_s4 + $0x38] sm:$0xff]  }
 0x510   : > { %v9045_v38 = vpop.f32.mrf.mxu0 }
 0x511   : > { %v9046_v49 = vadd.f32 %v9045_v38, %v9004_v1 }
 0x512   : > { %v9047_v0 = vpop.f32.mrf.mxu0 }
 0x514   : > { %v9048_v23 = vpop.f32.mrf.mxu0 }
 0x52c   : > { %v9084_v31 = vpop.f32.mrf.mxu1 }
 0x52d   : > { %v9085_v10 = vadd.f32 %v9084_v31, %v9044_v43 }
 0x52e   : > { %v9086_v41 = vpop.f32.mrf.mxu1  ;;  %v9125_v19 = vpop.f32.mrf.mxu0 }
 0x52f   : > { %v9087_v34 = vadd.f32 %v9086_v41, %v9046_v49  ;;  %v9126_v36 = vadd.f32 %v9125_v19, %v9085_v10  ;;  %v15138_v19 = vld [vmem:[%s18947_s4 + $0x40] sm:$0xff]  }
 0x530   : > { %v9088_v35 = vpop.f32.mrf.mxu1  ;;  %v9127_v37 = vpop.f32.mrf.mxu0 }
 0x531   : > { %v9132_v63 = vmax.f32 %v8293_v18, %v9126_v36  ;;  %v9128_v60 = vadd.f32 %v9127_v37, %v9087_v34  ;;  %v15139_v34 = vld [vmem:[%s18947_s4 + $0x48] sm:$0xff]  }
 0x532   : > { %v9089_v20 = vpop.f32.mrf.mxu1  ;;  %v9129_v45 = vpop.f32.mrf.mxu0 }
 0x533   : > { %v18207_v9 = vpack.c.bf16 %v9132_v63, %v9132_v63  ;;  %v9133_v30 = vmax.f32 %v8294_v56, %v9128_v60 }
 0x534   : > { %v9130_v42 = vpop.f32.mrf.mxu0 }
 0x535   : > { %v18209_v25 = vpack.c.bf16 %v9133_v30, %v9133_v30  ;;  %9272 = vrot.lane.b32.xlu0 %v18207_v9, %s18994_s16  ;;  %9148 = vrot.lane.b32.xlu1 %v18207_v9, %s18995_s20  ;;  %v9216_v6 = vsel %vm9157_vm3, %v18207_v9, 0  ;;  %v15140_v30 = vld [vmem:[%s18947_s4 + $0x50] sm:$0xff]   ;;  %v15141_v42 = vld [vmem:[%s18947_s4 + $0x58] sm:$0xff]  }
 0x537   : > { %13599 = vmatprep.subr.msk.bf16.mxu1 %vm9157_vm3, %v18209_v25 }
 0x538   : > { %9236 = vmatpush1.bf16.msra.mxu1 %v9216_v6 }
 0x539   : > { %9341 = vrot.lane.b32.xlu0 %v18207_v9, %s18996_s24  ;;  %9150 = vrot.lane.b32.xlu1 %v18209_v25, %s18995_s20  ;;  %s15330_s20 = smov 100  }
 0x53b   : > { %13600 = vmatmul.mubr.msk.bf16.vlgmr.msra.gmra.mxu1 %vm9153_vm14, %v15131_v14 }
 0x53c   : > { %9387 = vmatprep.mubr.bf16.mxu1 %v18988_v24 }
 0x53d   : > { %9410 = vrot.lane.b32.xlu0 %v18207_v9, %s18997_s22  ;;  %9274 = vrot.lane.b32.xlu1 %v18209_v25, %s18994_s16  ;;  %s15329_s16 = smov 110  }
 0x541   : > { %9479 = vrot.lane.b32.xlu0 %v18207_v9, %s15325_s0  ;;  %9343 = vrot.lane.b32.xlu1 %v18209_v25, %s18996_s24  ;;  %s15333_s24 = smov 97  }
 0x545   : > { %9549 = vrot.lane.b32.xlu0 %v18207_v9, %s15326_s1  ;;  %9412 = vrot.lane.b32.xlu1 %v18209_v25, %s18997_s22  ;;  %s18998_s22 = smov 96  }
 0x549   : > { %9619 = vrot.lane.b32.xlu0 %v18207_v9, %s15327_s21  ;;  %9481 = vrot.lane.b32.xlu1 %v18209_v25, %s15325_s0  ;;  %s15334_s0 = smov 86  }
 0x54d   : > { %9689 = vrot.lane.b32.xlu0 %v18207_v9, %s15328_s23  ;;  %9551 = vrot.lane.b32.xlu1 %v18209_v25, %s15326_s1  ;;  %s15335_s1 = smov 85  }
 0x551   : > { %9759 = vrot.lane.b32.xlu0 %v18207_v9, %s15329_s16  ;;  %9621 = vrot.lane.b32.xlu1 %v18209_v25, %s15327_s21  ;;  %s15336_s21 = smov 84  }
 0x555   : > { %9829 = vrot.lane.b32.xlu0 %v18207_v9, %s15330_s20  ;;  %9691 = vrot.lane.b32.xlu1 %v18209_v25, %s15328_s23  ;;  %s15337_s23 = smov 83  }
 0x559   : > { %9899 = vrot.lane.b32.xlu0 %v18207_v9, %s15331_s30  ;;  %9761 = vrot.lane.b32.xlu1 %v18209_v25, %s15329_s16  ;;  %s15338_s16 = smov 82  }
 0x55d   : > { %9969 = vrot.lane.b32.xlu0 %v18207_v9, %s15332_s15  ;;  %9831 = vrot.lane.b32.xlu1 %v18209_v25, %s15330_s20  ;;  %s15339_s20 = smov 72  }
 0x561   : > { %10039 = vrot.lane.b32.xlu0 %v18207_v9, %s15333_s24  ;;  %9901 = vrot.lane.b32.xlu1 %v18209_v25, %s15331_s30  ;;  %s15340_s30 = smov 71  }
 0x565   : > { %10109 = vrot.lane.b32.xlu0 %v18207_v9, %s18998_s22  ;;  %9971 = vrot.lane.b32.xlu1 %v18209_v25, %s15332_s15  ;;  %s15341_s15 = smov 70  }
 0x569   : > { %10178 = vrot.lane.b32.xlu0 %v18207_v9, %s15334_s0  ;;  %10041 = vrot.lane.b32.xlu1 %v18209_v25, %s15333_s24  ;;  %s15342_s24 = smov 69  }
 0x56d   : > { %10248 = vrot.lane.b32.xlu0 %v18207_v9, %s15335_s1  ;;  %10111 = vrot.lane.b32.xlu1 %v18209_v25, %s18998_s22  ;;  %s15343_s22 = smov 68  }
 0x571   : > { %10318 = vrot.lane.b32.xlu0 %v18207_v9, %s15336_s21  ;;  %10180 = vrot.lane.b32.xlu1 %v18209_v25, %s15334_s0 }
 0x575   : > { %10388 = vrot.lane.b32.xlu0 %v18207_v9, %s15337_s23  ;;  %10250 = vrot.lane.b32.xlu1 %v18209_v25, %s15335_s1 }
 0x579   : > { %10458 = vrot.lane.b32.xlu0 %v18207_v9, %s15338_s16  ;;  %10320 = vrot.lane.b32.xlu1 %v18209_v25, %s15336_s21 }
 0x57d   : > { %10528 = vrot.lane.b32.xlu0 %v18207_v9, %s15339_s20  ;;  %10390 = vrot.lane.b32.xlu1 %v18209_v25, %s15337_s23 }
 0x581   : > { %10598 = vrot.lane.b32.xlu0 %v18207_v9, %s15340_s30  ;;  %10460 = vrot.lane.b32.xlu1 %v18209_v25, %s15338_s16  ;;  %s431_s16 = sand.u32 1, %s15291_s26  }
 0x582   : > { %s12612_s23 = scalar_lea.sflag [#allocation3], %s431_s16 }
 0x585   : > { %10668 = vrot.lane.b32.xlu0 %v18207_v9, %s15341_s15  ;;  %10530 = vrot.lane.b32.xlu1 %v18209_v25, %s15339_s20 }
 0x589   : > { %10738 = vrot.lane.b32.xlu0 %v18207_v9, %s15342_s24  ;;  %10600 = vrot.lane.b32.xlu1 %v18209_v25, %s15340_s30 }
 0x58d   : > { %10808 = vrot.lane.b32.xlu0 %v18207_v9, %s15343_s22  ;;  %10670 = vrot.lane.b32.xlu1 %v18209_v25, %s15341_s15  ;;  %s13934_s15 = sshll.u32 %s15436_s29, 4  ;;  %s15344_s29 = smov [#allocation2]  }
 0x58e   : > { %s18902_s21 = scalar_lea.hbm %s18956_s13, %s13934_s15  ;;  %s15243_s30 = sshll.u32 %s15344_s29, 4  ;;  %s15244_s30 = int_to_ptr.vmem [resolvable:$false] %s15243_s30 }
 0x58f   : > { %s15245_s0 = scalar_lea.vmem %s15244_s30, 32 }
 0x591   : > { %10874 = vperm.xlu0 %14454, %v10870_v11   ;;  %10740 = vrot.lane.b32.xlu1 %v18209_v25, %s15342_s24  ;;  %s432_s24 = scalar_lea.vmem [#allocation2], %s431_s16 }
 0x595   : > { %10810 = vrot.lane.b32.xlu1 %v18209_v25, %s15343_s22  ;;  %s12624_s22 = sshll.u32 %s432_s24, 4  ;;  %s18904_s22 = int_to_ptr.vmem [resolvable:$true] %s12624_s22 }
 0x596   : > { %s15239_s20 = scalar_lea.vmem %s18904_s22, 16  ;;  %p15246_p0 = scmp.lt.s32.totalorder %s18904_s22, %s15244_s30 }
 0x597   : > { %p15240_p11 = scmp.ne.s32.totalorder %s18904_s22, %s15239_s20  ;;  %p15247_p1 = scmp.lt.s32.totalorder %s15245_s0, %s15239_s20 }
 0x599   : > { %10879 = vperm.xlu1 %14455, %v10871_v47   ;;  %p15241_p12 = pnand %p15240_p11, %p15453_p5  ;;  %p15248_p2 = por %p15247_p1, %p15246_p0 }
 0x59b   : > { %p15242_p13 = pneg %p15241_p12 }
 0x59d   : > { %p15249_p3 = pnand %p15248_p2, %p15242_p13 }
 0x5a7   : > { %v9273_v44 = vpop.permute.xlu0 %9272  ;;  %v9149_v48 = vpop.permute.xlu1 %9148 }
 0x5ab   : > { %v9342_v27 = vpop.permute.xlu0 %9341  ;;  %v9151_v62 = vpop.permute.xlu1 %9150 }
 0x5ac   : > { %v9152_v59 = vsel %vm497_vm2, %v9149_v48, %v9151_v62  ;;  %13596 = vmatprep.subr.msk.bf16.mxu0 %vm9157_vm3, %v9151_v62  ;;  %vm9483_vm2 = vcmask 932864   ;;  %v15142_v62 = vld [vmem:[%s18947_s4 + $0x60] sm:$0xff]  }
 0x5ad   : > { %v9159_v8 = vsel %vm9157_vm3, %v9152_v59, 0  ;;  %v15143_v59 = vld [vmem:[%s18947_s4 + $0x68] sm:$0xff]  }
 0x5ae   : > { %9179 = vmatpush1.bf16.msra.mxu0 %v9159_v8 }
 0x5af   : > { %v9411_v61 = vpop.permute.xlu0 %9410  ;;  %v9275_v26 = vpop.permute.xlu1 %9274 }
 0x5b0   : > { %v9276_v5 = vsel %vm902_vm5, %v9273_v44, %v9275_v26  ;;  %13604 = vmatprep.subr.msk.bf16.mxu0 %vm9157_vm3, %v9275_v26  ;;  %vm9553_vm5 = vcmask 924672  }
 0x5b1   : > { %v9281_v4 = vsel %vm9157_vm3, %v9276_v5, 0  ;;  %13597 = vmatmul.mubr.msk.bf16.vlgmr.msra.gmra.mxu0 %vm9153_vm14, %v15130_v22 }
 0x5b2   : > { %9301 = vmatpush1.bf16.msra.mxu0 %v9281_v4  ;;  %9318 = vmatprep.mubr.bf16.mxu0 %v18988_v24 }
 0x5b3   : > { %v9480_v51 = vpop.permute.xlu0 %9479  ;;  %v9344_v54 = vpop.permute.xlu1 %9343 }
 0x5b4   : > { %v9345_v29 = vsel %vm1122_vm6, %v9342_v27, %v9344_v54  ;;  %13609 = vmatprep.subr.msk.bf16.mxu1 %vm9157_vm3, %v9344_v54  ;;  %vm9623_vm6 = vcmask 916480  }
 0x5b5   : > { %v9350_v12 = vsel %vm9157_vm3, %v9345_v29, 0  ;;  %v15144_v29 = vld [vmem:[%s18947_s4 + $0x70] sm:$0xff]  }
 0x5b6   : > { %9370 = vmatpush1.bf16.msra.mxu1 %v9350_v12  ;;  %v15145_v12 = vld [vmem:[%s18947_s4 + $0x78] sm:$0xff]  }
 0x5b7   : > { %v9550_v15 = vpop.permute.xlu0 %9549  ;;  %v9413_v57 = vpop.permute.xlu1 %9412 }
 0x5b8   : > { %v9414_v52 = vsel %vm1342_vm7, %v9411_v61, %v9413_v57  ;;  %13614 = vmatprep.subr.msk.bf16.mxu0 %vm9157_vm3, %v9413_v57  ;;  %vm9693_vm7 = vcmask 908288  }
 0x5b9   : > { %v9419_v58 = vsel %vm9157_vm3, %v9414_v52, 0  ;;  %13605 = vmatmul.mubr.msk.bf16.vlgmr.msra.gmra.mxu0 %vm9153_vm14, %v15132_v3  ;;  %13610 = vmatmul.mubr.msk.bf16.vlgmr.msra.gmra.mxu1 %vm9153_vm14, %v15133_v28 }
 0x5ba   : > { %9439 = vmatpush1.bf16.msra.mxu0 %v9419_v58  ;;  %9456 = vmatprep.mubr.bf16.mxu0 %v18988_v24 }
 0x5bb   : > { %v9620_v50 = vpop.permute.xlu0 %9619  ;;  %v9482_v55 = vpop.permute.xlu1 %9481  ;;  %9526 = vmatprep.mubr.bf16.mxu1 %v18988_v24 }
 0x5bc   : > { %v9484_v46 = vsel %vm9483_vm2, %v9480_v51, %v9482_v55  ;;  %13619 = vmatprep.subr.msk.bf16.mxu1 %vm9157_vm3, %v9482_v55  ;;  %vm10462_vm2 = vcmask 670720  }
 0x5bd   : > { %v9489_v17 = vsel %vm9157_vm3, %v9484_v46, 0  ;;  %v15146_v46 = vld [vmem:[%s18947_s4 + $0x80] sm:$0xff]  }
 0x5be   : > { %9509 = vmatpush1.bf16.msra.mxu1 %v9489_v17  ;;  %v15147_v17 = vld [vmem:[%s18947_s4 + $0x88] sm:$0xff]  }
 0x5bf   : > { %v9690_v32 = vpop.permute.xlu0 %9689  ;;  %v9552_v39 = vpop.permute.xlu1 %9551 }
 0x5c0   : > { %v9554_v18 = vsel %vm9553_vm5, %v9550_v15, %v9552_v39  ;;  %13624 = vmatprep.subr.msk.bf16.mxu0 %vm9157_vm3, %v9552_v39  ;;  %vm10532_vm5 = vcmask 588800  }
 0x5c1   : > { %v9559_v40 = vsel %vm9157_vm3, %v9554_v18, 0  ;;  %13615 = vmatmul.mubr.msk.bf16.vlgmr.msra.gmra.mxu0 %vm9153_vm14, %v15134_v21  ;;  %13620 = vmatmul.mubr.msk.bf16.vlgmr.msra.gmra.mxu1 %vm9153_vm14, %v15135_v53 }
 0x5c2   : > { %9579 = vmatpush1.bf16.msra.mxu0 %v9559_v40  ;;  %9596 = vmatprep.mubr.bf16.mxu0 %v18988_v24 }
 0x5c3   : > { %v9760_v56 = vpop.permute.xlu0 %9759  ;;  %v9622_v7 = vpop.permute.xlu1 %9621  ;;  %9666 = vmatprep.mubr.bf16.mxu1 %v18988_v24 }
 0x5c4   : > { %v9624_v1 = vsel %vm9623_vm6, %v9620_v50, %v9622_v7  ;;  %13629 = vmatprep.subr.msk.bf16.mxu1 %vm9157_vm3, %v9622_v7  ;;  %vm10602_vm6 = vcmask 580608  }
 0x5c5   : > { %v9629_v33 = vsel %vm9157_vm3, %v9624_v1, 0  ;;  %v15148_v1 = vld [vmem:[%s18947_s4 + $0x90] sm:$0xff]  }
 0x5c6   : > { %9649 = vmatpush1.bf16.msra.mxu1 %v9629_v33  ;;  %v15149_v33 = vld [vmem:[%s18947_s4 + $0x98] sm:$0xff]  }
 0x5c7   : > { %v9830_v38 = vpop.permute.xlu0 %9829  ;;  %v9692_v0 = vpop.permute.xlu1 %9691 }
 0x5c8   : > { %v9694_v23 = vsel %vm9693_vm7, %v9690_v32, %v9692_v0  ;;  %13634 = vmatprep.subr.msk.bf16.mxu0 %vm9157_vm3, %v9692_v0  ;;  %vm10672_vm7 = vcmask 572416  }
 0x5c9   : > { %v9699_v43 = vsel %vm9157_vm3, %v9694_v23, 0  ;;  %13625 = vmatmul.mubr.msk.bf16.vlgmr.msra.gmra.mxu0 %vm9153_vm14, %v15136_v2  ;;  %13630 = vmatmul.mubr.msk.bf16.vlgmr.msra.gmra.mxu1 %vm9153_vm14, %v15137_v16 }
 0x5ca   : > { %9719 = vmatpush1.bf16.msra.mxu0 %v9699_v43  ;;  %9736 = vmatprep.mubr.bf16.mxu0 %v18988_v24 }
 0x5cb   : > { %v9900_v31 = vpop.permute.xlu0 %9899  ;;  %v9762_v49 = vpop.permute.xlu1 %9761  ;;  %9806 = vmatprep.mubr.bf16.mxu1 %v18988_v24 }
 0x5cc   : > { %v9764_v10 = vsel %vm9763_vm15, %v9760_v56, %v9762_v49  ;;  %13639 = vmatprep.subr.msk.bf16.mxu1 %vm9157_vm3, %v9762_v49  ;;  %v15150_v49 = vld [vmem:[%s18947_s4 + $0xa0] sm:$0xff]   ;;  %vm10742_vm15 = vcmask 564224  }
 0x5cd   : > { %v9769_v41 = vsel %vm9157_vm3, %v9764_v10, 0  ;;  %v15151_v10 = vld [vmem:[%s18947_s4 + $0xa8] sm:$0xff]  }
 0x5ce   : > { %9789 = vmatpush1.bf16.msra.mxu1 %v9769_v41 }
 0x5cf   : > { %v9970_v36 = vpop.permute.xlu0 %9969  ;;  %v9832_v35 = vpop.permute.xlu1 %9831 }
 0x5d0   : > { %v9834_v37 = vsel %vm9833_vm0, %v9830_v38, %v9832_v35  ;;  %13644 = vmatprep.subr.msk.bf16.mxu0 %vm9157_vm3, %v9832_v35  ;;  %vm10812_vm0 = vcmask 556032  }
 0x5d1   : > { %v9839_v63 = vsel %vm9157_vm3, %v9834_v37, 0  ;;  %13635 = vmatmul.mubr.msk.bf16.vlgmr.msra.gmra.mxu0 %vm9153_vm14, %v15138_v19  ;;  %13640 = vmatmul.mubr.msk.bf16.vlgmr.msra.gmra.mxu1 %vm9153_vm14, %v15139_v34 }
 0x5d2   : > { %9859 = vmatpush1.bf16.msra.mxu0 %v9839_v63  ;;  %9876 = vmatprep.mubr.bf16.mxu0 %v18988_v24 }
 0x5d3   : > { %v10040_v60 = vpop.permute.xlu0 %10039  ;;  %v9902_v20 = vpop.permute.xlu1 %9901  ;;  %9946 = vmatprep.mubr.bf16.mxu1 %v18988_v24 }
 0x5d4   : > { %v9904_v45 = vsel %vm9903_vm1, %v9900_v31, %v9902_v20  ;;  %13649 = vmatprep.subr.msk.bf16.mxu1 %vm9157_vm3, %v9902_v20  ;;  %v15153_v20 = vld [vmem:[%s18947_s4 + $0xb8] sm:$0xff]   ;;  %vm10963_vm1 = vcmask 97280  }
 0x5d5   : > { %v9909_v9 = vsel %vm9157_vm3, %v9904_v45, 0 }
 0x5d6   : > { %9929 = vmatpush1.bf16.msra.mxu1 %v9909_v9 }
 0x5d7   : > { %v10110_v25 = vpop.permute.xlu0 %10109  ;;  %v9972_v6 = vpop.permute.xlu1 %9971 }
 0x5d8   : > { %v9974_v14 = vsel %vm9973_vm9, %v9970_v36, %v9972_v6  ;;  %13654 = vmatprep.subr.msk.bf16.mxu0 %vm9157_vm3, %v9972_v6  ;;  %v15155_v6 = vld [vmem:[%s18949_s6 + $0x38] sm:$0xff]   ;;  %vm11387_vm9 = vcmask 1044480  }
 0x5d9   : > { %v9979_v11 = vsel %vm9157_vm3, %v9974_v14, 0  ;;  %13645 = vmatmul.mubr.msk.bf16.vlgmr.msra.gmra.mxu0 %vm9153_vm14, %v15140_v30  ;;  %13650 = vmatmul.mubr.msk.bf16.vlgmr.msra.gmra.mxu1 %vm9153_vm14, %v15141_v42  ;;  %v15156_v14 = vld [vmem:[%s18949_s6 + $0x80] sm:$0xff]  }
 0x5da   : > { %9999 = vmatpush1.bf16.msra.mxu0 %v9979_v11  ;;  %10016 = vmatprep.mubr.bf16.mxu0 %v18988_v24  ;;  %v15157_v11 = vld [vmem:[%s18949_s6 + $0x30] sm:$0xff]  }
 0x5db   : > { %v10179_v47 = vpop.permute.xlu0 %10178  ;;  %v10042_v44 = vpop.permute.xlu1 %10041  ;;  %10086 = vmatprep.mubr.bf16.mxu1 %v18988_v24 }
 0x5dc   : > { %v10044_v48 = vsel %vm10043_vm10, %v10040_v60, %v10042_v44  ;;  %13659 = vmatprep.subr.msk.bf16.mxu1 %vm9157_vm3, %v10042_v44  ;;  %v15152_v60 = vld [vmem:[%s18947_s4 + $0xb0] sm:$0xff]   ;;  %v15159_v44 = vld [vmem:[%s18949_s6 + $0x28] sm:$0xff]  }
 0x5dd   : > { %v10049_v27 = vsel %vm9157_vm3, %v10044_v48, 0  ;;  %v15160_v48 = vld [vmem:[%s18949_s6 + $0x70] sm:$0xff]  }
 0x5de   : > { %10069 = vmatpush1.bf16.msra.mxu1 %v10049_v27  ;;  %v15161_v27 = vld [vmem:[%s18949_s6 + $0x20] sm:$0xff]  }
 0x5df   : > { %v10249_v8 = vpop.permute.xlu0 %10248  ;;  %v10112_v22 = vpop.permute.xlu1 %10111 }
 0x5e0   : > { %v10113_v61 = vsel %vm1562_vm8, %v10110_v25, %v10112_v22  ;;  %13664 = vmatprep.subr.msk.bf16.mxu0 %vm9157_vm3, %v10112_v22  ;;  %vm10252_vm8 = vcmask 695296   ;;  %v15154_v25 = vld [vmem:[%s18947_s4 + $0xc0] sm:$0xff]   ;;  %v15165_v22 = vld [vmem:[%s18949_s6 + $0x10] sm:$0xff]  }
 0x5e1   : > { %v10118_v26 = vsel %vm9157_vm3, %v10113_v61, 0  ;;  %13655 = vmatmul.mubr.msk.bf16.vlgmr.msra.gmra.mxu0 %vm9153_vm14, %v15142_v62  ;;  %13660 = vmatmul.mubr.msk.bf16.vlgmr.msra.gmra.mxu1 %vm9153_vm14, %v15143_v59  ;;  %v15162_v62 = vld [vmem:[%s18949_s6 + $0x68] sm:$0xff]   ;;  %v15163_v59 = vld [vmem:[%s18949_s6 + $0x18] sm:$0xff]  }
 0x5e2   : > { %10138 = vmatpush1.bf16.msra.mxu0 %v10118_v26  ;;  %10155 = vmatprep.mubr.bf16.mxu0 %v18988_v24  ;;  %v15166_v61 = vld [vmem:[%s18949_s6 + $0x58] sm:$0xff]   ;;  %v15167_v26 = vld [vmem:[%s18949_s6 + $0x8] sm:$0xff]  }
 0x5e3   : > { %v10319_v5 = vpop.permute.xlu0 %10318  ;;  %v10181_v4 = vpop.permute.xlu1 %10180  ;;  %10225 = vmatprep.mubr.bf16.mxu1 %v18988_v24 }
 0x5e4   : > { %v10183_v51 = vsel %vm10182_vm11, %v10179_v47, %v10181_v4  ;;  %13669 = vmatprep.subr.msk.bf16.mxu1 %vm9157_vm3, %v10181_v4  ;;  %v15158_v47 = vld [vmem:[%s18949_s6 + $0x78] sm:$0xff]   ;;  %v15169_v4 = vld [vmem:[%s18949_s6] sm:$0xff]  }
 0x5e5   : > { %v10188_v54 = vsel %vm9157_vm3, %v10183_v51, 0  ;;  %v15170_v51 = vld [vmem:[%s18949_s6 + $0x48] sm:$0xff]  }
 0x5e6   : > { %10208 = vmatpush1.bf16.msra.mxu1 %v10188_v54  ;;  %v15171_v54 = vld [vmem:[%s18949_s6 + $0x40] sm:$0x3f]  }
 0x5e7   : > { %v10389_v3 = vpop.permute.xlu0 %10388  ;;  %v10251_v28 = vpop.permute.xlu1 %10250 }
 0x5e8   : > { %v10253_v15 = vsel %vm10252_vm8, %v10249_v8, %v10251_v28  ;;  %13674 = vmatprep.subr.msk.bf16.mxu0 %vm9157_vm3, %v10251_v28  ;;  %v15164_v8 = vld [vmem:[%s18949_s6 + $0x60] sm:$0xff]  }
 0x5e9   : > { %v10258_v57 = vsel %vm9157_vm3, %v10253_v15, 0  ;;  %13665 = vmatmul.mubr.msk.bf16.vlgmr.msra.gmra.mxu0 %vm9153_vm14, %v15144_v29  ;;  %13670 = vmatmul.mubr.msk.bf16.vlgmr.msra.gmra.mxu1 %vm9153_vm14, %v15145_v12  ;;  %v15172_v29 = vld [vmem:[%s18949_s6 + $0x88] sm:$0x3f]  }
 0x5ea   : > { %10278 = vmatpush1.bf16.msra.mxu0 %v10258_v57  ;;  %10295 = vmatprep.mubr.bf16.mxu0 %v18988_v24 }
 0x5eb   : > { %v10459_v52 = vpop.permute.xlu0 %10458  ;;  %v10321_v58 = vpop.permute.xlu1 %10320  ;;  %10365 = vmatprep.mubr.bf16.mxu1 %v18988_v24 }
 0x5ec   : > { %v10323_v50 = vsel %vm10322_vm12, %v10319_v5, %v10321_v58  ;;  %13679 = vmatprep.subr.msk.bf16.mxu1 %vm9157_vm3, %v10321_v58  ;;  %v15168_v5 = vld [vmem:[%s18949_s6 + $0x50] sm:$0xff]  }
 0x5ed   : > { %v10328_v55 = vsel %vm9157_vm3, %v10323_v50, 0 }
 0x5ee   : > { %10348 = vmatpush1.bf16.msra.mxu1 %v10328_v55 }
 0x5ef   : > { %v10529_v21 = vpop.permute.xlu0 %10528  ;;  %v10391_v53 = vpop.permute.xlu1 %10390 }
 0x5f0   : > { %v10393_v32 = vsel %vm10392_vm13, %v10389_v3, %v10391_v53  ;;  %13684 = vmatprep.subr.msk.bf16.mxu0 %vm9157_vm3, %v10391_v53 }
 0x5f1   : > { %v10398_v39 = vsel %vm9157_vm3, %v10393_v32, 0  ;;  %13675 = vmatmul.mubr.msk.bf16.vlgmr.msra.gmra.mxu0 %vm9153_vm14, %v15146_v46  ;;  %13680 = vmatmul.mubr.msk.bf16.vlgmr.msra.gmra.mxu1 %vm9153_vm14, %v15147_v17 }
 0x5f2   : > { %10418 = vmatpush1.bf16.msra.mxu0 %v10398_v39  ;;  %10435 = vmatprep.mubr.bf16.mxu0 %v18988_v24 }
 0x5f3   : > { %v10461_v18 = vpop.permute.xlu1 %10460  ;;  %10505 = vmatprep.mubr.bf16.mxu1 %v18988_v24  ;;  %v10599_v56 = vpop.permute.xlu0 %10598 }
 0x5f4   : > { %v10463_v40 = vsel %vm10462_vm2, %v10459_v52, %v10461_v18  ;;  %13689 = vmatprep.subr.msk.bf16.mxu1 %vm9157_vm3, %v10461_v18 }
 0x5f5   : > { %v10468_v7 = vsel %vm9157_vm3, %v10463_v40, 0 }
 0x5f6   : > { %10488 = vmatpush1.bf16.msra.mxu1 %v10468_v7 }
 0x5f7   : > { %v10531_v2 = vpop.permute.xlu1 %10530  ;;  %v10669_v0 = vpop.permute.xlu0 %10668 }
 0x5f8   : > { %v10533_v16 = vsel %vm10532_vm5, %v10529_v21, %v10531_v2  ;;  %13694 = vmatprep.subr.msk.bf16.mxu0 %vm9157_vm3, %v10531_v2 }
 0x5f9   : > { %v10538_v38 = vsel %vm9157_vm3, %v10533_v16, 0  ;;  %13685 = vmatmul.mubr.msk.bf16.vlgmr.msra.gmra.mxu0 %vm9153_vm14, %v15148_v1  ;;  %13690 = vmatmul.mubr.msk.bf16.vlgmr.msra.gmra.mxu1 %vm9153_vm14, %v15149_v33 }
 0x5fa   : > { %10558 = vmatpush1.bf16.msra.mxu0 %v10538_v38  ;;  %10575 = vmatprep.mubr.bf16.mxu0 %v18988_v24 }
 0x5fb   : > { %v10601_v23 = vpop.permute.xlu1 %10600  ;;  %10645 = vmatprep.mubr.bf16.mxu1 %v18988_v24  ;;  %v10739_v34 = vpop.permute.xlu0 %10738 }
 0x5fc   : > { %v10603_v43 = vsel %vm10602_vm6, %v10599_v56, %v10601_v23  ;;  %13699 = vmatprep.subr.msk.bf16.mxu1 %vm9157_vm3, %v10601_v23  ;;  %v9255_v28 = vpop.f32.mrf.mxu1 }
 0x5fd   : > { %v10608_v31 = vsel %vm9157_vm3, %v10603_v43, 0 }
 0x5fe   : > { %10628 = vmatpush1.bf16.msra.mxu1 %v10608_v31  ;;  %v9257_v15 = vpop.f32.mrf.mxu1 }
 0x5ff   : > { %v10671_v41 = vpop.permute.xlu1 %10670  ;;  %v10809_v45 = vpop.permute.xlu0 %10808 }
 0x600   : > { %v10673_v19 = vsel %vm10672_vm7, %v10669_v0, %v10671_v41  ;;  %13704 = vmatprep.subr.msk.bf16.mxu0 %vm9157_vm3, %v10671_v41  ;;  %v9259_v52 = vpop.f32.mrf.mxu1 }
 0x601   : > { %v10678_v36 = vsel %vm9157_vm3, %v10673_v19, 0  ;;  %13695 = vmatmul.mubr.msk.bf16.vlgmr.msra.gmra.mxu0 %vm9153_vm14, %v15150_v49  ;;  %13700 = vmatmul.mubr.msk.bf16.vlgmr.msra.gmra.mxu1 %vm9153_vm14, %v15151_v10 }
 0x602   : > { %10698 = vmatpush1.bf16.msra.mxu0 %v10678_v36  ;;  %10715 = vmatprep.mubr.bf16.mxu0 %v18988_v24  ;;  %v9261_v55 = vpop.f32.mrf.mxu1 }
 0x603   : > { %v10741_v35 = vpop.permute.xlu1 %10740  ;;  %10785 = vmatprep.mubr.bf16.mxu1 %v18988_v24 }
 0x604   : > { %v10743_v37 = vsel %vm10742_vm15, %v10739_v34, %v10741_v35  ;;  %13709 = vmatprep.subr.msk.bf16.mxu1 %vm9157_vm3, %v10741_v35 }
 0x605   : > { %v10748_v63 = vsel %vm9157_vm3, %v10743_v37, 0 }
 0x606   : > { %10768 = vmatpush1.bf16.msra.mxu1 %v10748_v63 }
 0x607   : > { %v10811_v9 = vpop.permute.xlu1 %10810  ;;  %10971 = vmatprep.subr.bf16.mxu1 %v18988_v24 }
 0x608   : > { %v10813_v30 = vsel %vm10812_vm0, %v10809_v45, %v10811_v9  ;;  %13714 = vmatprep.subr.msk.bf16.mxu0 %vm9157_vm3, %v10811_v9 }
 0x609   : > { %v10818_v42 = vsel %vm9157_vm3, %v10813_v30, 0  ;;  %13705 = vmatmul.mubr.msk.bf16.vlgmr.msra.gmra.mxu0 %vm9153_vm14, %v15152_v60  ;;  %13710 = vmatmul.mubr.msk.bf16.vlgmr.msra.gmra.mxu1 %vm9153_vm14, %v15153_v20 }
 0x60a   : > { %10838 = vmatpush1.bf16.msra.mxu0 %v10818_v42  ;;  %10855 = vmatprep.mubr.bf16.mxu0 %v18988_v24 }
 0x60b   : > { %11087 = vmatprep.subr.bf16.mxu0 %v18988_v24  ;;  %10972 = vmatpush1.bf16.msra.mxu1 %v15155_v6 }
 0x60c   : > { %10973 = vmatprep.subr.bf16.mxu1 %v18988_v24 }
 0x60f   : > { %10974 = vmatpush1.bf16.msra.mxu1 %v15157_v11 }
 0x610   : > { %10975 = vmatprep.subr.bf16.mxu1 %v18988_v24 }
 0x611   : > { %13715 = vmatmul.mubr.msk.bf16.vlgmr.msra.gmra.mxu0 %vm9153_vm14, %v15154_v25  ;;  %vm10967_vm14 = vcmask 1045504  }
 0x612   : > { %11088 = vmatpush1.bf16.msra.mxu0 %v15156_v14  ;;  %v10969_v12 = vsel %vm10967_vm14, %v15171_v54, 0  ;;  %v11085_v3 = vsel %vm10967_vm14, %v15172_v29, 0 }
 0x613   : > { %11089 = vmatprep.subr.bf16.mxu0 %v18988_v24  ;;  %10976 = vmatpush1.bf16.msra.mxu1 %v15159_v44 }
 0x614   : > { %10977 = vmatprep.subr.bf16.mxu1 %v18988_v24 }
 0x616   : > { %11090 = vmatpush1.bf16.msra.mxu0 %v15158_v47 }
 0x617   : > { %11091 = vmatprep.subr.bf16.mxu0 %v18988_v24  ;;  %10978 = vmatpush1.bf16.msra.mxu1 %v15161_v27 }
 0x618   : > { %10979 = vmatprep.subr.bf16.mxu1 %v18988_v24 }
 0x61a   : > { %11092 = vmatpush1.bf16.msra.mxu0 %v15160_v48 }
 0x61b   : > { %11093 = vmatprep.subr.bf16.mxu0 %v18988_v24  ;;  %10980 = vmatpush1.bf16.msra.mxu1 %v15163_v59 }
 0x61c   : > { %10981 = vmatprep.subr.bf16.mxu1 %v18988_v24 }
 0x61e   : > { %11094 = vmatpush1.bf16.msra.mxu0 %v15162_v62 }
 0x61f   : > { %11095 = vmatprep.subr.bf16.mxu0 %v18988_v24  ;;  %10982 = vmatpush1.bf16.msra.mxu1 %v15165_v22 }
 0x620   : > { %10983 = vmatprep.subr.bf16.mxu1 %v18988_v24 }
 0x622   : > { %11096 = vmatpush1.bf16.msra.mxu0 %v15164_v8 }
 0x623   : > { %11097 = vmatprep.subr.bf16.mxu0 %v18988_v24  ;;  %10984 = vmatpush1.bf16.msra.mxu1 %v15167_v26 }
 0x624   : > { %10985 = vmatprep.subr.bf16.mxu1 %v18988_v24 }
 0x626   : > { %11098 = vmatpush1.bf16.msra.mxu0 %v15166_v61 }
 0x627   : > { %11099 = vmatprep.subr.bf16.mxu0 %v18988_v24  ;;  %10986 = vmatpush1.bf16.msra.mxu1 %v15169_v4 }
 0x628   : > { %11001 = vmatprep.subr.bf16.mxu1 %v18988_v24 }
 0x62a   : > { %11100 = vmatpush1.bf16.msra.mxu0 %v15168_v5 }
 0x62b   : > { %11101 = vmatprep.subr.bf16.mxu0 %v18988_v24  ;;  %11002 = vmatpush2.bf16.msra.mxu1 %v10969_v12 }
 0x62c   : > { %11205 = vmatprep.subr.bf16.mxu1 %v18988_v24 }
 0x62e   : > { %11102 = vmatpush1.bf16.msra.mxu0 %v15170_v51 }
 0x62f   : > { %11117 = vmatprep.subr.bf16.mxu0 %v18988_v24 }
 0x632   : > { %11118 = vmatpush2.bf16.msra.mxu0 %v11085_v3 }
 0x633   : > { %11323 = vmatprep.subr.bf16.mxu0 %v18988_v24 }
 0x671   : > { %v9198_v57 = vpop.f32.mrf.mxu0 }
 0x672   : > { %v9256_v37 = vadd.f32 %v9255_v28, %v9198_v57 }
 0x673   : > { %v9200_v58 = vpop.f32.mrf.mxu0 }
 0x674   : > { %v9258_v35 = vadd.f32 %v9257_v15, %v9200_v58 }
 0x675   : > { %v9202_v50 = vpop.f32.mrf.mxu0 }
 0x676   : > { %v9260_v20 = vadd.f32 %v9259_v52, %v9202_v50 }
 0x677   : > { %v9204_v46 = vpop.f32.mrf.mxu0 }
 0x678   : > { %v9262_v25 = vadd.f32 %v9261_v55, %v9204_v46 }
 0x679   : > { %v9320_v17 = vpop.f32.mrf.mxu0  ;;  %v9389_v21 = vpop.f32.mrf.mxu1 }
 0x67a   : > { %v9329_v9 = vadd.f32 %v9320_v17, %v9256_v37 }
 0x67b   : > { %v9322_v53 = vpop.f32.mrf.mxu0  ;;  %v9391_v32 = vpop.f32.mrf.mxu1 }
 0x67c   : > { %v9330_v45 = vadd.f32 %v9322_v53, %v9258_v35  ;;  %v9398_v48 = vadd.f32 %v9389_v21, %v9329_v9 }
 0x67d   : > { %v9324_v39 = vpop.f32.mrf.mxu0  ;;  %v9393_v18 = vpop.f32.mrf.mxu1 }
 0x67e   : > { %v9331_v6 = vadd.f32 %v9324_v39, %v9260_v20  ;;  %v9399_v47 = vadd.f32 %v9391_v32, %v9330_v45 }
 0x67f   : > { %v9326_v40 = vpop.f32.mrf.mxu0  ;;  %v9395_v56 = vpop.f32.mrf.mxu1 }
 0x680   : > { %v9332_v44 = vadd.f32 %v9326_v40, %v9262_v25  ;;  %v9400_v59 = vadd.f32 %v9393_v18, %v9331_v6 }
 0x681   : > { %v9458_v7 = vpop.f32.mrf.mxu0  ;;  %v9528_v1 = vpop.f32.mrf.mxu1 }
 0x682   : > { %v9467_v22 = vadd.f32 %v9458_v7, %v9398_v48  ;;  %v9401_v5 = vadd.f32 %v9395_v56, %v9332_v44 }
 0x683   : > { %v9460_v33 = vpop.f32.mrf.mxu0  ;;  %v9530_v2 = vpop.f32.mrf.mxu1 }
 0x684   : > { %v9468_v8 = vadd.f32 %v9460_v33, %v9399_v47  ;;  %v9537_v3 = vadd.f32 %v9528_v1, %v9467_v22 }
 0x685   : > { %v9462_v16 = vpop.f32.mrf.mxu0  ;;  %v9532_v38 = vpop.f32.mrf.mxu1 }
 0x686   : > { %v9469_v4 = vadd.f32 %v9462_v16, %v9400_v59  ;;  %v9538_v29 = vadd.f32 %v9530_v2, %v9468_v8 }
 0x687   : > { %v9464_v0 = vpop.f32.mrf.mxu0  ;;  %v9534_v23 = vpop.f32.mrf.mxu1 }
 0x688   : > { %v9470_v12 = vadd.f32 %v9464_v0, %v9401_v5  ;;  %v9539_v57 = vadd.f32 %v9532_v38, %v9469_v4 }
 0x689   : > { %v9598_v43 = vpop.f32.mrf.mxu0  ;;  %v9668_v31 = vpop.f32.mrf.mxu1 }
 0x68a   : > { %v9607_v58 = vadd.f32 %v9598_v43, %v9537_v3  ;;  %v9540_v46 = vadd.f32 %v9534_v23, %v9470_v12 }
 0x68b   : > { %v9600_v49 = vpop.f32.mrf.mxu0  ;;  %v9670_v10 = vpop.f32.mrf.mxu1 }
 0x68c   : > { %v9608_v52 = vadd.f32 %v9600_v49, %v9538_v29  ;;  %v9677_v18 = vadd.f32 %v9668_v31, %v9607_v58 }
 0x68d   : > { %v9602_v41 = vpop.f32.mrf.mxu0  ;;  %v9672_v19 = vpop.f32.mrf.mxu1 }
 0x68e   : > { %v9609_v17 = vadd.f32 %v9602_v41, %v9539_v57  ;;  %v9678_v32 = vadd.f32 %v9670_v10, %v9608_v52 }
 0x68f   : > { %v9604_v34 = vpop.f32.mrf.mxu0  ;;  %v9674_v36 = vpop.f32.mrf.mxu1 }
 0x690   : > { %v9610_v39 = vadd.f32 %v9604_v34, %v9540_v46  ;;  %v9679_v7 = vadd.f32 %v9672_v19, %v9609_v17 }
 0x691   : > { %v9738_v63 = vpop.f32.mrf.mxu0  ;;  %v9808_v60 = vpop.f32.mrf.mxu1 }
 0x692   : > { %v9747_v2 = vadd.f32 %v9738_v63, %v9677_v18  ;;  %v9680_v0 = vadd.f32 %v9674_v36, %v9610_v39 }
 0x693   : > { %v9740_v30 = vpop.f32.mrf.mxu0  ;;  %v9810_v42 = vpop.f32.mrf.mxu1 }
 0x694   : > { %v9748_v33 = vadd.f32 %v9740_v30, %v9678_v32  ;;  %v9817_v23 = vadd.f32 %v9808_v60, %v9747_v2 }
 0x695   : > { %v9742_v14 = vpop.f32.mrf.mxu0  ;;  %v9812_v11 = vpop.f32.mrf.mxu1 }
 0x696   : > { %v9749_v38 = vadd.f32 %v9742_v14, %v9679_v7  ;;  %v9818_v35 = vadd.f32 %v9810_v42, %v9748_v33 }
 0x697   : > { %v9744_v27 = vpop.f32.mrf.mxu0  ;;  %v9814_v62 = vpop.f32.mrf.mxu1 }
 0x698   : > { %v9750_v37 = vadd.f32 %v9744_v27, %v9680_v0  ;;  %v9819_v45 = vadd.f32 %v9812_v11, %v9749_v38 }
 0x699   : > { %v9878_v61 = vpop.f32.mrf.mxu0  ;;  %v9948_v26 = vpop.f32.mrf.mxu1 }
 0x69a   : > { %v9887_v34 = vadd.f32 %v9878_v61, %v9817_v23  ;;  %v9820_v25 = vadd.f32 %v9814_v62, %v9750_v37 }
 0x69b   : > { %v9880_v51 = vpop.f32.mrf.mxu0  ;;  %v9950_v54 = vpop.f32.mrf.mxu1 }
 0x69c   : > { %v9888_v10 = vadd.f32 %v9880_v51, %v9818_v35  ;;  %v9957_v36 = vadd.f32 %v9948_v26, %v9887_v34 }
 0x69d   : > { %v9882_v28 = vpop.f32.mrf.mxu0  ;;  %v9952_v15 = vpop.f32.mrf.mxu1 }
 0x69e   : > { %v9889_v19 = vadd.f32 %v9882_v28, %v9819_v45  ;;  %v9958_v6 = vadd.f32 %v9950_v54, %v9888_v10 }
 0x69f   : > { %v9884_v50 = vpop.f32.mrf.mxu0  ;;  %v9954_v55 = vpop.f32.mrf.mxu1 }
 0x6a0   : > { %v9890_v47 = vadd.f32 %v9884_v50, %v9820_v25  ;;  %v9959_v48 = vadd.f32 %v9952_v15, %v9889_v19 }
 0x6a1   : > { %v10018_v21 = vpop.f32.mrf.mxu0  ;;  %v10088_v53 = vpop.f32.mrf.mxu1 }
 0x6a2   : > { %v10027_v27 = vadd.f32 %v10018_v21, %v9957_v36  ;;  %v9960_v8 = vadd.f32 %v9954_v55, %v9890_v47 }
 0x6a3   : > { %v10020_v40 = vpop.f32.mrf.mxu0  ;;  %v10090_v56 = vpop.f32.mrf.mxu1 }
 0x6a4   : > { %v10028_v42 = vadd.f32 %v10020_v40, %v9958_v6  ;;  %v10097_v62 = vadd.f32 %v10088_v53, %v10027_v27 }
 0x6a5   : > { %v10022_v1 = vpop.f32.mrf.mxu0  ;;  %v10092_v16 = vpop.f32.mrf.mxu1 }
 0x6a6   : > { %v10029_v11 = vadd.f32 %v10022_v1, %v9959_v48  ;;  %v10098_v5 = vadd.f32 %v10090_v56, %v10028_v42 }
 0x6a7   : > { %v10024_v49 = vpop.f32.mrf.mxu0  ;;  %v10094_v43 = vpop.f32.mrf.mxu1 }
 0x6a8   : > { %v10030_v4 = vadd.f32 %v10024_v49, %v9960_v8  ;;  %v10099_v12 = vadd.f32 %v10092_v16, %v10029_v11 }
 0x6a9   : > { %v10157_v41 = vpop.f32.mrf.mxu0  ;;  %v10227_v20 = vpop.f32.mrf.mxu1 }
 0x6aa   : > { %v10166_v3 = vadd.f32 %v10157_v41, %v10097_v62  ;;  %v10100_v57 = vadd.f32 %v10094_v43, %v10030_v4 }
 0x6ab   : > { %v10159_v31 = vpop.f32.mrf.mxu0  ;;  %v10229_v9 = vpop.f32.mrf.mxu1 }
 0x6ac   : > { %v10167_v54 = vadd.f32 %v10159_v31, %v10098_v5  ;;  %v10236_v55 = vadd.f32 %v10227_v20, %v10166_v3 }
 0x6ad   : > { %v10161_v30 = vpop.f32.mrf.mxu0  ;;  %v10231_v63 = vpop.f32.mrf.mxu1 }
 0x6ae   : > { %v10168_v15 = vadd.f32 %v10161_v30, %v10099_v12  ;;  %v10237_v50 = vadd.f32 %v10229_v9, %v10167_v54 }
 0x6af   : > { %v10163_v14 = vpop.f32.mrf.mxu0  ;;  %v10233_v44 = vpop.f32.mrf.mxu1 }
 0x6b0   : > { %v10169_v46 = vadd.f32 %v10163_v14, %v10100_v57  ;;  %v10238_v32 = vadd.f32 %v10231_v63, %v10168_v15 }
 0x6b1   : > { %v10297_v60 = vpop.f32.mrf.mxu0  ;;  %v10367_v59 = vpop.f32.mrf.mxu1 }
 0x6b2   : > { %v10306_v18 = vadd.f32 %v10297_v60, %v10236_v55  ;;  %v10239_v56 = vadd.f32 %v10233_v44, %v10169_v46 }
 0x6b3   : > { %v10299_v22 = vpop.f32.mrf.mxu0  ;;  %v10369_v61 = vpop.f32.mrf.mxu1 }
 0x6b4   : > { %v10307_v39 = vadd.f32 %v10299_v22, %v10237_v50  ;;  %v10376_v0 = vadd.f32 %v10367_v59, %v10306_v18 }
 0x6b5   : > { %v10301_v51 = vpop.f32.mrf.mxu0  ;;  %v10371_v29 = vpop.f32.mrf.mxu1 }
 0x6b6   : > { %v10308_v7 = vadd.f32 %v10301_v51, %v10238_v32  ;;  %v10377_v1 = vadd.f32 %v10369_v61, %v10307_v39 }
 0x6b7   : > { %v10303_v26 = vpop.f32.mrf.mxu0  ;;  %v10373_v28 = vpop.f32.mrf.mxu1 }
 0x6b8   : > { %v10309_v16 = vadd.f32 %v10303_v26, %v10239_v56  ;;  %v10378_v43 = vadd.f32 %v10371_v29, %v10308_v7 }
 0x6b9   : > { %v10437_v52 = vpop.f32.mrf.mxu0  ;;  %v10507_v58 = vpop.f32.mrf.mxu1 }
 0x6ba   : > { %v10446_v37 = vadd.f32 %v10437_v52, %v10376_v0  ;;  %v10379_v20 = vadd.f32 %v10373_v28, %v10309_v16  ;;  %v10880_v52 = vpop.permute.xlu1 %10879  ;;  %v15173_v0 = vld [vmem:[%s18949_s6 + $0xc8] sm:$0xff]  }
 0x6bb   : > { %v10439_v17 = vpop.f32.mrf.mxu0  ;;  %v10509_v21 = vpop.f32.mrf.mxu1 }
 0x6bc   : > { %v10447_v35 = vadd.f32 %v10439_v17, %v10377_v1  ;;  %v10516_v25 = vadd.f32 %v10507_v58, %v10446_v37  ;;  %v15177_v37 = vld [vmem:[%s18949_s6 + $0xb8] sm:$0xff]  }
 0x6bd   : > { %v10441_v53 = vpop.f32.mrf.mxu0  ;;  %v10511_v40 = vpop.f32.mrf.mxu1 }
 0x6be   : > { %v10448_v45 = vadd.f32 %v10441_v53, %v10378_v43  ;;  %v10517_v31 = vadd.f32 %v10509_v21, %v10447_v35  ;;  %v10875_v21 = vpop.permute.xlu0 %10874  ;;  %v15175_v43 = vld [vmem:[%s18949_s6 + $0xc0] sm:$0xff]   ;;  %v15176_v35 = vld [vmem:[%s18949_s6 + $0x108] sm:$0xff]  }
 0x6bf   : > { %v10443_v33 = vpop.f32.mrf.mxu0  ;;  %v10513_v2 = vpop.f32.mrf.mxu1 }
 0x6c0   : > { %v10449_v9 = vadd.f32 %v10443_v33, %v10379_v20  ;;  %v10518_v63 = vadd.f32 %v10511_v40, %v10448_v45  ;;  %v15180_v20 = vld [vmem:[%s18949_s6 + $0xf8] sm:$0xff]   ;;  %v15181_v45 = vld [vmem:[%s18949_s6 + $0xa8] sm:$0xff]  }
 0x6c1   : > { %v10577_v38 = vpop.f32.mrf.mxu0  ;;  %v10647_v49 = vpop.f32.mrf.mxu1 }
 0x6c2   : > { %v10586_v47 = vadd.f32 %v10577_v38, %v10516_v25  ;;  %v10519_v44 = vadd.f32 %v10513_v2, %v10449_v9  ;;  %v15174_v38 = vld [vmem:[%s18949_s6 + $0x110] sm:$0xff]   ;;  %v15185_v9 = vld [vmem:[%s18949_s6 + $0x98] sm:$0xff]   ;;  %v15186_v25 = vld [vmem:[%s18949_s6 + $0xe0] sm:$0xff]  }
 0x6c3   : > { %v10579_v23 = vpop.f32.mrf.mxu0  ;;  %v10649_v41 = vpop.f32.mrf.mxu1 }
 0x6c4   : > { %v10587_v6 = vadd.f32 %v10579_v23, %v10517_v31  ;;  %v10656_v59 = vadd.f32 %v10647_v49, %v10586_v47  ;;  %v15178_v23 = vld [vmem:[%s18949_s6 + $0x100] sm:$0xff]   ;;  %v15184_v31 = vld [vmem:[%s18949_s6 + $0xe8] sm:$0xff]  }
 0x6c5   : > { %v10581_v10 = vpop.f32.mrf.mxu0  ;;  %v10651_v34 = vpop.f32.mrf.mxu1 }
 0x6c6   : > { %v10588_v48 = vadd.f32 %v10581_v10, %v10518_v63  ;;  %v10657_v27 = vadd.f32 %v10649_v41, %v10587_v6  ;;  %v15179_v41 = vld [vmem:[%s18949_s6 + $0xb0] sm:$0xff]   ;;  %v15190_v6 = vld [vmem:[%s18949_s6 + $0x118] sm:$0x3f]  }
 0x6c7   : > { %v10583_v19 = vpop.f32.mrf.mxu0  ;;  %v10653_v30 = vpop.f32.mrf.mxu1  ;;  %v15182_v10 = vld [vmem:[%s18949_s6 + $0xf0] sm:$0xff]  }
 0x6c8   : > { %v10589_v60 = vadd.f32 %v10583_v19, %v10519_v44  ;;  %v10658_v22 = vadd.f32 %v10651_v34, %v10588_v48  ;;  %v15183_v34 = vld [vmem:[%s18949_s6 + $0xa0] sm:$0xff]   ;;  %v15187_v19 = vld [vmem:[%s18949_s6 + $0x90] sm:$0xff]  }
 0x6c9   : > { %v10717_v36 = vpop.f32.mrf.mxu0  ;;  %v10787_v14 = vpop.f32.mrf.mxu1  ;;  %v15189_v63 = vld [vmem:[%s18949_s6 + $0xd0] sm:$0x3f]  }
 0x6ca   : > { %v10726_v5 = vadd.f32 %v10717_v36, %v10656_v59  ;;  %v10659_v62 = vadd.f32 %v10653_v30, %v10589_v60  ;;  %v15188_v30 = vld [vmem:[%s18949_s6 + $0xd8] sm:$0xff]   ;;  %v11203_v47 = vsel %vm10967_vm14, %v15189_v63, 0  ;;  %v11321_v36 = vsel %vm10967_vm14, %v15190_v6, 0  ;;  %v15193_v59 = vld [vmem:[%s18950_s7] sm:$0xff]  }
 0x6cb   : > { %v10719_v42 = vpop.f32.mrf.mxu0  ;;  %v10789_v11 = vpop.f32.mrf.mxu1 }
 0x6cc   : > { %v10727_v61 = vadd.f32 %v10719_v42, %v10657_v27  ;;  %v10796_v26 = vadd.f32 %v10787_v14, %v10726_v5  ;;  %v18999_v14 = vmov 65535   ;;  %v15192_v27 = vld [vmem:[%s18950_s7 + $0x18] sm:$0x1f]  }
 0x6cd   : > { %v10721_v8 = vpop.f32.mrf.mxu0  ;;  %v10791_v29 = vpop.f32.mrf.mxu1  ;;  %v11388_v44 = vsel %vm9157_vm3, 4294967295, %v18999_v14  ;;  %vm11383_vm3 = vcmask 203776   ;;  %v15212_v14 = vld [vmem:[%s18950_s7 + $0xb8] sm:$0x1f]  }
 0x6ce   : > { %v10728_v51 = vadd.f32 %v10721_v8, %v10658_v22  ;;  %v10797_v54 = vadd.f32 %v10789_v11, %v10727_v61  ;;  %v18614_v48 = vsel %vm11387_vm9, %v11388_v44, 0  ;;  %v15194_v8 = vld [vmem:[%s18950_s7 + $0x10] sm:$0xff]  }
 0x6cf   : > { %v10723_v4 = vpop.f32.mrf.mxu0  ;;  %v10793_v58 = vpop.f32.mrf.mxu1  ;;  %v11456_v60 = vand.u32 %v15192_v27, %v18614_v48  ;;  %v12097_v27 = vand.u32 %v15212_v14, %v18614_v48 }
 0x6d0   : > { %v10729_v3 = vadd.f32 %v10723_v4, %v10659_v62  ;;  %v10798_v57 = vadd.f32 %v10791_v29, %v10728_v51 }
 0x6d1   : > { %v10857_v12 = vpop.f32.mrf.mxu0 }
 0x6d2   : > { %v10866_v50 = vadd.f32 %v10857_v12, %v10796_v26  ;;  %v10799_v55 = vadd.f32 %v10793_v58, %v10729_v3 }
 0x6d3   : > { %v10859_v28 = vpop.f32.mrf.mxu0 }
 0x6d4   : > { %v10867_v15 = vadd.f32 %v10859_v28, %v10797_v54  ;;  %v10882_v40 = vadd.f32 %v10875_v21, %v10866_v50  ;;  %v15195_v50 = vld [vmem:[%s18950_s7 + $0x28] sm:$0x1f]  }
 0x6d5   : > { %v10861_v46 = vpop.f32.mrf.mxu0 }
 0x6d6   : > { %v10868_v17 = vadd.f32 %v10861_v46, %v10798_v57  ;;  %v10883_v39 = vadd.f32 %v10875_v21, %v10867_v15  ;;  %v10886_v1 = vmax.f32 %v10882_v40, 0.0  ;;  %v15196_v21 = vld [vmem:[%s18950_s7 + $0x38] sm:$0x1f]  }
 0x6d7   : > { %v10863_v32 = vpop.f32.mrf.mxu0  ;;  %v11585_v40 = vand.u32 %v15196_v21, %v18614_v48  ;;  %v15227_v21 = vld [vmem:[%s18952_s9 + $0x18] sm:$0xff]  }
 0x6d8   : > { %v10869_v18 = vadd.f32 %v10863_v32, %v10799_v55  ;;  %v10884_v53 = vadd.f32 %v10880_v52, %v10868_v17  ;;  %v10887_v33 = vmax.f32 %v10883_v39, 0.0 }
 0x6da   : > { %v10885_v56 = vadd.f32 %v10880_v52, %v10869_v18  ;;  %v10888_v7 = vmax.f32 %v10884_v53, 0.0  ;;  %v11521_v18 = vand.u32 %v15195_v50, %v18614_v48  ;;  %v15223_v50 = vld [vmem:[%s18952_s9 + $0x38] sm:$0xff]  }
 0x6dc   : > { %v10889_v2 = vmax.f32 %v10885_v56, 0.0  ;;  %v10890_v49 = vpack.c.bf16 %v10888_v7, %v10886_v1  ;;  %v15197_v7 = vld [vmem:[%s18950_s7 + $0x20] sm:$0xff]   ;;  %v15200_v1 = vld [vmem:[%s18950_s7 + $0x58] sm:$0x1f]  }
 0x6de   : > { %v10891_v16 = vpack.c.bf16 %v10889_v2, %v10887_v33  ;;  %v15199_v33 = vld [vmem:[%s18950_s7 + $0x48] sm:$0x1f]   ;;  %v15198_v2 = vld [vmem:[%s18950_s7 + $0x30] sm:$0xff]  }
 0x6e0   : > { %13725 = vmatprep.mubr.msk.bf16.mxu1 %vm10963_vm1, %v10891_v16  ;;  %13753 = vmatprep.mubr.msk.bf16.mxu0 %vm10963_vm1, %v10891_v16 }
 0x6e1   : > { %11004 = vmatmul.mubr.bf16.vlgmr.msra.gmra.mxu1 %v10890_v49  ;;  %11120 = vmatmul.mubr.bf16.vlgmr.msra.gmra.mxu0 %v10890_v49 }
 0x6e2   : > { %11206 = vmatpush1.bf16.msra.mxu1 %v15173_v0  ;;  %11324 = vmatpush1.bf16.msra.mxu0 %v15174_v38  ;;  %v11713_v38 = vand.u32 %v15200_v1, %v18614_v48 }
 0x6e3   : > { %13781 = vmatprep.mubr.msk.bf16.mxu1 %vm10963_vm1, %v10891_v16  ;;  %13809 = vmatprep.mubr.msk.bf16.mxu0 %vm10963_vm1, %v10891_v16  ;;  %v11649_v16 = vand.u32 %v15199_v33, %v18614_v48  ;;  %v15235_v33 = vld [vmem:[%s18954_s11 + $0x18] sm:$0xff]  }
 0x6e4   : > { %11207 = vmatprep.subr.bf16.mxu1 %v18988_v24  ;;  %11325 = vmatprep.subr.bf16.mxu0 %v18988_v24 }
 0x6e6   : > { %11208 = vmatpush1.bf16.msra.mxu1 %v15175_v43  ;;  %11326 = vmatpush1.bf16.msra.mxu0 %v15176_v35  ;;  %v15201_v43 = vld [vmem:[%s18950_s7 + $0x40] sm:$0xff]   ;;  %v15203_v35 = vld [vmem:[%s18950_s7 + $0x68] sm:$0x1f]  }
 0x6e7   : > { %11209 = vmatprep.subr.bf16.mxu1 %v18988_v24  ;;  %11327 = vmatprep.subr.bf16.mxu0 %v18988_v24 }
 0x6ea   : > { %11210 = vmatpush1.bf16.msra.mxu1 %v15177_v37  ;;  %11328 = vmatpush1.bf16.msra.mxu0 %v15178_v23  ;;  %v15202_v37 = vld [vmem:[%s18950_s7 + $0x50] sm:$0xff]   ;;  %v15204_v23 = vld [vmem:[%s18950_s7 + $0x78] sm:$0x1f]  }
 0x6eb   : > { %11211 = vmatprep.subr.bf16.mxu1 %v18988_v24  ;;  %11329 = vmatprep.subr.bf16.mxu0 %v18988_v24 }
 0x6ee   : > { %11212 = vmatpush1.bf16.msra.mxu1 %v15179_v41  ;;  %11330 = vmatpush1.bf16.msra.mxu0 %v15180_v20  ;;  %v11777_v41 = vand.u32 %v15203_v35, %v18614_v48 }
 0x6ef   : > { %11213 = vmatprep.subr.bf16.mxu1 %v18988_v24  ;;  %11331 = vmatprep.subr.bf16.mxu0 %v18988_v24 }
 0x6f2   : > { %11214 = vmatpush1.bf16.msra.mxu1 %v15181_v45  ;;  %11332 = vmatpush1.bf16.msra.mxu0 %v15182_v10  ;;  %v11841_v45 = vand.u32 %v15204_v23, %v18614_v48 }
 0x6f3   : > { %11215 = vmatprep.subr.bf16.mxu1 %v18988_v24  ;;  %11333 = vmatprep.subr.bf16.mxu0 %v18988_v24 }
 0x6f6   : > { %11216 = vmatpush1.bf16.msra.mxu1 %v15183_v34  ;;  %11334 = vmatpush1.bf16.msra.mxu0 %v15184_v31  ;;  %v15205_v34 = vld [vmem:[%s18950_s7 + $0x60] sm:$0xff]   ;;  %v15207_v31 = vld [vmem:[%s18950_s7 + $0x88] sm:$0x1f]  }
 0x6f7   : > { %11217 = vmatprep.subr.bf16.mxu1 %v18988_v24  ;;  %11335 = vmatprep.subr.bf16.mxu0 %v18988_v24 }
 0x6fa   : > { %11218 = vmatpush1.bf16.msra.mxu1 %v15185_v9  ;;  %11336 = vmatpush1.bf16.msra.mxu0 %v15186_v25  ;;  %v15206_v9 = vld [vmem:[%s18950_s7 + $0x70] sm:$0xff]   ;;  %v15208_v25 = vld [vmem:[%s18950_s7 + $0x98] sm:$0x1f]  }
 0x6fb   : > { %11219 = vmatprep.subr.bf16.mxu1 %v18988_v24  ;;  %11337 = vmatprep.subr.bf16.mxu0 %v18988_v24  ;;  %v11969_v63 = vand.u32 %v15208_v25, %v18614_v48 }
 0x6fe   : > { %11220 = vmatpush1.bf16.msra.mxu1 %v15187_v19  ;;  %11338 = vmatpush1.bf16.msra.mxu0 %v15188_v30  ;;  %v11905_v19 = vand.u32 %v15207_v31, %v18614_v48 }
 0x6ff   : > { %11235 = vmatprep.subr.bf16.mxu1 %v18988_v24  ;;  %11353 = vmatprep.subr.bf16.mxu0 %v18988_v24  ;;  %v15191_v24 = vld [vmem:[%s18950_s7 + $0x8] sm:$0x1f]  }
 0x700   : > { %v11391_v42 = vand.u32 %v15191_v24, %v18614_v48  ;;  %v15210_v24 = vld [vmem:[%s18950_s7 + $0x90] sm:$0xff]  }
 0x702   : > { %11236 = vmatpush2.bf16.msra.mxu1 %v11203_v47  ;;  %11354 = vmatpush2.bf16.msra.mxu0 %v11321_v36  ;;  %v15209_v47 = vld [vmem:[%s18950_s7 + $0x80] sm:$0xff]   ;;  %v15211_v36 = vld [vmem:[%s18950_s7 + $0xa8] sm:$0x1f]  }
 0x703   : > { %14203 = vmatprep.subr.bf16.mxu1 %v18987_v13  ;;  %14211 = vmatprep.subr.bf16.mxu0 %v18987_v13  ;;  %v12033_v44 = vand.u32 %v15211_v36, %v18614_v48 }
 0x705   : > { %11238 = vmatmul.mubr.bf16.vlgmr.msra.gmra.mxu1 %v10890_v49  ;;  %11356 = vmatmul.mubr.bf16.vlgmr.msra.gmra.mxu0 %v10890_v49 }
 0x706   : > { %14207 = vmatprep.mubr.msk.bf16.mxu1 %vm15314_vm4, %v18987_v13  ;;  %14215 = vmatprep.mubr.msk.bf16.mxu0 %vm15314_vm4, %v18987_v13 }
 0x707   : > { %14204 = vmatpush3.bf16.msra.mxu1 %v11391_v42  ;;  %14212 = vmatpush3.bf16.msra.mxu0 %v11456_v60 }
 0x708   : > { %14205 = vmatprep.subr.bf16.mxu1 %v18987_v13  ;;  %14213 = vmatprep.subr.bf16.mxu0 %v18987_v13 }
 0x70b   : > { %14206 = vmatpush3.bf16.msra.mxu1 %v15193_v59  ;;  %14214 = vmatpush3.bf16.msra.mxu0 %v15194_v8  ;;  %v15213_v59 = vld [vmem:[%s18950_s7 + $0xa0] sm:$0xff]   ;;  %v15215_v8 = vld [vmem:[%s18950_s7 + $0xc8] sm:$0x1f]  }
 0x70c   : > { %14219 = vmatprep.subr.bf16.mxu1 %v18987_v13  ;;  %14227 = vmatprep.subr.bf16.mxu0 %v18987_v13 }
 0x7a1   : > { %v11005_v11 = vpop.f32.mrf.mxu1  ;;  %v11121_v22 = vpop.f32.mrf.mxu0 }
 0x7a2   : > { %v11128_v3 = vmax.f32 %v11005_v11, %v11121_v22  ;;  %v15214_v11 = vld [vmem:[%s18950_s7 + $0xb0] sm:$0xff]   ;;  %v15216_v22 = vld [vmem:[%s18950_s7 + $0xd8] sm:$0x1f]  }
 0x7a3   : > { %v11007_v61 = vpop.f32.mrf.mxu1  ;;  %v11123_v5 = vpop.f32.mrf.mxu0 }
 0x7a4   : > { %v12161_v61 = vand.u32 %v15215_v8, %v18614_v48 }
 0x7a5   : > { %v11008_v4 = vpop.f32.mrf.mxu1  ;;  %v11124_v62 = vpop.f32.mrf.mxu0 }
 0x7a6   : > { %v11129_v57 = vmax.f32 %v11008_v4, %v11124_v62  ;;  %v12225_v4 = vand.u32 %v15216_v22, %v18614_v48 }
 0x7a7   : > { %v11010_v51 = vpop.f32.mrf.mxu1  ;;  %v11126_v29 = vpop.f32.mrf.mxu0 }
 0x7a8   : > { %v15217_v51 = vld [vmem:[%s18950_s7 + $0xc0] sm:$0xff]   ;;  %v15219_v29 = vld [vmem:[%s18950_s7 + $0xe8] sm:$0x1f]  }
 0x7c5   : > { %v11239_v12 = vpop.f32.mrf.mxu1  ;;  %v11357_v54 = vpop.f32.mrf.mxu0 }
 0x7c6   : > { %v11246_v15 = vmax.f32 %v11128_v3, %v11239_v12  ;;  %v15218_v12 = vld [vmem:[%s18950_s7 + $0xd0] sm:$0xff]   ;;  %v12289_v3 = vand.u32 %v15219_v29, %v18614_v48 }
 0x7c7   : > { %v11241_v26 = vpop.f32.mrf.mxu1  ;;  %v11359_v28 = vpop.f32.mrf.mxu0 }
 0x7c8   : > { %v11364_v32 = vmax.f32 %v11246_v15, %v11357_v54  ;;  %v15220_v54 = vld [vmem:[%s18950_s7 + $0xf8] sm:$0x1f]   ;;  %v15221_v15 = vld [vmem:[%s18950_s7 + $0xe0] sm:$0xff]  }
 0x7c9   : > { %v11242_v52 = vpop.f32.mrf.mxu1  ;;  %v11360_v58 = vpop.f32.mrf.mxu0  ;;  %v12353_v28 = vand.u32 %v15220_v54, %v18614_v48  ;;  %v15222_v48 = vld [vmem:[%s18950_s7 + $0xf0] sm:$0xff]  }
 0x7ca   : > { %v11247_v46 = vmax.f32 %v11129_v57, %v11242_v52 }
 0x7cb   : > { %v11244_v55 = vpop.f32.mrf.mxu1  ;;  %v11362_v17 = vpop.f32.mrf.mxu0 }
 0x7cc   : > { %v11365_v39 = vmax.f32 %v11247_v46, %v11360_v58  ;;  %v15224_v46 = vld [vmem:[%s18952_s9 + $0x30] sm:$0xff]   ;;  %v15225_v55 = vld [vmem:[%s18952_s9 + $0x28] sm:$0xff]   ;;  %v15226_v17 = vld [vmem:[%s18952_s9 + $0x20] sm:$0xff]  }
 0x7ce   : > { %v18638_v53 = vpack.c.bf16 %v11365_v39, %v11364_v32  ;;  %v15228_v32 = vld [vmem:[%s18952_s9 + $0x10] sm:$0xff]   ;;  %v15229_v39 = vld [vmem:[%s18952_s9 + $0x8] sm:$0xff]  }
 0x7d0   : > { %14208 = vmatmul.mubr.msk.bf16.vlgmr.msra.gmra.mxu1 %vm11383_vm3, %v18638_v53  ;;  %v18644_v56 = vshrl.u32 %v18638_v53, 16  ;;  %v11505_v0 = vrot.slane %v18638_v53, 1  ;;  %v11633_v20 = vrot.slane %v18638_v53, 2  ;;  %v11761_v30 = vrot.slane %v18638_v53, 3 }
 0x7d1   : > { %14220 = vmatpush3.bf16.msra.mxu1 %v11521_v18  ;;  %14223 = vmatprep.mubr.msk.bf16.mxu1 %vm15314_vm4, %v18987_v13  ;;  %v11889_v42 = vrot.slane %v18638_v53, 4  ;;  %v12017_v5 = vrot.slane %v18638_v53, 5  ;;  %v12145_v26 = vrot.slane %v18638_v53, 6  ;;  %v12273_v52 = vrot.slane %v18638_v53, 7  ;;  %v15230_v18 = vld [vmem:[%s18952_s9] sm:$0xff]   ;;  %v15231_v53 = vld [vmem:[%s18954_s11 + $0x38] sm:$0xff]  }
 0x7d2   : > { %14216 = vmatmul.mubr.msk.bf16.vlgmr.msra.gmra.mxu0 %vm11383_vm3, %v18644_v56  ;;  %14221 = vmatprep.subr.bf16.mxu1 %v18987_v13  ;;  %v11569_v49 = vrot.slane %v18644_v56, 1  ;;  %v11697_v10 = vrot.slane %v18644_v56, 2  ;;  %v11825_v6 = vrot.slane %v18644_v56, 3  ;;  %v11953_v60 = vrot.slane %v18644_v56, 4 }
 0x7d3   : > { %14228 = vmatpush3.bf16.msra.mxu0 %v11585_v40  ;;  %14231 = vmatprep.mubr.msk.bf16.mxu0 %vm15314_vm4, %v18987_v13  ;;  %v12081_v62 = vrot.slane %v18644_v56, 5  ;;  %v12209_v57 = vrot.slane %v18644_v56, 6  ;;  %v12337_v58 = vrot.slane %v18644_v56, 7  ;;  %v15232_v40 = vld [vmem:[%s18954_s11 + $0x30] sm:$0xff]   ;;  %v15233_v56 = vld [vmem:[%s18954_s11 + $0x28] sm:$0xff]  }
 0x7d4   : > { %14229 = vmatprep.subr.bf16.mxu0 %v18987_v13 }
 0x7d5   : > { %14222 = vmatpush3.bf16.msra.mxu1 %v15197_v7  ;;  %v15234_v7 = vld [vmem:[%s18954_s11 + $0x20] sm:$0xff]  }
 0x7d6   : > { %14235 = vmatprep.subr.bf16.mxu1 %v18987_v13 }
 0x7d7   : > { %14230 = vmatpush3.bf16.msra.mxu0 %v15198_v2  ;;  %v15236_v2 = vld [vmem:[%s18954_s11 + $0x10] sm:$0xff]  }
 0x7d8   : > { %14224 = vmatmul.mubr.msk.bf16.vlgmr.msra.gmra.mxu1 %vm11383_vm3, %v11505_v0  ;;  %14243 = vmatprep.subr.bf16.mxu0 %v18987_v13 }
 0x7d9   : > { %14236 = vmatpush3.bf16.msra.mxu1 %v11649_v16  ;;  %14239 = vmatprep.mubr.msk.bf16.mxu1 %vm15314_vm4, %v18987_v13 }
 0x7da   : > { %14232 = vmatmul.mubr.msk.bf16.vlgmr.msra.gmra.mxu0 %vm11383_vm3, %v11569_v49  ;;  %14237 = vmatprep.subr.bf16.mxu1 %v18987_v13 }
 0x7db   : > { %14244 = vmatpush3.bf16.msra.mxu0 %v11713_v38  ;;  %14247 = vmatprep.mubr.msk.bf16.mxu0 %vm15314_vm4, %v18987_v13 }
 0x7dc   : > { %14245 = vmatprep.subr.bf16.mxu0 %v18987_v13 }
 0x7dd   : > { %14238 = vmatpush3.bf16.msra.mxu1 %v15201_v43 }
 0x7de   : > { %14251 = vmatprep.subr.bf16.mxu1 %v18987_v13 }
 0x7df   : > { %14246 = vmatpush3.bf16.msra.mxu0 %v15202_v37 }
 0x7e0   : > { %14240 = vmatmul.mubr.msk.bf16.vlgmr.msra.gmra.mxu1 %vm11383_vm3, %v11633_v20  ;;  %14259 = vmatprep.subr.bf16.mxu0 %v18987_v13 }
 0x7e1   : > { %14252 = vmatpush3.bf16.msra.mxu1 %v11777_v41  ;;  %14255 = vmatprep.mubr.msk.bf16.mxu1 %vm15314_vm4, %v18987_v13 }
 0x7e2   : > { %14248 = vmatmul.mubr.msk.bf16.vlgmr.msra.gmra.mxu0 %vm11383_vm3, %v11697_v10  ;;  %14253 = vmatprep.subr.bf16.mxu1 %v18987_v13 }
 0x7e3   : > { %14260 = vmatpush3.bf16.msra.mxu0 %v11841_v45  ;;  %14263 = vmatprep.mubr.msk.bf16.mxu0 %vm15314_vm4, %v18987_v13  ;;  %v11367_v45 = vld [vmem:[%s18951_s8] sm:$0x1] }
 0x7e4   : > { %14261 = vmatprep.subr.bf16.mxu0 %v18987_v13 }
 0x7e5   : > { %14254 = vmatpush3.bf16.msra.mxu1 %v15205_v34 }
 0x7e6   : > { %14267 = vmatprep.subr.bf16.mxu1 %v18987_v13 }
 0x7e7   : > { %14262 = vmatpush3.bf16.msra.mxu0 %v15206_v9 }
 0x7e8   : > { %14256 = vmatmul.mubr.msk.bf16.vlgmr.msra.gmra.mxu1 %vm11383_vm3, %v11761_v30  ;;  %14275 = vmatprep.subr.bf16.mxu0 %v18987_v13 }
 0x7e9   : > { %14268 = vmatpush3.bf16.msra.mxu1 %v11905_v19  ;;  %14271 = vmatprep.mubr.msk.bf16.mxu1 %vm15314_vm4, %v18987_v13 }
 0x7ea   : > { %14264 = vmatmul.mubr.msk.bf16.vlgmr.msra.gmra.mxu0 %vm11383_vm3, %v11825_v6  ;;  %14269 = vmatprep.subr.bf16.mxu1 %v18987_v13 }
 0x7eb   : > { %14276 = vmatpush3.bf16.msra.mxu0 %v11969_v63  ;;  %14279 = vmatprep.mubr.msk.bf16.mxu0 %vm15314_vm4, %v18987_v13 }
 0x7ec   : > { %14277 = vmatprep.subr.bf16.mxu0 %v18987_v13 }
 0x7ed   : > { %14270 = vmatpush3.bf16.msra.mxu1 %v15209_v47 }
 0x7ee   : > { %14283 = vmatprep.subr.bf16.mxu1 %v18987_v13 }
 0x7ef   : > { %14278 = vmatpush3.bf16.msra.mxu0 %v15210_v24 }
 0x7f0   : > { %14272 = vmatmul.mubr.msk.bf16.vlgmr.msra.gmra.mxu1 %vm11383_vm3, %v11889_v42  ;;  %14291 = vmatprep.subr.bf16.mxu0 %v18987_v13 }
 0x7f1   : > { %14284 = vmatpush3.bf16.msra.mxu1 %v12033_v44  ;;  %14287 = vmatprep.mubr.msk.bf16.mxu1 %vm15314_vm4, %v18987_v13 }
 0x7f2   : > { %14280 = vmatmul.mubr.msk.bf16.vlgmr.msra.gmra.mxu0 %vm11383_vm3, %v11953_v60  ;;  %14285 = vmatprep.subr.bf16.mxu1 %v18987_v13 }
 0x7f3   : > { %14292 = vmatpush3.bf16.msra.mxu0 %v12097_v27  ;;  %14295 = vmatprep.mubr.msk.bf16.mxu0 %vm15314_vm4, %v18987_v13 }
 0x7f4   : > { %14293 = vmatprep.subr.bf16.mxu0 %v18987_v13 }
 0x7f5   : > { %14286 = vmatpush3.bf16.msra.mxu1 %v15213_v59 }
 0x7f6   : > { %14299 = vmatprep.subr.bf16.mxu1 %v18987_v13 }
 0x7f7   : > { %14294 = vmatpush3.bf16.msra.mxu0 %v15214_v11 }
 0x7f8   : > { %14288 = vmatmul.mubr.msk.bf16.vlgmr.msra.gmra.mxu1 %vm11383_vm3, %v12017_v5  ;;  %14307 = vmatprep.subr.bf16.mxu0 %v18987_v13 }
 0x7f9   : > { %14300 = vmatpush3.bf16.msra.mxu1 %v12161_v61  ;;  %14303 = vmatprep.mubr.msk.bf16.mxu1 %vm15314_vm4, %v18987_v13 }
 0x7fa   : > { %14296 = vmatmul.mubr.msk.bf16.vlgmr.msra.gmra.mxu0 %vm11383_vm3, %v12081_v62  ;;  %14301 = vmatprep.subr.bf16.mxu1 %v18987_v13 }
 0x7fb   : > { %14308 = vmatpush3.bf16.msra.mxu0 %v12225_v4  ;;  %14311 = vmatprep.mubr.msk.bf16.mxu0 %vm15314_vm4, %v18987_v13 }
 0x7fc   : > { %14309 = vmatprep.subr.bf16.mxu0 %v18987_v13 }
 0x7fd   : > { %14302 = vmatpush3.bf16.msra.mxu1 %v15217_v51 }
 0x7fe   : > { %14315 = vmatprep.subr.bf16.mxu1 %v18987_v13 }
 0x7ff   : > { %14310 = vmatpush3.bf16.msra.mxu0 %v15218_v12 }
 0x800   : > { %14304 = vmatmul.mubr.msk.bf16.vlgmr.msra.gmra.mxu1 %vm11383_vm3, %v12145_v26  ;;  %14323 = vmatprep.subr.bf16.mxu0 %v18987_v13 }
 0x801   : > { %14316 = vmatpush3.bf16.msra.mxu1 %v12289_v3  ;;  %14319 = vmatprep.mubr.msk.bf16.mxu1 %vm15314_vm4, %v18987_v13 }
 0x802   : > { %14312 = vmatmul.mubr.msk.bf16.vlgmr.msra.gmra.mxu0 %vm11383_vm3, %v12209_v57  ;;  %14317 = vmatprep.subr.bf16.mxu1 %v18987_v13 }
 0x803   : > { %14324 = vmatpush3.bf16.msra.mxu0 %v12353_v28  ;;  %14327 = vmatprep.mubr.msk.bf16.mxu0 %vm15314_vm4, %v18987_v13 }
 0x804   : > { %14325 = vmatprep.subr.bf16.mxu0 %v18987_v13 }
 0x805   : > { %14318 = vmatpush3.bf16.msra.mxu1 %v15221_v15 }
 0x806   : > { %14331 = vmatprep.subr.bf16.mxu1 %v18987_v13 }
 0x807   : > { %14326 = vmatpush3.bf16.msra.mxu0 %v15222_v48 }
 0x808   : > { %14320 = vmatmul.mubr.msk.bf16.vlgmr.msra.gmra.mxu1 %vm11383_vm3, %v12273_v52  ;;  %14351 = vmatprep.subr.bf16.mxu0 %v18987_v13 }
 0x809   : > { %14347 = vmatprep.mubr.msk.bf16.mxu1 %vm15314_vm4, %v18987_v13  ;;  %14332 = vmatpush3.bf16.msra.mxu1 %v15223_v50 }
 0x80a   : > { %14328 = vmatmul.mubr.msk.bf16.vlgmr.msra.gmra.mxu0 %vm11383_vm3, %v12337_v58  ;;  %14333 = vmatprep.subr.bf16.mxu1 %v18987_v13 }
 0x80b   : > { %14367 = vmatprep.mubr.msk.bf16.mxu0 %vm15314_vm4, %v18987_v13  ;;  %14352 = vmatpush3.bf16.msra.mxu0 %v15231_v53 }
 0x80c   : > { %14353 = vmatprep.subr.bf16.mxu0 %v18987_v13 }
 0x80d   : > { %14334 = vmatpush3.bf16.msra.mxu1 %v15224_v46 }
 0x80e   : > { %14335 = vmatprep.subr.bf16.mxu1 %v18987_v13 }
 0x80f   : > { %14354 = vmatpush3.bf16.msra.mxu0 %v15232_v40 }
 0x810   : > { %14355 = vmatprep.subr.bf16.mxu0 %v18987_v13 }
 0x811   : > { %14336 = vmatpush3.bf16.msra.mxu1 %v15225_v55 }
 0x812   : > { %14337 = vmatprep.subr.bf16.mxu1 %v18987_v13 }
 0x813   : > { %14356 = vmatpush3.bf16.msra.mxu0 %v15233_v56 }
 0x814   : > { %14357 = vmatprep.subr.bf16.mxu0 %v18987_v13 }
 0x815   : > { %14338 = vmatpush3.bf16.msra.mxu1 %v15226_v17 }
 0x816   : > { %14339 = vmatprep.subr.bf16.mxu1 %v18987_v13 }
 0x817   : > { %14358 = vmatpush3.bf16.msra.mxu0 %v15234_v7 }
 0x818   : > { %14359 = vmatprep.subr.bf16.mxu0 %v18987_v13 }
 0x819   : > { %14340 = vmatpush3.bf16.msra.mxu1 %v15227_v21 }
 0x81a   : > { %14341 = vmatprep.subr.bf16.mxu1 %v18987_v13 }
 0x81b   : > { %14360 = vmatpush3.bf16.msra.mxu0 %v15235_v33 }
 0x81c   : > { %14361 = vmatprep.subr.bf16.mxu0 %v18987_v13 }
 0x81d   : > { %14342 = vmatpush3.bf16.msra.mxu1 %v15228_v32 }
 0x81e   : > { %14343 = vmatprep.subr.bf16.mxu1 %v18987_v13 }
 0x81f   : > { %14362 = vmatpush3.bf16.msra.mxu0 %v15236_v2 }
 0x820   : > { %14363 = vmatprep.subr.bf16.mxu0 %v18987_v13 }
 0x821   : > { %14344 = vmatpush3.bf16.msra.mxu1 %v15229_v39 }
 0x822   : > { %14345 = vmatprep.subr.bf16.mxu1 %v18987_v13 }
 0x825   : > { %14346 = vmatpush3.bf16.msra.mxu1 %v15230_v18 }
 0x890   : > { %v11427_v1 = vpop.f32.mrf.mxu1 }
 0x891   : > { %v11433_v25 = vadd.f32 %v11427_v1, %v11367_v45 }
 0x892   : > { %v14209_v16 = vpop.f32.mrf.mxu1  ;;  %v11492_v0 = vpop.f32.mrf.mxu0 }
 0x893   : > { %v11498_v47 = vadd.f32 %v11492_v0, %v11433_v25 }
 0x894   : > { %v11430_v38 = vpop.f32.mrf.mxu1  ;;  %v14217_v49 = vpop.f32.mrf.mxu0 }
 0x896   : > { %v14210_v43 = vpop.f32.mrf.mxu1  ;;  %v11495_v35 = vpop.f32.mrf.mxu0 }
 0x898   : > { %v14218_v37 = vpop.f32.mrf.mxu0  ;;  %v11557_v23 = vpop.f32.mrf.mxu1 }
 0x899   : > { %v11563_v14 = vadd.f32 %v11557_v23, %v11498_v47  ;;  %v15238_v47 = vld [vmem:[%s18954_s11] sm:$0xff]  }
 0x89a   : > { %v14225_v41 = vpop.f32.mrf.mxu1  ;;  %v11621_v20 = vpop.f32.mrf.mxu0 }
 0x89b   : > { %v11627_v59 = vadd.f32 %v11621_v20, %v11563_v14 }
 0x89c   : > { %v11560_v10 = vpop.f32.mrf.mxu1  ;;  %v14233_v34 = vpop.f32.mrf.mxu0 }
 0x89e   : > { %v14226_v31 = vpop.f32.mrf.mxu1  ;;  %v11624_v9 = vpop.f32.mrf.mxu0 }
 0x8a0   : > { %v14234_v19 = vpop.f32.mrf.mxu0  ;;  %v11685_v30 = vpop.f32.mrf.mxu1 }
 0x8a1   : > { %v11691_v22 = vadd.f32 %v11685_v30, %v11627_v59 }
 0x8a2   : > { %v14241_v63 = vpop.f32.mrf.mxu1  ;;  %v11749_v6 = vpop.f32.mrf.mxu0 }
 0x8a3   : > { %v11755_v51 = vadd.f32 %v11749_v6, %v11691_v22  ;;  %v15237_v6 = vld [vmem:[%s18954_s11 + $0x8] sm:$0xff]  }
 0x8a4   : > { %v11688_v36 = vpop.f32.mrf.mxu1  ;;  %v14249_v24 = vpop.f32.mrf.mxu0  ;;  %14364 = vmatpush3.bf16.msra.mxu0 %v15237_v6 }
 0x8a5   : > { %14365 = vmatprep.subr.bf16.mxu0 %v18987_v13  ;;  %v12414_v36 = vld [vmem:[%s18953_s10] sm:$0x1] }
 0x8a6   : > { %v14242_v44 = vpop.f32.mrf.mxu1  ;;  %v11752_v42 = vpop.f32.mrf.mxu0  ;;  %v12521_v13 = vld [vmem:[%s18955_s12] sm:$0x1] }
 0x8a8   : > { %v14250_v27 = vpop.f32.mrf.mxu0  ;;  %v11813_v60 = vpop.f32.mrf.mxu1  ;;  %14366 = vmatpush3.bf16.msra.mxu0 %v15238_v47 }
 0x8a9   : > { %v11819_v54 = vadd.f32 %v11813_v60, %v11755_v51 }
 0x8aa   : > { %v14257_v8 = vpop.f32.mrf.mxu1  ;;  %v11877_v11 = vpop.f32.mrf.mxu0 }
 0x8ab   : > { %v11883_v15 = vadd.f32 %v11877_v11, %v11819_v54 }
 0x8ac   : > { %v11816_v61 = vpop.f32.mrf.mxu1  ;;  %v14265_v5 = vpop.f32.mrf.mxu0 }
 0x8ae   : > { %v14258_v4 = vpop.f32.mrf.mxu1  ;;  %v11880_v62 = vpop.f32.mrf.mxu0 }
 0x8b0   : > { %v14266_v29 = vpop.f32.mrf.mxu0  ;;  %v11941_v12 = vpop.f32.mrf.mxu1 }
 0x8b1   : > { %v11947_v58 = vadd.f32 %v11941_v12, %v11883_v15 }
 0x8b2   : > { %v14273_v3 = vpop.f32.mrf.mxu1  ;;  %v12005_v26 = vpop.f32.mrf.mxu0 }
 0x8b3   : > { %v12011_v21 = vadd.f32 %v12005_v26, %v11947_v58 }
 0x8b4   : > { %v11944_v28 = vpop.f32.mrf.mxu1  ;;  %v14281_v57 = vpop.f32.mrf.mxu0 }
 0x8b6   : > { %v14274_v48 = vpop.f32.mrf.mxu1  ;;  %v12008_v52 = vpop.f32.mrf.mxu0 }
 0x8b8   : > { %v14282_v50 = vpop.f32.mrf.mxu0  ;;  %v12069_v46 = vpop.f32.mrf.mxu1 }
 0x8b9   : > { %v12075_v18 = vadd.f32 %v12069_v46, %v12011_v21 }
 0x8ba   : > { %v14289_v55 = vpop.f32.mrf.mxu1  ;;  %v12133_v17 = vpop.f32.mrf.mxu0 }
 0x8bb   : > { %v12139_v33 = vadd.f32 %v12133_v17, %v12075_v18 }
 0x8bc   : > { %v12072_v32 = vpop.f32.mrf.mxu1  ;;  %v14297_v39 = vpop.f32.mrf.mxu0 }
 0x8be   : > { %v14290_v53 = vpop.f32.mrf.mxu1  ;;  %v12136_v40 = vpop.f32.mrf.mxu0 }
 0x8c0   : > { %v14298_v56 = vpop.f32.mrf.mxu0  ;;  %v12197_v7 = vpop.f32.mrf.mxu1 }
 0x8c1   : > { %v12203_v16 = vadd.f32 %v12197_v7, %v12139_v33 }
 0x8c2   : > { %v14305_v2 = vpop.f32.mrf.mxu1  ;;  %v12261_v1 = vpop.f32.mrf.mxu0 }
 0x8c3   : > { %v12267_v35 = vadd.f32 %v12261_v1, %v12203_v16 }
 0x8c4   : > { %v12200_v0 = vpop.f32.mrf.mxu1  ;;  %v14313_v38 = vpop.f32.mrf.mxu0 }
 0x8c6   : > { %v14306_v49 = vpop.f32.mrf.mxu1  ;;  %v12264_v43 = vpop.f32.mrf.mxu0 }
 0x8c8   : > { %v14314_v37 = vpop.f32.mrf.mxu0  ;;  %v12325_v23 = vpop.f32.mrf.mxu1 }
 0x8c9   : > { %v12331_v41 = vadd.f32 %v12325_v23, %v12267_v35 }
 0x8ca   : > { %v14321_v20 = vpop.f32.mrf.mxu1  ;;  %v12389_v45 = vpop.f32.mrf.mxu0 }
 0x8cb   : > { %v12395_v10 = vadd.f32 %v12389_v45, %v12331_v41 }
 0x8cc   : > { %v12328_v34 = vpop.f32.mrf.mxu1  ;;  %v14329_v31 = vpop.f32.mrf.mxu0 }
 0x8cd   : > { %v12396_v9 = vmax.f32 %v12395_v10, 0.0 }
 0x8ce   : > { %v14322_v25 = vpop.f32.mrf.mxu1  ;;  %v12392_v19 = vpop.f32.mrf.mxu0 }
 0x8cf   : > { %v12397_v30 = vpack.c.bf16 %v12396_v9, %v12396_v9 }
 0x8d0   : > { %v14330_v63 = vpop.f32.mrf.mxu0 }
 0x8d1   : > { %14348 = vmatmul.mubr.bf16.vlgmr.msra.gmra.mxu1 %v12397_v30 }
 0x991   : > { %v12497_v24 = vpop.f32.mrf.mxu1 }
 0x992   : > { %v12498_v14 = vadd.f32 %v12497_v24, %v12414_v36 }
 0x993   : > { %v14349_v44 = vpop.f32.mrf.mxu1 }
 0x994   : > { %v12503_v42 = vmax.f32 %v12498_v14, 0.0 }
 0x995   : > { %v12500_v27 = vpop.f32.mrf.mxu1 }
 0x996   : > { %v12504_v60 = vpack.c.bf16 %v12503_v42, %v12503_v42 }
 0x997   : > { %v14350_v59 = vpop.f32.mrf.mxu1 }
 0x998   : > { %14368 = vmatmul.mubr.bf16.vlgmr.msra.gmra.mxu0 %v12504_v60 }
 0xa58   : > { %v12604_v8 = vpop.f32.mrf.mxu0 }
 0xa59   : > { %v12605_v11 = vadd.f32 %v12604_v8, %v12521_v13 }
 0xa5a   : > { %v14369_v22 = vpop.f32.mrf.mxu0 }
 0xa5b   : > { %12610 = vst [vmem:[%s432_s24] sm:$0x1] %v12605_v11 }
 0xa5c   : > { %v12607_v61 = vpop.f32.mrf.mxu0 }
 0xa5d   : > { %15252 = shalt.err (!%p15249_p3)
}
 0xa5e   : > { %s15253_s15 = scalar_lea.hbm %s18902_s21, 16  ;;  %s15257_s1 = scalar_lea.hbm %s18956_s13, 32 }
 0xa5f   : > { %p15254_p4 = scmp.ne.s32.totalorder %s18902_s21, %s15253_s15  ;;  %p15258_p9 = scmp.lt.s32.totalorder %s18902_s21, %s18956_s13 }
 0xa60   : > { %p15259_p10 = scmp.lt.s32.totalorder %s15257_s1, %s15253_s15 }
 0xa61   : > { %p15255_p7 = pnand %p15254_p4, %p15453_p5 }
 0xa62   : > { %p15260_p11 = por %p15259_p10, %p15258_p9 }
 0xa63   : > { %p15256_p8 = pneg %p15255_p7 }
 0xa65   : > { %p15261_p12 = pnand %p15260_p11, %p15256_p8 }
 0xa67   : > { %15264 = shalt.err (!%p15261_p12)
}
 0xa68   : > { %14372 = dma.vmem_to_hbm [thread:$0]  (%p15453_p5), %s18904_s22, 16, %s18902_s21, %s12612_s23   ;;  %v14370_v5 = vpop.f32.mrf.mxu0 }
 0xa69 PF: > { %p14378_p13 = scmp.ge.s32.totalorder %s15299_s28, 2  ;;  %s12636_s20 = sand.u32 1, %s15287_s25  }
 0xa6a   : > { %s12637_s2 = scalar_lea.sflag [#allocation3], %s12636_s20 }
 0xa6b   : > { %p14375_p0 = pnand %p14378_p13, %p15457_p6 }
 0xa6d   : > { %p14376_p1 = pneg %p14375_p0 }
 0xa6f   : > { %15282 = dma.done.wait (%p14376_p1), %s12637_s2, 16  }
 0xa70   : > { %15284 = vsyncadd (%p14376_p1), %s12637_s2, 4294967280  ;;  %p23_p2 = scmp.ge.s32.totalorder %s15440_s14, 4   ;;  %s19000_s25 = smov %s15291_s26 }
 0xa71   : > { %s19001_s26 = smov %s15295_s27  ;;  %s19002_s27 = smov %s15451_s17 }
 0xa72   : > { %s19003_s28 = smov %s15440_s14  ;;  %25 = sbr.rel (!%p23_p2) target bundleno = 7 (0x7), region = 176 }
 0xa77   :  { %12641 = vsyncpa [#allocation3], 1 }
 0xa78   :  { %12643 = vsyncpa [#allocation3 + $0x1], 1 }

</bundles_post_ra>
